<compile_context>
chip_gen: v6e
topology: v6e:2x2x1
jax: 0.10.0
libtpu: 0.0.40
codegen_flags: <defaults>
</compile_context>

<pallas_src>
import functools
import math

import jax
import jax.numpy as jnp
from jax.experimental import pallas as pl
from jax.experimental.pallas import tpu as pltpu

IN_PAD = 128   # padded feature width of layer inputs / hidden state vector (lanes)
GP = 128       # padded width of each gate block (i, f, g, o each own 128 lanes)
SUB = 16       # batch-tile granularity (bf16 sublane-tile height => aligned stores)


def _round_up(a, m):
    return ((a + m - 1) // m) * m


# ----------------------------------------------------------------------------
# Fused kernel: 2-layer bidirectional LSTM + last-step capture + linear head
# ----------------------------------------------------------------------------
def _bilstm_kernel(x_ref, len_ref,
                   wih0_ref, whh0_ref, b0_ref,
                   wih1_ref, whh1_ref, b1_ref,
                   wlin_ref, blin_ref,
                   out_ref,
                   g_scr, seq_scr,
                   *, T, TB, H):
    """Refs (all per batch tile of TB rows):
      x_ref    : (T, TB, IN_PAD) bf16  time-major embedded input
      len_ref  : (TB, GP) int32        per-row sequence length (lane-broadcast)
      wih*_ref : (IN_PAD, 4*GP) bf16   fused input->gate weights (both directions)
      whh*_ref : (IN_PAD, 4*GP) bf16   fused hidden->gate weights (block-diagonal)
      b*_ref   : (1, 4*GP) f32         fused bias (b_ih + b_hh)
      wlin_ref : (GP, GP) bf16         padded head weight; blin_ref: (1, GP) f32
      out_ref  : (TB, GP) f32          padded scores (lane-dense output)
      g_scr    : (T*TB, 4*GP) f32      hoisted, time-aligned input-gate projection
      seq_scr  : (T*TB, GP) bf16       layer-0 output sequence / layer-1 input
    Hidden-state lane layout: [h_fwd(0:H) | h_bwd(H:2H) | zero pad (2H:GP)].
    Gate lane layout:         [gate_k*GP + (0:H)=fwd, (H:2H)=bwd, rest zero], k=i,f,g,o.
    """
    lane = jax.lax.broadcasted_iota(jnp.int32, (1, GP), 1)
    is_fwd = lane < H                                          # (1, GP)
    glane = jax.lax.broadcasted_iota(jnp.int32, (1, 4 * GP), 1)
    gate_fwd = (glane % GP) < H                                # fwd lanes of each gate

    lengths = len_ref[...]                                     # (TB, GP) i32

    # ---- packed-sequence masks: computed ONCE, shared by both layers ----------
    # fwd direction sees time s at step s; bwd direction sees time T-1-s.
    valid = []   # update state only while the (per-direction) time index is in range
    cap = []     # capture unpacked[b, length-1] on the fly
    for s in range(T):
        step_lane = jnp.where(is_fwd, s, T - 1 - s)            # (1, GP) i32
        valid.append(step_lane < lengths)                      # (TB, GP) bool
        cap.append(lengths == step_lane + 1)                   # (TB, GP) bool

    def combine_dirs_inplace(buf, mask_fwd):
        # Align fwd lanes to time s and bwd lanes to time T-1-s, in place.
        # Pure vector pass over row pairs -- off the serial recurrent chain.
        for s in range(T // 2):
            u = T - 1 - s
            a = buf[pl.ds(s * TB, TB), :]
            b = buf[pl.ds(u * TB, TB), :]
            buf[pl.ds(s * TB, TB), :] = jnp.where(mask_fwd, a, b)
            buf[pl.ds(u * TB, TB), :] = jnp.where(mask_fwd, b, a)
        # odd T: middle row combines with itself -> unchanged.

    def run_layer(x_in, wih_ref, whh_ref, b_ref, store_seq):
        # (1) hoisted input->gate projection for ALL timesteps and both directions:
        #     one (T*TB, IN_PAD) @ (IN_PAD, 4*GP) MXU matmul, bias added once.
        g_scr[...] = jnp.dot(x_in, wih_ref[...],
                             preferred_element_type=jnp.float32) + b_ref[...]
        # (2) pre-combine fwd/bwd gate lanes by time (off the recurrent chain).
        combine_dirs_inplace(g_scr, gate_fwd)

        h = jnp.zeros((TB, GP), jnp.float32)
        c = jnp.zeros((TB, GP), jnp.float32)
        h_bf = jnp.zeros((TB, GP), jnp.bfloat16)
        last = jnp.zeros((TB, GP), jnp.float32)

        # T is small and static -> fully unrolled recurrence (full LLO visibility).
        for s in range(T):
            gates = g_scr[pl.ds(s * TB, TB), :] + jnp.dot(
                h_bf, whh_ref[...], preferred_element_type=jnp.float32)  # (TB, 4*GP)

            # 128-lane-aligned gate slices (PyTorch order i, f, g, o)
            i_g = jax.nn.sigmoid(gates[:, 0:GP])
            f_g = jax.nn.sigmoid(gates[:, GP:2 * GP])
            g_g = jnp.tanh(gates[:, 2 * GP:3 * GP])
            o_g = jax.nn.sigmoid(gates[:, 3 * GP:4 * GP])
            c_new = f_g * c + i_g * g_g
            h_new = o_g * jnp.tanh(c_new)

            # packed-sequence semantics: freeze state past the per-direction length
            c = jnp.where(valid[s], c_new, c)
            h = jnp.where(valid[s], h_new, h)
            h_bf = h.astype(jnp.bfloat16)          # reused by next-step matmul + store

            if store_seq:
                seq_scr[pl.ds(s * TB, TB), :] = h_bf

            # capture unpacked[b, length[b]-1] on the fly (fwd: final state; bwd: its
            # first valid step, i.e. the output at position length-1)
            last = jnp.where(cap[s], h, last)
        return last

    # ---- layer 0 (stores its full output sequence, bf16) ----
    run_layer(x_ref[...].reshape(T * TB, IN_PAD), wih0_ref, whh0_ref, b0_ref, True)

    # layer-0 output -> layer-1 input: align fwd/bwd lanes per time step, in place.
    combine_dirs_inplace(seq_scr, is_fwd)

    # ---- layer 1 (only the last-step capture is needed) ----
    last = run_layer(seq_scr[...], wih1_ref, whh1_ref, b1_ref, False)

    # ---- fused linear head, lane-dense (TB, 128) output ----
    out_ref[...] = jnp.dot(last.astype(jnp.bfloat16), wlin_ref[...],
                           preferred_element_type=jnp.float32) + blin_ref[...]


# ----------------------------------------------------------------------------
# Parameter construction / packing
# ----------------------------------------------------------------------------
def init_params(key, vocab_size, emb_size, hidden_size, out_size=17):
    """Deterministic synthetic params matching nn.Embedding / nn.LSTM / nn.Linear."""
    H = hidden_size
    raw = {}
    k_emb, key = jax.random.split(key)
    emb = jax.random.normal(k_emb, (vocab_size, emb_size), jnp.float32)
    raw["embedding"] = emb.at[0].set(0.0)                 # padding_idx = 0

    bound = 1.0 / math.sqrt(H)
    for layer in range(2):
        d_in = emb_size if layer == 0 else 2 * H
        for sfx in ("", "_reverse"):
            k1, k2, k3, k4, key = jax.random.split(key, 5)
            raw[f"weight_ih_l{layer}{sfx}"] = jax.random.uniform(
                k1, (4 * H, d_in), jnp.float32, -bound, bound)
            raw[f"weight_hh_l{layer}{sfx}"] = jax.random.uniform(
                k2, (4 * H, H), jnp.float32, -bound, bound)
            raw[f"bias_ih_l{layer}{sfx}"] = jax.random.uniform(
                k3, (4 * H,), jnp.float32, -bound, bound)
            raw[f"bias_hh_l{layer}{sfx}"] = jax.random.uniform(
                k4, (4 * H,), jnp.float32, -bound, bound)

    k5, k6, _ = jax.random.split(key, 3)
    lb = 1.0 / math.sqrt(2 * H)
    raw["w_lin"] = jax.random.uniform(k5, (out_size, 2 * H), jnp.float32, -lb, lb)
    raw["b_lin"] = jax.random.uniform(k6, (out_size,), jnp.float32, -lb, lb)
    return raw


def pack_params(raw):
    """Pack PyTorch-shaped params into fused, lane-padded, bf16 kernel weights."""
    H = raw["weight_hh_l0"].shape[1]
    E = raw["embedding"].shape[1]
    out_size = raw["w_lin"].shape[0]
    # NOTE: the lane-packing scheme requires 2*hidden_size <= 128.
    assert 2 * H <= GP and E <= IN_PAD and 2 * H <= IN_PAD and out_size <= GP

    packed = {"embedding": jnp.pad(raw["embedding"], ((0, 0), (0, IN_PAD - E)))}

    for layer in range(2):
        d_in = E if layer == 0 else 2 * H
        wih = jnp.zeros((IN_PAD, 4 * GP), jnp.float32)
        whh = jnp.zeros((IN_PAD, 4 * GP), jnp.float32)
        b = jnp.zeros((1, 4 * GP), jnp.float32)
        for d, sfx in enumerate(("", "_reverse")):
            w_ih = raw[f"weight_ih_l{layer}{sfx}"]        # (4H, d_in)
            w_hh = raw[f"weight_hh_l{layer}{sfx}"]        # (4H, H)
            bias = raw[f"bias_ih_l{layer}{sfx}"] + raw[f"bias_hh_l{layer}{sfx}"]
            for k in range(4):                            # gate order i, f, g, o
                cols = slice(k * GP + d * H, k * GP + (d + 1) * H)
                wih = wih.at[:d_in, cols].set(w_ih[k * H:(k + 1) * H, :].T)
                whh = whh.at[d * H:(d + 1) * H, cols].set(w_hh[k * H:(k + 1) * H, :].T)
                b = b.at[0, cols].set(bias[k * H:(k + 1) * H])
        packed[f"wih_l{layer}"] = wih.astype(jnp.bfloat16)
        packed[f"whh_l{layer}"] = whh.astype(jnp.bfloat16)
        packed[f"b_l{layer}"] = b

    w_head = jnp.zeros((GP, GP), jnp.float32).at[:2 * H, :out_size].set(raw["w_lin"].T)
    b_head = jnp.zeros((1, GP), jnp.float32).at[0, :out_size].set(raw["b_lin"])
    packed["w_head"] = w_head.astype(jnp.bfloat16)
    packed["b_head"] = b_head
    return packed


# ----------------------------------------------------------------------------
# Forward pass (single batch-tiled pallas_call)
# ----------------------------------------------------------------------------
def _vmem_budget_bytes(T, tb):
    scratch = T * tb * (4 * GP * 4 + GP * 2)              # g_scr f32 + seq bf16
    x_blk = 2 * T * tb * IN_PAD * 2                       # double-buffered bf16 x tile
    weights = 2 * (2 * (2 * IN_PAD * 4 * GP * 2 + 4 * GP * 4) + GP * GP * 2 + GP * 4)
    io = 2 * tb * GP * (4 + 4)                            # lengths in + scores out
    est = scratch + x_blk + weights + io
    return int(min(max(2 * est, 32 * 1024 * 1024), 64 * 1024 * 1024))


@functools.partial(jax.jit,
                   static_argnames=("hidden_size", "out_size", "batch_tile"))
def intention_lstm_forward(packed, input_ids, lengths, labels=None, *,
                           hidden_size, out_size, batch_tile=128):
    B, T = input_ids.shape

    # Batch tile: multiple of 16 (bf16 tile-aligned stores); 128 is a good default
    # across v5e/v6e/v7x (fills MXU rows). Pad batch to a whole number of tiles.
    tb = _round_up(min(batch_tile, _round_up(B, SUB)), SUB)
    Bp = _round_up(B, tb)

    ids = jnp.pad(input_ids, ((0, Bp - B), (0, 0)))                   # pad token = 0
    lens = jnp.pad(lengths.astype(jnp.int32), (0, Bp - B), constant_values=1)

    # Transpose the tiny int32 ids (not the bf16 activation slab), then gather:
    # embedding lookup lands directly time-major as (T, Bp, IN_PAD).
    x = packed["embedding"][ids.T].astype(jnp.bfloat16)               # (T, Bp, IN_PAD)
    len_b = jnp.broadcast_to(lens[:, None], (Bp, GP))

    kernel = functools.partial(_bilstm_kernel, T=T, TB=tb, H=hidden_size)
    w_spec = lambda shape: pl.BlockSpec(shape, lambda i: (0,) * len(shape))

    scores_pad = pl.pallas_call(
        kernel,
        out_shape=jax.ShapeDtypeStruct((Bp, GP), jnp.float32),
        grid=(Bp // tb,),
        in_specs=[
            pl.BlockSpec((T, tb, IN_PAD), lambda i: (0, i, 0)),   # x  (batch-tiled)
            pl.BlockSpec((tb, GP), lambda i: (i, 0)),             # lengths
            w_spec((IN_PAD, 4 * GP)), w_spec((IN_PAD, 4 * GP)), w_spec((1, 4 * GP)),
            w_spec((IN_PAD, 4 * GP)), w_spec((IN_PAD, 4 * GP)), w_spec((1, 4 * GP)),
            w_spec((GP, GP)), w_spec((1, GP)),
        ],
        out_specs=pl.BlockSpec((tb, GP), lambda i: (i, 0)),       # lane-dense per tile
        scratch_shapes=[
            pltpu.VMEM((T * tb, 4 * GP), jnp.float32),   # hoisted input-gate projection
            pltpu.VMEM((T * tb, GP), jnp.bfloat16),      # layer-0 output / layer-1 input
        ],
        compiler_params=pltpu.CompilerParams(
            dimension_semantics=("parallel",),
            vmem_limit_bytes=_vmem_budget_bytes(T, tb)),
    )(x, len_b,
      packed["wih_l0"], packed["whh_l0"], packed["b_l0"],
      packed["wih_l1"], packed["whh_l1"], packed["b_l1"],
      packed["w_head"], packed["b_head"])

    scores = scores_pad[:B, :out_size]
    outputs = (scores,)
    if labels is not None:
        logp = jax.nn.log_softmax(scores, axis=-1)
        loss = -jnp.mean(jnp.take_along_axis(logp, labels[:, None], axis=1))
        outputs = (loss,) + outputs
    return outputs


# ----------------------------------------------------------------------------
if __name__ == "__main__":
    vocab_size, emb_size, hidden_size, out_size = 50, 16, 32, 17
    B, T = 2, 8

    key = jax.random.PRNGKey(0)
    raw = init_params(key, vocab_size, emb_size, hidden_size, out_size)
    packed = pack_params(raw)

    k_ids, _ = jax.random.split(jax.random.PRNGKey(0))
    input_ids = jax.random.randint(k_ids, (B, T), 1, vocab_size, dtype=jnp.int32)
    lengths = jnp.array([8, 5], dtype=jnp.int32)     # sorted descending (enforce_sorted)
    tmask = jnp.arange(T)[None, :] < lengths[:, None]
    input_ids = jnp.where(tmask, input_ids, 0)       # zero out padded tokens

    (scores,) = intention_lstm_forward(packed, input_ids, lengths,
                                       hidden_size=hidden_size, out_size=out_size)
    jax.block_until_ready(scores)
    assert scores.shape == (B, out_size) and scores.dtype == jnp.float32
    print("KERNEL_OK")
</pallas_src>

<mosaic_0001>
module attributes {stable_mosaic.version = 11 : i64} {
  func.func @_bilstm_kernel(%arg0: i32, %arg1: memref<8x16x128xbf16, #tpu.memory_space<vmem>>, %arg2: memref<16x128xi32, #tpu.memory_space<vmem>>, %arg3: memref<128x512xbf16, #tpu.memory_space<vmem>>, %arg4: memref<128x512xbf16, #tpu.memory_space<vmem>>, %arg5: memref<1x512xf32, #tpu.memory_space<vmem>>, %arg6: memref<128x512xbf16, #tpu.memory_space<vmem>>, %arg7: memref<128x512xbf16, #tpu.memory_space<vmem>>, %arg8: memref<1x512xf32, #tpu.memory_space<vmem>>, %arg9: memref<128x128xbf16, #tpu.memory_space<vmem>>, %arg10: memref<1x128xf32, #tpu.memory_space<vmem>>, %arg11: memref<16x128xf32, #tpu.memory_space<vmem>>, %arg12: memref<128x512xf32, #tpu.memory_space<vmem>>, %arg13: memref<128x128xbf16, #tpu.memory_space<vmem>>) attributes {dimension_semantics = [#tpu.dimension_semantics<parallel>], iteration_bounds = array<i64: 1>, scalar_prefetch = 0 : i64, scratch_operands = 2 : i64, tpu.core_type = #tpu.core_type<tc>, window_params = [{transform_indices = @transform_0, window_bounds = array<i64: 8, 16, 128>}, {transform_indices = @transform_1, window_bounds = array<i64: 16, 128>}, {pipeline_mode = #tpu.pipeline_mode<synchronous>, transform_indices = @transform_2, window_bounds = array<i64: 128, 512>}, {pipeline_mode = #tpu.pipeline_mode<synchronous>, transform_indices = @transform_3, window_bounds = array<i64: 128, 512>}, {pipeline_mode = #tpu.pipeline_mode<synchronous>, transform_indices = @transform_4, window_bounds = array<i64: 1, 512>}, {pipeline_mode = #tpu.pipeline_mode<synchronous>, transform_indices = @transform_5, window_bounds = array<i64: 128, 512>}, {pipeline_mode = #tpu.pipeline_mode<synchronous>, transform_indices = @transform_6, window_bounds = array<i64: 128, 512>}, {pipeline_mode = #tpu.pipeline_mode<synchronous>, transform_indices = @transform_7, window_bounds = array<i64: 1, 512>}, {pipeline_mode = #tpu.pipeline_mode<synchronous>, transform_indices = @transform_8, window_bounds = array<i64: 128, 128>}, {pipeline_mode = #tpu.pipeline_mode<synchronous>, transform_indices = @transform_9, window_bounds = array<i64: 1, 128>}, {transform_indices = @transform_10, window_bounds = array<i64: 16, 128>}]} {
    %0 = tpu.iota {dimensions = array<i32: 1>} : vector<1x128xi32>
    %c32_i32 = arith.constant 32 : i32
    %1 = vector.broadcast %c32_i32 : i32 to vector<1x128xi32>
    %2 = arith.cmpi slt, %0, %1 : vector<1x128xi32>
    %3 = tpu.iota {dimensions = array<i32: 1>} : vector<1x512xi32>
    %c128_i32 = arith.constant 128 : i32
    %c0_i32 = arith.constant 0 : i32
    %4 = arith.cmpi eq, %c128_i32, %c0_i32 : i32
    %c1_i32 = arith.constant 1 : i32
    %5 = arith.select %4, %c1_i32, %c128_i32 : i32
    %6 = vector.broadcast %5 : i32 to vector<1x512xi32>
    %7 = arith.remsi %3, %6 : vector<1x512xi32>
    %c0_i32_0 = arith.constant 0 : i32
    %8 = vector.broadcast %c0_i32_0 : i32 to vector<1x512xi32>
    %9 = arith.cmpi ne, %7, %8 : vector<1x512xi32>
    %c0_i32_1 = arith.constant 0 : i32
    %10 = vector.broadcast %c0_i32_1 : i32 to vector<1x512xi32>
    %11 = arith.cmpi slt, %7, %10 : vector<1x512xi32>
    %c0_i32_2 = arith.constant 0 : i32
    %12 = arith.cmpi slt, %5, %c0_i32_2 : i32
    %13 = vector.broadcast %12 : i1 to vector<1x512xi1>
    %14 = vector.broadcast %13 : vector<1x512xi1> to vector<1x512xi1>
    %15 = arith.xori %11, %14 : vector<1x512xi1>
    %16 = arith.andi %15, %9 : vector<1x512xi1>
    %17 = vector.broadcast %5 : i32 to vector<1x512xi32>
    %18 = arith.addi %7, %17 : vector<1x512xi32>
    %19 = arith.select %16, %18, %7 : vector<1x512xi1>, vector<1x512xi32>
    %c32_i32_3 = arith.constant 32 : i32
    %20 = vector.broadcast %c32_i32_3 : i32 to vector<1x512xi32>
    %21 = arith.cmpi slt, %19, %20 : vector<1x512xi32>
    %c0 = arith.constant 0 : index
    %c0_4 = arith.constant 0 : index
    %22 = vector.load %arg2[%c0, %c0_4] : memref<16x128xi32, #tpu.memory_space<vmem>>, vector<16x128xi32>
    %c0_i32_5 = arith.constant 0 : i32
    %c7_i32 = arith.constant 7 : i32
    %23 = vector.broadcast %c0_i32_5 : i32 to vector<1x128xi32>
    %24 = vector.broadcast %c7_i32 : i32 to vector<1x128xi32>
    %25 = arith.select %2, %23, %24 : vector<1x128xi1>, vector<1x128xi32>
    %26 = vector.broadcast %25 : vector<1x128xi32> to vector<16x128xi32>
    %27 = arith.cmpi slt, %26, %22 : vector<16x128xi32>
    %c1_i32_6 = arith.constant 1 : i32
    %28 = vector.broadcast %c1_i32_6 : i32 to vector<1x128xi32>
    %29 = arith.addi %25, %28 : vector<1x128xi32>
    %30 = vector.broadcast %29 : vector<1x128xi32> to vector<16x128xi32>
    %31 = arith.cmpi eq, %22, %30 : vector<16x128xi32>
    %c1_i32_7 = arith.constant 1 : i32
    %c6_i32 = arith.constant 6 : i32
    %32 = vector.broadcast %c1_i32_7 : i32 to vector<1x128xi32>
    %33 = vector.broadcast %c6_i32 : i32 to vector<1x128xi32>
    %34 = arith.select %2, %32, %33 : vector<1x128xi1>, vector<1x128xi32>
    %35 = vector.broadcast %34 : vector<1x128xi32> to vector<16x128xi32>
    %36 = arith.cmpi slt, %35, %22 : vector<16x128xi32>
    %c1_i32_8 = arith.constant 1 : i32
    %37 = vector.broadcast %c1_i32_8 : i32 to vector<1x128xi32>
    %38 = arith.addi %34, %37 : vector<1x128xi32>
    %39 = vector.broadcast %38 : vector<1x128xi32> to vector<16x128xi32>
    %40 = arith.cmpi eq, %22, %39 : vector<16x128xi32>
    %c2_i32 = arith.constant 2 : i32
    %c5_i32 = arith.constant 5 : i32
    %41 = vector.broadcast %c2_i32 : i32 to vector<1x128xi32>
    %42 = vector.broadcast %c5_i32 : i32 to vector<1x128xi32>
    %43 = arith.select %2, %41, %42 : vector<1x128xi1>, vector<1x128xi32>
    %44 = vector.broadcast %43 : vector<1x128xi32> to vector<16x128xi32>
    %45 = arith.cmpi slt, %44, %22 : vector<16x128xi32>
    %c1_i32_9 = arith.constant 1 : i32
    %46 = vector.broadcast %c1_i32_9 : i32 to vector<1x128xi32>
    %47 = arith.addi %43, %46 : vector<1x128xi32>
    %48 = vector.broadcast %47 : vector<1x128xi32> to vector<16x128xi32>
    %49 = arith.cmpi eq, %22, %48 : vector<16x128xi32>
    %c3_i32 = arith.constant 3 : i32
    %c4_i32 = arith.constant 4 : i32
    %50 = vector.broadcast %c3_i32 : i32 to vector<1x128xi32>
    %51 = vector.broadcast %c4_i32 : i32 to vector<1x128xi32>
    %52 = arith.select %2, %50, %51 : vector<1x128xi1>, vector<1x128xi32>
    %53 = vector.broadcast %52 : vector<1x128xi32> to vector<16x128xi32>
    %54 = arith.cmpi slt, %53, %22 : vector<16x128xi32>
    %c1_i32_10 = arith.constant 1 : i32
    %55 = vector.broadcast %c1_i32_10 : i32 to vector<1x128xi32>
    %56 = arith.addi %52, %55 : vector<1x128xi32>
    %57 = vector.broadcast %56 : vector<1x128xi32> to vector<16x128xi32>
    %58 = arith.cmpi eq, %22, %57 : vector<16x128xi32>
    %c4_i32_11 = arith.constant 4 : i32
    %c3_i32_12 = arith.constant 3 : i32
    %59 = vector.broadcast %c4_i32_11 : i32 to vector<1x128xi32>
    %60 = vector.broadcast %c3_i32_12 : i32 to vector<1x128xi32>
    %61 = arith.select %2, %59, %60 : vector<1x128xi1>, vector<1x128xi32>
    %62 = vector.broadcast %61 : vector<1x128xi32> to vector<16x128xi32>
    %63 = arith.cmpi slt, %62, %22 : vector<16x128xi32>
    %c1_i32_13 = arith.constant 1 : i32
    %64 = vector.broadcast %c1_i32_13 : i32 to vector<1x128xi32>
    %65 = arith.addi %61, %64 : vector<1x128xi32>
    %66 = vector.broadcast %65 : vector<1x128xi32> to vector<16x128xi32>
    %67 = arith.cmpi eq, %22, %66 : vector<16x128xi32>
    %c5_i32_14 = arith.constant 5 : i32
    %c2_i32_15 = arith.constant 2 : i32
    %68 = vector.broadcast %c5_i32_14 : i32 to vector<1x128xi32>
    %69 = vector.broadcast %c2_i32_15 : i32 to vector<1x128xi32>
    %70 = arith.select %2, %68, %69 : vector<1x128xi1>, vector<1x128xi32>
    %71 = vector.broadcast %70 : vector<1x128xi32> to vector<16x128xi32>
    %72 = arith.cmpi slt, %71, %22 : vector<16x128xi32>
    %c1_i32_16 = arith.constant 1 : i32
    %73 = vector.broadcast %c1_i32_16 : i32 to vector<1x128xi32>
    %74 = arith.addi %70, %73 : vector<1x128xi32>
    %75 = vector.broadcast %74 : vector<1x128xi32> to vector<16x128xi32>
    %76 = arith.cmpi eq, %22, %75 : vector<16x128xi32>
    %c6_i32_17 = arith.constant 6 : i32
    %c1_i32_18 = arith.constant 1 : i32
    %77 = vector.broadcast %c6_i32_17 : i32 to vector<1x128xi32>
    %78 = vector.broadcast %c1_i32_18 : i32 to vector<1x128xi32>
    %79 = arith.select %2, %77, %78 : vector<1x128xi1>, vector<1x128xi32>
    %80 = vector.broadcast %79 : vector<1x128xi32> to vector<16x128xi32>
    %81 = arith.cmpi slt, %80, %22 : vector<16x128xi32>
    %c1_i32_19 = arith.constant 1 : i32
    %82 = vector.broadcast %c1_i32_19 : i32 to vector<1x128xi32>
    %83 = arith.addi %79, %82 : vector<1x128xi32>
    %84 = vector.broadcast %83 : vector<1x128xi32> to vector<16x128xi32>
    %85 = arith.cmpi eq, %22, %84 : vector<16x128xi32>
    %c7_i32_20 = arith.constant 7 : i32
    %c0_i32_21 = arith.constant 0 : i32
    %86 = vector.broadcast %c7_i32_20 : i32 to vector<1x128xi32>
    %87 = vector.broadcast %c0_i32_21 : i32 to vector<1x128xi32>
    %88 = arith.select %2, %86, %87 : vector<1x128xi1>, vector<1x128xi32>
    %89 = vector.broadcast %88 : vector<1x128xi32> to vector<16x128xi32>
    %90 = arith.cmpi slt, %89, %22 : vector<16x128xi32>
    %c1_i32_22 = arith.constant 1 : i32
    %91 = vector.broadcast %c1_i32_22 : i32 to vector<1x128xi32>
    %92 = arith.addi %88, %91 : vector<1x128xi32>
    %93 = vector.broadcast %92 : vector<1x128xi32> to vector<16x128xi32>
    %94 = arith.cmpi eq, %22, %93 : vector<16x128xi32>
    %c0_23 = arith.constant 0 : index
    %c0_24 = arith.constant 0 : index
    %c0_25 = arith.constant 0 : index
    %95 = vector.load %arg1[%c0_23, %c0_24, %c0_25] : memref<8x16x128xbf16, #tpu.memory_space<vmem>>, vector<8x16x128xbf16>
    %96 = vector.shape_cast %95 : vector<8x16x128xbf16> to vector<128x128xbf16>
    %c0_26 = arith.constant 0 : index
    %c0_27 = arith.constant 0 : index
    %97 = vector.load %arg3[%c0_26, %c0_27] : memref<128x512xbf16, #tpu.memory_space<vmem>>, vector<128x512xbf16>
    %cst = arith.constant dense<0.000000e+00> : vector<128x512xf32>
    %98 = tpu.matmul %96, %97, %cst {dimension_numbers = #tpu.dot_dimension_numbers<[1], [0], [0], [1], [0, 0, 1, 1], [], []>} : vector<128x128xbf16>, vector<128x512xbf16>, vector<128x512xf32> -> vector<128x512xf32>
    %c0_28 = arith.constant 0 : index
    %c0_29 = arith.constant 0 : index
    %99 = vector.load %arg5[%c0_28, %c0_29] : memref<1x512xf32, #tpu.memory_space<vmem>>, vector<1x512xf32>
    %100 = vector.broadcast %99 : vector<1x512xf32> to vector<128x512xf32>
    %101 = arith.addf %98, %100 : vector<128x512xf32>
    %c0_30 = arith.constant 0 : index
    %c0_31 = arith.constant 0 : index
    %102 = vector.load %arg12[%c0_30, %c0_31] : memref<128x512xf32, #tpu.memory_space<vmem>>, vector<128x512xf32>
    tpu.vector_store %arg12[%c0_30, %c0_31], %101 {strides = array<i32>} : memref<128x512xf32, #tpu.memory_space<vmem>>, vector<128x512xf32>,
    %c0_32 = arith.constant 0 : index
    %c0_33 = arith.constant 0 : index
    %103 = vector.load %arg12[%c0_32, %c0_33] : memref<128x512xf32, #tpu.memory_space<vmem>>, vector<16x512xf32>
    %c112 = arith.constant 112 : index
    %c0_34 = arith.constant 0 : index
    %104 = vector.load %arg12[%c112, %c0_34] : memref<128x512xf32, #tpu.memory_space<vmem>>, vector<16x512xf32>
    %105 = vector.shape_cast %21 : vector<1x512xi1> to vector<1x512xi1>
    %106 = vector.broadcast %105 : vector<1x512xi1> to vector<16x512xi1>
    %107 = arith.select %106, %103, %104 : vector<16x512xi1>, vector<16x512xf32>
    %c0_35 = arith.constant 0 : index
    %c0_36 = arith.constant 0 : index
    %108 = vector.load %arg12[%c0_35, %c0_36] : memref<128x512xf32, #tpu.memory_space<vmem>>, vector<16x512xf32>
    tpu.vector_store %arg12[%c0_35, %c0_36], %107 {strides = array<i32>} : memref<128x512xf32, #tpu.memory_space<vmem>>, vector<16x512xf32>,
    %109 = vector.shape_cast %21 : vector<1x512xi1> to vector<1x512xi1>
    %110 = vector.broadcast %109 : vector<1x512xi1> to vector<16x512xi1>
    %111 = arith.select %110, %104, %103 : vector<16x512xi1>, vector<16x512xf32>
    %c112_37 = arith.constant 112 : index
    %c0_38 = arith.constant 0 : index
    %112 = vector.load %arg12[%c112_37, %c0_38] : memref<128x512xf32, #tpu.memory_space<vmem>>, vector<16x512xf32>
    tpu.vector_store %arg12[%c112_37, %c0_38], %111 {strides = array<i32>} : memref<128x512xf32, #tpu.memory_space<vmem>>, vector<16x512xf32>,
    %c16 = arith.constant 16 : index
    %c0_39 = arith.constant 0 : index
    %113 = vector.load %arg12[%c16, %c0_39] : memref<128x512xf32, #tpu.memory_space<vmem>>, vector<16x512xf32>
    %c96 = arith.constant 96 : index
    %c0_40 = arith.constant 0 : index
    %114 = vector.load %arg12[%c96, %c0_40] : memref<128x512xf32, #tpu.memory_space<vmem>>, vector<16x512xf32>
    %115 = vector.shape_cast %21 : vector<1x512xi1> to vector<1x512xi1>
    %116 = vector.broadcast %115 : vector<1x512xi1> to vector<16x512xi1>
    %117 = arith.select %116, %113, %114 : vector<16x512xi1>, vector<16x512xf32>
    %c16_41 = arith.constant 16 : index
    %c0_42 = arith.constant 0 : index
    %118 = vector.load %arg12[%c16_41, %c0_42] : memref<128x512xf32, #tpu.memory_space<vmem>>, vector<16x512xf32>
    tpu.vector_store %arg12[%c16_41, %c0_42], %117 {strides = array<i32>} : memref<128x512xf32, #tpu.memory_space<vmem>>, vector<16x512xf32>,
    %119 = vector.shape_cast %21 : vector<1x512xi1> to vector<1x512xi1>
    %120 = vector.broadcast %119 : vector<1x512xi1> to vector<16x512xi1>
    %121 = arith.select %120, %114, %113 : vector<16x512xi1>, vector<16x512xf32>
    %c96_43 = arith.constant 96 : index
    %c0_44 = arith.constant 0 : index
    %122 = vector.load %arg12[%c96_43, %c0_44] : memref<128x512xf32, #tpu.memory_space<vmem>>, vector<16x512xf32>
    tpu.vector_store %arg12[%c96_43, %c0_44], %121 {strides = array<i32>} : memref<128x512xf32, #tpu.memory_space<vmem>>, vector<16x512xf32>,
    %c32 = arith.constant 32 : index
    %c0_45 = arith.constant 0 : index
    %123 = vector.load %arg12[%c32, %c0_45] : memref<128x512xf32, #tpu.memory_space<vmem>>, vector<16x512xf32>
    %c80 = arith.constant 80 : index
    %c0_46 = arith.constant 0 : index
    %124 = vector.load %arg12[%c80, %c0_46] : memref<128x512xf32, #tpu.memory_space<vmem>>, vector<16x512xf32>
    %125 = vector.shape_cast %21 : vector<1x512xi1> to vector<1x512xi1>
    %126 = vector.broadcast %125 : vector<1x512xi1> to vector<16x512xi1>
    %127 = arith.select %126, %123, %124 : vector<16x512xi1>, vector<16x512xf32>
    %c32_47 = arith.constant 32 : index
    %c0_48 = arith.constant 0 : index
    %128 = vector.load %arg12[%c32_47, %c0_48] : memref<128x512xf32, #tpu.memory_space<vmem>>, vector<16x512xf32>
    tpu.vector_store %arg12[%c32_47, %c0_48], %127 {strides = array<i32>} : memref<128x512xf32, #tpu.memory_space<vmem>>, vector<16x512xf32>,
    %129 = vector.shape_cast %21 : vector<1x512xi1> to vector<1x512xi1>
    %130 = vector.broadcast %129 : vector<1x512xi1> to vector<16x512xi1>
    %131 = arith.select %130, %124, %123 : vector<16x512xi1>, vector<16x512xf32>
    %c80_49 = arith.constant 80 : index
    %c0_50 = arith.constant 0 : index
    %132 = vector.load %arg12[%c80_49, %c0_50] : memref<128x512xf32, #tpu.memory_space<vmem>>, vector<16x512xf32>
    tpu.vector_store %arg12[%c80_49, %c0_50], %131 {strides = array<i32>} : memref<128x512xf32, #tpu.memory_space<vmem>>, vector<16x512xf32>,
    %c48 = arith.constant 48 : index
    %c0_51 = arith.constant 0 : index
    %133 = vector.load %arg12[%c48, %c0_51] : memref<128x512xf32, #tpu.memory_space<vmem>>, vector<16x512xf32>
    %c64 = arith.constant 64 : index
    %c0_52 = arith.constant 0 : index
    %134 = vector.load %arg12[%c64, %c0_52] : memref<128x512xf32, #tpu.memory_space<vmem>>, vector<16x512xf32>
    %135 = vector.shape_cast %21 : vector<1x512xi1> to vector<1x512xi1>
    %136 = vector.broadcast %135 : vector<1x512xi1> to vector<16x512xi1>
    %137 = arith.select %136, %133, %134 : vector<16x512xi1>, vector<16x512xf32>
    %c48_53 = arith.constant 48 : index
    %c0_54 = arith.constant 0 : index
    %138 = vector.load %arg12[%c48_53, %c0_54] : memref<128x512xf32, #tpu.memory_space<vmem>>, vector<16x512xf32>
    tpu.vector_store %arg12[%c48_53, %c0_54], %137 {strides = array<i32>} : memref<128x512xf32, #tpu.memory_space<vmem>>, vector<16x512xf32>,
    %139 = vector.shape_cast %21 : vector<1x512xi1> to vector<1x512xi1>
    %140 = vector.broadcast %139 : vector<1x512xi1> to vector<16x512xi1>
    %141 = arith.select %140, %134, %133 : vector<16x512xi1>, vector<16x512xf32>
    %c64_55 = arith.constant 64 : index
    %c0_56 = arith.constant 0 : index
    %142 = vector.load %arg12[%c64_55, %c0_56] : memref<128x512xf32, #tpu.memory_space<vmem>>, vector<16x512xf32>
    tpu.vector_store %arg12[%c64_55, %c0_56], %141 {strides = array<i32>} : memref<128x512xf32, #tpu.memory_space<vmem>>, vector<16x512xf32>,
    %cst_57 = arith.constant 0.000000e+00 : f32
    %143 = vector.broadcast %cst_57 : f32 to vector<16x128xf32>
    %cst_58 = arith.constant 0.000000e+00 : f32
    %144 = vector.broadcast %cst_58 : f32 to vector<16x128xf32>
    %cst_59 = arith.constant 0.000000e+00 : bf16
    %145 = vector.broadcast %cst_59 : bf16 to vector<16x128xbf16>
    %c0_60 = arith.constant 0 : index
    %c0_61 = arith.constant 0 : index
    %146 = vector.load %arg12[%c0_60, %c0_61] : memref<128x512xf32, #tpu.memory_space<vmem>>, vector<16x512xf32>
    %c0_62 = arith.constant 0 : index
    %c0_63 = arith.constant 0 : index
    %147 = vector.load %arg4[%c0_62, %c0_63] : memref<128x512xbf16, #tpu.memory_space<vmem>>, vector<128x512xbf16>
    %cst_64 = arith.constant dense<0.000000e+00> : vector<16x512xf32>
    %148 = tpu.matmul %145, %147, %cst_64 {dimension_numbers = #tpu.dot_dimension_numbers<[1], [0], [0], [1], [0, 0, 1, 1], [], []>} : vector<16x128xbf16>, vector<128x512xbf16>, vector<16x512xf32> -> vector<16x512xf32>
    %149 = arith.addf %146, %148 : vector<16x512xf32>
    %150 = vector.extract_strided_slice %149 {offsets = [0, 0], sizes = [16, 128], strides = [1, 1]} : vector<16x512xf32> to vector<16x128xf32>
    %151 = arith.negf %150 : vector<16x128xf32>
    %152 = math.exp %151 : vector<16x128xf32>
    %cst_65 = arith.constant 1.000000e+00 : f32
    %153 = vector.broadcast %cst_65 : f32 to vector<16x128xf32>
    %154 = arith.addf %153, %152 : vector<16x128xf32>
    %155 = arith.divf %153, %154 : vector<16x128xf32>
    %156 = vector.extract_strided_slice %149 {offsets = [0, 128], sizes = [16, 128], strides = [1, 1]} : vector<16x512xf32> to vector<16x128xf32>
    %157 = arith.negf %156 : vector<16x128xf32>
    %158 = math.exp %157 : vector<16x128xf32>
    %cst_66 = arith.constant 1.000000e+00 : f32
    %159 = vector.broadcast %cst_66 : f32 to vector<16x128xf32>
    %160 = arith.addf %159, %158 : vector<16x128xf32>
    %161 = arith.divf %159, %160 : vector<16x128xf32>
    %162 = vector.extract_strided_slice %149 {offsets = [0, 256], sizes = [16, 128], strides = [1, 1]} : vector<16x512xf32> to vector<16x128xf32>
    %163 = math.tanh %162 : vector<16x128xf32>
    %164 = vector.extract_strided_slice %149 {offsets = [0, 384], sizes = [16, 128], strides = [1, 1]} : vector<16x512xf32> to vector<16x128xf32>
    %165 = arith.negf %164 : vector<16x128xf32>
    %166 = math.exp %165 : vector<16x128xf32>
    %cst_67 = arith.constant 1.000000e+00 : f32
    %167 = vector.broadcast %cst_67 : f32 to vector<16x128xf32>
    %168 = arith.addf %167, %166 : vector<16x128xf32>
    %169 = arith.divf %167, %168 : vector<16x128xf32>
    %170 = arith.mulf %161, %144 : vector<16x128xf32>
    %171 = arith.mulf %155, %163 : vector<16x128xf32>
    %172 = arith.addf %170, %171 : vector<16x128xf32>
    %173 = math.tanh %172 : vector<16x128xf32>
    %174 = arith.mulf %169, %173 : vector<16x128xf32>
    %175 = arith.select %27, %172, %144 : vector<16x128xi1>, vector<16x128xf32>
    %176 = arith.select %27, %174, %143 : vector<16x128xi1>, vector<16x128xf32>
    %177 = arith.truncf %176 : vector<16x128xf32> to vector<16x128xbf16>
    %c0_68 = arith.constant 0 : index
    %c0_69 = arith.constant 0 : index
    %178 = vector.load %arg13[%c0_68, %c0_69] : memref<128x128xbf16, #tpu.memory_space<vmem>>, vector<16x128xbf16>
    tpu.vector_store %arg13[%c0_68, %c0_69], %177 {strides = array<i32>} : memref<128x128xbf16, #tpu.memory_space<vmem>>, vector<16x128xbf16>,
    %c16_70 = arith.constant 16 : index
    %c0_71 = arith.constant 0 : index
    %179 = vector.load %arg12[%c16_70, %c0_71] : memref<128x512xf32, #tpu.memory_space<vmem>>, vector<16x512xf32>
    %c0_72 = arith.constant 0 : index
    %c0_73 = arith.constant 0 : index
    %180 = vector.load %arg4[%c0_72, %c0_73] : memref<128x512xbf16, #tpu.memory_space<vmem>>, vector<128x512xbf16>
    %cst_74 = arith.constant dense<0.000000e+00> : vector<16x512xf32>
    %181 = tpu.matmul %177, %180, %cst_74 {dimension_numbers = #tpu.dot_dimension_numbers<[1], [0], [0], [1], [0, 0, 1, 1], [], []>} : vector<16x128xbf16>, vector<128x512xbf16>, vector<16x512xf32> -> vector<16x512xf32>
    %182 = arith.addf %179, %181 : vector<16x512xf32>
    %183 = vector.extract_strided_slice %182 {offsets = [0, 0], sizes = [16, 128], strides = [1, 1]} : vector<16x512xf32> to vector<16x128xf32>
    %184 = arith.negf %183 : vector<16x128xf32>
    %185 = math.exp %184 : vector<16x128xf32>
    %cst_75 = arith.constant 1.000000e+00 : f32
    %186 = vector.broadcast %cst_75 : f32 to vector<16x128xf32>
    %187 = arith.addf %186, %185 : vector<16x128xf32>
    %188 = arith.divf %186, %187 : vector<16x128xf32>
    %189 = vector.extract_strided_slice %182 {offsets = [0, 128], sizes = [16, 128], strides = [1, 1]} : vector<16x512xf32> to vector<16x128xf32>
    %190 = arith.negf %189 : vector<16x128xf32>
    %191 = math.exp %190 : vector<16x128xf32>
    %cst_76 = arith.constant 1.000000e+00 : f32
    %192 = vector.broadcast %cst_76 : f32 to vector<16x128xf32>
    %193 = arith.addf %192, %191 : vector<16x128xf32>
    %194 = arith.divf %192, %193 : vector<16x128xf32>
    %195 = vector.extract_strided_slice %182 {offsets = [0, 256], sizes = [16, 128], strides = [1, 1]} : vector<16x512xf32> to vector<16x128xf32>
    %196 = math.tanh %195 : vector<16x128xf32>
    %197 = vector.extract_strided_slice %182 {offsets = [0, 384], sizes = [16, 128], strides = [1, 1]} : vector<16x512xf32> to vector<16x128xf32>
    %198 = arith.negf %197 : vector<16x128xf32>
    %199 = math.exp %198 : vector<16x128xf32>
    %cst_77 = arith.constant 1.000000e+00 : f32
    %200 = vector.broadcast %cst_77 : f32 to vector<16x128xf32>
    %201 = arith.addf %200, %199 : vector<16x128xf32>
    %202 = arith.divf %200, %201 : vector<16x128xf32>
    %203 = arith.mulf %194, %175 : vector<16x128xf32>
    %204 = arith.mulf %188, %196 : vector<16x128xf32>
    %205 = arith.addf %203, %204 : vector<16x128xf32>
    %206 = math.tanh %205 : vector<16x128xf32>
    %207 = arith.mulf %202, %206 : vector<16x128xf32>
    %208 = arith.select %36, %205, %175 : vector<16x128xi1>, vector<16x128xf32>
    %209 = arith.select %36, %207, %176 : vector<16x128xi1>, vector<16x128xf32>
    %210 = arith.truncf %209 : vector<16x128xf32> to vector<16x128xbf16>
    %c16_78 = arith.constant 16 : index
    %c0_79 = arith.constant 0 : index
    %211 = vector.load %arg13[%c16_78, %c0_79] : memref<128x128xbf16, #tpu.memory_space<vmem>>, vector<16x128xbf16>
    tpu.vector_store %arg13[%c16_78, %c0_79], %210 {strides = array<i32>} : memref<128x128xbf16, #tpu.memory_space<vmem>>, vector<16x128xbf16>,
    %c32_80 = arith.constant 32 : index
    %c0_81 = arith.constant 0 : index
    %212 = vector.load %arg12[%c32_80, %c0_81] : memref<128x512xf32, #tpu.memory_space<vmem>>, vector<16x512xf32>
    %c0_82 = arith.constant 0 : index
    %c0_83 = arith.constant 0 : index
    %213 = vector.load %arg4[%c0_82, %c0_83] : memref<128x512xbf16, #tpu.memory_space<vmem>>, vector<128x512xbf16>
    %cst_84 = arith.constant dense<0.000000e+00> : vector<16x512xf32>
    %214 = tpu.matmul %210, %213, %cst_84 {dimension_numbers = #tpu.dot_dimension_numbers<[1], [0], [0], [1], [0, 0, 1, 1], [], []>} : vector<16x128xbf16>, vector<128x512xbf16>, vector<16x512xf32> -> vector<16x512xf32>
    %215 = arith.addf %212, %214 : vector<16x512xf32>
    %216 = vector.extract_strided_slice %215 {offsets = [0, 0], sizes = [16, 128], strides = [1, 1]} : vector<16x512xf32> to vector<16x128xf32>
    %217 = arith.negf %216 : vector<16x128xf32>
    %218 = math.exp %217 : vector<16x128xf32>
    %cst_85 = arith.constant 1.000000e+00 : f32
    %219 = vector.broadcast %cst_85 : f32 to vector<16x128xf32>
    %220 = arith.addf %219, %218 : vector<16x128xf32>
    %221 = arith.divf %219, %220 : vector<16x128xf32>
    %222 = vector.extract_strided_slice %215 {offsets = [0, 128], sizes = [16, 128], strides = [1, 1]} : vector<16x512xf32> to vector<16x128xf32>
    %223 = arith.negf %222 : vector<16x128xf32>
    %224 = math.exp %223 : vector<16x128xf32>
    %cst_86 = arith.constant 1.000000e+00 : f32
    %225 = vector.broadcast %cst_86 : f32 to vector<16x128xf32>
    %226 = arith.addf %225, %224 : vector<16x128xf32>
    %227 = arith.divf %225, %226 : vector<16x128xf32>
    %228 = vector.extract_strided_slice %215 {offsets = [0, 256], sizes = [16, 128], strides = [1, 1]} : vector<16x512xf32> to vector<16x128xf32>
    %229 = math.tanh %228 : vector<16x128xf32>
    %230 = vector.extract_strided_slice %215 {offsets = [0, 384], sizes = [16, 128], strides = [1, 1]} : vector<16x512xf32> to vector<16x128xf32>
    %231 = arith.negf %230 : vector<16x128xf32>
    %232 = math.exp %231 : vector<16x128xf32>
    %cst_87 = arith.constant 1.000000e+00 : f32
    %233 = vector.broadcast %cst_87 : f32 to vector<16x128xf32>
    %234 = arith.addf %233, %232 : vector<16x128xf32>
    %235 = arith.divf %233, %234 : vector<16x128xf32>
    %236 = arith.mulf %227, %208 : vector<16x128xf32>
    %237 = arith.mulf %221, %229 : vector<16x128xf32>
    %238 = arith.addf %236, %237 : vector<16x128xf32>
    %239 = math.tanh %238 : vector<16x128xf32>
    %240 = arith.mulf %235, %239 : vector<16x128xf32>
    %241 = arith.select %45, %238, %208 : vector<16x128xi1>, vector<16x128xf32>
    %242 = arith.select %45, %240, %209 : vector<16x128xi1>, vector<16x128xf32>
    %243 = arith.truncf %242 : vector<16x128xf32> to vector<16x128xbf16>
    %c32_88 = arith.constant 32 : index
    %c0_89 = arith.constant 0 : index
    %244 = vector.load %arg13[%c32_88, %c0_89] : memref<128x128xbf16, #tpu.memory_space<vmem>>, vector<16x128xbf16>
    tpu.vector_store %arg13[%c32_88, %c0_89], %243 {strides = array<i32>} : memref<128x128xbf16, #tpu.memory_space<vmem>>, vector<16x128xbf16>,
    %c48_90 = arith.constant 48 : index
    %c0_91 = arith.constant 0 : index
    %245 = vector.load %arg12[%c48_90, %c0_91] : memref<128x512xf32, #tpu.memory_space<vmem>>, vector<16x512xf32>
    %c0_92 = arith.constant 0 : index
    %c0_93 = arith.constant 0 : index
    %246 = vector.load %arg4[%c0_92, %c0_93] : memref<128x512xbf16, #tpu.memory_space<vmem>>, vector<128x512xbf16>
    %cst_94 = arith.constant dense<0.000000e+00> : vector<16x512xf32>
    %247 = tpu.matmul %243, %246, %cst_94 {dimension_numbers = #tpu.dot_dimension_numbers<[1], [0], [0], [1], [0, 0, 1, 1], [], []>} : vector<16x128xbf16>, vector<128x512xbf16>, vector<16x512xf32> -> vector<16x512xf32>
    %248 = arith.addf %245, %247 : vector<16x512xf32>
    %249 = vector.extract_strided_slice %248 {offsets = [0, 0], sizes = [16, 128], strides = [1, 1]} : vector<16x512xf32> to vector<16x128xf32>
    %250 = arith.negf %249 : vector<16x128xf32>
    %251 = math.exp %250 : vector<16x128xf32>
    %cst_95 = arith.constant 1.000000e+00 : f32
    %252 = vector.broadcast %cst_95 : f32 to vector<16x128xf32>
    %253 = arith.addf %252, %251 : vector<16x128xf32>
    %254 = arith.divf %252, %253 : vector<16x128xf32>
    %255 = vector.extract_strided_slice %248 {offsets = [0, 128], sizes = [16, 128], strides = [1, 1]} : vector<16x512xf32> to vector<16x128xf32>
    %256 = arith.negf %255 : vector<16x128xf32>
    %257 = math.exp %256 : vector<16x128xf32>
    %cst_96 = arith.constant 1.000000e+00 : f32
    %258 = vector.broadcast %cst_96 : f32 to vector<16x128xf32>
    %259 = arith.addf %258, %257 : vector<16x128xf32>
    %260 = arith.divf %258, %259 : vector<16x128xf32>
    %261 = vector.extract_strided_slice %248 {offsets = [0, 256], sizes = [16, 128], strides = [1, 1]} : vector<16x512xf32> to vector<16x128xf32>
    %262 = math.tanh %261 : vector<16x128xf32>
    %263 = vector.extract_strided_slice %248 {offsets = [0, 384], sizes = [16, 128], strides = [1, 1]} : vector<16x512xf32> to vector<16x128xf32>
    %264 = arith.negf %263 : vector<16x128xf32>
    %265 = math.exp %264 : vector<16x128xf32>
    %cst_97 = arith.constant 1.000000e+00 : f32
    %266 = vector.broadcast %cst_97 : f32 to vector<16x128xf32>
    %267 = arith.addf %266, %265 : vector<16x128xf32>
    %268 = arith.divf %266, %267 : vector<16x128xf32>
    %269 = arith.mulf %260, %241 : vector<16x128xf32>
    %270 = arith.mulf %254, %262 : vector<16x128xf32>
    %271 = arith.addf %269, %270 : vector<16x128xf32>
    %272 = math.tanh %271 : vector<16x128xf32>
    %273 = arith.mulf %268, %272 : vector<16x128xf32>
    %274 = arith.select %54, %271, %241 : vector<16x128xi1>, vector<16x128xf32>
    %275 = arith.select %54, %273, %242 : vector<16x128xi1>, vector<16x128xf32>
    %276 = arith.truncf %275 : vector<16x128xf32> to vector<16x128xbf16>
    %c48_98 = arith.constant 48 : index
    %c0_99 = arith.constant 0 : index
    %277 = vector.load %arg13[%c48_98, %c0_99] : memref<128x128xbf16, #tpu.memory_space<vmem>>, vector<16x128xbf16>
    tpu.vector_store %arg13[%c48_98, %c0_99], %276 {strides = array<i32>} : memref<128x128xbf16, #tpu.memory_space<vmem>>, vector<16x128xbf16>,
    %c64_100 = arith.constant 64 : index
    %c0_101 = arith.constant 0 : index
    %278 = vector.load %arg12[%c64_100, %c0_101] : memref<128x512xf32, #tpu.memory_space<vmem>>, vector<16x512xf32>
    %c0_102 = arith.constant 0 : index
    %c0_103 = arith.constant 0 : index
    %279 = vector.load %arg4[%c0_102, %c0_103] : memref<128x512xbf16, #tpu.memory_space<vmem>>, vector<128x512xbf16>
    %cst_104 = arith.constant dense<0.000000e+00> : vector<16x512xf32>
    %280 = tpu.matmul %276, %279, %cst_104 {dimension_numbers = #tpu.dot_dimension_numbers<[1], [0], [0], [1], [0, 0, 1, 1], [], []>} : vector<16x128xbf16>, vector<128x512xbf16>, vector<16x512xf32> -> vector<16x512xf32>
    %281 = arith.addf %278, %280 : vector<16x512xf32>
    %282 = vector.extract_strided_slice %281 {offsets = [0, 0], sizes = [16, 128], strides = [1, 1]} : vector<16x512xf32> to vector<16x128xf32>
    %283 = arith.negf %282 : vector<16x128xf32>
    %284 = math.exp %283 : vector<16x128xf32>
    %cst_105 = arith.constant 1.000000e+00 : f32
    %285 = vector.broadcast %cst_105 : f32 to vector<16x128xf32>
    %286 = arith.addf %285, %284 : vector<16x128xf32>
    %287 = arith.divf %285, %286 : vector<16x128xf32>
    %288 = vector.extract_strided_slice %281 {offsets = [0, 128], sizes = [16, 128], strides = [1, 1]} : vector<16x512xf32> to vector<16x128xf32>
    %289 = arith.negf %288 : vector<16x128xf32>
    %290 = math.exp %289 : vector<16x128xf32>
    %cst_106 = arith.constant 1.000000e+00 : f32
    %291 = vector.broadcast %cst_106 : f32 to vector<16x128xf32>
    %292 = arith.addf %291, %290 : vector<16x128xf32>
    %293 = arith.divf %291, %292 : vector<16x128xf32>
    %294 = vector.extract_strided_slice %281 {offsets = [0, 256], sizes = [16, 128], strides = [1, 1]} : vector<16x512xf32> to vector<16x128xf32>
    %295 = math.tanh %294 : vector<16x128xf32>
    %296 = vector.extract_strided_slice %281 {offsets = [0, 384], sizes = [16, 128], strides = [1, 1]} : vector<16x512xf32> to vector<16x128xf32>
    %297 = arith.negf %296 : vector<16x128xf32>
    %298 = math.exp %297 : vector<16x128xf32>
    %cst_107 = arith.constant 1.000000e+00 : f32
    %299 = vector.broadcast %cst_107 : f32 to vector<16x128xf32>
    %300 = arith.addf %299, %298 : vector<16x128xf32>
    %301 = arith.divf %299, %300 : vector<16x128xf32>
    %302 = arith.mulf %293, %274 : vector<16x128xf32>
    %303 = arith.mulf %287, %295 : vector<16x128xf32>
    %304 = arith.addf %302, %303 : vector<16x128xf32>
    %305 = math.tanh %304 : vector<16x128xf32>
    %306 = arith.mulf %301, %305 : vector<16x128xf32>
    %307 = arith.select %63, %304, %274 : vector<16x128xi1>, vector<16x128xf32>
    %308 = arith.select %63, %306, %275 : vector<16x128xi1>, vector<16x128xf32>
    %309 = arith.truncf %308 : vector<16x128xf32> to vector<16x128xbf16>
    %c64_108 = arith.constant 64 : index
    %c0_109 = arith.constant 0 : index
    %310 = vector.load %arg13[%c64_108, %c0_109] : memref<128x128xbf16, #tpu.memory_space<vmem>>, vector<16x128xbf16>
    tpu.vector_store %arg13[%c64_108, %c0_109], %309 {strides = array<i32>} : memref<128x128xbf16, #tpu.memory_space<vmem>>, vector<16x128xbf16>,
    %c80_110 = arith.constant 80 : index
    %c0_111 = arith.constant 0 : index
    %311 = vector.load %arg12[%c80_110, %c0_111] : memref<128x512xf32, #tpu.memory_space<vmem>>, vector<16x512xf32>
    %c0_112 = arith.constant 0 : index
    %c0_113 = arith.constant 0 : index
    %312 = vector.load %arg4[%c0_112, %c0_113] : memref<128x512xbf16, #tpu.memory_space<vmem>>, vector<128x512xbf16>
    %cst_114 = arith.constant dense<0.000000e+00> : vector<16x512xf32>
    %313 = tpu.matmul %309, %312, %cst_114 {dimension_numbers = #tpu.dot_dimension_numbers<[1], [0], [0], [1], [0, 0, 1, 1], [], []>} : vector<16x128xbf16>, vector<128x512xbf16>, vector<16x512xf32> -> vector<16x512xf32>
    %314 = arith.addf %311, %313 : vector<16x512xf32>
    %315 = vector.extract_strided_slice %314 {offsets = [0, 0], sizes = [16, 128], strides = [1, 1]} : vector<16x512xf32> to vector<16x128xf32>
    %316 = arith.negf %315 : vector<16x128xf32>
    %317 = math.exp %316 : vector<16x128xf32>
    %cst_115 = arith.constant 1.000000e+00 : f32
    %318 = vector.broadcast %cst_115 : f32 to vector<16x128xf32>
    %319 = arith.addf %318, %317 : vector<16x128xf32>
    %320 = arith.divf %318, %319 : vector<16x128xf32>
    %321 = vector.extract_strided_slice %314 {offsets = [0, 128], sizes = [16, 128], strides = [1, 1]} : vector<16x512xf32> to vector<16x128xf32>
    %322 = arith.negf %321 : vector<16x128xf32>
    %323 = math.exp %322 : vector<16x128xf32>
    %cst_116 = arith.constant 1.000000e+00 : f32
    %324 = vector.broadcast %cst_116 : f32 to vector<16x128xf32>
    %325 = arith.addf %324, %323 : vector<16x128xf32>
    %326 = arith.divf %324, %325 : vector<16x128xf32>
    %327 = vector.extract_strided_slice %314 {offsets = [0, 256], sizes = [16, 128], strides = [1, 1]} : vector<16x512xf32> to vector<16x128xf32>
    %328 = math.tanh %327 : vector<16x128xf32>
    %329 = vector.extract_strided_slice %314 {offsets = [0, 384], sizes = [16, 128], strides = [1, 1]} : vector<16x512xf32> to vector<16x128xf32>
    %330 = arith.negf %329 : vector<16x128xf32>
    %331 = math.exp %330 : vector<16x128xf32>
    %cst_117 = arith.constant 1.000000e+00 : f32
    %332 = vector.broadcast %cst_117 : f32 to vector<16x128xf32>
    %333 = arith.addf %332, %331 : vector<16x128xf32>
    %334 = arith.divf %332, %333 : vector<16x128xf32>
    %335 = arith.mulf %326, %307 : vector<16x128xf32>
    %336 = arith.mulf %320, %328 : vector<16x128xf32>
    %337 = arith.addf %335, %336 : vector<16x128xf32>
    %338 = math.tanh %337 : vector<16x128xf32>
    %339 = arith.mulf %334, %338 : vector<16x128xf32>
    %340 = arith.select %72, %337, %307 : vector<16x128xi1>, vector<16x128xf32>
    %341 = arith.select %72, %339, %308 : vector<16x128xi1>, vector<16x128xf32>
    %342 = arith.truncf %341 : vector<16x128xf32> to vector<16x128xbf16>
    %c80_118 = arith.constant 80 : index
    %c0_119 = arith.constant 0 : index
    %343 = vector.load %arg13[%c80_118, %c0_119] : memref<128x128xbf16, #tpu.memory_space<vmem>>, vector<16x128xbf16>
    tpu.vector_store %arg13[%c80_118, %c0_119], %342 {strides = array<i32>} : memref<128x128xbf16, #tpu.memory_space<vmem>>, vector<16x128xbf16>,
    %c96_120 = arith.constant 96 : index
    %c0_121 = arith.constant 0 : index
    %344 = vector.load %arg12[%c96_120, %c0_121] : memref<128x512xf32, #tpu.memory_space<vmem>>, vector<16x512xf32>
    %c0_122 = arith.constant 0 : index
    %c0_123 = arith.constant 0 : index
    %345 = vector.load %arg4[%c0_122, %c0_123] : memref<128x512xbf16, #tpu.memory_space<vmem>>, vector<128x512xbf16>
    %cst_124 = arith.constant dense<0.000000e+00> : vector<16x512xf32>
    %346 = tpu.matmul %342, %345, %cst_124 {dimension_numbers = #tpu.dot_dimension_numbers<[1], [0], [0], [1], [0, 0, 1, 1], [], []>} : vector<16x128xbf16>, vector<128x512xbf16>, vector<16x512xf32> -> vector<16x512xf32>
    %347 = arith.addf %344, %346 : vector<16x512xf32>
    %348 = vector.extract_strided_slice %347 {offsets = [0, 0], sizes = [16, 128], strides = [1, 1]} : vector<16x512xf32> to vector<16x128xf32>
    %349 = arith.negf %348 : vector<16x128xf32>
    %350 = math.exp %349 : vector<16x128xf32>
    %cst_125 = arith.constant 1.000000e+00 : f32
    %351 = vector.broadcast %cst_125 : f32 to vector<16x128xf32>
    %352 = arith.addf %351, %350 : vector<16x128xf32>
    %353 = arith.divf %351, %352 : vector<16x128xf32>
    %354 = vector.extract_strided_slice %347 {offsets = [0, 128], sizes = [16, 128], strides = [1, 1]} : vector<16x512xf32> to vector<16x128xf32>
    %355 = arith.negf %354 : vector<16x128xf32>
    %356 = math.exp %355 : vector<16x128xf32>
    %cst_126 = arith.constant 1.000000e+00 : f32
    %357 = vector.broadcast %cst_126 : f32 to vector<16x128xf32>
    %358 = arith.addf %357, %356 : vector<16x128xf32>
    %359 = arith.divf %357, %358 : vector<16x128xf32>
    %360 = vector.extract_strided_slice %347 {offsets = [0, 256], sizes = [16, 128], strides = [1, 1]} : vector<16x512xf32> to vector<16x128xf32>
    %361 = math.tanh %360 : vector<16x128xf32>
    %362 = vector.extract_strided_slice %347 {offsets = [0, 384], sizes = [16, 128], strides = [1, 1]} : vector<16x512xf32> to vector<16x128xf32>
    %363 = arith.negf %362 : vector<16x128xf32>
    %364 = math.exp %363 : vector<16x128xf32>
    %cst_127 = arith.constant 1.000000e+00 : f32
    %365 = vector.broadcast %cst_127 : f32 to vector<16x128xf32>
    %366 = arith.addf %365, %364 : vector<16x128xf32>
    %367 = arith.divf %365, %366 : vector<16x128xf32>
    %368 = arith.mulf %359, %340 : vector<16x128xf32>
    %369 = arith.mulf %353, %361 : vector<16x128xf32>
    %370 = arith.addf %368, %369 : vector<16x128xf32>
    %371 = math.tanh %370 : vector<16x128xf32>
    %372 = arith.mulf %367, %371 : vector<16x128xf32>
    %373 = arith.select %81, %370, %340 : vector<16x128xi1>, vector<16x128xf32>
    %374 = arith.select %81, %372, %341 : vector<16x128xi1>, vector<16x128xf32>
    %375 = arith.truncf %374 : vector<16x128xf32> to vector<16x128xbf16>
    %c96_128 = arith.constant 96 : index
    %c0_129 = arith.constant 0 : index
    %376 = vector.load %arg13[%c96_128, %c0_129] : memref<128x128xbf16, #tpu.memory_space<vmem>>, vector<16x128xbf16>
    tpu.vector_store %arg13[%c96_128, %c0_129], %375 {strides = array<i32>} : memref<128x128xbf16, #tpu.memory_space<vmem>>, vector<16x128xbf16>,
    %c112_130 = arith.constant 112 : index
    %c0_131 = arith.constant 0 : index
    %377 = vector.load %arg12[%c112_130, %c0_131] : memref<128x512xf32, #tpu.memory_space<vmem>>, vector<16x512xf32>
    %c0_132 = arith.constant 0 : index
    %c0_133 = arith.constant 0 : index
    %378 = vector.load %arg4[%c0_132, %c0_133] : memref<128x512xbf16, #tpu.memory_space<vmem>>, vector<128x512xbf16>
    %cst_134 = arith.constant dense<0.000000e+00> : vector<16x512xf32>
    %379 = tpu.matmul %375, %378, %cst_134 {dimension_numbers = #tpu.dot_dimension_numbers<[1], [0], [0], [1], [0, 0, 1, 1], [], []>} : vector<16x128xbf16>, vector<128x512xbf16>, vector<16x512xf32> -> vector<16x512xf32>
    %380 = arith.addf %377, %379 : vector<16x512xf32>
    %381 = vector.extract_strided_slice %380 {offsets = [0, 0], sizes = [16, 128], strides = [1, 1]} : vector<16x512xf32> to vector<16x128xf32>
    %382 = arith.negf %381 : vector<16x128xf32>
    %383 = math.exp %382 : vector<16x128xf32>
    %cst_135 = arith.constant 1.000000e+00 : f32
    %384 = vector.broadcast %cst_135 : f32 to vector<16x128xf32>
    %385 = arith.addf %384, %383 : vector<16x128xf32>
    %386 = arith.divf %384, %385 : vector<16x128xf32>
    %387 = vector.extract_strided_slice %380 {offsets = [0, 128], sizes = [16, 128], strides = [1, 1]} : vector<16x512xf32> to vector<16x128xf32>
    %388 = arith.negf %387 : vector<16x128xf32>
    %389 = math.exp %388 : vector<16x128xf32>
    %cst_136 = arith.constant 1.000000e+00 : f32
    %390 = vector.broadcast %cst_136 : f32 to vector<16x128xf32>
    %391 = arith.addf %390, %389 : vector<16x128xf32>
    %392 = arith.divf %390, %391 : vector<16x128xf32>
    %393 = vector.extract_strided_slice %380 {offsets = [0, 256], sizes = [16, 128], strides = [1, 1]} : vector<16x512xf32> to vector<16x128xf32>
    %394 = math.tanh %393 : vector<16x128xf32>
    %395 = vector.extract_strided_slice %380 {offsets = [0, 384], sizes = [16, 128], strides = [1, 1]} : vector<16x512xf32> to vector<16x128xf32>
    %396 = arith.negf %395 : vector<16x128xf32>
    %397 = math.exp %396 : vector<16x128xf32>
    %cst_137 = arith.constant 1.000000e+00 : f32
    %398 = vector.broadcast %cst_137 : f32 to vector<16x128xf32>
    %399 = arith.addf %398, %397 : vector<16x128xf32>
    %400 = arith.divf %398, %399 : vector<16x128xf32>
    %401 = arith.mulf %392, %373 : vector<16x128xf32>
    %402 = arith.mulf %386, %394 : vector<16x128xf32>
    %403 = arith.addf %401, %402 : vector<16x128xf32>
    %404 = math.tanh %403 : vector<16x128xf32>
    %405 = arith.mulf %400, %404 : vector<16x128xf32>
    %406 = arith.select %90, %405, %374 : vector<16x128xi1>, vector<16x128xf32>
    %407 = arith.truncf %406 : vector<16x128xf32> to vector<16x128xbf16>
    %c112_138 = arith.constant 112 : index
    %c0_139 = arith.constant 0 : index
    %408 = vector.load %arg13[%c112_138, %c0_139] : memref<128x128xbf16, #tpu.memory_space<vmem>>, vector<16x128xbf16>
    tpu.vector_store %arg13[%c112_138, %c0_139], %407 {strides = array<i32>} : memref<128x128xbf16, #tpu.memory_space<vmem>>, vector<16x128xbf16>,
    %c0_140 = arith.constant 0 : index
    %c0_141 = arith.constant 0 : index
    %409 = vector.load %arg13[%c0_140, %c0_141] : memref<128x128xbf16, #tpu.memory_space<vmem>>, vector<16x128xbf16>
    %c112_142 = arith.constant 112 : index
    %c0_143 = arith.constant 0 : index
    %410 = vector.load %arg13[%c112_142, %c0_143] : memref<128x128xbf16, #tpu.memory_space<vmem>>, vector<16x128xbf16>
    %411 = vector.shape_cast %2 : vector<1x128xi1> to vector<1x128xi1>
    %412 = vector.broadcast %411 : vector<1x128xi1> to vector<16x128xi1>
    %413 = arith.select %412, %409, %410 : vector<16x128xi1>, vector<16x128xbf16>
    %c0_144 = arith.constant 0 : index
    %c0_145 = arith.constant 0 : index
    %414 = vector.load %arg13[%c0_144, %c0_145] : memref<128x128xbf16, #tpu.memory_space<vmem>>, vector<16x128xbf16>
    tpu.vector_store %arg13[%c0_144, %c0_145], %413 {strides = array<i32>} : memref<128x128xbf16, #tpu.memory_space<vmem>>, vector<16x128xbf16>,
    %415 = vector.shape_cast %2 : vector<1x128xi1> to vector<1x128xi1>
    %416 = vector.broadcast %415 : vector<1x128xi1> to vector<16x128xi1>
    %417 = arith.select %416, %410, %409 : vector<16x128xi1>, vector<16x128xbf16>
    %c112_146 = arith.constant 112 : index
    %c0_147 = arith.constant 0 : index
    %418 = vector.load %arg13[%c112_146, %c0_147] : memref<128x128xbf16, #tpu.memory_space<vmem>>, vector<16x128xbf16>
    tpu.vector_store %arg13[%c112_146, %c0_147], %417 {strides = array<i32>} : memref<128x128xbf16, #tpu.memory_space<vmem>>, vector<16x128xbf16>,
    %c16_148 = arith.constant 16 : index
    %c0_149 = arith.constant 0 : index
    %419 = vector.load %arg13[%c16_148, %c0_149] : memref<128x128xbf16, #tpu.memory_space<vmem>>, vector<16x128xbf16>
    %c96_150 = arith.constant 96 : index
    %c0_151 = arith.constant 0 : index
    %420 = vector.load %arg13[%c96_150, %c0_151] : memref<128x128xbf16, #tpu.memory_space<vmem>>, vector<16x128xbf16>
    %421 = vector.shape_cast %2 : vector<1x128xi1> to vector<1x128xi1>
    %422 = vector.broadcast %421 : vector<1x128xi1> to vector<16x128xi1>
    %423 = arith.select %422, %419, %420 : vector<16x128xi1>, vector<16x128xbf16>
    %c16_152 = arith.constant 16 : index
    %c0_153 = arith.constant 0 : index
    %424 = vector.load %arg13[%c16_152, %c0_153] : memref<128x128xbf16, #tpu.memory_space<vmem>>, vector<16x128xbf16>
    tpu.vector_store %arg13[%c16_152, %c0_153], %423 {strides = array<i32>} : memref<128x128xbf16, #tpu.memory_space<vmem>>, vector<16x128xbf16>,
    %425 = vector.shape_cast %2 : vector<1x128xi1> to vector<1x128xi1>
    %426 = vector.broadcast %425 : vector<1x128xi1> to vector<16x128xi1>
    %427 = arith.select %426, %420, %419 : vector<16x128xi1>, vector<16x128xbf16>
    %c96_154 = arith.constant 96 : index
    %c0_155 = arith.constant 0 : index
    %428 = vector.load %arg13[%c96_154, %c0_155] : memref<128x128xbf16, #tpu.memory_space<vmem>>, vector<16x128xbf16>
    tpu.vector_store %arg13[%c96_154, %c0_155], %427 {strides = array<i32>} : memref<128x128xbf16, #tpu.memory_space<vmem>>, vector<16x128xbf16>,
    %c32_156 = arith.constant 32 : index
    %c0_157 = arith.constant 0 : index
    %429 = vector.load %arg13[%c32_156, %c0_157] : memref<128x128xbf16, #tpu.memory_space<vmem>>, vector<16x128xbf16>
    %c80_158 = arith.constant 80 : index
    %c0_159 = arith.constant 0 : index
    %430 = vector.load %arg13[%c80_158, %c0_159] : memref<128x128xbf16, #tpu.memory_space<vmem>>, vector<16x128xbf16>
    %431 = vector.shape_cast %2 : vector<1x128xi1> to vector<1x128xi1>
    %432 = vector.broadcast %431 : vector<1x128xi1> to vector<16x128xi1>
    %433 = arith.select %432, %429, %430 : vector<16x128xi1>, vector<16x128xbf16>
    %c32_160 = arith.constant 32 : index
    %c0_161 = arith.constant 0 : index
    %434 = vector.load %arg13[%c32_160, %c0_161] : memref<128x128xbf16, #tpu.memory_space<vmem>>, vector<16x128xbf16>
    tpu.vector_store %arg13[%c32_160, %c0_161], %433 {strides = array<i32>} : memref<128x128xbf16, #tpu.memory_space<vmem>>, vector<16x128xbf16>,
    %435 = vector.shape_cast %2 : vector<1x128xi1> to vector<1x128xi1>
    %436 = vector.broadcast %435 : vector<1x128xi1> to vector<16x128xi1>
    %437 = arith.select %436, %430, %429 : vector<16x128xi1>, vector<16x128xbf16>
    %c80_162 = arith.constant 80 : index
    %c0_163 = arith.constant 0 : index
    %438 = vector.load %arg13[%c80_162, %c0_163] : memref<128x128xbf16, #tpu.memory_space<vmem>>, vector<16x128xbf16>
    tpu.vector_store %arg13[%c80_162, %c0_163], %437 {strides = array<i32>} : memref<128x128xbf16, #tpu.memory_space<vmem>>, vector<16x128xbf16>,
    %c48_164 = arith.constant 48 : index
    %c0_165 = arith.constant 0 : index
    %439 = vector.load %arg13[%c48_164, %c0_165] : memref<128x128xbf16, #tpu.memory_space<vmem>>, vector<16x128xbf16>
    %c64_166 = arith.constant 64 : index
    %c0_167 = arith.constant 0 : index
    %440 = vector.load %arg13[%c64_166, %c0_167] : memref<128x128xbf16, #tpu.memory_space<vmem>>, vector<16x128xbf16>
    %441 = vector.shape_cast %2 : vector<1x128xi1> to vector<1x128xi1>
    %442 = vector.broadcast %441 : vector<1x128xi1> to vector<16x128xi1>
    %443 = arith.select %442, %439, %440 : vector<16x128xi1>, vector<16x128xbf16>
    %c48_168 = arith.constant 48 : index
    %c0_169 = arith.constant 0 : index
    %444 = vector.load %arg13[%c48_168, %c0_169] : memref<128x128xbf16, #tpu.memory_space<vmem>>, vector<16x128xbf16>
    tpu.vector_store %arg13[%c48_168, %c0_169], %443 {strides = array<i32>} : memref<128x128xbf16, #tpu.memory_space<vmem>>, vector<16x128xbf16>,
    %445 = vector.shape_cast %2 : vector<1x128xi1> to vector<1x128xi1>
    %446 = vector.broadcast %445 : vector<1x128xi1> to vector<16x128xi1>
    %447 = arith.select %446, %440, %439 : vector<16x128xi1>, vector<16x128xbf16>
    %c64_170 = arith.constant 64 : index
    %c0_171 = arith.constant 0 : index
    %448 = vector.load %arg13[%c64_170, %c0_171] : memref<128x128xbf16, #tpu.memory_space<vmem>>, vector<16x128xbf16>
    tpu.vector_store %arg13[%c64_170, %c0_171], %447 {strides = array<i32>} : memref<128x128xbf16, #tpu.memory_space<vmem>>, vector<16x128xbf16>,
    %c0_172 = arith.constant 0 : index
    %c0_173 = arith.constant 0 : index
    %449 = vector.load %arg13[%c0_172, %c0_173] : memref<128x128xbf16, #tpu.memory_space<vmem>>, vector<128x128xbf16>
    %c0_174 = arith.constant 0 : index
    %c0_175 = arith.constant 0 : index
    %450 = vector.load %arg6[%c0_174, %c0_175] : memref<128x512xbf16, #tpu.memory_space<vmem>>, vector<128x512xbf16>
    %cst_176 = arith.constant dense<0.000000e+00> : vector<128x512xf32>
    %451 = tpu.matmul %449, %450, %cst_176 {dimension_numbers = #tpu.dot_dimension_numbers<[1], [0], [0], [1], [0, 0, 1, 1], [], []>} : vector<128x128xbf16>, vector<128x512xbf16>, vector<128x512xf32> -> vector<128x512xf32>
    %c0_177 = arith.constant 0 : index
    %c0_178 = arith.constant 0 : index
    %452 = vector.load %arg8[%c0_177, %c0_178] : memref<1x512xf32, #tpu.memory_space<vmem>>, vector<1x512xf32>
    %453 = vector.broadcast %452 : vector<1x512xf32> to vector<128x512xf32>
    %454 = arith.addf %451, %453 : vector<128x512xf32>
    %c0_179 = arith.constant 0 : index
    %c0_180 = arith.constant 0 : index
    %455 = vector.load %arg12[%c0_179, %c0_180] : memref<128x512xf32, #tpu.memory_space<vmem>>, vector<128x512xf32>
    tpu.vector_store %arg12[%c0_179, %c0_180], %454 {strides = array<i32>} : memref<128x512xf32, #tpu.memory_space<vmem>>, vector<128x512xf32>,
    %c0_181 = arith.constant 0 : index
    %c0_182 = arith.constant 0 : index
    %456 = vector.load %arg12[%c0_181, %c0_182] : memref<128x512xf32, #tpu.memory_space<vmem>>, vector<16x512xf32>
    %c112_183 = arith.constant 112 : index
    %c0_184 = arith.constant 0 : index
    %457 = vector.load %arg12[%c112_183, %c0_184] : memref<128x512xf32, #tpu.memory_space<vmem>>, vector<16x512xf32>
    %458 = vector.shape_cast %21 : vector<1x512xi1> to vector<1x512xi1>
    %459 = vector.broadcast %458 : vector<1x512xi1> to vector<16x512xi1>
    %460 = arith.select %459, %456, %457 : vector<16x512xi1>, vector<16x512xf32>
    %c0_185 = arith.constant 0 : index
    %c0_186 = arith.constant 0 : index
    %461 = vector.load %arg12[%c0_185, %c0_186] : memref<128x512xf32, #tpu.memory_space<vmem>>, vector<16x512xf32>
    tpu.vector_store %arg12[%c0_185, %c0_186], %460 {strides = array<i32>} : memref<128x512xf32, #tpu.memory_space<vmem>>, vector<16x512xf32>,
    %462 = vector.shape_cast %21 : vector<1x512xi1> to vector<1x512xi1>
    %463 = vector.broadcast %462 : vector<1x512xi1> to vector<16x512xi1>
    %464 = arith.select %463, %457, %456 : vector<16x512xi1>, vector<16x512xf32>
    %c112_187 = arith.constant 112 : index
    %c0_188 = arith.constant 0 : index
    %465 = vector.load %arg12[%c112_187, %c0_188] : memref<128x512xf32, #tpu.memory_space<vmem>>, vector<16x512xf32>
    tpu.vector_store %arg12[%c112_187, %c0_188], %464 {strides = array<i32>} : memref<128x512xf32, #tpu.memory_space<vmem>>, vector<16x512xf32>,
    %c16_189 = arith.constant 16 : index
    %c0_190 = arith.constant 0 : index
    %466 = vector.load %arg12[%c16_189, %c0_190] : memref<128x512xf32, #tpu.memory_space<vmem>>, vector<16x512xf32>
    %c96_191 = arith.constant 96 : index
    %c0_192 = arith.constant 0 : index
    %467 = vector.load %arg12[%c96_191, %c0_192] : memref<128x512xf32, #tpu.memory_space<vmem>>, vector<16x512xf32>
    %468 = vector.shape_cast %21 : vector<1x512xi1> to vector<1x512xi1>
    %469 = vector.broadcast %468 : vector<1x512xi1> to vector<16x512xi1>
    %470 = arith.select %469, %466, %467 : vector<16x512xi1>, vector<16x512xf32>
    %c16_193 = arith.constant 16 : index
    %c0_194 = arith.constant 0 : index
    %471 = vector.load %arg12[%c16_193, %c0_194] : memref<128x512xf32, #tpu.memory_space<vmem>>, vector<16x512xf32>
    tpu.vector_store %arg12[%c16_193, %c0_194], %470 {strides = array<i32>} : memref<128x512xf32, #tpu.memory_space<vmem>>, vector<16x512xf32>,
    %472 = vector.shape_cast %21 : vector<1x512xi1> to vector<1x512xi1>
    %473 = vector.broadcast %472 : vector<1x512xi1> to vector<16x512xi1>
    %474 = arith.select %473, %467, %466 : vector<16x512xi1>, vector<16x512xf32>
    %c96_195 = arith.constant 96 : index
    %c0_196 = arith.constant 0 : index
    %475 = vector.load %arg12[%c96_195, %c0_196] : memref<128x512xf32, #tpu.memory_space<vmem>>, vector<16x512xf32>
    tpu.vector_store %arg12[%c96_195, %c0_196], %474 {strides = array<i32>} : memref<128x512xf32, #tpu.memory_space<vmem>>, vector<16x512xf32>,
    %c32_197 = arith.constant 32 : index
    %c0_198 = arith.constant 0 : index
    %476 = vector.load %arg12[%c32_197, %c0_198] : memref<128x512xf32, #tpu.memory_space<vmem>>, vector<16x512xf32>
    %c80_199 = arith.constant 80 : index
    %c0_200 = arith.constant 0 : index
    %477 = vector.load %arg12[%c80_199, %c0_200] : memref<128x512xf32, #tpu.memory_space<vmem>>, vector<16x512xf32>
    %478 = vector.shape_cast %21 : vector<1x512xi1> to vector<1x512xi1>
    %479 = vector.broadcast %478 : vector<1x512xi1> to vector<16x512xi1>
    %480 = arith.select %479, %476, %477 : vector<16x512xi1>, vector<16x512xf32>
    %c32_201 = arith.constant 32 : index
    %c0_202 = arith.constant 0 : index
    %481 = vector.load %arg12[%c32_201, %c0_202] : memref<128x512xf32, #tpu.memory_space<vmem>>, vector<16x512xf32>
    tpu.vector_store %arg12[%c32_201, %c0_202], %480 {strides = array<i32>} : memref<128x512xf32, #tpu.memory_space<vmem>>, vector<16x512xf32>,
    %482 = vector.shape_cast %21 : vector<1x512xi1> to vector<1x512xi1>
    %483 = vector.broadcast %482 : vector<1x512xi1> to vector<16x512xi1>
    %484 = arith.select %483, %477, %476 : vector<16x512xi1>, vector<16x512xf32>
    %c80_203 = arith.constant 80 : index
    %c0_204 = arith.constant 0 : index
    %485 = vector.load %arg12[%c80_203, %c0_204] : memref<128x512xf32, #tpu.memory_space<vmem>>, vector<16x512xf32>
    tpu.vector_store %arg12[%c80_203, %c0_204], %484 {strides = array<i32>} : memref<128x512xf32, #tpu.memory_space<vmem>>, vector<16x512xf32>,
    %c48_205 = arith.constant 48 : index
    %c0_206 = arith.constant 0 : index
    %486 = vector.load %arg12[%c48_205, %c0_206] : memref<128x512xf32, #tpu.memory_space<vmem>>, vector<16x512xf32>
    %c64_207 = arith.constant 64 : index
    %c0_208 = arith.constant 0 : index
    %487 = vector.load %arg12[%c64_207, %c0_208] : memref<128x512xf32, #tpu.memory_space<vmem>>, vector<16x512xf32>
    %488 = vector.shape_cast %21 : vector<1x512xi1> to vector<1x512xi1>
    %489 = vector.broadcast %488 : vector<1x512xi1> to vector<16x512xi1>
    %490 = arith.select %489, %486, %487 : vector<16x512xi1>, vector<16x512xf32>
    %c48_209 = arith.constant 48 : index
    %c0_210 = arith.constant 0 : index
    %491 = vector.load %arg12[%c48_209, %c0_210] : memref<128x512xf32, #tpu.memory_space<vmem>>, vector<16x512xf32>
    tpu.vector_store %arg12[%c48_209, %c0_210], %490 {strides = array<i32>} : memref<128x512xf32, #tpu.memory_space<vmem>>, vector<16x512xf32>,
    %492 = vector.shape_cast %21 : vector<1x512xi1> to vector<1x512xi1>
    %493 = vector.broadcast %492 : vector<1x512xi1> to vector<16x512xi1>
    %494 = arith.select %493, %487, %486 : vector<16x512xi1>, vector<16x512xf32>
    %c64_211 = arith.constant 64 : index
    %c0_212 = arith.constant 0 : index
    %495 = vector.load %arg12[%c64_211, %c0_212] : memref<128x512xf32, #tpu.memory_space<vmem>>, vector<16x512xf32>
    tpu.vector_store %arg12[%c64_211, %c0_212], %494 {strides = array<i32>} : memref<128x512xf32, #tpu.memory_space<vmem>>, vector<16x512xf32>,
    %cst_213 = arith.constant 0.000000e+00 : f32
    %496 = vector.broadcast %cst_213 : f32 to vector<16x128xf32>
    %cst_214 = arith.constant 0.000000e+00 : f32
    %497 = vector.broadcast %cst_214 : f32 to vector<16x128xf32>
    %cst_215 = arith.constant 0.000000e+00 : bf16
    %498 = vector.broadcast %cst_215 : bf16 to vector<16x128xbf16>
    %cst_216 = arith.constant 0.000000e+00 : f32
    %499 = vector.broadcast %cst_216 : f32 to vector<16x128xf32>
    %c0_217 = arith.constant 0 : index
    %c0_218 = arith.constant 0 : index
    %500 = vector.load %arg12[%c0_217, %c0_218] : memref<128x512xf32, #tpu.memory_space<vmem>>, vector<16x512xf32>
    %c0_219 = arith.constant 0 : index
    %c0_220 = arith.constant 0 : index
    %501 = vector.load %arg7[%c0_219, %c0_220] : memref<128x512xbf16, #tpu.memory_space<vmem>>, vector<128x512xbf16>
    %cst_221 = arith.constant dense<0.000000e+00> : vector<16x512xf32>
    %502 = tpu.matmul %498, %501, %cst_221 {dimension_numbers = #tpu.dot_dimension_numbers<[1], [0], [0], [1], [0, 0, 1, 1], [], []>} : vector<16x128xbf16>, vector<128x512xbf16>, vector<16x512xf32> -> vector<16x512xf32>
    %503 = arith.addf %500, %502 : vector<16x512xf32>
    %504 = vector.extract_strided_slice %503 {offsets = [0, 0], sizes = [16, 128], strides = [1, 1]} : vector<16x512xf32> to vector<16x128xf32>
    %505 = arith.negf %504 : vector<16x128xf32>
    %506 = math.exp %505 : vector<16x128xf32>
    %cst_222 = arith.constant 1.000000e+00 : f32
    %507 = vector.broadcast %cst_222 : f32 to vector<16x128xf32>
    %508 = arith.addf %507, %506 : vector<16x128xf32>
    %509 = arith.divf %507, %508 : vector<16x128xf32>
    %510 = vector.extract_strided_slice %503 {offsets = [0, 128], sizes = [16, 128], strides = [1, 1]} : vector<16x512xf32> to vector<16x128xf32>
    %511 = arith.negf %510 : vector<16x128xf32>
    %512 = math.exp %511 : vector<16x128xf32>
    %cst_223 = arith.constant 1.000000e+00 : f32
    %513 = vector.broadcast %cst_223 : f32 to vector<16x128xf32>
    %514 = arith.addf %513, %512 : vector<16x128xf32>
    %515 = arith.divf %513, %514 : vector<16x128xf32>
    %516 = vector.extract_strided_slice %503 {offsets = [0, 256], sizes = [16, 128], strides = [1, 1]} : vector<16x512xf32> to vector<16x128xf32>
    %517 = math.tanh %516 : vector<16x128xf32>
    %518 = vector.extract_strided_slice %503 {offsets = [0, 384], sizes = [16, 128], strides = [1, 1]} : vector<16x512xf32> to vector<16x128xf32>
    %519 = arith.negf %518 : vector<16x128xf32>
    %520 = math.exp %519 : vector<16x128xf32>
    %cst_224 = arith.constant 1.000000e+00 : f32
    %521 = vector.broadcast %cst_224 : f32 to vector<16x128xf32>
    %522 = arith.addf %521, %520 : vector<16x128xf32>
    %523 = arith.divf %521, %522 : vector<16x128xf32>
    %524 = arith.mulf %515, %497 : vector<16x128xf32>
    %525 = arith.mulf %509, %517 : vector<16x128xf32>
    %526 = arith.addf %524, %525 : vector<16x128xf32>
    %527 = math.tanh %526 : vector<16x128xf32>
    %528 = arith.mulf %523, %527 : vector<16x128xf32>
    %529 = arith.select %27, %526, %497 : vector<16x128xi1>, vector<16x128xf32>
    %530 = arith.select %27, %528, %496 : vector<16x128xi1>, vector<16x128xf32>
    %531 = arith.truncf %530 : vector<16x128xf32> to vector<16x128xbf16>
    %532 = arith.select %31, %530, %499 : vector<16x128xi1>, vector<16x128xf32>
    %c16_225 = arith.constant 16 : index
    %c0_226 = arith.constant 0 : index
    %533 = vector.load %arg12[%c16_225, %c0_226] : memref<128x512xf32, #tpu.memory_space<vmem>>, vector<16x512xf32>
    %c0_227 = arith.constant 0 : index
    %c0_228 = arith.constant 0 : index
    %534 = vector.load %arg7[%c0_227, %c0_228] : memref<128x512xbf16, #tpu.memory_space<vmem>>, vector<128x512xbf16>
    %cst_229 = arith.constant dense<0.000000e+00> : vector<16x512xf32>
    %535 = tpu.matmul %531, %534, %cst_229 {dimension_numbers = #tpu.dot_dimension_numbers<[1], [0], [0], [1], [0, 0, 1, 1], [], []>} : vector<16x128xbf16>, vector<128x512xbf16>, vector<16x512xf32> -> vector<16x512xf32>
    %536 = arith.addf %533, %535 : vector<16x512xf32>
    %537 = vector.extract_strided_slice %536 {offsets = [0, 0], sizes = [16, 128], strides = [1, 1]} : vector<16x512xf32> to vector<16x128xf32>
    %538 = arith.negf %537 : vector<16x128xf32>
    %539 = math.exp %538 : vector<16x128xf32>
    %cst_230 = arith.constant 1.000000e+00 : f32
    %540 = vector.broadcast %cst_230 : f32 to vector<16x128xf32>
    %541 = arith.addf %540, %539 : vector<16x128xf32>
    %542 = arith.divf %540, %541 : vector<16x128xf32>
    %543 = vector.extract_strided_slice %536 {offsets = [0, 128], sizes = [16, 128], strides = [1, 1]} : vector<16x512xf32> to vector<16x128xf32>
    %544 = arith.negf %543 : vector<16x128xf32>
    %545 = math.exp %544 : vector<16x128xf32>
    %cst_231 = arith.constant 1.000000e+00 : f32
    %546 = vector.broadcast %cst_231 : f32 to vector<16x128xf32>
    %547 = arith.addf %546, %545 : vector<16x128xf32>
    %548 = arith.divf %546, %547 : vector<16x128xf32>
    %549 = vector.extract_strided_slice %536 {offsets = [0, 256], sizes = [16, 128], strides = [1, 1]} : vector<16x512xf32> to vector<16x128xf32>
    %550 = math.tanh %549 : vector<16x128xf32>
    %551 = vector.extract_strided_slice %536 {offsets = [0, 384], sizes = [16, 128], strides = [1, 1]} : vector<16x512xf32> to vector<16x128xf32>
    %552 = arith.negf %551 : vector<16x128xf32>
    %553 = math.exp %552 : vector<16x128xf32>
    %cst_232 = arith.constant 1.000000e+00 : f32
    %554 = vector.broadcast %cst_232 : f32 to vector<16x128xf32>
    %555 = arith.addf %554, %553 : vector<16x128xf32>
    %556 = arith.divf %554, %555 : vector<16x128xf32>
    %557 = arith.mulf %548, %529 : vector<16x128xf32>
    %558 = arith.mulf %542, %550 : vector<16x128xf32>
    %559 = arith.addf %557, %558 : vector<16x128xf32>
    %560 = math.tanh %559 : vector<16x128xf32>
    %561 = arith.mulf %556, %560 : vector<16x128xf32>
    %562 = arith.select %36, %559, %529 : vector<16x128xi1>, vector<16x128xf32>
    %563 = arith.select %36, %561, %530 : vector<16x128xi1>, vector<16x128xf32>
    %564 = arith.truncf %563 : vector<16x128xf32> to vector<16x128xbf16>
    %565 = arith.select %40, %563, %532 : vector<16x128xi1>, vector<16x128xf32>
    %c32_233 = arith.constant 32 : index
    %c0_234 = arith.constant 0 : index
    %566 = vector.load %arg12[%c32_233, %c0_234] : memref<128x512xf32, #tpu.memory_space<vmem>>, vector<16x512xf32>
    %c0_235 = arith.constant 0 : index
    %c0_236 = arith.constant 0 : index
    %567 = vector.load %arg7[%c0_235, %c0_236] : memref<128x512xbf16, #tpu.memory_space<vmem>>, vector<128x512xbf16>
    %cst_237 = arith.constant dense<0.000000e+00> : vector<16x512xf32>
    %568 = tpu.matmul %564, %567, %cst_237 {dimension_numbers = #tpu.dot_dimension_numbers<[1], [0], [0], [1], [0, 0, 1, 1], [], []>} : vector<16x128xbf16>, vector<128x512xbf16>, vector<16x512xf32> -> vector<16x512xf32>
    %569 = arith.addf %566, %568 : vector<16x512xf32>
    %570 = vector.extract_strided_slice %569 {offsets = [0, 0], sizes = [16, 128], strides = [1, 1]} : vector<16x512xf32> to vector<16x128xf32>
    %571 = arith.negf %570 : vector<16x128xf32>
    %572 = math.exp %571 : vector<16x128xf32>
    %cst_238 = arith.constant 1.000000e+00 : f32
    %573 = vector.broadcast %cst_238 : f32 to vector<16x128xf32>
    %574 = arith.addf %573, %572 : vector<16x128xf32>
    %575 = arith.divf %573, %574 : vector<16x128xf32>
    %576 = vector.extract_strided_slice %569 {offsets = [0, 128], sizes = [16, 128], strides = [1, 1]} : vector<16x512xf32> to vector<16x128xf32>
    %577 = arith.negf %576 : vector<16x128xf32>
    %578 = math.exp %577 : vector<16x128xf32>
    %cst_239 = arith.constant 1.000000e+00 : f32
    %579 = vector.broadcast %cst_239 : f32 to vector<16x128xf32>
    %580 = arith.addf %579, %578 : vector<16x128xf32>
    %581 = arith.divf %579, %580 : vector<16x128xf32>
    %582 = vector.extract_strided_slice %569 {offsets = [0, 256], sizes = [16, 128], strides = [1, 1]} : vector<16x512xf32> to vector<16x128xf32>
    %583 = math.tanh %582 : vector<16x128xf32>
    %584 = vector.extract_strided_slice %569 {offsets = [0, 384], sizes = [16, 128], strides = [1, 1]} : vector<16x512xf32> to vector<16x128xf32>
    %585 = arith.negf %584 : vector<16x128xf32>
    %586 = math.exp %585 : vector<16x128xf32>
    %cst_240 = arith.constant 1.000000e+00 : f32
    %587 = vector.broadcast %cst_240 : f32 to vector<16x128xf32>
    %588 = arith.addf %587, %586 : vector<16x128xf32>
    %589 = arith.divf %587, %588 : vector<16x128xf32>
    %590 = arith.mulf %581, %562 : vector<16x128xf32>
    %591 = arith.mulf %575, %583 : vector<16x128xf32>
    %592 = arith.addf %590, %591 : vector<16x128xf32>
    %593 = math.tanh %592 : vector<16x128xf32>
    %594 = arith.mulf %589, %593 : vector<16x128xf32>
    %595 = arith.select %45, %592, %562 : vector<16x128xi1>, vector<16x128xf32>
    %596 = arith.select %45, %594, %563 : vector<16x128xi1>, vector<16x128xf32>
    %597 = arith.truncf %596 : vector<16x128xf32> to vector<16x128xbf16>
    %598 = arith.select %49, %596, %565 : vector<16x128xi1>, vector<16x128xf32>
    %c48_241 = arith.constant 48 : index
    %c0_242 = arith.constant 0 : index
    %599 = vector.load %arg12[%c48_241, %c0_242] : memref<128x512xf32, #tpu.memory_space<vmem>>, vector<16x512xf32>
    %c0_243 = arith.constant 0 : index
    %c0_244 = arith.constant 0 : index
    %600 = vector.load %arg7[%c0_243, %c0_244] : memref<128x512xbf16, #tpu.memory_space<vmem>>, vector<128x512xbf16>
    %cst_245 = arith.constant dense<0.000000e+00> : vector<16x512xf32>
    %601 = tpu.matmul %597, %600, %cst_245 {dimension_numbers = #tpu.dot_dimension_numbers<[1], [0], [0], [1], [0, 0, 1, 1], [], []>} : vector<16x128xbf16>, vector<128x512xbf16>, vector<16x512xf32> -> vector<16x512xf32>
    %602 = arith.addf %599, %601 : vector<16x512xf32>
    %603 = vector.extract_strided_slice %602 {offsets = [0, 0], sizes = [16, 128], strides = [1, 1]} : vector<16x512xf32> to vector<16x128xf32>
    %604 = arith.negf %603 : vector<16x128xf32>
    %605 = math.exp %604 : vector<16x128xf32>
    %cst_246 = arith.constant 1.000000e+00 : f32
    %606 = vector.broadcast %cst_246 : f32 to vector<16x128xf32>
    %607 = arith.addf %606, %605 : vector<16x128xf32>
    %608 = arith.divf %606, %607 : vector<16x128xf32>
    %609 = vector.extract_strided_slice %602 {offsets = [0, 128], sizes = [16, 128], strides = [1, 1]} : vector<16x512xf32> to vector<16x128xf32>
    %610 = arith.negf %609 : vector<16x128xf32>
    %611 = math.exp %610 : vector<16x128xf32>
    %cst_247 = arith.constant 1.000000e+00 : f32
    %612 = vector.broadcast %cst_247 : f32 to vector<16x128xf32>
    %613 = arith.addf %612, %611 : vector<16x128xf32>
    %614 = arith.divf %612, %613 : vector<16x128xf32>
    %615 = vector.extract_strided_slice %602 {offsets = [0, 256], sizes = [16, 128], strides = [1, 1]} : vector<16x512xf32> to vector<16x128xf32>
    %616 = math.tanh %615 : vector<16x128xf32>
    %617 = vector.extract_strided_slice %602 {offsets = [0, 384], sizes = [16, 128], strides = [1, 1]} : vector<16x512xf32> to vector<16x128xf32>
    %618 = arith.negf %617 : vector<16x128xf32>
    %619 = math.exp %618 : vector<16x128xf32>
    %cst_248 = arith.constant 1.000000e+00 : f32
    %620 = vector.broadcast %cst_248 : f32 to vector<16x128xf32>
    %621 = arith.addf %620, %619 : vector<16x128xf32>
    %622 = arith.divf %620, %621 : vector<16x128xf32>
    %623 = arith.mulf %614, %595 : vector<16x128xf32>
    %624 = arith.mulf %608, %616 : vector<16x128xf32>
    %625 = arith.addf %623, %624 : vector<16x128xf32>
    %626 = math.tanh %625 : vector<16x128xf32>
    %627 = arith.mulf %622, %626 : vector<16x128xf32>
    %628 = arith.select %54, %625, %595 : vector<16x128xi1>, vector<16x128xf32>
    %629 = arith.select %54, %627, %596 : vector<16x128xi1>, vector<16x128xf32>
    %630 = arith.truncf %629 : vector<16x128xf32> to vector<16x128xbf16>
    %631 = arith.select %58, %629, %598 : vector<16x128xi1>, vector<16x128xf32>
    %c64_249 = arith.constant 64 : index
    %c0_250 = arith.constant 0 : index
    %632 = vector.load %arg12[%c64_249, %c0_250] : memref<128x512xf32, #tpu.memory_space<vmem>>, vector<16x512xf32>
    %c0_251 = arith.constant 0 : index
    %c0_252 = arith.constant 0 : index
    %633 = vector.load %arg7[%c0_251, %c0_252] : memref<128x512xbf16, #tpu.memory_space<vmem>>, vector<128x512xbf16>
    %cst_253 = arith.constant dense<0.000000e+00> : vector<16x512xf32>
    %634 = tpu.matmul %630, %633, %cst_253 {dimension_numbers = #tpu.dot_dimension_numbers<[1], [0], [0], [1], [0, 0, 1, 1], [], []>} : vector<16x128xbf16>, vector<128x512xbf16>, vector<16x512xf32> -> vector<16x512xf32>
    %635 = arith.addf %632, %634 : vector<16x512xf32>
    %636 = vector.extract_strided_slice %635 {offsets = [0, 0], sizes = [16, 128], strides = [1, 1]} : vector<16x512xf32> to vector<16x128xf32>
    %637 = arith.negf %636 : vector<16x128xf32>
    %638 = math.exp %637 : vector<16x128xf32>
    %cst_254 = arith.constant 1.000000e+00 : f32
    %639 = vector.broadcast %cst_254 : f32 to vector<16x128xf32>
    %640 = arith.addf %639, %638 : vector<16x128xf32>
    %641 = arith.divf %639, %640 : vector<16x128xf32>
    %642 = vector.extract_strided_slice %635 {offsets = [0, 128], sizes = [16, 128], strides = [1, 1]} : vector<16x512xf32> to vector<16x128xf32>
    %643 = arith.negf %642 : vector<16x128xf32>
    %644 = math.exp %643 : vector<16x128xf32>
    %cst_255 = arith.constant 1.000000e+00 : f32
    %645 = vector.broadcast %cst_255 : f32 to vector<16x128xf32>
    %646 = arith.addf %645, %644 : vector<16x128xf32>
    %647 = arith.divf %645, %646 : vector<16x128xf32>
    %648 = vector.extract_strided_slice %635 {offsets = [0, 256], sizes = [16, 128], strides = [1, 1]} : vector<16x512xf32> to vector<16x128xf32>
    %649 = math.tanh %648 : vector<16x128xf32>
    %650 = vector.extract_strided_slice %635 {offsets = [0, 384], sizes = [16, 128], strides = [1, 1]} : vector<16x512xf32> to vector<16x128xf32>
    %651 = arith.negf %650 : vector<16x128xf32>
    %652 = math.exp %651 : vector<16x128xf32>
    %cst_256 = arith.constant 1.000000e+00 : f32
    %653 = vector.broadcast %cst_256 : f32 to vector<16x128xf32>
    %654 = arith.addf %653, %652 : vector<16x128xf32>
    %655 = arith.divf %653, %654 : vector<16x128xf32>
    %656 = arith.mulf %647, %628 : vector<16x128xf32>
    %657 = arith.mulf %641, %649 : vector<16x128xf32>
    %658 = arith.addf %656, %657 : vector<16x128xf32>
    %659 = math.tanh %658 : vector<16x128xf32>
    %660 = arith.mulf %655, %659 : vector<16x128xf32>
    %661 = arith.select %63, %658, %628 : vector<16x128xi1>, vector<16x128xf32>
    %662 = arith.select %63, %660, %629 : vector<16x128xi1>, vector<16x128xf32>
    %663 = arith.truncf %662 : vector<16x128xf32> to vector<16x128xbf16>
    %664 = arith.select %67, %662, %631 : vector<16x128xi1>, vector<16x128xf32>
    %c80_257 = arith.constant 80 : index
    %c0_258 = arith.constant 0 : index
    %665 = vector.load %arg12[%c80_257, %c0_258] : memref<128x512xf32, #tpu.memory_space<vmem>>, vector<16x512xf32>
    %c0_259 = arith.constant 0 : index
    %c0_260 = arith.constant 0 : index
    %666 = vector.load %arg7[%c0_259, %c0_260] : memref<128x512xbf16, #tpu.memory_space<vmem>>, vector<128x512xbf16>
    %cst_261 = arith.constant dense<0.000000e+00> : vector<16x512xf32>
    %667 = tpu.matmul %663, %666, %cst_261 {dimension_numbers = #tpu.dot_dimension_numbers<[1], [0], [0], [1], [0, 0, 1, 1], [], []>} : vector<16x128xbf16>, vector<128x512xbf16>, vector<16x512xf32> -> vector<16x512xf32>
    %668 = arith.addf %665, %667 : vector<16x512xf32>
    %669 = vector.extract_strided_slice %668 {offsets = [0, 0], sizes = [16, 128], strides = [1, 1]} : vector<16x512xf32> to vector<16x128xf32>
    %670 = arith.negf %669 : vector<16x128xf32>
    %671 = math.exp %670 : vector<16x128xf32>
    %cst_262 = arith.constant 1.000000e+00 : f32
    %672 = vector.broadcast %cst_262 : f32 to vector<16x128xf32>
    %673 = arith.addf %672, %671 : vector<16x128xf32>
    %674 = arith.divf %672, %673 : vector<16x128xf32>
    %675 = vector.extract_strided_slice %668 {offsets = [0, 128], sizes = [16, 128], strides = [1, 1]} : vector<16x512xf32> to vector<16x128xf32>
    %676 = arith.negf %675 : vector<16x128xf32>
    %677 = math.exp %676 : vector<16x128xf32>
    %cst_263 = arith.constant 1.000000e+00 : f32
    %678 = vector.broadcast %cst_263 : f32 to vector<16x128xf32>
    %679 = arith.addf %678, %677 : vector<16x128xf32>
    %680 = arith.divf %678, %679 : vector<16x128xf32>
    %681 = vector.extract_strided_slice %668 {offsets = [0, 256], sizes = [16, 128], strides = [1, 1]} : vector<16x512xf32> to vector<16x128xf32>
    %682 = math.tanh %681 : vector<16x128xf32>
    %683 = vector.extract_strided_slice %668 {offsets = [0, 384], sizes = [16, 128], strides = [1, 1]} : vector<16x512xf32> to vector<16x128xf32>
    %684 = arith.negf %683 : vector<16x128xf32>
    %685 = math.exp %684 : vector<16x128xf32>
    %cst_264 = arith.constant 1.000000e+00 : f32
    %686 = vector.broadcast %cst_264 : f32 to vector<16x128xf32>
    %687 = arith.addf %686, %685 : vector<16x128xf32>
    %688 = arith.divf %686, %687 : vector<16x128xf32>
    %689 = arith.mulf %680, %661 : vector<16x128xf32>
    %690 = arith.mulf %674, %682 : vector<16x128xf32>
    %691 = arith.addf %689, %690 : vector<16x128xf32>
    %692 = math.tanh %691 : vector<16x128xf32>
    %693 = arith.mulf %688, %692 : vector<16x128xf32>
    %694 = arith.select %72, %691, %661 : vector<16x128xi1>, vector<16x128xf32>
    %695 = arith.select %72, %693, %662 : vector<16x128xi1>, vector<16x128xf32>
    %696 = arith.truncf %695 : vector<16x128xf32> to vector<16x128xbf16>
    %697 = arith.select %76, %695, %664 : vector<16x128xi1>, vector<16x128xf32>
    %c96_265 = arith.constant 96 : index
    %c0_266 = arith.constant 0 : index
    %698 = vector.load %arg12[%c96_265, %c0_266] : memref<128x512xf32, #tpu.memory_space<vmem>>, vector<16x512xf32>
    %c0_267 = arith.constant 0 : index
    %c0_268 = arith.constant 0 : index
    %699 = vector.load %arg7[%c0_267, %c0_268] : memref<128x512xbf16, #tpu.memory_space<vmem>>, vector<128x512xbf16>
    %cst_269 = arith.constant dense<0.000000e+00> : vector<16x512xf32>
    %700 = tpu.matmul %696, %699, %cst_269 {dimension_numbers = #tpu.dot_dimension_numbers<[1], [0], [0], [1], [0, 0, 1, 1], [], []>} : vector<16x128xbf16>, vector<128x512xbf16>, vector<16x512xf32> -> vector<16x512xf32>
    %701 = arith.addf %698, %700 : vector<16x512xf32>
    %702 = vector.extract_strided_slice %701 {offsets = [0, 0], sizes = [16, 128], strides = [1, 1]} : vector<16x512xf32> to vector<16x128xf32>
    %703 = arith.negf %702 : vector<16x128xf32>
    %704 = math.exp %703 : vector<16x128xf32>
    %cst_270 = arith.constant 1.000000e+00 : f32
    %705 = vector.broadcast %cst_270 : f32 to vector<16x128xf32>
    %706 = arith.addf %705, %704 : vector<16x128xf32>
    %707 = arith.divf %705, %706 : vector<16x128xf32>
    %708 = vector.extract_strided_slice %701 {offsets = [0, 128], sizes = [16, 128], strides = [1, 1]} : vector<16x512xf32> to vector<16x128xf32>
    %709 = arith.negf %708 : vector<16x128xf32>
    %710 = math.exp %709 : vector<16x128xf32>
    %cst_271 = arith.constant 1.000000e+00 : f32
    %711 = vector.broadcast %cst_271 : f32 to vector<16x128xf32>
    %712 = arith.addf %711, %710 : vector<16x128xf32>
    %713 = arith.divf %711, %712 : vector<16x128xf32>
    %714 = vector.extract_strided_slice %701 {offsets = [0, 256], sizes = [16, 128], strides = [1, 1]} : vector<16x512xf32> to vector<16x128xf32>
    %715 = math.tanh %714 : vector<16x128xf32>
    %716 = vector.extract_strided_slice %701 {offsets = [0, 384], sizes = [16, 128], strides = [1, 1]} : vector<16x512xf32> to vector<16x128xf32>
    %717 = arith.negf %716 : vector<16x128xf32>
    %718 = math.exp %717 : vector<16x128xf32>
    %cst_272 = arith.constant 1.000000e+00 : f32
    %719 = vector.broadcast %cst_272 : f32 to vector<16x128xf32>
    %720 = arith.addf %719, %718 : vector<16x128xf32>
    %721 = arith.divf %719, %720 : vector<16x128xf32>
    %722 = arith.mulf %713, %694 : vector<16x128xf32>
    %723 = arith.mulf %707, %715 : vector<16x128xf32>
    %724 = arith.addf %722, %723 : vector<16x128xf32>
    %725 = math.tanh %724 : vector<16x128xf32>
    %726 = arith.mulf %721, %725 : vector<16x128xf32>
    %727 = arith.select %81, %724, %694 : vector<16x128xi1>, vector<16x128xf32>
    %728 = arith.select %81, %726, %695 : vector<16x128xi1>, vector<16x128xf32>
    %729 = arith.truncf %728 : vector<16x128xf32> to vector<16x128xbf16>
    %730 = arith.select %85, %728, %697 : vector<16x128xi1>, vector<16x128xf32>
    %c112_273 = arith.constant 112 : index
    %c0_274 = arith.constant 0 : index
    %731 = vector.load %arg12[%c112_273, %c0_274] : memref<128x512xf32, #tpu.memory_space<vmem>>, vector<16x512xf32>
    %c0_275 = arith.constant 0 : index
    %c0_276 = arith.constant 0 : index
    %732 = vector.load %arg7[%c0_275, %c0_276] : memref<128x512xbf16, #tpu.memory_space<vmem>>, vector<128x512xbf16>
    %cst_277 = arith.constant dense<0.000000e+00> : vector<16x512xf32>
    %733 = tpu.matmul %729, %732, %cst_277 {dimension_numbers = #tpu.dot_dimension_numbers<[1], [0], [0], [1], [0, 0, 1, 1], [], []>} : vector<16x128xbf16>, vector<128x512xbf16>, vector<16x512xf32> -> vector<16x512xf32>
    %734 = arith.addf %731, %733 : vector<16x512xf32>
    %735 = vector.extract_strided_slice %734 {offsets = [0, 0], sizes = [16, 128], strides = [1, 1]} : vector<16x512xf32> to vector<16x128xf32>
    %736 = arith.negf %735 : vector<16x128xf32>
    %737 = math.exp %736 : vector<16x128xf32>
    %cst_278 = arith.constant 1.000000e+00 : f32
    %738 = vector.broadcast %cst_278 : f32 to vector<16x128xf32>
    %739 = arith.addf %738, %737 : vector<16x128xf32>
    %740 = arith.divf %738, %739 : vector<16x128xf32>
    %741 = vector.extract_strided_slice %734 {offsets = [0, 128], sizes = [16, 128], strides = [1, 1]} : vector<16x512xf32> to vector<16x128xf32>
    %742 = arith.negf %741 : vector<16x128xf32>
    %743 = math.exp %742 : vector<16x128xf32>
    %cst_279 = arith.constant 1.000000e+00 : f32
    %744 = vector.broadcast %cst_279 : f32 to vector<16x128xf32>
    %745 = arith.addf %744, %743 : vector<16x128xf32>
    %746 = arith.divf %744, %745 : vector<16x128xf32>
    %747 = vector.extract_strided_slice %734 {offsets = [0, 256], sizes = [16, 128], strides = [1, 1]} : vector<16x512xf32> to vector<16x128xf32>
    %748 = math.tanh %747 : vector<16x128xf32>
    %749 = vector.extract_strided_slice %734 {offsets = [0, 384], sizes = [16, 128], strides = [1, 1]} : vector<16x512xf32> to vector<16x128xf32>
    %750 = arith.negf %749 : vector<16x128xf32>
    %751 = math.exp %750 : vector<16x128xf32>
    %cst_280 = arith.constant 1.000000e+00 : f32
    %752 = vector.broadcast %cst_280 : f32 to vector<16x128xf32>
    %753 = arith.addf %752, %751 : vector<16x128xf32>
    %754 = arith.divf %752, %753 : vector<16x128xf32>
    %755 = arith.mulf %746, %727 : vector<16x128xf32>
    %756 = arith.mulf %740, %748 : vector<16x128xf32>
    %757 = arith.addf %755, %756 : vector<16x128xf32>
    %758 = math.tanh %757 : vector<16x128xf32>
    %759 = arith.mulf %754, %758 : vector<16x128xf32>
    %760 = arith.select %90, %759, %728 : vector<16x128xi1>, vector<16x128xf32>
    %761 = arith.select %94, %760, %730 : vector<16x128xi1>, vector<16x128xf32>
    %762 = arith.truncf %761 : vector<16x128xf32> to vector<16x128xbf16>
    %c0_281 = arith.constant 0 : index
    %c0_282 = arith.constant 0 : index
    %763 = vector.load %arg9[%c0_281, %c0_282] : memref<128x128xbf16, #tpu.memory_space<vmem>>, vector<128x128xbf16>
    %cst_283 = arith.constant dense<0.000000e+00> : vector<16x128xf32>
    %764 = tpu.matmul %762, %763, %cst_283 {dimension_numbers = #tpu.dot_dimension_numbers<[1], [0], [0], [1], [0, 0, 1, 1], [], []>} : vector<16x128xbf16>, vector<128x128xbf16>, vector<16x128xf32> -> vector<16x128xf32>
    %c0_284 = arith.constant 0 : index
    %c0_285 = arith.constant 0 : index
    %765 = vector.load %arg10[%c0_284, %c0_285] : memref<1x128xf32, #tpu.memory_space<vmem>>, vector<1x128xf32>
    %766 = vector.broadcast %765 : vector<1x128xf32> to vector<16x128xf32>
    %767 = arith.addf %764, %766 : vector<16x128xf32>
    %c0_286 = arith.constant 0 : index
    %c0_287 = arith.constant 0 : index
    %768 = vector.load %arg11[%c0_286, %c0_287] : memref<16x128xf32, #tpu.memory_space<vmem>>, vector<16x128xf32>
    tpu.vector_store %arg11[%c0_286, %c0_287], %767 {strides = array<i32>} : memref<16x128xf32, #tpu.memory_space<vmem>>, vector<16x128xf32>,
    return
  }
  func.func @transform_0(%arg0: i32) -> (i32, i32, i32) {
    %c0_i32 = arith.constant 0 : i32
    %c0_i32_0 = arith.constant 0 : i32
    %c0_i32_1 = arith.constant 0 : i32
    return %c0_i32, %arg0, %c0_i32_0 : i32, i32, i32
  }
  func.func @transform_1(%arg0: i32) -> (i32, i32) {
    %c0_i32 = arith.constant 0 : i32
    %c0_i32_0 = arith.constant 0 : i32
    return %arg0, %c0_i32 : i32, i32
  }
  func.func @transform_2(%arg0: i32) -> (i32, i32) {
    %c0_i32 = arith.constant 0 : i32
    %c0_i32_0 = arith.constant 0 : i32
    %c0_i32_1 = arith.constant 0 : i32
    return %c0_i32, %c0_i32_0 : i32, i32
  }
  func.func @transform_3(%arg0: i32) -> (i32, i32) {
    %c0_i32 = arith.constant 0 : i32
    %c0_i32_0 = arith.constant 0 : i32
    %c0_i32_1 = arith.constant 0 : i32
    return %c0_i32, %c0_i32_0 : i32, i32
  }
  func.func @transform_4(%arg0: i32) -> (i32, i32) {
    %c0_i32 = arith.constant 0 : i32
    %c0_i32_0 = arith.constant 0 : i32
    %c0_i32_1 = arith.constant 0 : i32
    return %c0_i32, %c0_i32_0 : i32, i32
  }
  func.func @transform_5(%arg0: i32) -> (i32, i32) {
    %c0_i32 = arith.constant 0 : i32
    %c0_i32_0 = arith.constant 0 : i32
    %c0_i32_1 = arith.constant 0 : i32
    return %c0_i32, %c0_i32_0 : i32, i32
  }
  func.func @transform_6(%arg0: i32) -> (i32, i32) {
    %c0_i32 = arith.constant 0 : i32
    %c0_i32_0 = arith.constant 0 : i32
    %c0_i32_1 = arith.constant 0 : i32
    return %c0_i32, %c0_i32_0 : i32, i32
  }
  func.func @transform_7(%arg0: i32) -> (i32, i32) {
    %c0_i32 = arith.constant 0 : i32
    %c0_i32_0 = arith.constant 0 : i32
    %c0_i32_1 = arith.constant 0 : i32
    return %c0_i32, %c0_i32_0 : i32, i32
  }
  func.func @transform_8(%arg0: i32) -> (i32, i32) {
    %c0_i32 = arith.constant 0 : i32
    %c0_i32_0 = arith.constant 0 : i32
    %c0_i32_1 = arith.constant 0 : i32
    return %c0_i32, %c0_i32_0 : i32, i32
  }
  func.func @transform_9(%arg0: i32) -> (i32, i32) {
    %c0_i32 = arith.constant 0 : i32
    %c0_i32_0 = arith.constant 0 : i32
    %c0_i32_1 = arith.constant 0 : i32
    return %c0_i32, %c0_i32_0 : i32, i32
  }
  func.func @transform_10(%arg0: i32) -> (i32, i32) {
    %c0_i32 = arith.constant 0 : i32
    %c0_i32_0 = arith.constant 0 : i32
    return %arg0, %c0_i32 : i32, i32
  }
}

</mosaic_0001>

<bundles_post_ra>
// kernel: intention_lstm_forward.1
= control target key start
LH: loop header
LB: loop body
LE: loop exit
PB: predicated region body
PF: predicated region fallthrough
CT: control target
= control target key end

     0   :  { %15 = vsyncpa [#allocation5], 0  ;;  %s11182_s0 = inlined_call_operand.vmem [shape: bf16[8,16,128], index: 0, kind: input, shape index: {}]   ;;  %s11183_s1 = inlined_call_operand.vmem [shape: s32[16,128], index: 1, kind: input, shape index: {}]   ;;  %s11184_s2 = inlined_call_operand.vmem [shape: bf16[128,512], index: 2, kind: input, shape index: {}]   ;;  %s11185_s3 = inlined_call_operand.vmem [shape: bf16[128,512], index: 3, kind: input, shape index: {}]   ;;  %s11186_s4 = inlined_call_operand.vmem [shape: f32[1,512], index: 4, kind: input, shape index: {}]   ;;  %s11187_s5 = inlined_call_operand.hbm [shape: bf16[128,512], index: 5, kind: input, shape index: {}]   ;;  %s11188_s6 = inlined_call_operand.hbm [shape: bf16[128,512], index: 6, kind: input, shape index: {}]   ;;  %s11189_s7 = inlined_call_operand.vmem [shape: f32[1,512], index: 7, kind: input, shape index: {}]   ;;  %s11190_s8 = inlined_call_operand.vmem [shape: bf16[128,128], index: 8, kind: input, shape index: {}]   ;;  %s11191_s9 = inlined_call_operand.vmem [shape: f32[1,128], index: 9, kind: input, shape index: {}]   ;;  %s11192_s10 = inlined_call_operand.vmem [shape: f32[16,128], index: 10, kind: output, shape index: {}]  }
   0x1   :  { %16 = vsyncpa [#allocation7], 0  ;;  %s7695_s13 = smov [#allocation4]  }
   0x2   :  { %s32_s14 = sshll.u32 %s7695_s13, 4  ;;  %s33_s14 = int_to_ptr.vmem [resolvable:$true] %s32_s14 }
   0x3   :  { %s7659_s15 = scalar_lea.vmem %s33_s14, 4096  ;;  %p7664_p1 = scmp.lt.s32.totalorder %s33_s14, %s33_s14 }
   0x4   :  { %p7660_p0 = scmp.ne.s32.totalorder %s33_s14, %s7659_s15  ;;  %p7665_p2 = scmp.lt.s32.totalorder %s7659_s15, %s7659_s15 }
   0x6   :  { %p7666_p3 = por %p7665_p2, %p7664_p1 }
   0x8   :  { %p7667_p4 = pnand %p7666_p3, %p7660_p0 }
   0xa   :  { %7670 = shalt.err (!%p7667_p4)
}
   0xb   :  { %s7696_s16 = smov 256   ;;  %s7697_s17 = smov 16  }
   0xc   :  { %38 = dma.hbm_to_vmem [thread:$0]  %s11187_s5, 4096, %s33_s14, [#allocation5], %s7696_s16, %s7696_s16, %s7697_s17  }
   0xd   :  { %s7698_s20 = smov [#allocation6]  }
   0xe   :  { %s44_s21 = sshll.u32 %s7698_s20, 4  ;;  %s45_s21 = int_to_ptr.vmem [resolvable:$true] %s44_s21 }
   0xf   :  { %s7679_s22 = scalar_lea.vmem %s45_s21, 4096  ;;  %p7684_p6 = scmp.lt.s32.totalorder %s45_s21, %s45_s21 }
  0x10   :  { %p7680_p5 = scmp.ne.s32.totalorder %s45_s21, %s7679_s22  ;;  %p7685_p7 = scmp.lt.s32.totalorder %s7679_s22, %s7679_s22 }
  0x12   :  { %p7686_p8 = por %p7685_p7, %p7684_p6 }
  0x14   :  { %p7687_p9 = pnand %p7686_p8, %p7680_p5 }
  0x16   :  { %7690 = shalt.err (!%p7687_p9)
}
  0x17   :  { %50 = dma.hbm_to_vmem [thread:$0]  %s11188_s6, 4096, %s45_s21, [#allocation7], %s7696_s16, %s7696_s16, %s7697_s17  }
  0x18   :  { %7691 = dma.done.wait [#allocation5], 4096  }
  0x19   :  { %7692 = vsyncadd [#allocation5], 4294963200 }
  0x1a   :  { %7693 = dma.done.wait [#allocation7], 4096  }
  0x1b   :  { %7694 = vsyncadd [#allocation7], 4294963200  ;;  %v11197_v0 = vmov 0   ;;  %v6770_v1 = vld [vmem:[%s11184_s2 + $0xe4] ss:$16 sps:$4 sm:$0xff]   ;;  %v6822_v43 = vld [vmem:[%s11182_s0 + $0x8] sm:$0xff]  }
  0x1c   :  { %482 = vmatprep.mubr.bf16.mxu0 %v11197_v0  ;;  %595 = vmatprep.mubr.bf16.mxu1 %v11197_v0  ;;  %v6772_v2 = vld [vmem:[%s11184_s2 + $0xec] ss:$16 sps:$4 sm:$0xff]   ;;  %v6774_v3 = vld [vmem:[%s11184_s2 + $0xe0] ss:$16 sps:$4 sm:$0xff]   ;;  %v6775_v4 = vld [vmem:[%s11184_s2 + $0xe8] ss:$16 sps:$4 sm:$0xff]  }
  0x1d   :  { %450 = vmatprep.subr.bf16.mxu0 %v6770_v1  ;;  %563 = vmatprep.subr.bf16.mxu1 %v6772_v2  ;;  %v6776_v5 = vld [vmem:[%s11184_s2 + $0xc4] ss:$16 sps:$4 sm:$0xff]   ;;  %v6778_v6 = vld [vmem:[%s11184_s2 + $0xcc] ss:$16 sps:$4 sm:$0xff]   ;;  %v6780_v7 = vld [vmem:[%s11184_s2 + $0xc0] ss:$16 sps:$4 sm:$0xff]  }
  0x1e   :  { %451 = vmatpush1.bf16.msra.mxu0 %v6774_v3  ;;  %564 = vmatpush1.bf16.msra.mxu1 %v6775_v4  ;;  %v6781_v8 = vld [vmem:[%s11184_s2 + $0xc8] ss:$16 sps:$4 sm:$0xff]   ;;  %v6782_v9 = vld [vmem:[%s11184_s2 + $0xa4] ss:$16 sps:$4 sm:$0xff]   ;;  %v6784_v10 = vld [vmem:[%s11184_s2 + $0xac] ss:$16 sps:$4 sm:$0xff]  }
  0x1f   :  { %452 = vmatprep.subr.bf16.mxu0 %v6776_v5  ;;  %565 = vmatprep.subr.bf16.mxu1 %v6778_v6  ;;  %v6786_v11 = vld [vmem:[%s11184_s2 + $0xa0] ss:$16 sps:$4 sm:$0xff]   ;;  %v6787_v12 = vld [vmem:[%s11184_s2 + $0xa8] ss:$16 sps:$4 sm:$0xff]   ;;  %v6788_v13 = vld [vmem:[%s11184_s2 + $0x84] ss:$16 sps:$4 sm:$0xff]  }
  0x20   :  { %v6790_v14 = vld [vmem:[%s11184_s2 + $0x8c] ss:$16 sps:$4 sm:$0xff]   ;;  %v6792_v15 = vld [vmem:[%s11184_s2 + $0x80] ss:$16 sps:$4 sm:$0xff]   ;;  %v6793_v16 = vld [vmem:[%s11184_s2 + $0x88] ss:$16 sps:$4 sm:$0xff]  }
  0x21   :  { %v6794_v17 = vld [vmem:[%s11184_s2 + $0x64] ss:$16 sps:$4 sm:$0xff]   ;;  %v6796_v18 = vld [vmem:[%s11184_s2 + $0x6c] ss:$16 sps:$4 sm:$0xff]   ;;  %v6798_v19 = vld [vmem:[%s11184_s2 + $0x60] ss:$16 sps:$4 sm:$0xff]  }
  0x22   :  { %453 = vmatpush1.bf16.msra.mxu0 %v6780_v7  ;;  %566 = vmatpush1.bf16.msra.mxu1 %v6781_v8  ;;  %v6799_v20 = vld [vmem:[%s11184_s2 + $0x68] ss:$16 sps:$4 sm:$0xff]   ;;  %v6800_v21 = vld [vmem:[%s11184_s2 + $0x44] ss:$16 sps:$4 sm:$0xff]   ;;  %v6802_v22 = vld [vmem:[%s11184_s2 + $0x4c] ss:$16 sps:$4 sm:$0xff]  }
  0x23   :  { %454 = vmatprep.subr.bf16.mxu0 %v6782_v9  ;;  %567 = vmatprep.subr.bf16.mxu1 %v6784_v10  ;;  %v6804_v23 = vld [vmem:[%s11184_s2 + $0x40] ss:$16 sps:$4 sm:$0xff]   ;;  %v6805_v24 = vld [vmem:[%s11184_s2 + $0x48] ss:$16 sps:$4 sm:$0xff]   ;;  %v6806_v25 = vld [vmem:[%s11184_s2 + $0x24] ss:$16 sps:$4 sm:$0xff]   ;;  %v64_v10 = vlaneseq }
  0x24   :  { %v6808_v26 = vld [vmem:[%s11184_s2 + $0x2c] ss:$16 sps:$4 sm:$0xff]   ;;  %v6810_v27 = vld [vmem:[%s11184_s2 + $0x20] ss:$16 sps:$4 sm:$0xff]   ;;  %v6811_v28 = vld [vmem:[%s11184_s2 + $0x28] ss:$16 sps:$4 sm:$0xff]  }
  0x25   :  { %v6812_v29 = vld [vmem:[%s11184_s2 + $0x4] ss:$16 sps:$4 sm:$0xff]   ;;  %v6814_v30 = vld [vmem:[%s11184_s2 + $0xc] ss:$16 sps:$4 sm:$0xff]   ;;  %v6816_v31 = vld [vmem:[%s11184_s2] ss:$16 sps:$4 sm:$0xff]  }
  0x26   :  { %455 = vmatpush1.bf16.msra.mxu0 %v6786_v11  ;;  %568 = vmatpush1.bf16.msra.mxu1 %v6787_v12  ;;  %v6817_v32 = vld [vmem:[%s11184_s2 + $0x8] ss:$16 sps:$4 sm:$0xff]   ;;  %v7871_v33 = vld [vmem:[%s11185_s3 + $0xe4] ss:$16 sps:$4 sm:$0xff]   ;;  %v7876_v34 = vld [vmem:[%s11185_s3 + $0xec] ss:$16 sps:$4 sm:$0xff]  }
  0x27   :  { %456 = vmatprep.subr.bf16.mxu0 %v6788_v13  ;;  %569 = vmatprep.subr.bf16.mxu1 %v6790_v14  ;;  %v6818_v35 = vld [vmem:[%s11182_s0] sm:$0xff]   ;;  %v7896_v38 = vld [vmem:[%s11185_s3 + $0xe8] ss:$16 sps:$4 sm:$0xff]   ;;  %v7901_v39 = vld [vmem:[%s11185_s3 + $0xcc] ss:$16 sps:$4 sm:$0xff]   ;;  %v8137_v11 = vshrl.u32 %v64_v10, 7 }
  0x28   :  { %v7884_v36 = vld [vmem:[%s11185_s3 + $0xe0] ss:$16 sps:$4 sm:$0xff]   ;;  %v7890_v37 = vld [vmem:[%s11185_s3 + $0xc4] ss:$16 sps:$4 sm:$0xff]   ;;  %v7921_v42 = vld [vmem:[%s11185_s3 + $0xc8] ss:$16 sps:$4 sm:$0xff]  }
  0x29   :  { %v7908_v40 = vld [vmem:[%s11185_s3 + $0xc0] ss:$16 sps:$4 sm:$0xff]   ;;  %v7915_v41 = vld [vmem:[%s11185_s3 + $0xa4] ss:$16 sps:$4 sm:$0xff]   ;;  %v7937_v45 = vld [vmem:[%s11185_s3 + $0xac] ss:$16 sps:$4 sm:$0xff]  }
  0x2a   :  { %457 = vmatpush1.bf16.msra.mxu0 %v6792_v15  ;;  %570 = vmatpush1.bf16.msra.mxu1 %v6793_v16  ;;  %v7931_v44 = vld [vmem:[%s11185_s3 + $0xa0] ss:$16 sps:$4 sm:$0xff]   ;;  %v7942_v46 = vld [vmem:[%s11185_s3 + $0x84] ss:$16 sps:$4 sm:$0xff]   ;;  %v7948_v47 = vld [vmem:[%s11185_s3 + $0xa8] ss:$16 sps:$4 sm:$0xff]  }
  0x2b   :  { %458 = vmatprep.subr.bf16.mxu0 %v6794_v17  ;;  %571 = vmatprep.subr.bf16.mxu1 %v6796_v18  ;;  %v7953_v48 = vld [vmem:[%s11185_s3 + $0x8c] ss:$16 sps:$4 sm:$0xff]   ;;  %v7961_v49 = vld [vmem:[%s11185_s3 + $0x80] ss:$16 sps:$4 sm:$0xff]   ;;  %v7966_v50 = vld [vmem:[%s11185_s3 + $0x64] ss:$16 sps:$4 sm:$0xff]  }
  0x2c   :  { %v7974_v51 = vld [vmem:[%s11185_s3 + $0x88] ss:$16 sps:$4 sm:$0xff]   ;;  %v6826_v52 = vld [vmem:[%s11182_s0 + $0x10] sm:$0xff]   ;;  %v7989_v54 = vld [vmem:[%s11185_s3 + $0x6c] ss:$16 sps:$4 sm:$0xff]   ;;  %11423 = vst [vmem:[#allocation10_spill] sm:$0xff] %v8137_v11 }
  0x2d   :  { %v7983_v53 = vld [vmem:[%s11185_s3 + $0x60] ss:$16 sps:$4 sm:$0xff]   ;;  %v7995_v55 = vld [vmem:[%s11185_s3 + $0x44] ss:$16 sps:$4 sm:$0xff]   ;;  %v8001_v56 = vld [vmem:[%s11185_s3 + $0x68] ss:$16 sps:$4 sm:$0xff]  }
  0x2e   :  { %459 = vmatpush1.bf16.msra.mxu0 %v6798_v19  ;;  %572 = vmatpush1.bf16.msra.mxu1 %v6799_v20  ;;  %v8006_v57 = vld [vmem:[%s11185_s3 + $0x4c] ss:$16 sps:$4 sm:$0xff]   ;;  %v8011_v58 = vld [vmem:[%s11185_s3 + $0x40] ss:$16 sps:$4 sm:$0xff]   ;;  %v8018_v59 = vld [vmem:[%s11185_s3 + $0x24] ss:$16 sps:$4 sm:$0xff]  }
  0x2f   :  { %460 = vmatprep.subr.bf16.mxu0 %v6800_v21  ;;  %573 = vmatprep.subr.bf16.mxu1 %v6802_v22  ;;  %v8023_v60 = vld [vmem:[%s11185_s3 + $0x48] ss:$16 sps:$4 sm:$0xff]   ;;  %v8035_v62 = vld [vmem:[%s11185_s3 + $0x20] ss:$16 sps:$4 sm:$0xff]   ;;  %v8041_v63 = vld [vmem:[%s11185_s3 + $0x2c] ss:$16 sps:$4 sm:$0xff]  }
  0x30   :  { %v6833_v61 = vld [vmem:[%s11182_s0 + $0x18] sm:$0xff]   ;;  %v8046_v1 = vld [vmem:[%s11185_s3 + $0x4] ss:$16 sps:$4 sm:$0xff]   ;;  %v8064_v4 = vld [vmem:[%s11185_s3] ss:$16 sps:$4 sm:$0xff]   ;;  %v11196_v16 = vsub.s32 0, %v8137_v11 }
  0x31   :  { %v8051_v2 = vld [vmem:[%s11185_s3 + $0x28] ss:$16 sps:$4 sm:$0xff]   ;;  %v8057_v3 = vld [vmem:[%s11185_s3 + $0xc] ss:$16 sps:$4 sm:$0xff]   ;;  %v6840_v6 = vld [vmem:[%s11182_s0 + $0x20] sm:$0xff]   ;;  %v11195_v17 = vsub.s32 2, %v8137_v11 }
  0x32   :  { %461 = vmatpush1.bf16.msra.mxu0 %v6804_v23  ;;  %574 = vmatpush1.bf16.msra.mxu1 %v6805_v24  ;;  %v8071_v5 = vld [vmem:[%s11185_s3 + $0x8] ss:$16 sps:$4 sm:$0xff]   ;;  %v6854_v8 = vld [vmem:[%s11182_s0 + $0x30] sm:$0xff]   ;;  %v220_v18 = vld [vmem:[%s11186_s4] sm:$0xf]  ;;  %v11194_v21 = vsub.s32 1, %v8137_v11 }
  0x33   :  { %462 = vmatprep.subr.bf16.mxu0 %v6806_v25  ;;  %575 = vmatprep.subr.bf16.mxu1 %v6808_v26  ;;  %v6847_v7 = vld [vmem:[%s11182_s0 + $0x28] sm:$0xff]   ;;  %v6864_v9 = vld [vmem:[%s11182_s0 + $0x38] sm:$0xff]   ;;  %v11193_v22 = vsub.s32 3, %v8137_v11  ;;  %v8164_v25 = vrot.slane %v220_v18, %v11196_v16  ;;  %v8168_v26 = vrot.slane %v220_v18, %v11195_v17 }
  0x36   :  { %463 = vmatpush1.bf16.msra.mxu0 %v6810_v27  ;;  %576 = vmatpush1.bf16.msra.mxu1 %v6811_v28 }
  0x37   :  { %464 = vmatprep.subr.bf16.mxu0 %v6812_v29  ;;  %577 = vmatprep.subr.bf16.mxu1 %v6814_v30  ;;  %v8172_v29 = vrot.slane %v220_v18, %v11194_v21  ;;  %v8176_v30 = vrot.slane %v220_v18, %v11193_v22 }
  0x3a   :  { %465 = vmatpush1.bf16.msra.mxu0 %v6816_v31  ;;  %578 = vmatpush1.bf16.msra.mxu1 %v6817_v32 }
  0x3b   :  { %1140 = vmatprep.subr.bf16.mxu0 %v7871_v33  ;;  %1183 = vmatprep.subr.bf16.mxu1 %v7876_v34 }
  0x3d   :  { %483 = vmatmul.mubr.bf16.vlgmr.msra.gmra.mxu0 %v6818_v35  ;;  %596 = vmatmul.mubr.bf16.vlgmr.msra.gmra.mxu1 %v6818_v35 }
  0x3e   :  { %1141 = vmatpush1.bf16.msra.mxu0 %v7884_v36  ;;  %492 = vmatprep.mubr.bf16.mxu0 %v11197_v0 }
  0x3f   :  { %605 = vmatprep.mubr.bf16.mxu1 %v11197_v0  ;;  %1142 = vmatprep.subr.bf16.mxu0 %v7890_v37 }
  0x40   :  { %1184 = vmatpush1.bf16.msra.mxu1 %v7896_v38 }
  0x41   :  { %1185 = vmatprep.subr.bf16.mxu1 %v7901_v39 }
  0x42   :  { %1143 = vmatpush1.bf16.msra.mxu0 %v7908_v40 }
  0x43   :  { %1144 = vmatprep.subr.bf16.mxu0 %v7915_v41 }
  0x44   :  { %1186 = vmatpush1.bf16.msra.mxu1 %v7921_v42 }
  0x45   :  { %493 = vmatmul.mubr.bf16.gmra.mxu0 %v6822_v43  ;;  %606 = vmatmul.mubr.bf16.gmra.mxu1 %v6822_v43 }
  0x46   :  { %502 = vmatprep.mubr.bf16.mxu0 %v11197_v0  ;;  %615 = vmatprep.mubr.bf16.mxu1 %v11197_v0 }
  0x47   :  { %1145 = vmatpush1.bf16.msra.mxu0 %v7931_v44  ;;  %1187 = vmatprep.subr.bf16.mxu1 %v7937_v45 }
  0x48   :  { %1146 = vmatprep.subr.bf16.mxu0 %v7942_v46  ;;  %1188 = vmatpush1.bf16.msra.mxu1 %v7948_v47 }
  0x49   :  { %1189 = vmatprep.subr.bf16.mxu1 %v7953_v48 }
  0x4b   :  { %1147 = vmatpush1.bf16.msra.mxu0 %v7961_v49 }
  0x4c   :  { %1148 = vmatprep.subr.bf16.mxu0 %v7966_v50  ;;  %1190 = vmatpush1.bf16.msra.mxu1 %v7974_v51 }
  0x4d   :  { %503 = vmatmul.mubr.bf16.gmra.mxu0 %v6826_v52  ;;  %616 = vmatmul.mubr.bf16.gmra.mxu1 %v6826_v52 }
  0x4e   :  { %512 = vmatprep.mubr.bf16.mxu0 %v11197_v0  ;;  %625 = vmatprep.mubr.bf16.mxu1 %v11197_v0 }
  0x4f   :  { %1149 = vmatpush1.bf16.msra.mxu0 %v7983_v53  ;;  %1191 = vmatprep.subr.bf16.mxu1 %v7989_v54 }
  0x50   :  { %1150 = vmatprep.subr.bf16.mxu0 %v7995_v55  ;;  %1192 = vmatpush1.bf16.msra.mxu1 %v8001_v56 }
  0x51   :  { %1193 = vmatprep.subr.bf16.mxu1 %v8006_v57 }
  0x53   :  { %1151 = vmatpush1.bf16.msra.mxu0 %v8011_v58 }
  0x54   :  { %1152 = vmatprep.subr.bf16.mxu0 %v8018_v59  ;;  %1194 = vmatpush1.bf16.msra.mxu1 %v8023_v60 }
  0x55   :  { %513 = vmatmul.mubr.bf16.gmra.mxu0 %v6833_v61  ;;  %626 = vmatmul.mubr.bf16.gmra.mxu1 %v6833_v61 }
  0x56   :  { %522 = vmatprep.mubr.bf16.mxu0 %v11197_v0  ;;  %635 = vmatprep.mubr.bf16.mxu1 %v11197_v0 }
  0x57   :  { %1153 = vmatpush1.bf16.msra.mxu0 %v8035_v62  ;;  %1195 = vmatprep.subr.bf16.mxu1 %v8041_v63 }
  0x58   :  { %1154 = vmatprep.subr.bf16.mxu0 %v8046_v1  ;;  %1196 = vmatpush1.bf16.msra.mxu1 %v8051_v2 }
  0x59   :  { %1197 = vmatprep.subr.bf16.mxu1 %v8057_v3 }
  0x5b   :  { %1155 = vmatpush1.bf16.msra.mxu0 %v8064_v4 }
  0x5c   :  { %1198 = vmatpush1.bf16.msra.mxu1 %v8071_v5  ;;  %1496 = vmatprep.subr.bf16.mxu0 %v7871_v33 }
  0x5d   :  { %523 = vmatmul.mubr.bf16.gmra.mxu0 %v6840_v6  ;;  %636 = vmatmul.mubr.bf16.gmra.mxu1 %v6840_v6 }
  0x5e   :  { %532 = vmatprep.mubr.bf16.mxu0 %v11197_v0  ;;  %645 = vmatprep.mubr.bf16.mxu1 %v11197_v0 }
  0x5f   :  { %1539 = vmatprep.subr.bf16.mxu1 %v7876_v34 }
  0x65   :  { %533 = vmatmul.mubr.bf16.gmra.mxu0 %v6847_v7  ;;  %646 = vmatmul.mubr.bf16.gmra.mxu1 %v6847_v7 }
  0x66   :  { %542 = vmatprep.mubr.bf16.mxu0 %v11197_v0  ;;  %655 = vmatprep.mubr.bf16.mxu1 %v11197_v0 }
  0x6d   :  { %543 = vmatmul.mubr.bf16.gmra.mxu0 %v6854_v8  ;;  %656 = vmatmul.mubr.bf16.gmra.mxu1 %v6854_v8 }
  0x6e   :  { %552 = vmatprep.mubr.bf16.mxu0 %v11197_v0  ;;  %665 = vmatprep.mubr.bf16.mxu1 %v11197_v0 }
  0x75   :  { %553 = vmatmul.mubr.bf16.gmra.mxu0 %v6864_v9  ;;  %666 = vmatmul.mubr.bf16.gmra.mxu1 %v6864_v9 }
  0x76   :  { %1172 = vmatprep.mubr.bf16.mxu0 %v11197_v0  ;;  %1215 = vmatprep.mubr.bf16.mxu1 %v11197_v0 }
  0x7d   :  { %1173 = vmatmul.mubr.bf16.vlgmr.msra.gmra.mxu0 %v11197_v0  ;;  %1216 = vmatmul.mubr.bf16.vlgmr.msra.gmra.mxu1 %v11197_v0 }
  0x7e   :  { %1497 = vmatpush1.bf16.msra.mxu0 %v7884_v36  ;;  %1540 = vmatpush1.bf16.msra.mxu1 %v7896_v38 }
  0x7f   :  { %1498 = vmatprep.subr.bf16.mxu0 %v7890_v37  ;;  %1541 = vmatprep.subr.bf16.mxu1 %v7901_v39 }
  0x80   :  { %1528 = vmatprep.mubr.bf16.mxu0 %v11197_v0  ;;  %1571 = vmatprep.mubr.bf16.mxu1 %v11197_v0 }
  0x82   :  { %1499 = vmatpush1.bf16.msra.mxu0 %v7908_v40  ;;  %1542 = vmatpush1.bf16.msra.mxu1 %v7921_v42 }
  0x83   :  { %1500 = vmatprep.subr.bf16.mxu0 %v7915_v41  ;;  %1543 = vmatprep.subr.bf16.mxu1 %v7937_v45 }
  0x86   :  { %1501 = vmatpush1.bf16.msra.mxu0 %v7931_v44  ;;  %1544 = vmatpush1.bf16.msra.mxu1 %v7948_v47 }
  0x87   :  { %1502 = vmatprep.subr.bf16.mxu0 %v7942_v46  ;;  %1545 = vmatprep.subr.bf16.mxu1 %v7953_v48 }
  0x8a   :  { %1503 = vmatpush1.bf16.msra.mxu0 %v7961_v49  ;;  %1546 = vmatpush1.bf16.msra.mxu1 %v7974_v51 }
  0x8b   :  { %1504 = vmatprep.subr.bf16.mxu0 %v7966_v50  ;;  %1547 = vmatprep.subr.bf16.mxu1 %v7989_v54 }
  0x8e   :  { %1505 = vmatpush1.bf16.msra.mxu0 %v7983_v53  ;;  %1548 = vmatpush1.bf16.msra.mxu1 %v8001_v56 }
  0x8f   :  { %1506 = vmatprep.subr.bf16.mxu0 %v7995_v55  ;;  %1549 = vmatprep.subr.bf16.mxu1 %v8006_v57  ;;  %v8222_v57 = vand.u32 127, %v64_v10 }
  0x91   :  { %vm66_vm0 = vcmp.lt.s32.totalorder %v8222_v57, 32 }
  0x92   :  { %1507 = vmatpush1.bf16.msra.mxu0 %v8011_v58  ;;  %1550 = vmatpush1.bf16.msra.mxu1 %v8023_v60  ;;  %vm9352_vm15 = vmpackc.low %vm66_vm0, %vm66_vm0 }
  0x93   :  { %1508 = vmatprep.subr.bf16.mxu0 %v8018_v59  ;;  %1551 = vmatprep.subr.bf16.mxu1 %v8041_v63 }
  0x96   :  { %1509 = vmatpush1.bf16.msra.mxu0 %v8035_v62  ;;  %1552 = vmatpush1.bf16.msra.mxu1 %v8051_v2  ;;  %v68_v2 = vadd.s32 256, %v8222_v57 }
  0x97   :  { %1510 = vmatprep.subr.bf16.mxu0 %v8046_v1  ;;  %1553 = vmatprep.subr.bf16.mxu1 %v8057_v3  ;;  %v67_v1 = vadd.s32 128, %v8222_v57 }
  0x9a   :  { %1511 = vmatpush1.bf16.msra.mxu0 %v8064_v4  ;;  %1554 = vmatpush1.bf16.msra.mxu1 %v8071_v5  ;;  %v69_v4 = vadd.s32 384, %v8222_v57 }
  0x9b   :  { %1895 = vmatprep.subr.bf16.mxu1 %v7876_v34 }
  0xfd   :  { %v8139_v12 = vpop.f32.mrf.mxu0  ;;  %v8141_v13 = vpop.f32.mrf.mxu1 }
  0xff   :  { %v8143_v14 = vpop.f32.mrf.mxu0  ;;  %v8145_v15 = vpop.f32.mrf.mxu1 }
 0x101   :  { %v8152_v19 = vpop.f32.mrf.mxu0  ;;  %v8154_v20 = vpop.f32.mrf.mxu1 }
 0x103   :  { %v8158_v23 = vpop.f32.mrf.mxu0  ;;  %v8160_v24 = vpop.f32.mrf.mxu1 }
 0x105   :  { %v494_v27 = vpop.f32.mrf.mxu0  ;;  %v607_v28 = vpop.f32.mrf.mxu1 }
 0x106   :  { %v8179_v31 = vadd.f32 %v494_v27, %v8164_v25  ;;  %v8182_v32 = vadd.f32 %v607_v28, %v8168_v26 }
 0x107   :  { %v496_v33 = vpop.f32.mrf.mxu0  ;;  %v609_v34 = vpop.f32.mrf.mxu1 }
 0x108   :  { %11424 = vst [vmem:[#allocation11_spill] sm:$0xff] %v8182_v32  ;;  %v8185_v35 = vadd.f32 %v496_v33, %v8172_v29  ;;  %v8188_v36 = vadd.f32 %v609_v34, %v8176_v30  ;;  %v81_v33 = vand.u32 127, %v67_v1  ;;  %v88_v34 = vand.u32 127, %v68_v2 }
 0x109   :  { %v498_v37 = vpop.f32.mrf.mxu0  ;;  %v611_v38 = vpop.f32.mrf.mxu1 }
 0x10a   :  { %11425 = vst [vmem:[#allocation12_spill] sm:$0xff] %v8185_v35  ;;  %11426 = vst [vmem:[#allocation13_spill] sm:$0xff] %v8188_v36  ;;  %v8191_v39 = vadd.f32 %v498_v37, %v8164_v25  ;;  %v8194_v40 = vadd.f32 %v611_v38, %v8168_v26  ;;  %v95_v37 = vand.u32 127, %v69_v4  ;;  %vm8246_vm1 = vcmp.lt.s32.totalorder %v81_v33, 32 }
 0x10b   :  { %v8196_v41 = vpop.f32.mrf.mxu0  ;;  %v8198_v42 = vpop.f32.mrf.mxu1  ;;  %vm8250_vm2 = vcmp.lt.s32.totalorder %v88_v34, 32 }
 0x10c   :  { %11427 = vst [vmem:[#allocation14_spill] sm:$0xff] %v8194_v40  ;;  %vm8254_vm3 = vcmp.lt.s32.totalorder %v95_v37, 32 }
 0x10d   :  { %v504_v43 = vpop.f32.mrf.mxu0  ;;  %v617_v44 = vpop.f32.mrf.mxu1 }
 0x10e   :  { %v8201_v45 = vadd.f32 %v504_v43, %v8164_v25  ;;  %v8204_v46 = vadd.f32 %v617_v44, %v8168_v26 }
 0x10f   :  { %v506_v47 = vpop.f32.mrf.mxu0  ;;  %v619_v48 = vpop.f32.mrf.mxu1 }
 0x110   :  { %11428 = vst [vmem:[#allocation15_spill] sm:$0xff] %v8204_v46  ;;  %v8207_v49 = vadd.f32 %v506_v47, %v8172_v29  ;;  %v8210_v50 = vadd.f32 %v619_v48, %v8176_v30 }
 0x111   :  { %v508_v51 = vpop.f32.mrf.mxu0  ;;  %v621_v52 = vpop.f32.mrf.mxu1 }
 0x112   :  { %11429 = vst [vmem:[#allocation16_spill] sm:$0xff] %v8207_v49  ;;  %11430 = vst [vmem:[#allocation17_spill] sm:$0xff] %v8210_v50  ;;  %v8213_v53 = vadd.f32 %v508_v51, %v8164_v25  ;;  %v8216_v54 = vadd.f32 %v621_v52, %v8168_v26 }
 0x113   :  { %v8218_v55 = vpop.f32.mrf.mxu0  ;;  %v8220_v56 = vpop.f32.mrf.mxu1 }
 0x114   :  { %11431 = vst [vmem:[#allocation18_spill] sm:$0xff] %v8216_v54 }
 0x115   :  { %v514_v58 = vpop.f32.mrf.mxu0  ;;  %v627_v59 = vpop.f32.mrf.mxu1 }
 0x116   :  { %v515_v60 = vadd.f32 %v514_v58, %v8164_v25  ;;  %v8226_v61 = vadd.f32 %v627_v59, %v8168_v26 }
 0x117   :  { %v516_v62 = vpop.f32.mrf.mxu0  ;;  %v629_v63 = vpop.f32.mrf.mxu1 }
 0x118   :  { %11432 = vst [vmem:[#allocation19_spill] sm:$0xff] %v8226_v61  ;;  %v8232_v6 = vadd.f32 %v516_v62, %v8172_v29  ;;  %v8235_v7 = vadd.f32 %v629_v63, %v8176_v30  ;;  %v8554_v61 = vadd.f32 %v8145_v15, %v8176_v30  ;;  %v489_v15 = vadd.f32 %v8152_v19, %v8164_v25 }
 0x119   :  { %v518_v8 = vpop.f32.mrf.mxu0  ;;  %v631_v9 = vpop.f32.mrf.mxu1 }
 0x11a   :  { %11433 = vst [vmem:[#allocation20_spill] sm:$0xff] %v8232_v6  ;;  %11434 = vst [vmem:[#allocation21_spill] sm:$0xff] %v8235_v7  ;;  %v519_v10 = vadd.f32 %v518_v8, %v8164_v25  ;;  %v8239_v18 = vadd.f32 %v631_v9, %v8168_v26 }
 0x11b   :  { %v520_v27 = vpop.f32.mrf.mxu0  ;;  %v633_v28 = vpop.f32.mrf.mxu1  ;;  %11479 = vst [vmem:[#allocation60_spill] sm:$0xff] %v8554_v61 }
 0x11c   :  { %11435 = vst [vmem:[#allocation22_spill] sm:$0xff] %v8239_v18  ;;  %v8273_v4 = vadd.f32 %v633_v28, %v8176_v30  ;;  %v8318_v17 = vadd.f32 %v520_v27, %v8172_v29 }
 0x11d   :  { %v524_v38 = vpop.f32.mrf.mxu0  ;;  %v637_v43 = vpop.f32.mrf.mxu1 }
 0x11e   :  { %v525_v44 = vadd.f32 %v524_v38, %v8164_v25  ;;  %v8244_v47 = vadd.f32 %v637_v43, %v8168_v26  ;;  %11446 = vst [vmem:[#allocation27_spill] sm:$0xff] %v8273_v4  ;;  %11452 = vst [vmem:[#allocation33_spill] sm:$0xff] %v8318_v17 }
 0x11f   :  { %v526_v48 = vpop.f32.mrf.mxu0  ;;  %v639_v51 = vpop.f32.mrf.mxu1 }
 0x120   :  { %11436 = vst [vmem:[#allocation23_spill] sm:$0xff] %v8244_v47  ;;  %v8259_v62 = vadd.f32 %v526_v48, %v8172_v29  ;;  %v8262_v63 = vadd.f32 %v639_v51, %v8176_v30  ;;  %v8266_v1 = vsel %vm66_vm0, %v515_v60, %v525_v44  ;;  %v8277_v33 = vsel %vm66_vm0, %v525_v44, %v515_v60 }
 0x121   :  { %11445 = vst [vmem:[#allocation26_spill] sm:$0xff] %v8266_v1  ;;  %v528_v8 = vpop.f32.mrf.mxu0  ;;  %v641_v9 = vpop.f32.mrf.mxu1  ;;  %11447 = vst [vmem:[#allocation28_spill] sm:$0xff] %v8277_v33 }
 0x122   :  { %11443 = vst [vmem:[#allocation24_spill] sm:$0xff] %v8259_v62  ;;  %11444 = vst [vmem:[#allocation25_spill] sm:$0xff] %v8262_v63  ;;  %v529_v37 = vadd.f32 %v528_v8, %v8164_v25  ;;  %v8285_v38 = vadd.f32 %v641_v9, %v8168_v26 }
 0x123   :  { %v530_v43 = vpop.f32.mrf.mxu0  ;;  %v643_v44 = vpop.f32.mrf.mxu1 }
 0x124   :  { %11448 = vst [vmem:[#allocation29_spill] sm:$0xff] %v8285_v38  ;;  %v8304_v8 = vadd.f32 %v530_v43, %v8172_v29  ;;  %v8307_v9 = vadd.f32 %v643_v44, %v8176_v30  ;;  %v8311_v22 = vsel %vm66_vm0, %v519_v10, %v529_v37  ;;  %v8322_v43 = vsel %vm66_vm0, %v529_v37, %v519_v10 }
 0x125   :  { %11451 = vst [vmem:[#allocation32_spill] sm:$0xff] %v8311_v22  ;;  %v534_v16 = vpop.f32.mrf.mxu0  ;;  %v647_v34 = vpop.f32.mrf.mxu1  ;;  %11453 = vst [vmem:[#allocation34_spill] sm:$0xff] %v8322_v43 }
 0x126   :  { %11449 = vst [vmem:[#allocation30_spill] sm:$0xff] %v8304_v8  ;;  %11450 = vst [vmem:[#allocation31_spill] sm:$0xff] %v8307_v9  ;;  %v535_v51 = vadd.f32 %v534_v16, %v8164_v25  ;;  %v8330_v48 = vadd.f32 %v647_v34, %v8168_v26 }
 0x127   :  { %v536_v21 = vpop.f32.mrf.mxu0  ;;  %v649_v2 = vpop.f32.mrf.mxu1 }
 0x128   :  { %11454 = vst [vmem:[#allocation35_spill] sm:$0xff] %v8330_v48  ;;  %v8345_v34 = vadd.f32 %v536_v21, %v8172_v29  ;;  %v8348_v37 = vadd.f32 %v649_v2, %v8176_v30  ;;  %v8353_v44 = vsel %vm66_vm0, %v8201_v45, %v535_v51  ;;  %v8362_v21 = vsel %vm66_vm0, %v535_v51, %v8201_v45 }
 0x129   :  { %v538_v27 = vpop.f32.mrf.mxu0  ;;  %v651_v60 = vpop.f32.mrf.mxu1  ;;  %11457 = vst [vmem:[#allocation38_spill] sm:$0xff] %v8362_v21  ;;  %v8382_v51 = vadd.f32 %v8218_v55, %v8172_v29 }
 0x12a   :  { %11455 = vst [vmem:[#allocation36_spill] sm:$0xff] %v8345_v34  ;;  %11456 = vst [vmem:[#allocation37_spill] sm:$0xff] %v8348_v37  ;;  %v539_v16 = vadd.f32 %v538_v27, %v8164_v25  ;;  %v8370_v28 = vadd.f32 %v651_v60, %v8168_v26  ;;  %v8386_v27 = vadd.f32 %v8220_v56, %v8176_v30 }
 0x12b   :  { %11459 = vst [vmem:[#allocation40_spill] sm:$0xff] %v8382_v51  ;;  %v540_v60 = vpop.f32.mrf.mxu0  ;;  %v653_v2 = vpop.f32.mrf.mxu1 }
 0x12c   :  { %11458 = vst [vmem:[#allocation39_spill] sm:$0xff] %v8370_v28  ;;  %11460 = vst [vmem:[#allocation41_spill] sm:$0xff] %v8386_v27  ;;  %v8397_v0 = vadd.f32 %v540_v60, %v8172_v29  ;;  %v8400_v55 = vadd.f32 %v653_v2, %v8176_v30  ;;  %v8405_v56 = vsel %vm66_vm0, %v8213_v53, %v539_v16 }
 0x12d   :  { %v544_v11 = vpop.f32.mrf.mxu0  ;;  %v657_v21 = vpop.f32.mrf.mxu1  ;;  %v8414_v60 = vsel %vm66_vm0, %v539_v16, %v8213_v53 }
 0x12e   :  { %11461 = vst [vmem:[#allocation42_spill] sm:$0xff] %v8397_v0  ;;  %11462 = vst [vmem:[#allocation43_spill] sm:$0xff] %v8400_v55  ;;  %v545_v45 = vadd.f32 %v544_v11, %v8164_v25  ;;  %v8422_v43 = vadd.f32 %v657_v21, %v8168_v26  ;;  %v8572_v11 = vadd.f32 %v8154_v20, %v8168_v26 }
 0x12f   :  { %11463 = vst [vmem:[#allocation44_spill] sm:$0xff] %v8414_v60  ;;  %v546_v16 = vpop.f32.mrf.mxu0  ;;  %v659_v60 = vpop.f32.mrf.mxu1 }
 0x130   :  { %11464 = vst [vmem:[#allocation45_spill] sm:$0xff] %v8422_v43  ;;  %v8441_v2 = vadd.f32 %v546_v16, %v8172_v29  ;;  %v8444_v10 = vadd.f32 %v659_v60, %v8176_v30  ;;  %v8449_v53 = vsel %vm66_vm0, %v8179_v31, %v545_v45  ;;  %v8458_v16 = vsel %vm66_vm0, %v545_v45, %v8179_v31 }
 0x131   :  { %v548_v33 = vpop.f32.mrf.mxu0  ;;  %v661_v38 = vpop.f32.mrf.mxu1  ;;  %11467 = vst [vmem:[#allocation48_spill] sm:$0xff] %v8458_v16  ;;  %v8478_v45 = vadd.f32 %v8196_v41, %v8172_v29  ;;  %11482 = vst [vmem:[#allocation63_spill] sm:$0xff] %v8572_v11 }
 0x132   :  { %11465 = vst [vmem:[#allocation46_spill] sm:$0xff] %v8441_v2  ;;  %11466 = vst [vmem:[#allocation47_spill] sm:$0xff] %v8444_v10  ;;  %v549_v21 = vadd.f32 %v548_v33, %v8164_v25  ;;  %v8466_v18 = vadd.f32 %v661_v38, %v8168_v26  ;;  %v8482_v33 = vadd.f32 %v8198_v42, %v8176_v30 }
 0x133   :  { %11469 = vst [vmem:[#allocation50_spill] sm:$0xff] %v8478_v45  ;;  %v550_v38 = vpop.f32.mrf.mxu0  ;;  %v663_v60 = vpop.f32.mrf.mxu1 }
 0x134   :  { %11468 = vst [vmem:[#allocation49_spill] sm:$0xff] %v8466_v18  ;;  %11470 = vst [vmem:[#allocation51_spill] sm:$0xff] %v8482_v33  ;;  %v8493_v16 = vadd.f32 %v550_v38, %v8172_v29  ;;  %v8496_v41 = vadd.f32 %v663_v60, %v8176_v30  ;;  %v8501_v42 = vsel %vm66_vm0, %v8191_v39, %v549_v21 }
 0x135   :  { %v554_v9 = vpop.f32.mrf.mxu0  ;;  %v667_v4 = vpop.f32.mrf.mxu1  ;;  %v8510_v38 = vsel %vm66_vm0, %v549_v21, %v8191_v39  ;;  %v485_v21 = vadd.f32 %v8139_v12, %v8164_v25  ;;  %v8532_v60 = vadd.f32 %v8141_v13, %v8168_v26  ;;  %v8550_v13 = vadd.f32 %v8143_v14, %v8172_v29 }
 0x136   :  { %11471 = vst [vmem:[#allocation52_spill] sm:$0xff] %v8493_v16  ;;  %11472 = vst [vmem:[#allocation53_spill] sm:$0xff] %v8496_v41  ;;  %v555_v31 = vadd.f32 %v554_v9, %v8164_v25  ;;  %v8518_v47 = vadd.f32 %v667_v4, %v8168_v26 }
 0x137   :  { %11473 = vst [vmem:[#allocation54_spill] sm:$0xff] %v8510_v38  ;;  %11475 = vst [vmem:[#allocation56_spill] sm:$0xff] %v8532_v60  ;;  %v556_v9 = vpop.f32.mrf.mxu0  ;;  %v669_v4 = vpop.f32.mrf.mxu1 }
 0x138   :  { %11474 = vst [vmem:[#allocation55_spill] sm:$0xff] %v8518_v47  ;;  %v8543_v39 = vadd.f32 %v556_v9, %v8172_v29  ;;  %v8546_v12 = vadd.f32 %v669_v4, %v8176_v30  ;;  %11478 = vst [vmem:[#allocation59_spill] sm:$0xff] %v8550_v13  ;;  %v8558_v7 = vsel %vm66_vm0, %v555_v31, %v485_v21 }
 0x139   :  { %v558_v38 = vpop.f32.mrf.mxu0  ;;  %v671_v63 = vpop.f32.mrf.mxu1  ;;  %11480 = vst [vmem:[#allocation61_spill] sm:$0xff] %v8558_v7 }
 0x13a   :  { %11476 = vst [vmem:[#allocation57_spill] sm:$0xff] %v8543_v39  ;;  %11477 = vst [vmem:[#allocation58_spill] sm:$0xff] %v8546_v12  ;;  %v559_v4 = vadd.f32 %v558_v38, %v8164_v25  ;;  %v8566_v14 = vadd.f32 %v671_v63, %v8168_v26  ;;  %v8584_v38 = vadd.f32 %v8158_v23, %v8172_v29 }
 0x13b   :  { %v560_v17 = vpop.f32.mrf.mxu0  ;;  %v673_v8 = vpop.f32.mrf.mxu1  ;;  %v8594_v25 = vadd.f32 %v8160_v24, %v8176_v30  ;;  %v764_v26 = vsel %vm66_vm0, %v485_v21, %v555_v31  ;;  %v765_v24 = vsel %vm8246_vm1, %v8550_v13, %v8543_v39 }
 0x13c   :  { %11481 = vst [vmem:[#allocation62_spill] sm:$0xff] %v8566_v14  ;;  %11483 = vst [vmem:[#allocation64_spill] sm:$0xff] %v8584_v38  ;;  %v8587_v19 = vadd.f32 %v560_v17, %v8172_v29  ;;  %v8590_v20 = vadd.f32 %v673_v8, %v8176_v30  ;;  %v8600_v63 = vsel %vm66_vm0, %v559_v4, %v489_v15 }
 0x13d   :  { %11486 = vst [vmem:[#allocation67_spill] sm:$0xff] %v8594_v25  ;;  %v1174_v9 = vpop.f32.mrf.mxu0  ;;  %11487 = vst [vmem:[#allocation68_spill] sm:$0xff] %v8600_v63  ;;  %v1217_v29 = vpop.f32.mrf.mxu1 }
 0x13e   :  { %11484 = vst [vmem:[#allocation65_spill] sm:$0xff] %v8587_v19  ;;  %11485 = vst [vmem:[#allocation66_spill] sm:$0xff] %v8590_v20  ;;  %v1226_v23 = vadd.f32 %v1174_v9, %v764_v26  ;;  %v768_v9 = vsel %vm66_vm0, %v489_v15, %v559_v4  ;;  %v769_v8 = vsel %vm8246_vm1, %v8584_v38, %v8587_v19 }
 0x13f   :  { %v1176_v30 = vpop.f32.mrf.mxu0  ;;  %v1219_v63 = vpop.f32.mrf.mxu1  ;;  %v767_v4 = vsel %vm8254_vm3, %v8554_v61, %v8546_v12 }
 0x140   :  { %v6235_v21 = vmul.f32 -1.442695, %v1226_v23  ;;  %v1227_v17 = vadd.f32 %v1176_v30, %v765_v24  ;;  %v1229_v15 = vadd.f32 %v1219_v63, %v767_v4  ;;  %v766_v30 = vsel %vm8250_vm2, %v8532_v60, %v8518_v47 }
 0x141   :  { %v1178_v26 = vpop.f32.mrf.mxu0  ;;  %v1221_v23 = vpop.f32.mrf.mxu1 }
 0x142   :  { %7082 = vpow2.f32 %v6235_v21  ;;  %v6237_v7 = vmul.f32 -1.442695, %v1227_v17  ;;  %v1230_v13 = vadd.f32 %v1178_v26, %v768_v9  ;;  %v1228_v21 = vadd.f32 %v1217_v29, %v766_v30 }
 0x143   :  { %v1180_v39 = vpop.f32.mrf.mxu0  ;;  %v1223_v17 = vpop.f32.mrf.mxu1  ;;  %v770_v29 = vsel %vm8250_vm2, %v8572_v11, %v8566_v14 }
 0x144   :  { %7084 = vpow2.f32 %v6237_v7  ;;  %v6236_v22 = vmul.f32 -1.442695, %v1230_v13  ;;  %v1231_v62 = vadd.f32 %v1180_v39, %v769_v8  ;;  %v6239_v7 = vmul.f32 -1.442695, %v1229_v15 }
 0x146   :  { %7086 = vpow2.f32 %v6236_v22  ;;  %v6238_v24 = vmul.f32 -1.442695, %v1231_v62  ;;  %v771_v22 = vsel %vm8254_vm3, %v8594_v25, %v8590_v20 }
 0x147   :  { %v1233_v62 = vadd.f32 %v1223_v17, %v771_v22 }
 0x148   :  { %7088 = vpow2.f32 %v6238_v24  ;;  %v1232_v24 = vadd.f32 %v1221_v23, %v770_v29 }
 0x149   :  { %7090 = vtanh.f32 %v1228_v21  ;;  %v6240_v63 = vmul.f32 -1.442695, %v1233_v62 }
 0x14a   :  { %7092 = vpow2.f32 %v6239_v7 }
 0x14f   :  { %v7083_v39 = vpop.eup %7082 }
 0x150   :  { %v1240_v13 = vadd.f32 1.0, %v7083_v39 }
 0x151   :  { %v7085_v8 = vpop.eup %7084 }
 0x152   :  { %7094 = vrcp.f32 %v1240_v13  ;;  %v1252_v9 = vadd.f32 1.0, %v7085_v8 }
 0x153   :  { %v7087_v26 = vpop.eup %7086 }
 0x154   :  { %7096 = vrcp.f32 %v1252_v9  ;;  %v1241_v4 = vadd.f32 1.0, %v7087_v26 }
 0x155   :  { %v7089_v30 = vpop.eup %7088  ;;  %7098 = vpow2.f32 %v6240_v63 }
 0x156   :  { %7100 = vrcp.f32 %v1241_v4  ;;  %v1253_v15 = vadd.f32 1.0, %v7089_v30  ;;  %v7091_v17 = vpop.eup %7090 }
 0x157   :  { %7102 = vtanh.f32 %v1232_v24  ;;  %v7093_v21 = vpop.eup %7092 }
 0x158   :  { %7104 = vrcp.f32 %v1253_v15  ;;  %v1266_v39 = vadd.f32 1.0, %v7093_v21  ;;  %v8649_v15 = vld [vmem:[%s11183_s1] sm:$0xff]  ;;  %v7700_v21 = vmov 7  }
 0x159   :  { %11488 = vst [vmem:[#allocation69_spill] sm:$0xff] %v8649_v15 }
 0x15a   :  { %7106 = vrcp.f32 %v1266_v39 }
 0x15f   :  { %v7095_v22 = vpop.eup %7094 }
 0x160   :  { %v1274_v7 = vmul.f32 %v7095_v22, %v7091_v17  ;;  %v8654_v17 = vld [vmem:[%s11183_s1 + $0x8] sm:$0xff] }
 0x161   :  { %v7097_v62 = vpop.eup %7096  ;;  %11489 = vst [vmem:[#allocation70_spill] sm:$0xff] %v8654_v17 }
 0x162   :  { %v7099_v13 = vpop.eup %7098  ;;  %v1272_v8 = vmul.f32 0.0, %v7097_v62  ;;  %v11494_v62 = vmov 0 }
 0x163   :  { %v7101_v31 = vpop.eup %7100  ;;  %v1267_v9 = vadd.f32 1.0, %v7099_v13  ;;  %v11497_v13 = vmov 0 }
 0x164   :  { %v7103_v11 = vpop.eup %7102  ;;  %v8640_v14 = vadd.f32 %v1274_v7, %v1272_v8  ;;  %v11491_v7 = vmov 0 }
 0x165   :  { %v7105_v23 = vpop.eup %7104  ;;  %v1275_v29 = vmul.f32 %v7103_v11, %v7101_v31  ;;  %v8658_v11 = vsel %vm66_vm0, 0, %v7700_v21  ;;  %v7597_v21 = vld [vmem:[%s11185_s3 + $0xac] ss:$16 sps:$4 sm:$0xff]  }
 0x166   :  { %7108 = vtanh.f32 %v8640_v14  ;;  %v1273_v63 = vmul.f32 0.0, %v7105_v23  ;;  %11490 = vst [vmem:[#allocation71_spill] sm:$0xff] %v8658_v11  ;;  %vm8662_vm4 = vcmp.lt.s32.totalorder %v8658_v11, %v8649_v15  ;;  %vm8668_vm5 = vcmp.lt.s32.totalorder %v8658_v11, %v8654_v17  ;;  %v7610_v11 = vld [vmem:[%s11185_s3 + $0x40] ss:$16 sps:$4 sm:$0xff]  }
 0x167   :  { %7110 = vrcp.f32 %v1267_v9  ;;  %v7107_v24 = vpop.eup %7106  ;;  %v11492_v7 = vsel %vm8662_vm4, 4294967295, %v11491_v7  ;;  %v11495_v62 = vsel %vm8668_vm5, 4294967295, %v11494_v62  ;;  %vm8676_vm6 = vmpackc.low %vm8668_vm5, %vm8662_vm4 }
 0x168   :  { %v8643_v26 = vadd.f32 %v1275_v29, %v1273_v63  ;;  %11493 = vst [vmem:[#allocation72_spill] sm:$0xff] %v11492_v7  ;;  %11496 = vst [vmem:[#allocation73_spill] sm:$0xff] %v11495_v62  ;;  %v11498_v13 = vsel %vm8676_vm6, 4294967295, %v11497_v13  ;;  %v7594_v29 = vld [vmem:[%s11185_s3 + $0xe8] ss:$16 sps:$4 sm:$0xff]  }
 0x169   :  { %11499 = vst [vmem:[#allocation74_spill] sm:$0xff] %v11498_v13  ;;  %v7611_v13 = vld [vmem:[%s11185_s3 + $0x24] ss:$16 sps:$4 sm:$0xff]   ;;  %v8997_v62 = vld [vmem:[%s11185_s3 + $0x48] ss:$16 sps:$4 sm:$0xff]  }
 0x16a   :  { %7112 = vtanh.f32 %v8643_v26  ;;  %v9003_v7 = vld [vmem:[%s11185_s3 + $0x2c] ss:$16 sps:$4 sm:$0xff]  }
 0x173   :  { %v7109_v4 = vpop.eup %7108 }
 0x174   :  { %v1280_v30 = vmul.f32 %v7109_v4, %v7107_v24  ;;  %v7111_v31 = vpop.eup %7110  ;;  %v11500_v24 = vmov 0   ;;  %v7595_v4 = vld [vmem:[%s11185_s3 + $0xcc] ss:$16 sps:$4 sm:$0xff]  }
 0x176   :  { %v8682_v23 = vsel %vm8662_vm4, %v1280_v30, 0.0 }
 0x177   :  { %v7113_v22 = vpop.eup %7112 }
 0x178   :  { %v1281_v39 = vmul.f32 %v7113_v22, %v7111_v31  ;;  %v7598_v31 = vld [vmem:[%s11185_s3 + $0xa8] ss:$16 sps:$4 sm:$0xff]   ;;  %v7599_v22 = vld [vmem:[%s11185_s3 + $0x8c] ss:$16 sps:$4 sm:$0xff]  }
 0x17a   :  { %v6276_v8 = vpack.c.bf16 %v1281_v39, %v1280_v30  ;;  %v8686_v9 = vsel %vm8668_vm5, %v1281_v39, 0.0  ;;  %v7596_v30 = vld [vmem:[%s11185_s3 + $0xc8] ss:$16 sps:$4 sm:$0xff]  }
 0x17b   :  { %v6683_v63 = vpack.c.bf16 %v8686_v9, %v8682_v23  ;;  %v7600_v39 = vld [vmem:[%s11185_s3 + $0x88] ss:$16 sps:$4 sm:$0xff]  }
 0x17c   :  { %6277 = vmatmul.mubr.msk.bf16.vlgmr.msra.gmra.mxu0 %vm8676_vm6, %v6276_v8  ;;  %6280 = vmatmul.mubr.msk.bf16.vlgmr.msra.gmra.mxu1 %vm8676_vm6, %v6276_v8  ;;  %v7601_v8 = vld [vmem:[%s11185_s3 + $0x6c] ss:$16 sps:$4 sm:$0xff]  }
 0x17d   :  { %1896 = vmatpush1.bf16.msra.mxu1 %v7594_v29  ;;  %1884 = vmatprep.mubr.bf16.mxu0 %v11500_v24  ;;  %6684 = vst [vmem:[#allocation3] sm:$0xff] %v6683_v63   ;;  %v7602_v63 = vld [vmem:[%s11185_s3 + $0x68] ss:$16 sps:$4 sm:$0xff]   ;;  %v7603_v29 = vld [vmem:[%s11185_s3 + $0x4c] ss:$16 sps:$4 sm:$0xff]  }
 0x17e   :  { %1897 = vmatprep.subr.bf16.mxu1 %v7595_v4  ;;  %1927 = vmatprep.mubr.bf16.mxu1 %v11500_v24  ;;  %v7604_v4 = vld [vmem:[%s11185_s3 + $0x48] ss:$16 sps:$4 sm:$0xff]  }
 0x181   :  { %1898 = vmatpush1.bf16.msra.mxu1 %v7596_v30  ;;  %v7605_v30 = vld [vmem:[%s11185_s3 + $0x2c] ss:$16 sps:$4 sm:$0xff]  }
 0x182   :  { %1899 = vmatprep.subr.bf16.mxu1 %v7597_v21  ;;  %v7606_v21 = vld [vmem:[%s11185_s3 + $0x28] ss:$16 sps:$4 sm:$0xff]  }
 0x185   :  { %1900 = vmatpush1.bf16.msra.mxu1 %v7598_v31  ;;  %v8740_v31 = vld [vmem:[%s11185_s3 + $0xe4] ss:$16 sps:$4 sm:$0xff]  }
 0x186   :  { %1901 = vmatprep.subr.bf16.mxu1 %v7599_v22  ;;  %v8745_v22 = vld [vmem:[%s11185_s3 + $0xe0] ss:$16 sps:$4 sm:$0xff]   ;;  %1852 = vmatprep.subr.bf16.mxu0 %v8740_v31 }
 0x187   :  { %1853 = vmatpush1.bf16.msra.mxu0 %v8745_v22 }
 0x189   :  { %1902 = vmatpush1.bf16.msra.mxu1 %v7600_v39  ;;  %v8764_v39 = vld [vmem:[%s11185_s3 + $0xa0] ss:$16 sps:$4 sm:$0xff]  }
 0x18a   :  { %1903 = vmatprep.subr.bf16.mxu1 %v7601_v8  ;;  %v8769_v8 = vld [vmem:[%s11185_s3 + $0xa4] ss:$16 sps:$4 sm:$0xff]  }
 0x18d   :  { %1904 = vmatpush1.bf16.msra.mxu1 %v7602_v63  ;;  %v8774_v63 = vld [vmem:[%s11185_s3 + $0x84] ss:$16 sps:$4 sm:$0xff]  }
 0x18e   :  { %1905 = vmatprep.subr.bf16.mxu1 %v7603_v29  ;;  %v8781_v29 = vld [vmem:[%s11185_s3 + $0x80] ss:$16 sps:$4 sm:$0xff]  }
 0x191   :  { %1906 = vmatpush1.bf16.msra.mxu1 %v7604_v4  ;;  %v7607_v4 = vld [vmem:[%s11185_s3 + $0x64] ss:$16 sps:$4 sm:$0xff]  }
 0x192   :  { %1907 = vmatprep.subr.bf16.mxu1 %v7605_v30  ;;  %v7608_v30 = vld [vmem:[%s11185_s3 + $0x60] ss:$16 sps:$4 sm:$0xff]  }
 0x195   :  { %1908 = vmatpush1.bf16.msra.mxu1 %v7606_v21  ;;  %v7609_v21 = vld [vmem:[%s11185_s3 + $0x44] ss:$16 sps:$4 sm:$0xff]  }
 0x196   :  { %1909 = vmatprep.subr.bf16.mxu1 %v8057_v3  ;;  %v8752_v3 = vld [vmem:[%s11185_s3 + $0xc4] ss:$16 sps:$4 sm:$0xff]  }
 0x197   :  { %1854 = vmatprep.subr.bf16.mxu0 %v8752_v3 }
 0x199   :  { %1910 = vmatpush1.bf16.msra.mxu1 %v8071_v5  ;;  %v8757_v5 = vld [vmem:[%s11185_s3 + $0xc0] ss:$16 sps:$4 sm:$0xff]  }
 0x19a   :  { %1855 = vmatpush1.bf16.msra.mxu0 %v8757_v5 }
 0x19b   :  { %1856 = vmatprep.subr.bf16.mxu0 %v8769_v8 }
 0x19e   :  { %1857 = vmatpush1.bf16.msra.mxu0 %v8764_v39 }
 0x19f   :  { %1858 = vmatprep.subr.bf16.mxu0 %v8774_v63 }
 0x1a2   :  { %1859 = vmatpush1.bf16.msra.mxu0 %v8781_v29 }
 0x1a3   :  { %1860 = vmatprep.subr.bf16.mxu0 %v7607_v4  ;;  %v7612_v4 = vld [vmem:[%s11185_s3 + $0x20] ss:$16 sps:$4 sm:$0xff]  }
 0x1a6   :  { %1861 = vmatpush1.bf16.msra.mxu0 %v7608_v30  ;;  %v7613_v30 = vld [vmem:[%s11185_s3 + $0x4] ss:$16 sps:$4 sm:$0xff]  }
 0x1a7   :  { %1862 = vmatprep.subr.bf16.mxu0 %v7609_v21  ;;  %v7614_v21 = vld [vmem:[%s11185_s3] ss:$16 sps:$4 sm:$0xff]  }
 0x1aa   :  { %1863 = vmatpush1.bf16.msra.mxu0 %v7610_v11 }
 0x1ab   :  { %1864 = vmatprep.subr.bf16.mxu0 %v7611_v13 }
 0x1ae   :  { %1865 = vmatpush1.bf16.msra.mxu0 %v7612_v4  ;;  %v11501_v4 = vsel %vm8246_vm1, %v8185_v35, %v8441_v2 }
 0x1af   :  { %1866 = vmatprep.subr.bf16.mxu0 %v7613_v30 }
 0x1b2   :  { %1867 = vmatpush1.bf16.msra.mxu0 %v7614_v21 }
 0x1b3   :  { %2208 = vmatprep.subr.bf16.mxu0 %v8740_v31 }
 0x23c   :  { %v1530_v11 = vpop.f32.mrf.mxu0  ;;  %v1573_v25 = vpop.f32.mrf.mxu1 }
 0x23d   :  { %v1582_v13 = vadd.f32 %v1530_v11, %v8449_v53  ;;  %v11502_v53 = vsel %vm8246_vm1, %v8478_v45, %v8493_v16 }
 0x23e   :  { %v1532_v20 = vpop.f32.mrf.mxu0  ;;  %v1575_v12 = vpop.f32.mrf.mxu1 }
 0x23f   :  { %v6281_v60 = vmul.f32 -1.442695, %v1582_v13  ;;  %v1583_v47 = vadd.f32 %v1532_v20, %v11501_v4 }
 0x240   :  { %v1534_v30 = vpop.f32.mrf.mxu0  ;;  %v1577_v13 = vpop.f32.mrf.mxu1 }
 0x241   :  { %7114 = vpow2.f32 %v6281_v60  ;;  %v6283_v61 = vmul.f32 -1.442695, %v1583_v47  ;;  %v1586_v21 = vadd.f32 %v1534_v30, %v8501_v42  ;;  %v11503_v47 = vsel %vm8254_vm3, %v8188_v36, %v8444_v10 }
 0x242   :  { %v1536_v38 = vpop.f32.mrf.mxu0  ;;  %v1585_v60 = vadd.f32 %v1575_v12, %v11503_v47  ;;  %v1579_v42 = vpop.f32.mrf.mxu1  ;;  %v11506_v12 = vsel %vm8250_vm2, %v8194_v40, %v8466_v18  ;;  %v9009_v18 = vld [vmem:[%s11185_s3] ss:$16 sps:$4 sm:$0xff]  }
 0x243   :  { %7116 = vpow2.f32 %v6283_v61  ;;  %v6282_v19 = vmul.f32 -1.442695, %v1586_v21  ;;  %v1587_v11 = vadd.f32 %v1536_v38, %v11502_v53  ;;  %v11504_v61 = vsel %vm8250_vm2, %v8182_v32, %v8422_v43  ;;  %11510 = vst [vmem:[#allocation78_spill] sm:$0xff] %v9009_v18  ;;  %v9022_v32 = vld [vmem:[%s11185_s3 + $0xc] ss:$16 sps:$4 sm:$0xff]  }
 0x244   :  { %v1584_v20 = vadd.f32 %v1573_v25, %v11504_v61  ;;  %v6285_v4 = vmul.f32 -1.442695, %v1585_v60  ;;  %v11505_v38 = vsel %vm8254_vm3, %v8482_v33, %v8496_v41  ;;  %v1588_v30 = vadd.f32 %v1577_v13, %v11506_v12  ;;  %v9016_v41 = vld [vmem:[%s11185_s3 + $0x28] ss:$16 sps:$4 sm:$0xff]   ;;  %11512 = vst [vmem:[#allocation80_spill] sm:$0xff] %v9022_v32 }
 0x245   :  { %7118 = vpow2.f32 %v6282_v19  ;;  %v6284_v6 = vmul.f32 -1.442695, %v1587_v11  ;;  %v1282_v12 = vsel %vm8662_vm4, %v8640_v14, 0.0  ;;  %11511 = vst [vmem:[#allocation79_spill] sm:$0xff] %v9016_v41  ;;  %v9030_v43 = vld [vmem:[%s11185_s3 + $0x8] ss:$16 sps:$4 sm:$0xff]  }
 0x246   :  { %11513 = vst [vmem:[#allocation81_spill] sm:$0xff] %v9030_v43 }
 0x247   :  { %7120 = vpow2.f32 %v6284_v6  ;;  %v1589_v6 = vadd.f32 %v1579_v42, %v11505_v38 }
 0x248   :  { %7122 = vtanh.f32 %v1584_v20  ;;  %v7701_v20 = vmov 6  }
 0x249   :  { %7124 = vpow2.f32 %v6285_v4  ;;  %v6286_v11 = vmul.f32 -1.442695, %v1589_v6  ;;  %v8844_v4 = vsel %vm66_vm0, 1, %v7701_v20 }
 0x24a   :  { %11507 = vst [vmem:[#allocation75_spill] sm:$0xff] %v8844_v4  ;;  %vm131_vm7 = vcmp.lt.s32.totalorder %v8844_v4, %v8649_v15  ;;  %vm132_vm8 = vcmp.lt.s32.totalorder %v8844_v4, %v8654_v17  ;;  %v8991_v4 = vld [vmem:[%s11185_s3 + $0x4] ss:$16 sps:$4 sm:$0xff]  }
 0x24b   :  { %11509 = vst [vmem:[#allocation77_spill] sm:$0xff] %v8991_v4 }
 0x24e   :  { %v7115_v19 = vpop.eup %7114 }
 0x24f   :  { %v1596_v21 = vadd.f32 1.0, %v7115_v19 }
 0x250   :  { %v7117_v53 = vpop.eup %7116 }
 0x251   :  { %7126 = vrcp.f32 %v1596_v21  ;;  %v1608_v25 = vadd.f32 1.0, %v7117_v53 }
 0x252   :  { %v7119_v47 = vpop.eup %7118  ;;  %7128 = vtanh.f32 %v1588_v30 }
 0x253   :  { %7130 = vrcp.f32 %v1608_v25  ;;  %v1597_v60 = vadd.f32 1.0, %v7119_v47 }
 0x254   :  { %v7121_v61 = vpop.eup %7120  ;;  %7132 = vpow2.f32 %v6286_v11 }
 0x255   :  { %7134 = vrcp.f32 %v1597_v60  ;;  %v1609_v42 = vadd.f32 1.0, %v7121_v61  ;;  %v7123_v38 = vpop.eup %7122  ;;  %v1283_v60 = vsel %vm8668_vm5, %v8643_v26, 0.0 }
 0x256   :  { %v7125_v33 = vpop.eup %7124 }
 0x257   :  { %7136 = vrcp.f32 %v1609_v42  ;;  %v1622_v30 = vadd.f32 1.0, %v7125_v33 }
 0x259   :  { %7138 = vrcp.f32 %v1622_v30 }
 0x25e   :  { %v7127_v40 = vpop.eup %7126 }
 0x25f   :  { %v7129_v13 = vpop.eup %7128  ;;  %v1630_v19 = vmul.f32 %v7127_v40, %v7123_v38 }
 0x260   :  { %v7131_v6 = vpop.eup %7130 }
 0x261   :  { %v7133_v21 = vpop.eup %7132  ;;  %v1628_v53 = vmul.f32 %v7131_v6, %v1282_v12 }
 0x262   :  { %v7135_v11 = vpop.eup %7134  ;;  %v1623_v61 = vadd.f32 1.0, %v7133_v21 }
 0x263   :  { %v1631_v25 = vmul.f32 %v7135_v11, %v7129_v13  ;;  %v1632_v47 = vadd.f32 %v1630_v19, %v1628_v53  ;;  %v8904_v11 = vld [vmem:[%s11185_s3 + $0xcc] ss:$16 sps:$4 sm:$0xff]  }
 0x264   :  { %v7137_v40 = vpop.eup %7136 }
 0x265   :  { %v1629_v42 = vmul.f32 %v7137_v40, %v1283_v60  ;;  %7140 = vtanh.f32 %v1632_v47  ;;  %v8857_v33 = vsel %vm131_vm7, %v1632_v47, %v1282_v12  ;;  %v8916_v47 = vld [vmem:[%s11185_s3 + $0xa8] ss:$16 sps:$4 sm:$0xff]   ;;  %v8921_v40 = vld [vmem:[%s11185_s3 + $0xac] ss:$16 sps:$4 sm:$0xff]  }
 0x266   :  { %7142 = vrcp.f32 %v1623_v61  ;;  %v7139_v26 = vpop.eup %7138  ;;  %v8931_v61 = vld [vmem:[%s11185_s3 + $0x60] ss:$16 sps:$4 sm:$0xff]  }
 0x267   :  { %v1633_v14 = vadd.f32 %v1631_v25, %v1629_v42  ;;  %v8909_v25 = vld [vmem:[%s11185_s3 + $0xc8] ss:$16 sps:$4 sm:$0xff]   ;;  %v8936_v42 = vld [vmem:[%s11185_s3 + $0x64] ss:$16 sps:$4 sm:$0xff]  }
 0x269   :  { %7144 = vtanh.f32 %v1633_v14  ;;  %v8864_v38 = vsel %vm132_vm8, %v1633_v14, %v1283_v60  ;;  %v8926_v60 = vld [vmem:[%s11185_s3 + $0x8c] ss:$16 sps:$4 sm:$0xff]   ;;  %v8943_v14 = vld [vmem:[%s11185_s3 + $0x88] ss:$16 sps:$4 sm:$0xff]  }
 0x272   :  { %v7141_v13 = vpop.eup %7140 }
 0x273   :  { %v1636_v19 = vmul.f32 %v7141_v13, %v7139_v26  ;;  %v7143_v20 = vpop.eup %7142  ;;  %v8949_v26 = vld [vmem:[%s11185_s3 + $0x44] ss:$16 sps:$4 sm:$0xff]   ;;  %v8955_v13 = vld [vmem:[%s11185_s3 + $0x6c] ss:$16 sps:$4 sm:$0xff]  }
 0x275   :  { %v8870_v12 = vsel %vm131_vm7, %v1636_v19, %v8682_v23  ;;  %v8892_v23 = vld [vmem:[%s11185_s3 + $0xec] ss:$16 sps:$4 sm:$0xff]   ;;  %v8961_v19 = vld [vmem:[%s11185_s3 + $0x40] ss:$16 sps:$4 sm:$0xff]  }
 0x276   :  { %v7145_v6 = vpop.eup %7144  ;;  %11508 = vst [vmem:[#allocation76_spill] sm:$0xff] %v8892_v23  ;;  %2251 = vmatprep.subr.bf16.mxu1 %v8892_v23 }
 0x277   :  { %v1637_v30 = vmul.f32 %v7145_v6, %v7143_v20  ;;  %v8967_v20 = vld [vmem:[%s11185_s3 + $0x24] ss:$16 sps:$4 sm:$0xff]   ;;  %v8973_v6 = vld [vmem:[%s11185_s3 + $0x68] ss:$16 sps:$4 sm:$0xff]  }
 0x279   :  { %v8876_v21 = vsel %vm132_vm8, %v1637_v30, %v8686_v9  ;;  %v8897_v9 = vld [vmem:[%s11185_s3 + $0xe8] ss:$16 sps:$4 sm:$0xff]   ;;  %v8979_v30 = vld [vmem:[%s11185_s3 + $0x4c] ss:$16 sps:$4 sm:$0xff]  }
 0x27a   :  { %v1642_v53 = vpack.c.bf16 %v8876_v21, %v8870_v12 }
 0x27c   :  { %6720 = vst [vmem:[#allocation3 + $0x8] sm:$0xff] %v1642_v53   ;;  %1885 = vmatmul.mubr.bf16.vlgmr.msra.gmra.mxu0 %v1642_v53  ;;  %1928 = vmatmul.mubr.bf16.vlgmr.msra.gmra.mxu1 %v1642_v53  ;;  %v8985_v53 = vld [vmem:[%s11185_s3 + $0x20] ss:$16 sps:$4 sm:$0xff]  }
 0x27d   :  { %2209 = vmatpush1.bf16.msra.mxu0 %v8745_v22  ;;  %2240 = vmatprep.mubr.bf16.mxu0 %v11500_v24 }
 0x27e   :  { %2210 = vmatprep.subr.bf16.mxu0 %v8752_v3  ;;  %2283 = vmatprep.mubr.bf16.mxu1 %v11500_v24 }
 0x27f   :  { %2252 = vmatpush1.bf16.msra.mxu1 %v8897_v9 }
 0x280   :  { %2253 = vmatprep.subr.bf16.mxu1 %v8904_v11 }
 0x281   :  { %2211 = vmatpush1.bf16.msra.mxu0 %v8757_v5 }
 0x282   :  { %2212 = vmatprep.subr.bf16.mxu0 %v8769_v8 }
 0x283   :  { %2254 = vmatpush1.bf16.msra.mxu1 %v8909_v25 }
 0x284   :  { %2255 = vmatprep.subr.bf16.mxu1 %v8921_v40 }
 0x285   :  { %2213 = vmatpush1.bf16.msra.mxu0 %v8764_v39 }
 0x286   :  { %2214 = vmatprep.subr.bf16.mxu0 %v8774_v63 }
 0x287   :  { %2256 = vmatpush1.bf16.msra.mxu1 %v8916_v47 }
 0x288   :  { %2257 = vmatprep.subr.bf16.mxu1 %v8926_v60 }
 0x289   :  { %2215 = vmatpush1.bf16.msra.mxu0 %v8781_v29 }
 0x28a   :  { %2216 = vmatprep.subr.bf16.mxu0 %v8936_v42 }
 0x28b   :  { %2258 = vmatpush1.bf16.msra.mxu1 %v8943_v14 }
 0x28c   :  { %2259 = vmatprep.subr.bf16.mxu1 %v8955_v13 }
 0x28d   :  { %2217 = vmatpush1.bf16.msra.mxu0 %v8931_v61 }
 0x28e   :  { %2218 = vmatprep.subr.bf16.mxu0 %v8949_v26 }
 0x28f   :  { %2260 = vmatpush1.bf16.msra.mxu1 %v8973_v6 }
 0x290   :  { %2261 = vmatprep.subr.bf16.mxu1 %v8979_v30 }
 0x291   :  { %2219 = vmatpush1.bf16.msra.mxu0 %v8961_v19 }
 0x292   :  { %2220 = vmatprep.subr.bf16.mxu0 %v8967_v20 }
 0x293   :  { %2262 = vmatpush1.bf16.msra.mxu1 %v8997_v62 }
 0x294   :  { %2263 = vmatprep.subr.bf16.mxu1 %v9003_v7 }
 0x295   :  { %2221 = vmatpush1.bf16.msra.mxu0 %v8985_v53 }
 0x296   :  { %2222 = vmatprep.subr.bf16.mxu0 %v8991_v4 }
 0x297   :  { %2264 = vmatpush1.bf16.msra.mxu1 %v9016_v41 }
 0x298   :  { %2265 = vmatprep.subr.bf16.mxu1 %v9022_v32 }
 0x299   :  { %2223 = vmatpush1.bf16.msra.mxu0 %v9009_v18 }
 0x29a   :  { %2564 = vmatprep.subr.bf16.mxu0 %v8740_v31  ;;  %v11514_v31 = vsel %vm8246_vm1, %v8207_v49, %v8345_v34 }
 0x29b   :  { %2266 = vmatpush1.bf16.msra.mxu1 %v9030_v43 }
 0x29c   :  { %2607 = vmatprep.subr.bf16.mxu1 %v8892_v23 }
 0x33c   :  { %v1886_v36 = vpop.f32.mrf.mxu0  ;;  %v1929_v45 = vpop.f32.mrf.mxu1 }
 0x33d   :  { %v1938_v10 = vadd.f32 %v1886_v36, %v8353_v44  ;;  %v11515_v36 = vsel %vm8246_vm1, %v8382_v51, %v8397_v0 }
 0x33e   :  { %v1888_v16 = vpop.f32.mrf.mxu0  ;;  %v1931_v32 = vpop.f32.mrf.mxu1 }
 0x33f   :  { %v6321_v35 = vmul.f32 -1.442695, %v1938_v10  ;;  %v1939_v2 = vadd.f32 %v1888_v16, %v11514_v31  ;;  %v11518_v16 = vsel %vm8254_vm3, %v8386_v27, %v8400_v55 }
 0x340   :  { %v1890_v1 = vpop.f32.mrf.mxu0  ;;  %v1933_v10 = vpop.f32.mrf.mxu1 }
 0x341   :  { %7146 = vpow2.f32 %v6321_v35  ;;  %v6323_v18 = vmul.f32 -1.442695, %v1939_v2  ;;  %v1942_v43 = vadd.f32 %v1890_v1, %v8405_v56  ;;  %v11516_v35 = vsel %vm8254_vm3, %v8210_v50, %v8348_v37 }
 0x342   :  { %v1892_v4 = vpop.f32.mrf.mxu0  ;;  %v1941_v2 = vadd.f32 %v1931_v32, %v11516_v35  ;;  %v1935_v1 = vpop.f32.mrf.mxu1  ;;  %v11519_v32 = vsel %vm8250_vm2, %v8216_v54, %v8370_v28  ;;  %v11538_v28 = vld [vmem:[#allocation23_spill] sm:$0xff] }
 0x343   :  { %7148 = vpow2.f32 %v6323_v18  ;;  %v6322_v23 = vmul.f32 -1.442695, %v1942_v43  ;;  %v1943_v44 = vadd.f32 %v1892_v4, %v11515_v36  ;;  %v11517_v18 = vsel %vm8250_vm2, %v8204_v46, %v8330_v48  ;;  %v11544_v48 = vld [vmem:[#allocation29_spill] sm:$0xff] }
 0x344   :  { %v1940_v43 = vadd.f32 %v1929_v45, %v11517_v18  ;;  %v6325_v56 = vmul.f32 -1.442695, %v1941_v2 }
 0x345   :  { %7150 = vpow2.f32 %v6322_v23  ;;  %v6324_v41 = vmul.f32 -1.442695, %v1943_v44  ;;  %v1944_v23 = vadd.f32 %v1933_v10, %v11519_v32 }
 0x347   :  { %7152 = vpow2.f32 %v6324_v41  ;;  %v1945_v41 = vadd.f32 %v1935_v1, %v11518_v16 }
 0x348   :  { %7154 = vtanh.f32 %v1940_v43  ;;  %v7702_v43 = vmov 5  }
 0x349   :  { %7156 = vpow2.f32 %v6325_v56  ;;  %v6326_v44 = vmul.f32 -1.442695, %v1945_v41  ;;  %v9069_v56 = vsel %vm66_vm0, 2, %v7702_v43 }
 0x34a   :  { %11520 = vst [vmem:[#allocation82_spill] sm:$0xff] %v9069_v56  ;;  %vm137_vm9 = vcmp.lt.s32.totalorder %v9069_v56, %v8649_v15  ;;  %vm138_vm10 = vcmp.lt.s32.totalorder %v9069_v56, %v8654_v17 }
 0x34e   :  { %v7147_v4 = vpop.eup %7146 }
 0x34f   :  { %v1952_v31 = vadd.f32 1.0, %v7147_v4 }
 0x350   :  { %v7149_v36 = vpop.eup %7148 }
 0x351   :  { %7158 = vrcp.f32 %v1952_v31  ;;  %v1964_v45 = vadd.f32 1.0, %v7149_v36 }
 0x352   :  { %v7151_v35 = vpop.eup %7150  ;;  %7160 = vtanh.f32 %v1944_v23 }
 0x353   :  { %7162 = vrcp.f32 %v1964_v45  ;;  %v1953_v2 = vadd.f32 1.0, %v7151_v35 }
 0x354   :  { %v7153_v18 = vpop.eup %7152  ;;  %7164 = vpow2.f32 %v6326_v44 }
 0x355   :  { %7166 = vrcp.f32 %v1953_v2  ;;  %v1965_v1 = vadd.f32 1.0, %v7153_v18  ;;  %v7155_v16 = vpop.eup %7154 }
 0x356   :  { %v7157_v27 = vpop.eup %7156 }
 0x357   :  { %7168 = vrcp.f32 %v1965_v1  ;;  %v1978_v32 = vadd.f32 1.0, %v7157_v27 }
 0x359   :  { %7170 = vrcp.f32 %v1978_v32 }
 0x35e   :  { %v7159_v54 = vpop.eup %7158 }
 0x35f   :  { %v7161_v10 = vpop.eup %7160  ;;  %v1986_v4 = vmul.f32 %v7159_v54, %v7155_v16 }
 0x360   :  { %v7163_v41 = vpop.eup %7162 }
 0x361   :  { %v7165_v23 = vpop.eup %7164  ;;  %v1984_v31 = vmul.f32 %v7163_v41, %v8857_v33 }
 0x362   :  { %v7167_v36 = vpop.eup %7166  ;;  %v1979_v2 = vadd.f32 1.0, %v7165_v23 }
 0x363   :  { %v1987_v44 = vmul.f32 %v7167_v36, %v7161_v10  ;;  %v1988_v45 = vadd.f32 %v1986_v4, %v1984_v31 }
 0x364   :  { %v7169_v35 = vpop.eup %7168 }
 0x365   :  { %v1985_v54 = vmul.f32 %v7169_v35, %v8864_v38  ;;  %7172 = vtanh.f32 %v1988_v45  ;;  %v9079_v27 = vsel %vm137_vm9, %v1988_v45, %v8857_v33  ;;  %v11528_v45 = vld [vmem:[#allocation20_spill] sm:$0xff] }
 0x366   :  { %7174 = vrcp.f32 %v1979_v2  ;;  %v7171_v16 = vpop.eup %7170  ;;  %v11529_v35 = vld [vmem:[#allocation24_spill] sm:$0xff] }
 0x367   :  { %v1989_v18 = vadd.f32 %v1987_v44, %v1985_v54  ;;  %v11530_v2 = vsel %vm8246_vm1, %v11528_v45, %v11529_v35 }
 0x369   :  { %7176 = vtanh.f32 %v1989_v18  ;;  %v9087_v1 = vsel %vm138_vm10, %v1989_v18, %v8864_v38 }
 0x372   :  { %v7173_v10 = vpop.eup %7172 }
 0x373   :  { %v1992_v4 = vmul.f32 %v7173_v10, %v7171_v16  ;;  %v7175_v43 = vpop.eup %7174 }
 0x375   :  { %v9093_v33 = vsel %vm137_vm9, %v1992_v4, %v8870_v12  ;;  %v11527_v12 = vld [vmem:[#allocation26_spill] sm:$0xff]  ;;  %v11531_v4 = vld [vmem:[#allocation32_spill] sm:$0xff] }
 0x376   :  { %v7177_v41 = vpop.eup %7176 }
 0x377   :  { %v1993_v32 = vmul.f32 %v7177_v41, %v7175_v43  ;;  %v11532_v41 = vld [vmem:[#allocation30_spill] sm:$0xff] }
 0x379   :  { %v9099_v23 = vsel %vm138_vm10, %v1993_v32, %v8876_v21  ;;  %v11533_v32 = vld [vmem:[#allocation33_spill] sm:$0xff] }
 0x37a   :  { %v1998_v38 = vpack.c.bf16 %v9099_v23, %v9093_v33 }
 0x37c   :  { %6721 = vst [vmem:[#allocation3 + $0x10] sm:$0xff] %v1998_v38   ;;  %2241 = vmatmul.mubr.bf16.vlgmr.msra.gmra.mxu0 %v1998_v38  ;;  %2284 = vmatmul.mubr.bf16.vlgmr.msra.gmra.mxu1 %v1998_v38  ;;  %v913_v38 = vsel %vm8246_vm1, %v11533_v32, %v11532_v41 }
 0x37d   :  { %2565 = vmatpush1.bf16.msra.mxu0 %v8745_v22  ;;  %2608 = vmatpush1.bf16.msra.mxu1 %v8897_v9  ;;  %v11521_v22 = vld [vmem:[#allocation79_spill] sm:$0xff] }
 0x37e   :  { %2566 = vmatprep.subr.bf16.mxu0 %v8752_v3  ;;  %2609 = vmatprep.subr.bf16.mxu1 %v8904_v11  ;;  %v11522_v3 = vld [vmem:[#allocation77_spill] sm:$0xff] }
 0x37f   :  { %2596 = vmatprep.mubr.bf16.mxu0 %v11500_v24  ;;  %2639 = vmatprep.mubr.bf16.mxu1 %v11500_v24 }
 0x381   :  { %2567 = vmatpush1.bf16.msra.mxu0 %v8757_v5  ;;  %2610 = vmatpush1.bf16.msra.mxu1 %v8909_v25  ;;  %v11523_v5 = vld [vmem:[#allocation80_spill] sm:$0xff] }
 0x382   :  { %2568 = vmatprep.subr.bf16.mxu0 %v8769_v8  ;;  %2611 = vmatprep.subr.bf16.mxu1 %v8921_v40  ;;  %v11525_v8 = vld [vmem:[#allocation81_spill] sm:$0xff] }
 0x385   :  { %2569 = vmatpush1.bf16.msra.mxu0 %v8764_v39  ;;  %2612 = vmatpush1.bf16.msra.mxu1 %v8916_v47  ;;  %v11524_v39 = vld [vmem:[#allocation78_spill] sm:$0xff] }
 0x386   :  { %2570 = vmatprep.subr.bf16.mxu0 %v8774_v63  ;;  %2613 = vmatprep.subr.bf16.mxu1 %v8926_v60  ;;  %v11526_v63 = vld [vmem:[#allocation76_spill] sm:$0xff] }
 0x389   :  { %2571 = vmatpush1.bf16.msra.mxu0 %v8781_v29  ;;  %2614 = vmatpush1.bf16.msra.mxu1 %v8943_v14 }
 0x38a   :  { %2572 = vmatprep.subr.bf16.mxu0 %v8936_v42  ;;  %2615 = vmatprep.subr.bf16.mxu1 %v8955_v13 }
 0x38d   :  { %2573 = vmatpush1.bf16.msra.mxu0 %v8931_v61  ;;  %2616 = vmatpush1.bf16.msra.mxu1 %v8973_v6 }
 0x38e   :  { %2574 = vmatprep.subr.bf16.mxu0 %v8949_v26  ;;  %2617 = vmatprep.subr.bf16.mxu1 %v8979_v30 }
 0x391   :  { %2575 = vmatpush1.bf16.msra.mxu0 %v8961_v19  ;;  %2618 = vmatpush1.bf16.msra.mxu1 %v8997_v62 }
 0x392   :  { %2576 = vmatprep.subr.bf16.mxu0 %v8967_v20  ;;  %2619 = vmatprep.subr.bf16.mxu1 %v9003_v7 }
 0x395   :  { %2577 = vmatpush1.bf16.msra.mxu0 %v8985_v53  ;;  %2620 = vmatpush1.bf16.msra.mxu1 %v11521_v22 }
 0x396   :  { %2578 = vmatprep.subr.bf16.mxu0 %v11522_v3  ;;  %2621 = vmatprep.subr.bf16.mxu1 %v11523_v5 }
 0x399   :  { %2579 = vmatpush1.bf16.msra.mxu0 %v11524_v39  ;;  %2622 = vmatpush1.bf16.msra.mxu1 %v11525_v8 }
 0x39a   :  { %2963 = vmatprep.subr.bf16.mxu1 %v11526_v63 }
 0x43c   :  { %v2242_v29 = vpop.f32.mrf.mxu0  ;;  %v2285_v31 = vpop.f32.mrf.mxu1 }
 0x43d   :  { %v2294_v21 = vadd.f32 %v2242_v29, %v11527_v12 }
 0x43e   :  { %v2244_v36 = vpop.f32.mrf.mxu0  ;;  %v2287_v10 = vpop.f32.mrf.mxu1 }
 0x43f   :  { %v6361_v44 = vmul.f32 -1.442695, %v2294_v21  ;;  %v2295_v54 = vadd.f32 %v2244_v36, %v11530_v2  ;;  %v11534_v36 = vld [vmem:[#allocation21_spill] sm:$0xff] }
 0x440   :  { %v2246_v18 = vpop.f32.mrf.mxu0  ;;  %v2289_v21 = vpop.f32.mrf.mxu1 }
 0x441   :  { %7178 = vpow2.f32 %v6361_v44  ;;  %v6363_v16 = vmul.f32 -1.442695, %v2295_v54  ;;  %v2298_v43 = vadd.f32 %v2246_v18, %v11531_v4  ;;  %v11535_v44 = vld [vmem:[#allocation25_spill] sm:$0xff]  ;;  %v11537_v4 = vld [vmem:[#allocation19_spill] sm:$0xff] }
 0x442   :  { %v2248_v63 = vpop.f32.mrf.mxu0  ;;  %v11536_v2 = vsel %vm8254_vm3, %v11534_v36, %v11535_v44  ;;  %v2291_v18 = vpop.f32.mrf.mxu1  ;;  %v11539_v55 = vsel %vm8250_vm2, %v11537_v4, %v11538_v28 }
 0x443   :  { %7180 = vpow2.f32 %v6363_v16  ;;  %v6362_v29 = vmul.f32 -1.442695, %v2298_v43  ;;  %v2299_v12 = vadd.f32 %v2248_v63, %v913_v38  ;;  %v2297_v54 = vadd.f32 %v2287_v10, %v11536_v2  ;;  %v11540_v43 = vld [vmem:[#allocation27_spill] sm:$0xff] }
 0x444   :  { %v2296_v46 = vadd.f32 %v2285_v31, %v11539_v55  ;;  %v11541_v38 = vld [vmem:[#allocation31_spill] sm:$0xff] }
 0x445   :  { %7182 = vpow2.f32 %v6362_v29  ;;  %v6364_v56 = vmul.f32 -1.442695, %v2299_v12  ;;  %v6365_v16 = vmul.f32 -1.442695, %v2297_v54  ;;  %v11542_v63 = vsel %vm8254_vm3, %v11540_v43, %v11541_v38  ;;  %v11543_v12 = vld [vmem:[#allocation22_spill] sm:$0xff] }
 0x446   :  { %v11545_v10 = vsel %vm8250_vm2, %v11543_v12, %v11544_v48 }
 0x447   :  { %7184 = vpow2.f32 %v6364_v56  ;;  %v2301_v56 = vadd.f32 %v2291_v18, %v11542_v63  ;;  %v2300_v2 = vadd.f32 %v2289_v21, %v11545_v10 }
 0x448   :  { %7186 = vtanh.f32 %v2296_v46  ;;  %v7703_v46 = vmov 4  }
 0x449   :  { %7188 = vpow2.f32 %v6365_v16  ;;  %v6366_v51 = vmul.f32 -1.442695, %v2301_v56  ;;  %v9169_v16 = vsel %vm66_vm0, 3, %v7703_v46 }
 0x44a   :  { %11546 = vst [vmem:[#allocation79_spill] sm:$0xff] %v9169_v16  ;;  %vm143_vm11 = vcmp.lt.s32.totalorder %v9169_v16, %v8649_v15  ;;  %vm144_vm12 = vcmp.lt.s32.totalorder %v9169_v16, %v8654_v17 }
 0x44e   :  { %v7179_v29 = vpop.eup %7178 }
 0x44f   :  { %v2308_v50 = vadd.f32 1.0, %v7179_v29 }
 0x450   :  { %v7181_v37 = vpop.eup %7180 }
 0x451   :  { %7190 = vrcp.f32 %v2308_v50  ;;  %v2320_v55 = vadd.f32 1.0, %v7181_v37 }
 0x452   :  { %v7183_v31 = vpop.eup %7182  ;;  %7192 = vtanh.f32 %v2300_v2 }
 0x453   :  { %7194 = vrcp.f32 %v2320_v55  ;;  %v2309_v54 = vadd.f32 1.0, %v7183_v31 }
 0x454   :  { %v7185_v0 = vpop.eup %7184  ;;  %7196 = vpow2.f32 %v6366_v51 }
 0x455   :  { %7198 = vrcp.f32 %v2309_v54  ;;  %v2321_v18 = vadd.f32 1.0, %v7185_v0  ;;  %v7187_v63 = vpop.eup %7186 }
 0x456   :  { %v7189_v49 = vpop.eup %7188 }
 0x457   :  { %7200 = vrcp.f32 %v2321_v18  ;;  %v2334_v37 = vadd.f32 1.0, %v7189_v49 }
 0x459   :  { %7202 = vrcp.f32 %v2334_v37 }
 0x45e   :  { %v7191_v34 = vpop.eup %7190 }
 0x45f   :  { %v7193_v21 = vpop.eup %7192  ;;  %v2342_v29 = vmul.f32 %v7191_v34, %v7187_v63 }
 0x460   :  { %v7195_v50 = vpop.eup %7194 }
 0x461   :  { %v7197_v56 = vpop.eup %7196  ;;  %v2340_v10 = vmul.f32 %v7195_v50, %v9079_v27 }
 0x462   :  { %v7199_v2 = vpop.eup %7198  ;;  %v2335_v31 = vadd.f32 1.0, %v7197_v56 }
 0x463   :  { %v2343_v0 = vmul.f32 %v7199_v2, %v7193_v21  ;;  %v2344_v51 = vadd.f32 %v2342_v29, %v2340_v10 }
 0x464   :  { %v7201_v55 = vpop.eup %7200 }
 0x465   :  { %v2341_v34 = vmul.f32 %v7201_v55, %v9087_v1  ;;  %7204 = vtanh.f32 %v2344_v51  ;;  %v9179_v49 = vsel %vm143_vm11, %v2344_v51, %v9079_v27  ;;  %v11552_v51 = vsel %vm8250_vm2, %v11538_v28, %v11537_v4 }
 0x466   :  { %7206 = vrcp.f32 %v2335_v31  ;;  %v7203_v63 = vpop.eup %7202 }
 0x467   :  { %v2345_v54 = vadd.f32 %v2343_v0, %v2341_v34 }
 0x469   :  { %7208 = vtanh.f32 %v2345_v54  ;;  %v9187_v18 = vsel %vm144_vm12, %v2345_v54, %v9087_v1 }
 0x472   :  { %v7205_v21 = vpop.eup %7204 }
 0x473   :  { %v2348_v29 = vmul.f32 %v7205_v21, %v7203_v63  ;;  %v7207_v46 = vpop.eup %7206 }
 0x475   :  { %v9193_v27 = vsel %vm143_vm11, %v2348_v29, %v9093_v33 }
 0x476   :  { %v7209_v50 = vpop.eup %7208 }
 0x477   :  { %v2349_v37 = vmul.f32 %v7209_v50, %v7207_v46 }
 0x479   :  { %v9199_v56 = vsel %vm144_vm12, %v2349_v37, %v9099_v23  ;;  %v11549_v23 = vld [vmem:[#allocation34_spill] sm:$0xff] }
 0x47a   :  { %v2354_v1 = vpack.c.bf16 %v9199_v56, %v9193_v27 }
 0x47c   :  { %6722 = vst [vmem:[#allocation3 + $0x18] sm:$0xff] %v2354_v1   ;;  %2597 = vmatmul.mubr.bf16.vlgmr.msra.gmra.mxu0 %v2354_v1  ;;  %2640 = vmatmul.mubr.bf16.vlgmr.msra.gmra.mxu1 %v2354_v1  ;;  %v7704_v1 = vmov 3  }
 0x47d   :  { %2964 = vmatpush1.bf16.msra.mxu1 %v8897_v9  ;;  %2952 = vmatprep.mubr.bf16.mxu0 %v11500_v24  ;;  %v9223_v9 = vld [vmem:[%s11185_s3 + $0xe4] ss:$16 sps:$4 sm:$0xff]  }
 0x47e   :  { %2965 = vmatprep.subr.bf16.mxu1 %v8904_v11  ;;  %2995 = vmatprep.mubr.bf16.mxu1 %v11500_v24  ;;  %v9228_v11 = vld [vmem:[%s11185_s3 + $0xe0] ss:$16 sps:$4 sm:$0xff]  }
 0x47f   :  { %2920 = vmatprep.subr.bf16.mxu0 %v9223_v9 }
 0x480   :  { %2921 = vmatpush1.bf16.msra.mxu0 %v9228_v11 }
 0x481   :  { %2966 = vmatpush1.bf16.msra.mxu1 %v8909_v25  ;;  %v9247_v25 = vld [vmem:[%s11185_s3 + $0xa0] ss:$16 sps:$4 sm:$0xff]  }
 0x482   :  { %2967 = vmatprep.subr.bf16.mxu1 %v8921_v40  ;;  %v9257_v40 = vld [vmem:[%s11185_s3 + $0x84] ss:$16 sps:$4 sm:$0xff]  }
 0x485   :  { %2968 = vmatpush1.bf16.msra.mxu1 %v8916_v47  ;;  %v9252_v47 = vld [vmem:[%s11185_s3 + $0xa4] ss:$16 sps:$4 sm:$0xff]  }
 0x486   :  { %2969 = vmatprep.subr.bf16.mxu1 %v8926_v60  ;;  %v9264_v60 = vld [vmem:[%s11185_s3 + $0x80] ss:$16 sps:$4 sm:$0xff]  }
 0x489   :  { %2970 = vmatpush1.bf16.msra.mxu1 %v8943_v14 }
 0x48a   :  { %2971 = vmatprep.subr.bf16.mxu1 %v8955_v13  ;;  %v11547_v13 = vld [vmem:[#allocation28_spill] sm:$0xff] }
 0x48d   :  { %2972 = vmatpush1.bf16.msra.mxu1 %v8973_v6 }
 0x48e   :  { %2973 = vmatprep.subr.bf16.mxu1 %v8979_v30 }
 0x491   :  { %2974 = vmatpush1.bf16.msra.mxu1 %v8997_v62  ;;  %v9240_v62 = vld [vmem:[%s11185_s3 + $0xc0] ss:$16 sps:$4 sm:$0xff]  }
 0x492   :  { %2975 = vmatprep.subr.bf16.mxu1 %v9003_v7  ;;  %v9235_v7 = vld [vmem:[%s11185_s3 + $0xc4] ss:$16 sps:$4 sm:$0xff]  }
 0x493   :  { %2922 = vmatprep.subr.bf16.mxu0 %v9235_v7 }
 0x494   :  { %2923 = vmatpush1.bf16.msra.mxu0 %v9240_v62 }
 0x495   :  { %2976 = vmatpush1.bf16.msra.mxu1 %v11521_v22  ;;  %2924 = vmatprep.subr.bf16.mxu0 %v9252_v47 }
 0x496   :  { %2977 = vmatprep.subr.bf16.mxu1 %v11523_v5 }
 0x498   :  { %2925 = vmatpush1.bf16.msra.mxu0 %v9247_v25 }
 0x499   :  { %2978 = vmatpush1.bf16.msra.mxu1 %v11525_v8  ;;  %2926 = vmatprep.subr.bf16.mxu0 %v9257_v40 }
 0x49c   :  { %2927 = vmatpush1.bf16.msra.mxu0 %v9264_v60 }
 0x49d   :  { %2928 = vmatprep.subr.bf16.mxu0 %v8936_v42 }
 0x4a0   :  { %2929 = vmatpush1.bf16.msra.mxu0 %v8931_v61 }
 0x4a1   :  { %2930 = vmatprep.subr.bf16.mxu0 %v8949_v26  ;;  %v11548_v26 = vsel %vm8246_vm1, %v11529_v35, %v11528_v45  ;;  %v11551_v45 = vsel %vm8254_vm3, %v11535_v44, %v11534_v36  ;;  %v11554_v36 = vsel %vm8250_vm2, %v11544_v48, %v11543_v12 }
 0x4a4   :  { %2931 = vmatpush1.bf16.msra.mxu0 %v8961_v19 }
 0x4a5   :  { %2932 = vmatprep.subr.bf16.mxu0 %v8967_v20 }
 0x4a8   :  { %2933 = vmatpush1.bf16.msra.mxu0 %v8985_v53 }
 0x4a9   :  { %2934 = vmatprep.subr.bf16.mxu0 %v11522_v3 }
 0x4ac   :  { %2935 = vmatpush1.bf16.msra.mxu0 %v11524_v39  ;;  %v11550_v39 = vsel %vm8246_vm1, %v11532_v41, %v11533_v32  ;;  %v11553_v41 = vsel %vm8254_vm3, %v11541_v38, %v11540_v43 }
 0x4ad   :  { %3276 = vmatprep.subr.bf16.mxu0 %v9223_v9 }
 0x53c   :  { %v2598_v14 = vpop.f32.mrf.mxu0  ;;  %v2641_v42 = vpop.f32.mrf.mxu1 }
 0x53d   :  { %v2650_v6 = vadd.f32 %v2598_v14, %v11547_v13  ;;  %v2652_v55 = vadd.f32 %v2641_v42, %v11552_v51  ;;  %v9311_v14 = vsel %vm66_vm0, 4, %v7704_v1  ;;  %v9456_v1 = vld [vmem:[%s11185_s3 + $0x4c] ss:$16 sps:$4 sm:$0xff]  }
 0x53e   :  { %v2600_v30 = vpop.f32.mrf.mxu0  ;;  %v2643_v33 = vpop.f32.mrf.mxu1  ;;  %11555 = vst [vmem:[#allocation77_spill] sm:$0xff] %v9311_v14  ;;  %vm11284_vm13 = vcmp.lt.s32.totalorder %v9311_v14, %v8649_v15  ;;  %vm11283_vm14 = vcmp.lt.s32.totalorder %v9311_v14, %v8654_v17 }
 0x53f   :  { %v6401_v61 = vmul.f32 -1.442695, %v2650_v6  ;;  %v2651_v19 = vadd.f32 %v2600_v30, %v11548_v26  ;;  %v2653_v35 = vadd.f32 %v2643_v33, %v11551_v45 }
 0x540   :  { %v2602_v20 = vpop.f32.mrf.mxu0  ;;  %v2645_v10 = vpop.f32.mrf.mxu1 }
 0x541   :  { %7210 = vpow2.f32 %v6401_v61  ;;  %v6403_v53 = vmul.f32 -1.442695, %v2651_v19  ;;  %v2654_v22 = vadd.f32 %v2602_v20, %v11549_v23  ;;  %v6405_v31 = vmul.f32 -1.442695, %v2653_v35 }
 0x542   :  { %v2604_v3 = vpop.f32.mrf.mxu0  ;;  %v2647_v0 = vpop.f32.mrf.mxu1  ;;  %v2656_v44 = vadd.f32 %v2645_v10, %v11554_v36  ;;  %v6936_v36 = vld [vmem:[%s11185_s3 + $0xec] ss:$16 sps:$4 sm:$0xff]  }
 0x543   :  { %7212 = vpow2.f32 %v6403_v53  ;;  %v6402_v5 = vmul.f32 -1.442695, %v2654_v22  ;;  %v2655_v8 = vadd.f32 %v2604_v3, %v11550_v39  ;;  %v2657_v32 = vadd.f32 %v2647_v0, %v11553_v41  ;;  %v3826_v0 = vld [vmem:[#allocation3 + $0x1c] sm:$0xf]  ;;  %3319 = vmatprep.subr.bf16.mxu1 %v6936_v36 }
 0x545   :  { %7214 = vpow2.f32 %v6402_v5  ;;  %v6404_v2 = vmul.f32 -1.442695, %v2655_v8  ;;  %v6406_v28 = vmul.f32 -1.442695, %v2657_v32 }
 0x547   :  { %7216 = vpow2.f32 %v6404_v2 }
 0x548   :  { %7218 = vtanh.f32 %v2652_v55 }
 0x549   :  { %7220 = vpow2.f32 %v6405_v31 }
 0x54e   :  { %v7211_v34 = vpop.eup %7210 }
 0x54f   :  { %v2664_v54 = vadd.f32 1.0, %v7211_v34 }
 0x550   :  { %v7213_v63 = vpop.eup %7212 }
 0x551   :  { %7222 = vrcp.f32 %v2664_v54  ;;  %v2676_v4 = vadd.f32 1.0, %v7213_v63  ;;  %v9381_v54 = vld [vmem:[%s11185_s3 + $0xcc] ss:$16 sps:$4 sm:$0xff]   ;;  %v9386_v63 = vld [vmem:[%s11185_s3 + $0xc8] ss:$16 sps:$4 sm:$0xff]  }
 0x552   :  { %v7215_v21 = vpop.eup %7214  ;;  %7224 = vtanh.f32 %v2656_v44  ;;  %v9375_v44 = vld [vmem:[%s11185_s3 + $0xe8] ss:$16 sps:$4 sm:$0xff]  }
 0x553   :  { %7226 = vrcp.f32 %v2676_v4  ;;  %v2665_v29 = vadd.f32 1.0, %v7215_v21  ;;  %v9398_v4 = vld [vmem:[%s11185_s3 + $0xac] ss:$16 sps:$4 sm:$0xff]  }
 0x554   :  { %v7217_v43 = vpop.eup %7216  ;;  %7228 = vpow2.f32 %v6406_v28  ;;  %v9393_v28 = vld [vmem:[%s11185_s3 + $0xa8] ss:$16 sps:$4 sm:$0xff]   ;;  %v9403_v21 = vld [vmem:[%s11185_s3 + $0x8c] ss:$16 sps:$4 sm:$0xff]  }
 0x555   :  { %7230 = vrcp.f32 %v2665_v29  ;;  %v2677_v38 = vadd.f32 1.0, %v7217_v43  ;;  %v7219_v46 = vpop.eup %7218  ;;  %v9408_v29 = vld [vmem:[%s11185_s3 + $0x60] ss:$16 sps:$4 sm:$0xff]   ;;  %v9413_v43 = vld [vmem:[%s11185_s3 + $0x64] ss:$16 sps:$4 sm:$0xff]  }
 0x556   :  { %v7221_v50 = vpop.eup %7220 }
 0x557   :  { %7232 = vrcp.f32 %v2677_v38  ;;  %v2690_v6 = vadd.f32 1.0, %v7221_v50  ;;  %v9420_v38 = vld [vmem:[%s11185_s3 + $0x88] ss:$16 sps:$4 sm:$0xff]   ;;  %v9432_v50 = vld [vmem:[%s11185_s3 + $0x6c] ss:$16 sps:$4 sm:$0xff]  }
 0x559   :  { %7234 = vrcp.f32 %v2690_v6  ;;  %v9468_v6 = vld [vmem:[%s11185_s3 + $0x4] ss:$16 sps:$4 sm:$0xff]  }
 0x55e   :  { %v7223_v48 = vpop.eup %7222 }
 0x55f   :  { %v7225_v12 = vpop.eup %7224  ;;  %v2698_v37 = vmul.f32 %v7223_v48, %v7219_v46  ;;  %v9426_v46 = vld [vmem:[%s11185_s3 + $0x44] ss:$16 sps:$4 sm:$0xff]   ;;  %v9438_v48 = vld [vmem:[%s11185_s3 + $0x40] ss:$16 sps:$4 sm:$0xff]  }
 0x560   :  { %v7227_v13 = vpop.eup %7226 }
 0x561   :  { %v7229_v42 = vpop.eup %7228  ;;  %v2696_v30 = vmul.f32 %v7227_v13, %v9179_v49  ;;  %v9462_v13 = vld [vmem:[%s11185_s3 + $0x20] ss:$16 sps:$4 sm:$0xff]  }
 0x562   :  { %v7231_v61 = vpop.eup %7230  ;;  %v2691_v53 = vadd.f32 1.0, %v7229_v42  ;;  %v9474_v42 = vld [vmem:[%s11185_s3 + $0x48] ss:$16 sps:$4 sm:$0xff]  }
 0x563   :  { %v2699_v26 = vmul.f32 %v7231_v61, %v7225_v12  ;;  %v2700_v19 = vadd.f32 %v2698_v37, %v2696_v30  ;;  %v9444_v12 = vld [vmem:[%s11185_s3 + $0x24] ss:$16 sps:$4 sm:$0xff]   ;;  %v9450_v37 = vld [vmem:[%s11185_s3 + $0x68] ss:$16 sps:$4 sm:$0xff]   ;;  %v9480_v30 = vld [vmem:[%s11185_s3 + $0x2c] ss:$16 sps:$4 sm:$0xff]  }
 0x564   :  { %v7233_v20 = vpop.eup %7232  ;;  %v9486_v61 = vld [vmem:[%s11185_s3] ss:$16 sps:$4 sm:$0xff]  }
 0x565   :  { %v2697_v33 = vmul.f32 %v7233_v20, %v9187_v18  ;;  %7236 = vtanh.f32 %v2700_v19  ;;  %v9321_v23 = vsel %vm11284_vm13, %v2700_v19, %v9179_v49  ;;  %v9499_v19 = vld [vmem:[%s11185_s3 + $0xc] ss:$16 sps:$4 sm:$0xff]   ;;  %v9507_v20 = vld [vmem:[%s11185_s3 + $0x8] ss:$16 sps:$4 sm:$0xff]  }
 0x566   :  { %7238 = vrcp.f32 %v2691_v53  ;;  %v7235_v5 = vpop.eup %7234 }
 0x567   :  { %v2701_v22 = vadd.f32 %v2699_v26, %v2697_v33  ;;  %v9493_v26 = vld [vmem:[%s11185_s3 + $0x28] ss:$16 sps:$4 sm:$0xff]   ;;  %v11558_v33 = vld [vmem:[#allocation38_spill] sm:$0xff] }
 0x569   :  { %7240 = vtanh.f32 %v2701_v22  ;;  %v9329_v3 = vsel %vm11283_vm14, %v2701_v22, %v9187_v18 }
 0x572   :  { %v7237_v39 = vpop.eup %7236 }
 0x573   :  { %v2704_v8 = vmul.f32 %v7237_v39, %v7235_v5  ;;  %v7239_v10 = vpop.eup %7238 }
 0x575   :  { %v9335_v49 = vsel %vm11284_vm13, %v2704_v8, %v9193_v27  ;;  %v9782_v27 = vld [vmem:[#allocation6 + $0xc0] ss:$16 sps:$4 sm:$0xff]  }
 0x576   :  { %v7241_v2 = vpop.eup %7240 }
 0x577   :  { %v2705_v45 = vmul.f32 %v7241_v2, %v7239_v10  ;;  %v11560_v10 = vld [vmem:[#allocation16_spill] sm:$0xff] }
 0x579   :  { %v9341_v35 = vsel %vm11283_vm14, %v2705_v45, %v9199_v56  ;;  %v3825_v56 = vld [vmem:[#allocation3 + $0x18] sm:$0xf] }
 0x57a   :  { %v2710_v18 = vpack.c.bf16 %v9341_v35, %v9335_v49 }
 0x57c   :  { %6723 = vst [vmem:[#allocation3 + $0x20] sm:$0xff] %v2710_v18   ;;  %2953 = vmatmul.mubr.bf16.vlgmr.msra.gmra.mxu0 %v2710_v18  ;;  %2996 = vmatmul.mubr.bf16.vlgmr.msra.gmra.mxu1 %v2710_v18 }
 0x57d   :  { %3277 = vmatpush1.bf16.msra.mxu0 %v9228_v11  ;;  %3308 = vmatprep.mubr.bf16.mxu0 %v11500_v24 }
 0x57e   :  { %3278 = vmatprep.subr.bf16.mxu0 %v9235_v7  ;;  %3351 = vmatprep.mubr.bf16.mxu1 %v11500_v24 }
 0x57f   :  { %3320 = vmatpush1.bf16.msra.mxu1 %v9375_v44 }
 0x580   :  { %3321 = vmatprep.subr.bf16.mxu1 %v9381_v54 }
 0x581   :  { %3279 = vmatpush1.bf16.msra.mxu0 %v9240_v62 }
 0x582   :  { %3280 = vmatprep.subr.bf16.mxu0 %v9252_v47 }
 0x583   :  { %v3827_v51 = vld [vmem:[#allocation3 + $0x20] sm:$0xf]  ;;  %v3828_v55 = vld [vmem:[#allocation3 + $0x24] sm:$0xf]  ;;  %3322 = vmatpush1.bf16.msra.mxu1 %v9386_v63 }
 0x584   :  { %v3829_v31 = vsel %vm9352_vm15, %v3825_v56, %v3827_v51  ;;  %v3830_v41 = vsel %vm9352_vm15, %v3826_v0, %v3828_v55  ;;  %v3833_v32 = vsel %vm9352_vm15, %v3827_v51, %v3825_v56  ;;  %v3834_v34 = vsel %vm9352_vm15, %v3828_v55, %v3826_v0  ;;  %3323 = vmatprep.subr.bf16.mxu1 %v9398_v4  ;;  %v11562_v51 = vld [vmem:[#allocation44_spill] sm:$0xff] }
 0x585   :  { %3831 = vst [vmem:[#allocation3 + $0x18] sm:$0xf] %v3829_v31  ;;  %3832 = vst [vmem:[#allocation3 + $0x1c] sm:$0xf] %v3830_v41  ;;  %3281 = vmatpush1.bf16.msra.mxu0 %v9247_v25 }
 0x586   :  { %3835 = vst [vmem:[#allocation3 + $0x20] sm:$0xf] %v3833_v32  ;;  %3836 = vst [vmem:[#allocation3 + $0x24] sm:$0xf] %v3834_v34  ;;  %3282 = vmatprep.subr.bf16.mxu0 %v9257_v40  ;;  %v11563_v32 = vld [vmem:[#allocation42_spill] sm:$0xff]  ;;  %v11564_v34 = vld [vmem:[#allocation40_spill] sm:$0xff] }
 0x587   :  { %3324 = vmatpush1.bf16.msra.mxu1 %v9393_v28 }
 0x588   :  { %3325 = vmatprep.subr.bf16.mxu1 %v9403_v21 }
 0x589   :  { %3283 = vmatpush1.bf16.msra.mxu0 %v9264_v60 }
 0x58a   :  { %3284 = vmatprep.subr.bf16.mxu0 %v9413_v43 }
 0x58b   :  { %3326 = vmatpush1.bf16.msra.mxu1 %v9420_v38 }
 0x58c   :  { %3327 = vmatprep.subr.bf16.mxu1 %v9432_v50 }
 0x58d   :  { %3285 = vmatpush1.bf16.msra.mxu0 %v9408_v29 }
 0x58e   :  { %3286 = vmatprep.subr.bf16.mxu0 %v9426_v46 }
 0x58f   :  { %3328 = vmatpush1.bf16.msra.mxu1 %v9450_v37 }
 0x590   :  { %3329 = vmatprep.subr.bf16.mxu1 %v9456_v1 }
 0x591   :  { %3287 = vmatpush1.bf16.msra.mxu0 %v9438_v48 }
 0x592   :  { %3288 = vmatprep.subr.bf16.mxu0 %v9444_v12 }
 0x593   :  { %3330 = vmatpush1.bf16.msra.mxu1 %v9474_v42 }
 0x594   :  { %3331 = vmatprep.subr.bf16.mxu1 %v9480_v30 }
 0x595   :  { %3289 = vmatpush1.bf16.msra.mxu0 %v9462_v13 }
 0x596   :  { %3290 = vmatprep.subr.bf16.mxu0 %v9468_v6 }
 0x597   :  { %3332 = vmatpush1.bf16.msra.mxu1 %v9493_v26 }
 0x598   :  { %3333 = vmatprep.subr.bf16.mxu1 %v9499_v19 }
 0x599   :  { %3291 = vmatpush1.bf16.msra.mxu0 %v9486_v61 }
 0x59a   :  { %3632 = vmatprep.subr.bf16.mxu0 %v9223_v9  ;;  %v11559_v9 = vld [vmem:[#allocation36_spill] sm:$0xff] }
 0x59b   :  { %3334 = vmatpush1.bf16.msra.mxu1 %v9507_v20  ;;  %v11561_v2 = vsel %vm8246_vm1, %v11559_v9, %v11560_v10 }
 0x59c   :  { %3675 = vmatprep.subr.bf16.mxu1 %v6936_v36  ;;  %v11565_v36 = vsel %vm8246_vm1, %v11563_v32, %v11564_v34 }
 0x63c   :  { %v2954_v53 = vpop.f32.mrf.mxu0  ;;  %v2997_v5 = vpop.f32.mrf.mxu1 }
 0x63d   :  { %v3006_v22 = vadd.f32 %v2954_v53, %v11558_v33 }
 0x63e   :  { %v2956_v39 = vpop.f32.mrf.mxu0  ;;  %v2999_v0 = vpop.f32.mrf.mxu1 }
 0x63f   :  { %v6441_v8 = vmul.f32 -1.442695, %v3006_v22  ;;  %v3007_v45 = vadd.f32 %v2956_v39, %v11561_v2  ;;  %v11566_v39 = vld [vmem:[#allocation37_spill] sm:$0xff] }
 0x640   :  { %v2958_v18 = vpop.f32.mrf.mxu0  ;;  %v3001_v33 = vpop.f32.mrf.mxu1 }
 0x641   :  { %7242 = vpow2.f32 %v6441_v8  ;;  %v6443_v56 = vmul.f32 -1.442695, %v3007_v45  ;;  %v3010_v55 = vadd.f32 %v2958_v18, %v11562_v51  ;;  %v11567_v8 = vld [vmem:[#allocation17_spill] sm:$0xff]  ;;  %v11569_v45 = vld [vmem:[#allocation35_spill] sm:$0xff] }
 0x642   :  { %v2960_v31 = vpop.f32.mrf.mxu0  ;;  %v11568_v9 = vsel %vm8254_vm3, %v11566_v39, %v11567_v8  ;;  %v3003_v2 = vpop.f32.mrf.mxu1  ;;  %v11570_v18 = vld [vmem:[#allocation15_spill] sm:$0xff] }
 0x643   :  { %7244 = vpow2.f32 %v6443_v56  ;;  %v6442_v41 = vmul.f32 -1.442695, %v3010_v55  ;;  %v3011_v53 = vadd.f32 %v2960_v31, %v11565_v36  ;;  %v3009_v10 = vadd.f32 %v2999_v0, %v11568_v9  ;;  %v11572_v31 = vld [vmem:[#allocation43_spill] sm:$0xff] }
 0x644   :  { %v11571_v56 = vsel %vm8250_vm2, %v11569_v45, %v11570_v18 }
 0x645   :  { %7246 = vpow2.f32 %v6442_v41  ;;  %v6444_v22 = vmul.f32 -1.442695, %v3011_v53  ;;  %v3008_v51 = vadd.f32 %v2997_v5, %v11571_v56  ;;  %v6445_v55 = vmul.f32 -1.442695, %v3009_v10  ;;  %v11573_v41 = vld [vmem:[#allocation41_spill] sm:$0xff]  ;;  %v11575_v53 = vld [vmem:[#allocation39_spill] sm:$0xff] }
 0x646   :  { %v11574_v32 = vsel %vm8254_vm3, %v11572_v31, %v11573_v41 }
 0x647   :  { %7248 = vpow2.f32 %v6444_v22  ;;  %v3013_v34 = vadd.f32 %v3003_v2, %v11574_v32  ;;  %v11576_v22 = vld [vmem:[#allocation18_spill] sm:$0xff] }
 0x648   :  { %v11577_v0 = vsel %vm8250_vm2, %v11575_v53, %v11576_v22  ;;  %7250 = vtanh.f32 %v3008_v51  ;;  %v7705_v51 = vmov 2  }
 0x649   :  { %v3012_v39 = vadd.f32 %v3001_v33, %v11577_v0  ;;  %7252 = vpow2.f32 %v6445_v55  ;;  %v6446_v45 = vmul.f32 -1.442695, %v3013_v34  ;;  %v9545_v55 = vsel %vm66_vm0, 5, %v7705_v51 }
 0x64a   :  { %11578 = vst [vmem:[#allocation80_spill] sm:$0xff] %v9545_v55 }
 0x64e   :  { %v7243_v36 = vpop.eup %7242 }
 0x64f   :  { %v3020_v8 = vadd.f32 1.0, %v7243_v36 }
 0x650   :  { %v7245_v9 = vpop.eup %7244 }
 0x651   :  { %7254 = vrcp.f32 %v3020_v8  ;;  %v3032_v5 = vadd.f32 1.0, %v7245_v9  ;;  %v9551_v8 = vld [vmem:[%s11183_s1] sm:$0xff] }
 0x652   :  { %v7247_v10 = vpop.eup %7246  ;;  %7256 = vtanh.f32 %v3012_v39  ;;  %11579 = vst [vmem:[#allocation78_spill] sm:$0xff] %v9551_v8  ;;  %vm11286_vm14 = vcmp.lt.s32.totalorder %v9545_v55, %v9551_v8 }
 0x653   :  { %7258 = vrcp.f32 %v3032_v5  ;;  %v3021_v18 = vadd.f32 1.0, %v7247_v10 }
 0x654   :  { %v7249_v56 = vpop.eup %7248  ;;  %7260 = vpow2.f32 %v6446_v45 }
 0x655   :  { %7262 = vrcp.f32 %v3021_v18  ;;  %v3033_v2 = vadd.f32 1.0, %v7249_v56  ;;  %v7251_v31 = vpop.eup %7250 }
 0x656   :  { %v7253_v41 = vpop.eup %7252 }
 0x657   :  { %7264 = vrcp.f32 %v3033_v2  ;;  %v3046_v53 = vadd.f32 1.0, %v7253_v41  ;;  %v9565_v2 = vld [vmem:[%s11183_s1 + $0x8] sm:$0xff] }
 0x658   :  { %11580 = vst [vmem:[#allocation81_spill] sm:$0xff] %v9565_v2  ;;  %vm11285_vm13 = vcmp.lt.s32.totalorder %v9545_v55, %v9565_v2 }
 0x659   :  { %7266 = vrcp.f32 %v3046_v53 }
 0x65e   :  { %v7255_v32 = vpop.eup %7254 }
 0x65f   :  { %v7257_v33 = vpop.eup %7256  ;;  %v3054_v36 = vmul.f32 %v7255_v32, %v7251_v31 }
 0x660   :  { %v7259_v34 = vpop.eup %7258 }
 0x661   :  { %v7261_v22 = vpop.eup %7260  ;;  %v3052_v0 = vmul.f32 %v7259_v34, %v9321_v23 }
 0x662   :  { %v7263_v39 = vpop.eup %7262  ;;  %v3047_v10 = vadd.f32 1.0, %v7261_v22 }
 0x663   :  { %v3055_v9 = vmul.f32 %v7263_v39, %v7257_v33  ;;  %v3056_v45 = vadd.f32 %v3054_v36, %v3052_v0 }
 0x664   :  { %v7265_v5 = vpop.eup %7264 }
 0x665   :  { %v3053_v18 = vmul.f32 %v7265_v5, %v9329_v3  ;;  %7268 = vtanh.f32 %v3056_v45  ;;  %v9560_v56 = vsel %vm11286_vm14, %v3056_v45, %v9321_v23  ;;  %v11592_v5 = vld [vmem:[#allocation45_spill] sm:$0xff] }
 0x666   :  { %7270 = vrcp.f32 %v3047_v10  ;;  %v7267_v32 = vpop.eup %7266  ;;  %v11593_v10 = vld [vmem:[#allocation11_spill] sm:$0xff] }
 0x667   :  { %v3057_v31 = vadd.f32 %v3055_v9, %v3053_v18  ;;  %v11594_v18 = vsel %vm8250_vm2, %v11592_v5, %v11593_v10 }
 0x669   :  { %7272 = vtanh.f32 %v3057_v31  ;;  %v9573_v41 = vsel %vm11285_vm13, %v3057_v31, %v9329_v3 }
 0x672   :  { %v7269_v23 = vpop.eup %7268 }
 0x673   :  { %v3060_v33 = vmul.f32 %v7269_v23, %v7267_v32  ;;  %v7271_v36 = vpop.eup %7270  ;;  %v11595_v23 = vld [vmem:[#allocation53_spill] sm:$0xff] }
 0x675   :  { %v9579_v53 = vsel %vm11286_vm14, %v3060_v33, %v9335_v49  ;;  %v3813_v49 = vld [vmem:[#allocation3 + $0x10] sm:$0xf]  ;;  %v11596_v33 = vld [vmem:[#allocation51_spill] sm:$0xff] }
 0x676   :  { %v7273_v51 = vpop.eup %7272 }
 0x677   :  { %v3061_v34 = vmul.f32 %v7273_v51, %v7271_v36  ;;  %v11597_v36 = vsel %vm8254_vm3, %v11595_v23, %v11596_v33 }
 0x679   :  { %v9585_v22 = vsel %vm11285_vm13, %v3061_v34, %v9341_v35 }
 0x67a   :  { %v3066_v3 = vpack.c.bf16 %v9585_v22, %v9579_v53 }
 0x67c   :  { %6724 = vst [vmem:[#allocation3 + $0x28] sm:$0xff] %v3066_v3   ;;  %3309 = vmatmul.mubr.bf16.vlgmr.msra.gmra.mxu0 %v3066_v3  ;;  %3352 = vmatmul.mubr.bf16.vlgmr.msra.gmra.mxu1 %v3066_v3  ;;  %v11598_v3 = vld [vmem:[#allocation49_spill] sm:$0xff] }
 0x67d   :  { %3633 = vmatpush1.bf16.msra.mxu0 %v9228_v11  ;;  %3676 = vmatpush1.bf16.msra.mxu1 %v9375_v44  ;;  %v3814_v11 = vld [vmem:[#allocation3 + $0x14] sm:$0xf] }
 0x67e   :  { %3634 = vmatprep.subr.bf16.mxu0 %v9235_v7  ;;  %3677 = vmatprep.subr.bf16.mxu1 %v9381_v54 }
 0x67f   :  { %3664 = vmatprep.mubr.bf16.mxu0 %v11500_v24  ;;  %3707 = vmatprep.mubr.bf16.mxu1 %v11500_v24 }
 0x681   :  { %3635 = vmatpush1.bf16.msra.mxu0 %v9240_v62  ;;  %3678 = vmatpush1.bf16.msra.mxu1 %v9386_v63 }
 0x682   :  { %3636 = vmatprep.subr.bf16.mxu0 %v9252_v47  ;;  %3679 = vmatprep.subr.bf16.mxu1 %v9398_v4  ;;  %v11581_v47 = vld [vmem:[#allocation48_spill] sm:$0xff]  ;;  %v11582_v4 = vld [vmem:[#allocation46_spill] sm:$0xff] }
 0x683   :  { %v3815_v35 = vld [vmem:[#allocation3 + $0x28] sm:$0xf]  ;;  %v3816_v44 = vld [vmem:[#allocation3 + $0x2c] sm:$0xf] }
 0x684   :  { %v3817_v7 = vsel %vm9352_vm15, %v3813_v49, %v3815_v35  ;;  %v3818_v54 = vsel %vm9352_vm15, %v3814_v11, %v3816_v44  ;;  %v3821_v0 = vsel %vm9352_vm15, %v3815_v35, %v3813_v49  ;;  %v3822_v62 = vsel %vm9352_vm15, %v3816_v44, %v3814_v11  ;;  %v11599_v49 = vld [vmem:[#allocation14_spill] sm:$0xff] }
 0x685   :  { %3819 = vst [vmem:[#allocation3 + $0x10] sm:$0xf] %v3817_v7  ;;  %3820 = vst [vmem:[#allocation3 + $0x14] sm:$0xf] %v3818_v54  ;;  %3637 = vmatpush1.bf16.msra.mxu0 %v9247_v25  ;;  %3680 = vmatpush1.bf16.msra.mxu1 %v9393_v28  ;;  %v11600_v11 = vsel %vm8250_vm2, %v11598_v3, %v11599_v49  ;;  %v6970_v3 = vld [vmem:[#allocation4 + $0xe0] ss:$16 sps:$4 sm:$0xff]  }
 0x686   :  { %3823 = vst [vmem:[#allocation3 + $0x28] sm:$0xf] %v3821_v0  ;;  %3824 = vst [vmem:[#allocation3 + $0x2c] sm:$0xf] %v3822_v62  ;;  %3638 = vmatprep.subr.bf16.mxu0 %v9257_v40  ;;  %3681 = vmatprep.subr.bf16.mxu1 %v9403_v21  ;;  %v11583_v21 = vld [vmem:[#allocation12_spill] sm:$0xff] }
 0x687   :  { %v6973_v49 = vld [vmem:[#allocation4 + $0xe8] ss:$16 sps:$4 sm:$0xff]  }
 0x689   :  { %3639 = vmatpush1.bf16.msra.mxu0 %v9264_v60  ;;  %3682 = vmatpush1.bf16.msra.mxu1 %v9420_v38 }
 0x68a   :  { %3640 = vmatprep.subr.bf16.mxu0 %v9413_v43  ;;  %3683 = vmatprep.subr.bf16.mxu1 %v9432_v50 }
 0x68d   :  { %3641 = vmatpush1.bf16.msra.mxu0 %v9408_v29  ;;  %3684 = vmatpush1.bf16.msra.mxu1 %v9450_v37  ;;  %v11584_v29 = vsel %vm8246_vm1, %v11582_v4, %v11583_v21 }
 0x68e   :  { %3642 = vmatprep.subr.bf16.mxu0 %v9426_v46  ;;  %3685 = vmatprep.subr.bf16.mxu1 %v9456_v1 }
 0x691   :  { %3643 = vmatpush1.bf16.msra.mxu0 %v9438_v48  ;;  %3686 = vmatpush1.bf16.msra.mxu1 %v9474_v42  ;;  %v11585_v48 = vld [vmem:[#allocation54_spill] sm:$0xff] }
 0x692   :  { %3644 = vmatprep.subr.bf16.mxu0 %v9444_v12  ;;  %3687 = vmatprep.subr.bf16.mxu1 %v9480_v30 }
 0x695   :  { %3645 = vmatpush1.bf16.msra.mxu0 %v9462_v13  ;;  %3688 = vmatpush1.bf16.msra.mxu1 %v9493_v26  ;;  %v11586_v13 = vld [vmem:[#allocation52_spill] sm:$0xff] }
 0x696   :  { %3646 = vmatprep.subr.bf16.mxu0 %v9468_v6  ;;  %3689 = vmatprep.subr.bf16.mxu1 %v9499_v19  ;;  %v11587_v6 = vld [vmem:[#allocation50_spill] sm:$0xff]  ;;  %v11589_v19 = vld [vmem:[#allocation47_spill] sm:$0xff] }
 0x697   :  { %v11588_v42 = vsel %vm8246_vm1, %v11586_v13, %v11587_v6 }
 0x699   :  { %3647 = vmatpush1.bf16.msra.mxu0 %v9486_v61  ;;  %3690 = vmatpush1.bf16.msra.mxu1 %v9507_v20  ;;  %v11590_v20 = vld [vmem:[#allocation13_spill] sm:$0xff] }
 0x69a   :  { %v11591_v39 = vsel %vm8254_vm3, %v11589_v19, %v11590_v20 }
 0x73c   :  { %v3310_v25 = vpop.f32.mrf.mxu0  ;;  %v3353_v60 = vpop.f32.mrf.mxu1 }
 0x73d   :  { %v3362_v40 = vadd.f32 %v3310_v25, %v11581_v47  ;;  %v3364_v31 = vadd.f32 %v3353_v60, %v11594_v18  ;;  %v3801_v18 = vld [vmem:[#allocation3 + $0x8] sm:$0xf] }
 0x73e   :  { %v3312_v63 = vpop.f32.mrf.mxu0  ;;  %v3355_v50 = vpop.f32.mrf.mxu1 }
 0x73f   :  { %v6481_v28 = vmul.f32 -1.442695, %v3362_v40  ;;  %v3363_v43 = vadd.f32 %v3312_v63, %v11584_v29  ;;  %v3365_v9 = vadd.f32 %v3355_v50, %v11591_v39  ;;  %v7706_v29 = vmov 1  }
 0x740   :  { %v3314_v38 = vpop.f32.mrf.mxu0  ;;  %v3357_v61 = vpop.f32.mrf.mxu1 }
 0x741   :  { %7274 = vpow2.f32 %v6481_v28  ;;  %v6483_v46 = vmul.f32 -1.442695, %v3363_v43  ;;  %v3366_v12 = vadd.f32 %v3314_v38, %v11585_v48  ;;  %v6485_v32 = vmul.f32 -1.442695, %v3365_v9 }
 0x742   :  { %v3316_v37 = vpop.f32.mrf.mxu0  ;;  %v3359_v45 = vpop.f32.mrf.mxu1  ;;  %v3368_v35 = vadd.f32 %v3357_v61, %v11600_v11  ;;  %v9663_v43 = vsel %vm66_vm0, 6, %v7706_v29  ;;  %v6978_v11 = vld [vmem:[#allocation4 + $0xc4] ss:$16 sps:$4 sm:$0xff]   ;;  %v6997_v29 = vld [vmem:[#allocation4 + $0x68] ss:$16 sps:$4 sm:$0xff]  }
 0x743   :  { %7276 = vpow2.f32 %v6483_v46  ;;  %v6482_v1 = vmul.f32 -1.442695, %v3366_v12  ;;  %v3367_v30 = vadd.f32 %v3316_v37, %v11588_v42  ;;  %v3369_v51 = vadd.f32 %v3359_v45, %v11597_v36  ;;  %11601 = vst [vmem:[#allocation76_spill] sm:$0xff] %v9663_v43 }
 0x744   :  { %vm11288_vm13 = vcmp.lt.s32.totalorder %v9663_v43, %v9551_v8  ;;  %vm11287_vm14 = vcmp.lt.s32.totalorder %v9663_v43, %v9565_v2 }
 0x745   :  { %7278 = vpow2.f32 %v6482_v1  ;;  %v6484_v26 = vmul.f32 -1.442695, %v3367_v30  ;;  %v6486_v54 = vmul.f32 -1.442695, %v3369_v51  ;;  %v6972_v51 = vld [vmem:[#allocation4 + $0xe4] ss:$16 sps:$4 sm:$0xff]  }
 0x746   :  { %4115 = vmatprep.subr.bf16.mxu0 %v6972_v51 }
 0x747   :  { %7280 = vpow2.f32 %v6484_v26 }
 0x748   :  { %7282 = vtanh.f32 %v3364_v31  ;;  %v3802_v31 = vld [vmem:[#allocation3 + $0xc] sm:$0xf] }
 0x749   :  { %7284 = vpow2.f32 %v6485_v32 }
 0x74e   :  { %v7275_v34 = vpop.eup %7274 }
 0x74f   :  { %v3376_v44 = vadd.f32 1.0, %v7275_v34  ;;  %v6975_v34 = vld [vmem:[#allocation4 + $0xec] ss:$16 sps:$4 sm:$0xff]  }
 0x750   :  { %v7277_v7 = vpop.eup %7276  ;;  %4228 = vmatprep.subr.bf16.mxu1 %v6975_v34  ;;  %v11606_v34 = vld [vmem:[#allocation68_spill] sm:$0xff] }
 0x751   :  { %7286 = vrcp.f32 %v3376_v44  ;;  %v3388_v0 = vadd.f32 1.0, %v7277_v7  ;;  %v6976_v44 = vld [vmem:[#allocation4 + $0xc0] ss:$16 sps:$4 sm:$0xff]   ;;  %v6979_v7 = vld [vmem:[#allocation4 + $0xc8] ss:$16 sps:$4 sm:$0xff]  }
 0x752   :  { %v7279_v62 = vpop.eup %7278  ;;  %7288 = vtanh.f32 %v3368_v35  ;;  %v6981_v35 = vld [vmem:[#allocation4 + $0xcc] ss:$16 sps:$4 sm:$0xff]  }
 0x753   :  { %7290 = vrcp.f32 %v3388_v0  ;;  %v3377_v25 = vadd.f32 1.0, %v7279_v62  ;;  %v6987_v0 = vld [vmem:[#allocation4 + $0xac] ss:$16 sps:$4 sm:$0xff]   ;;  %v6982_v62 = vld [vmem:[#allocation4 + $0xa0] ss:$16 sps:$4 sm:$0xff]  }
 0x754   :  { %v7281_v47 = vpop.eup %7280  ;;  %7292 = vpow2.f32 %v6486_v54  ;;  %v6984_v54 = vld [vmem:[#allocation4 + $0xa4] ss:$16 sps:$4 sm:$0xff]  }
 0x755   :  { %7294 = vrcp.f32 %v3377_v25  ;;  %v3389_v40 = vadd.f32 1.0, %v7281_v47  ;;  %v7283_v60 = vpop.eup %7282  ;;  %v6985_v25 = vld [vmem:[#allocation4 + $0xa8] ss:$16 sps:$4 sm:$0xff]   ;;  %v6990_v47 = vld [vmem:[#allocation4 + $0x84] ss:$16 sps:$4 sm:$0xff]  }
 0x756   :  { %v7285_v63 = vpop.eup %7284 }
 0x757   :  { %7296 = vrcp.f32 %v3389_v40  ;;  %v3402_v46 = vadd.f32 1.0, %v7285_v63  ;;  %v6993_v40 = vld [vmem:[#allocation4 + $0x8c] ss:$16 sps:$4 sm:$0xff]   ;;  %v6991_v63 = vld [vmem:[#allocation4 + $0x88] ss:$16 sps:$4 sm:$0xff]  }
 0x759   :  { %7298 = vrcp.f32 %v3402_v46  ;;  %v7005_v46 = vld [vmem:[#allocation4 + $0x4c] ss:$16 sps:$4 sm:$0xff]  }
 0x75e   :  { %v7287_v28 = vpop.eup %7286 }
 0x75f   :  { %v7289_v4 = vpop.eup %7288  ;;  %v3410_v21 = vmul.f32 %v7287_v28, %v7283_v60  ;;  %v6988_v60 = vld [vmem:[#allocation4 + $0x80] ss:$16 sps:$4 sm:$0xff]   ;;  %v6996_v28 = vld [vmem:[#allocation4 + $0x64] ss:$16 sps:$4 sm:$0xff]  }
 0x760   :  { %v7291_v38 = vpop.eup %7290 }
 0x761   :  { %v7293_v50 = vpop.eup %7292  ;;  %v3408_v48 = vmul.f32 %v7291_v38, %v9560_v56  ;;  %v7002_v38 = vld [vmem:[#allocation4 + $0x44] ss:$16 sps:$4 sm:$0xff]  }
 0x762   :  { %v7295_v12 = vpop.eup %7294  ;;  %v3403_v6 = vadd.f32 1.0, %v7293_v50  ;;  %v7000_v50 = vld [vmem:[#allocation4 + $0x40] ss:$16 sps:$4 sm:$0xff]  }
 0x763   :  { %v3411_v37 = vmul.f32 %v7295_v12, %v7289_v4  ;;  %v3412_v1 = vadd.f32 %v3410_v21, %v3408_v48  ;;  %v6999_v4 = vld [vmem:[#allocation4 + $0x6c] ss:$16 sps:$4 sm:$0xff]   ;;  %v6994_v21 = vld [vmem:[#allocation4 + $0x60] ss:$16 sps:$4 sm:$0xff]   ;;  %v7003_v48 = vld [vmem:[#allocation4 + $0x48] ss:$16 sps:$4 sm:$0xff]  }
 0x764   :  { %v7297_v13 = vpop.eup %7296  ;;  %v7008_v12 = vld [vmem:[#allocation4 + $0x24] ss:$16 sps:$4 sm:$0xff]  }
 0x765   :  { %v3409_v42 = vmul.f32 %v7297_v13, %v9573_v41  ;;  %7300 = vtanh.f32 %v3412_v1  ;;  %v9673_v30 = vsel %vm11288_vm13, %v3412_v1, %v9560_v56  ;;  %v7009_v1 = vld [vmem:[#allocation4 + $0x28] ss:$16 sps:$4 sm:$0xff]   ;;  %v7011_v13 = vld [vmem:[#allocation4 + $0x2c] ss:$16 sps:$4 sm:$0xff]  }
 0x766   :  { %7302 = vrcp.f32 %v3403_v6  ;;  %v7299_v19 = vpop.eup %7298  ;;  %v7014_v6 = vld [vmem:[#allocation4 + $0x4] ss:$16 sps:$4 sm:$0xff]  }
 0x767   :  { %v3413_v61 = vadd.f32 %v3411_v37, %v3409_v42  ;;  %v7006_v37 = vld [vmem:[#allocation4 + $0x20] ss:$16 sps:$4 sm:$0xff]   ;;  %v7017_v42 = vld [vmem:[#allocation4 + $0xc] ss:$16 sps:$4 sm:$0xff]  }
 0x769   :  { %7304 = vtanh.f32 %v3413_v61  ;;  %v9681_v26 = vsel %vm11287_vm14, %v3413_v61, %v9573_v41  ;;  %v7012_v61 = vld [vmem:[#allocation4] ss:$16 sps:$4 sm:$0xff]  }
 0x772   :  { %v7301_v20 = vpop.eup %7300 }
 0x773   :  { %v3416_v39 = vmul.f32 %v7301_v20, %v7299_v19  ;;  %v7303_v9 = vpop.eup %7302  ;;  %v7015_v19 = vld [vmem:[#allocation4 + $0x8] ss:$16 sps:$4 sm:$0xff]   ;;  %v9707_v20 = vld [vmem:[#allocation6 + $0xe4] ss:$16 sps:$4 sm:$0xff]  }
 0x775   :  { %v9687_v56 = vsel %vm11288_vm13, %v3416_v39, %v9579_v53  ;;  %v9710_v39 = vld [vmem:[#allocation6 + $0xec] ss:$16 sps:$4 sm:$0xff]  }
 0x776   :  { %v7305_v45 = vpop.eup %7304 }
 0x777   :  { %v3417_v5 = vmul.f32 %v7305_v45, %v7303_v9  ;;  %v11602_v45 = vld [vmem:[#allocation61_spill] sm:$0xff] }
 0x779   :  { %v9693_v10 = vsel %vm11287_vm14, %v3417_v5, %v9585_v22 }
 0x77a   :  { %v3422_v41 = vpack.c.bf16 %v9693_v10, %v9687_v56 }
 0x77c   :  { %6725 = vst [vmem:[#allocation3 + $0x30] sm:$0xff] %v3422_v41   ;;  %3665 = vmatmul.mubr.bf16.vlgmr.msra.gmra.mxu0 %v3422_v41  ;;  %3708 = vmatmul.mubr.bf16.vlgmr.msra.gmra.mxu1 %v3422_v41 }
 0x77d   :  { %4147 = vmatprep.mubr.bf16.mxu0 %v11500_v24  ;;  %4260 = vmatprep.mubr.bf16.mxu1 %v11500_v24 }
 0x77e   :  { %4116 = vmatpush1.bf16.msra.mxu0 %v6970_v3  ;;  %4229 = vmatpush1.bf16.msra.mxu1 %v6973_v49 }
 0x77f   :  { %4117 = vmatprep.subr.bf16.mxu0 %v6978_v11  ;;  %4230 = vmatprep.subr.bf16.mxu1 %v6981_v35  ;;  %v11607_v35 = vld [vmem:[#allocation65_spill] sm:$0xff] }
 0x782   :  { %4118 = vmatpush1.bf16.msra.mxu0 %v6976_v44  ;;  %4231 = vmatpush1.bf16.msra.mxu1 %v6979_v7  ;;  %v11608_v44 = vld [vmem:[#allocation64_spill] sm:$0xff] }
 0x783   :  { %v3803_v53 = vld [vmem:[#allocation3 + $0x30] sm:$0xf]  ;;  %v3804_v32 = vld [vmem:[#allocation3 + $0x34] sm:$0xf]  ;;  %4119 = vmatprep.subr.bf16.mxu0 %v6984_v54  ;;  %4232 = vmatprep.subr.bf16.mxu1 %v6987_v0  ;;  %v11609_v7 = vsel %vm8246_vm1, %v11607_v35, %v11608_v44 }
 0x784   :  { %v3805_v23 = vsel %vm9352_vm15, %v3801_v18, %v3803_v53  ;;  %v3806_v22 = vsel %vm9352_vm15, %v3802_v31, %v3804_v32  ;;  %v3809_v33 = vsel %vm9352_vm15, %v3803_v53, %v3801_v18  ;;  %v3810_v36 = vsel %vm9352_vm15, %v3804_v32, %v3802_v31  ;;  %v11603_v53 = vld [vmem:[#allocation57_spill] sm:$0xff]  ;;  %v11604_v32 = vld [vmem:[#allocation59_spill] sm:$0xff] }
 0x785   :  { %3807 = vst [vmem:[#allocation3 + $0x8] sm:$0xf] %v3805_v23  ;;  %3808 = vst [vmem:[#allocation3 + $0xc] sm:$0xf] %v3806_v22  ;;  %v11605_v23 = vsel %vm8246_vm1, %v11603_v53, %v11604_v32 }
 0x786   :  { %3811 = vst [vmem:[#allocation3 + $0x30] sm:$0xf] %v3809_v33  ;;  %3812 = vst [vmem:[#allocation3 + $0x34] sm:$0xf] %v3810_v36  ;;  %4120 = vmatpush1.bf16.msra.mxu0 %v6982_v62  ;;  %4233 = vmatpush1.bf16.msra.mxu1 %v6985_v25  ;;  %v11610_v25 = vld [vmem:[#allocation58_spill] sm:$0xff] }
 0x787   :  { %4121 = vmatprep.subr.bf16.mxu0 %v6990_v47  ;;  %4234 = vmatprep.subr.bf16.mxu1 %v6993_v40  ;;  %v11611_v47 = vld [vmem:[#allocation60_spill] sm:$0xff] }
 0x788   :  { %v11612_v40 = vsel %vm8254_vm3, %v11610_v25, %v11611_v47  ;;  %v9750_v47 = vsel %vm66_vm0, 7, %v11500_v24 }
 0x789   :  { %11622 = vst [vmem:[#allocation26_spill] sm:$0xff] %v9750_v47  ;;  %vm167_vm14 = vcmp.lt.s32.totalorder %v9750_v47, %v9551_v8  ;;  %vm168_vm13 = vcmp.lt.s32.totalorder %v9750_v47, %v9565_v2 }
 0x78a   :  { %4122 = vmatpush1.bf16.msra.mxu0 %v6988_v60  ;;  %4235 = vmatpush1.bf16.msra.mxu1 %v6991_v63 }
 0x78b   :  { %4123 = vmatprep.subr.bf16.mxu0 %v6996_v28  ;;  %4236 = vmatprep.subr.bf16.mxu1 %v6999_v4  ;;  %v11613_v28 = vld [vmem:[#allocation55_spill] sm:$0xff]  ;;  %v11614_v4 = vld [vmem:[#allocation56_spill] sm:$0xff] }
 0x78e   :  { %4124 = vmatpush1.bf16.msra.mxu0 %v6994_v21  ;;  %4237 = vmatpush1.bf16.msra.mxu1 %v6997_v29  ;;  %v11615_v21 = vsel %vm8250_vm2, %v11613_v28, %v11614_v4 }
 0x78f   :  { %4125 = vmatprep.subr.bf16.mxu0 %v7002_v38  ;;  %4238 = vmatprep.subr.bf16.mxu1 %v7005_v46  ;;  %v11616_v46 = vld [vmem:[#allocation66_spill] sm:$0xff] }
 0x792   :  { %4126 = vmatpush1.bf16.msra.mxu0 %v7000_v50  ;;  %4239 = vmatpush1.bf16.msra.mxu1 %v7003_v48  ;;  %v11617_v50 = vld [vmem:[#allocation67_spill] sm:$0xff] }
 0x793   :  { %4127 = vmatprep.subr.bf16.mxu0 %v7008_v12  ;;  %4240 = vmatprep.subr.bf16.mxu1 %v7011_v13  ;;  %v11618_v48 = vsel %vm8254_vm3, %v11616_v46, %v11617_v50  ;;  %v11620_v13 = vld [vmem:[#allocation63_spill] sm:$0xff] }
 0x796   :  { %4128 = vmatpush1.bf16.msra.mxu0 %v7006_v37  ;;  %4241 = vmatpush1.bf16.msra.mxu1 %v7009_v1  ;;  %v11619_v1 = vld [vmem:[#allocation62_spill] sm:$0xff] }
 0x797   :  { %4129 = vmatprep.subr.bf16.mxu0 %v7014_v6  ;;  %4242 = vmatprep.subr.bf16.mxu1 %v7017_v42  ;;  %v11621_v6 = vsel %vm8250_vm2, %v11619_v1, %v11620_v13  ;;  %v9776_v13 = vld [vmem:[#allocation6 + $0xe8] ss:$16 sps:$4 sm:$0xff]  }
 0x79a   :  { %4130 = vmatpush1.bf16.msra.mxu0 %v7012_v61  ;;  %4243 = vmatpush1.bf16.msra.mxu1 %v7015_v19 }
 0x79b   :  { %4797 = vmatprep.subr.bf16.mxu0 %v9707_v20  ;;  %4840 = vmatprep.subr.bf16.mxu1 %v9710_v39 }
 0x83c   :  { %v3666_v9 = vpop.f32.mrf.mxu0  ;;  %v3709_v41 = vpop.f32.mrf.mxu1 }
 0x83d   :  { %v3718_v5 = vadd.f32 %v3666_v9, %v11602_v45  ;;  %v3720_v29 = vadd.f32 %v3709_v41, %v11615_v21  ;;  %v3786_v21 = vld [vmem:[#allocation3] sm:$0xf] }
 0x83e   :  { %v3668_v18 = vpop.f32.mrf.mxu0  ;;  %v3711_v51 = vpop.f32.mrf.mxu1 }
 0x83f   :  { %v6521_v31 = vmul.f32 -1.442695, %v3718_v5  ;;  %v3719_v22 = vadd.f32 %v3668_v18, %v11605_v23  ;;  %v3721_v60 = vadd.f32 %v3711_v51, %v11612_v40 }
 0x840   :  { %v3670_v33 = vpop.f32.mrf.mxu0  ;;  %v3713_v0 = vpop.f32.mrf.mxu1 }
 0x841   :  { %7306 = vpow2.f32 %v6521_v31  ;;  %v6523_v36 = vmul.f32 -1.442695, %v3719_v22  ;;  %v3722_v3 = vadd.f32 %v3670_v33, %v11606_v34  ;;  %v6525_v38 = vmul.f32 -1.442695, %v3721_v60 }
 0x842   :  { %v3672_v49 = vpop.f32.mrf.mxu0  ;;  %v3715_v63 = vpop.f32.mrf.mxu1  ;;  %v3724_v42 = vadd.f32 %v3713_v0, %v11621_v6  ;;  %v9778_v6 = vld [vmem:[#allocation6 + $0xcc] ss:$16 sps:$4 sm:$0xff]  }
 0x843   :  { %7308 = vpow2.f32 %v6523_v36  ;;  %v6522_v11 = vmul.f32 -1.442695, %v3722_v3  ;;  %v3723_v54 = vadd.f32 %v3672_v49, %v11609_v7  ;;  %v3725_v12 = vadd.f32 %v3715_v63, %v11618_v48 }
 0x845   :  { %7310 = vpow2.f32 %v6522_v11  ;;  %v6524_v62 = vmul.f32 -1.442695, %v3723_v54  ;;  %v6526_v9 = vmul.f32 -1.442695, %v3725_v12 }
 0x847   :  { %7312 = vpow2.f32 %v6524_v62 }
 0x848   :  { %7314 = vtanh.f32 %v3720_v29  ;;  %v3787_v29 = vld [vmem:[#allocation3 + $0x4] sm:$0xf] }
 0x849   :  { %7316 = vpow2.f32 %v6525_v38 }
 0x84e   :  { %v7307_v37 = vpop.eup %7306 }
 0x84f   :  { %v3732_v61 = vadd.f32 1.0, %v7307_v37  ;;  %v9774_v37 = vld [vmem:[#allocation6 + $0xc4] ss:$16 sps:$4 sm:$0xff]  }
 0x850   :  { %v7309_v19 = vpop.eup %7308 }
 0x851   :  { %7318 = vrcp.f32 %v3732_v61  ;;  %v3744_v45 = vadd.f32 1.0, %v7309_v19  ;;  %v9789_v61 = vld [vmem:[#allocation6 + $0xc8] ss:$16 sps:$4 sm:$0xff]  }
 0x852   :  { %v7311_v5 = vpop.eup %7310  ;;  %7320 = vtanh.f32 %v3724_v42  ;;  %v9786_v42 = vld [vmem:[#allocation6 + $0xa4] ss:$16 sps:$4 sm:$0xff]   ;;  %v7022_v19 = vld [vmem:[#allocation3 + $0x8] sm:$0xff]  }
 0x853   :  { %7322 = vrcp.f32 %v3744_v45  ;;  %v3733_v41 = vadd.f32 1.0, %v7311_v5  ;;  %v9796_v45 = vld [vmem:[#allocation6 + $0xac] ss:$16 sps:$4 sm:$0xff]   ;;  %v9798_v5 = vld [vmem:[#allocation6 + $0x84] ss:$16 sps:$4 sm:$0xff]  }
 0x854   :  { %v7313_v18 = vpop.eup %7312  ;;  %7324 = vpow2.f32 %v6526_v9  ;;  %v9794_v9 = vld [vmem:[#allocation6 + $0xa0] ss:$16 sps:$4 sm:$0xff]  }
 0x855   :  { %7326 = vrcp.f32 %v3733_v41  ;;  %v3745_v31 = vadd.f32 1.0, %v7313_v18  ;;  %v7315_v53 = vpop.eup %7314  ;;  %v9801_v41 = vld [vmem:[#allocation6 + $0xa8] ss:$16 sps:$4 sm:$0xff]   ;;  %v9803_v18 = vld [vmem:[#allocation6 + $0x8c] ss:$16 sps:$4 sm:$0xff]  }
 0x856   :  { %v7317_v32 = vpop.eup %7316 }
 0x857   :  { %7328 = vrcp.f32 %v3745_v31  ;;  %v3758_v51 = vadd.f32 1.0, %v7317_v32  ;;  %v9808_v31 = vld [vmem:[#allocation6 + $0x80] ss:$16 sps:$4 sm:$0xff]   ;;  %v9815_v32 = vld [vmem:[#allocation6 + $0x88] ss:$16 sps:$4 sm:$0xff]  }
 0x858   :  { %11623 = vst [vmem:[#allocation20_spill] sm:$0xff] %v9808_v31  ;;  %11625 = vst [vmem:[#allocation32_spill] sm:$0xff] %v9815_v32 }
 0x859   :  { %7330 = vrcp.f32 %v3758_v51  ;;  %v9827_v51 = vld [vmem:[#allocation6 + $0x68] ss:$16 sps:$4 sm:$0xff]  }
 0x85a   :  { %11629 = vst [vmem:[#allocation25_spill] sm:$0xff] %v9827_v51 }
 0x85e   :  { %v7319_v23 = vpop.eup %7318 }
 0x85f   :  { %v7321_v22 = vpop.eup %7320  ;;  %v3766_v33 = vmul.f32 %v7319_v23, %v7315_v53  ;;  %v9812_v53 = vld [vmem:[#allocation6 + $0x64] ss:$16 sps:$4 sm:$0xff]  }
 0x860   :  { %v7323_v36 = vpop.eup %7322  ;;  %11624 = vst [vmem:[#allocation24_spill] sm:$0xff] %v9812_v53  ;;  %v7026_v23 = vld [vmem:[#allocation3 + $0x10] sm:$0xff]  }
 0x861   :  { %v7325_v34 = vpop.eup %7324  ;;  %v3764_v3 = vmul.f32 %v7323_v36, %v9673_v30  ;;  %v9824_v36 = vld [vmem:[#allocation6 + $0x44] ss:$16 sps:$4 sm:$0xff]  }
 0x862   :  { %v7327_v49 = vpop.eup %7326  ;;  %v3759_v7 = vadd.f32 1.0, %v7325_v34  ;;  %11628 = vst [vmem:[#allocation21_spill] sm:$0xff] %v9824_v36  ;;  %v9829_v34 = vld [vmem:[#allocation6 + $0x4c] ss:$16 sps:$4 sm:$0xff]  }
 0x863   :  { %v3768_v11 = vadd.f32 %v3766_v33, %v3764_v3  ;;  %v3767_v35 = vmul.f32 %v7327_v49, %v7321_v22  ;;  %v9819_v22 = vld [vmem:[#allocation6 + $0x60] ss:$16 sps:$4 sm:$0xff]   ;;  %v9821_v33 = vld [vmem:[#allocation6 + $0x6c] ss:$16 sps:$4 sm:$0xff]   ;;  %11630 = vst [vmem:[#allocation19_spill] sm:$0xff] %v9829_v34 }
 0x864   :  { %v7329_v44 = vpop.eup %7328  ;;  %11626 = vst [vmem:[#allocation30_spill] sm:$0xff] %v9819_v22  ;;  %11627 = vst [vmem:[#allocation33_spill] sm:$0xff] %v9821_v33  ;;  %v9834_v3 = vld [vmem:[#allocation6 + $0x40] ss:$16 sps:$4 sm:$0xff]   ;;  %v9838_v49 = vld [vmem:[#allocation6 + $0x24] ss:$16 sps:$4 sm:$0xff]  }
 0x865   :  { %7332 = vtanh.f32 %v3768_v11  ;;  %v3765_v54 = vmul.f32 %v7329_v44, %v9681_v26  ;;  %11631 = vst [vmem:[#allocation23_spill] sm:$0xff] %v9834_v3  ;;  %11632 = vst [vmem:[#allocation27_spill] sm:$0xff] %v9838_v49  ;;  %v9841_v11 = vld [vmem:[#allocation6 + $0x48] ss:$16 sps:$4 sm:$0xff]   ;;  %v9845_v44 = vld [vmem:[#allocation6 + $0x20] ss:$16 sps:$4 sm:$0xff]  }
 0x866   :  { %7334 = vrcp.f32 %v3759_v7  ;;  %v7331_v62 = vpop.eup %7330  ;;  %11633 = vst [vmem:[#allocation31_spill] sm:$0xff] %v9841_v11  ;;  %11634 = vst [vmem:[#allocation22_spill] sm:$0xff] %v9845_v44  ;;  %v9847_v7 = vld [vmem:[#allocation6 + $0x2c] ss:$16 sps:$4 sm:$0xff]  }
 0x867   :  { %v3769_v0 = vadd.f32 %v3767_v35, %v3765_v54  ;;  %v7033_v35 = vld [vmem:[#allocation3 + $0x18] sm:$0xff]   ;;  %11635 = vst [vmem:[#allocation29_spill] sm:$0xff] %v9847_v7  ;;  %v9851_v54 = vld [vmem:[#allocation6 + $0x4] ss:$16 sps:$4 sm:$0xff]  }
 0x868   :  { %11636 = vst [vmem:[#allocation28_spill] sm:$0xff] %v9851_v54 }
 0x869   :  { %7336 = vtanh.f32 %v3769_v0  ;;  %v9853_v0 = vld [vmem:[#allocation6 + $0x28] ss:$16 sps:$4 sm:$0xff]  }
 0x86a   :  { %11637 = vst [vmem:[#allocation34_spill] sm:$0xff] %v9853_v0 }
 0x872   :  { %v7333_v25 = vpop.eup %7332 }
 0x873   :  { %v3772_v30 = vmul.f32 %v7333_v25, %v7331_v62  ;;  %v7335_v40 = vpop.eup %7334  ;;  %v9855_v62 = vld [vmem:[#allocation6 + $0xc] ss:$16 sps:$4 sm:$0xff]   ;;  %v9861_v25 = vld [vmem:[#allocation6] ss:$16 sps:$4 sm:$0xff]  }
 0x874   :  { %11638 = vst [vmem:[#allocation38_spill] sm:$0xff] %v9855_v62  ;;  %11639 = vst [vmem:[#allocation36_spill] sm:$0xff] %v9861_v25 }
 0x875   :  { %v3774_v63 = vsel %vm167_vm14, %v3772_v30, %v9687_v56  ;;  %v9865_v30 = vld [vmem:[#allocation6 + $0x8] ss:$16 sps:$4 sm:$0xff]  }
 0x876   :  { %v7337_v60 = vpop.eup %7336  ;;  %11640 = vst [vmem:[#allocation16_spill] sm:$0xff] %v9865_v30 }
 0x877   :  { %v3773_v26 = vmul.f32 %v7337_v60, %v7335_v40  ;;  %v7040_v40 = vld [vmem:[#allocation3 + $0x20] sm:$0xff]   ;;  %v7047_v60 = vld [vmem:[#allocation3 + $0x28] sm:$0xff]  }
 0x879   :  { %v3775_v28 = vsel %vm168_vm13, %v3773_v26, %v9693_v10  ;;  %v9772_v10 = vld [vmem:[#allocation6 + $0xe0] ss:$16 sps:$4 sm:$0xff]  }
 0x87a   :  { %v6718_v4 = vpack.c.bf16 %v3775_v28, %v3774_v63  ;;  %v7054_v26 = vld [vmem:[#allocation3 + $0x30] sm:$0xff]  }
 0x87c   :  { %6726 = vst [vmem:[#allocation3 + $0x38] sm:$0xff] %v6718_v4  }
 0x883   :  { %v3788_v38 = vld [vmem:[#allocation3 + $0x38] sm:$0xf]  ;;  %v3789_v46 = vld [vmem:[#allocation3 + $0x3c] sm:$0xf] }
 0x884   :  { %v3793_v50 = vsel %vm9352_vm15, %v3786_v21, %v3788_v38  ;;  %v3794_v48 = vsel %vm9352_vm15, %v3787_v29, %v3789_v46  ;;  %v3797_v56 = vsel %vm9352_vm15, %v3788_v38, %v3786_v21  ;;  %v3798_v12 = vsel %vm9352_vm15, %v3789_v46, %v3787_v29  ;;  %v3885_v38 = vld [vmem:[%s11189_s7] sm:$0xf] }
 0x885   :  { %3799 = vst [vmem:[#allocation3 + $0x38] sm:$0xf] %v3797_v56  ;;  %3800 = vst [vmem:[#allocation3 + $0x3c] sm:$0xf] %v3798_v12 }
 0x886   :  { %3795 = vst [vmem:[#allocation3] sm:$0xf] %v3793_v50  ;;  %3796 = vst [vmem:[#allocation3 + $0x4] sm:$0xf] %v3794_v48 }
 0x88c   :  { %v7064_v63 = vld [vmem:[#allocation3 + $0x38] sm:$0xff]  }
 0x88d   :  { %v7018_v1 = vld [vmem:[#allocation3] sm:$0xff]  }
 0x88e   :  { %4148 = vmatmul.mubr.bf16.vlgmr.msra.gmra.mxu0 %v7018_v1  ;;  %4261 = vmatmul.mubr.bf16.vlgmr.msra.gmra.mxu1 %v7018_v1 }
 0x88f   :  { %4798 = vmatpush1.bf16.msra.mxu0 %v9772_v10  ;;  %4157 = vmatprep.mubr.bf16.mxu0 %v11500_v24 }
 0x890   :  { %4270 = vmatprep.mubr.bf16.mxu1 %v11500_v24  ;;  %4799 = vmatprep.subr.bf16.mxu0 %v9774_v37 }
 0x891   :  { %4841 = vmatpush1.bf16.msra.mxu1 %v9776_v13 }
 0x892   :  { %4842 = vmatprep.subr.bf16.mxu1 %v9778_v6 }
 0x893   :  { %4800 = vmatpush1.bf16.msra.mxu0 %v9782_v27 }
 0x894   :  { %4801 = vmatprep.subr.bf16.mxu0 %v9786_v42 }
 0x895   :  { %4843 = vmatpush1.bf16.msra.mxu1 %v9789_v61 }
 0x896   :  { %4158 = vmatmul.mubr.bf16.gmra.mxu0 %v7022_v19  ;;  %4271 = vmatmul.mubr.bf16.gmra.mxu1 %v7022_v19 }
 0x897   :  { %4167 = vmatprep.mubr.bf16.mxu0 %v11500_v24  ;;  %4280 = vmatprep.mubr.bf16.mxu1 %v11500_v24 }
 0x898   :  { %4802 = vmatpush1.bf16.msra.mxu0 %v9794_v9  ;;  %4844 = vmatprep.subr.bf16.mxu1 %v9796_v45 }
 0x899   :  { %4803 = vmatprep.subr.bf16.mxu0 %v9798_v5  ;;  %4845 = vmatpush1.bf16.msra.mxu1 %v9801_v41 }
 0x89a   :  { %4846 = vmatprep.subr.bf16.mxu1 %v9803_v18 }
 0x89c   :  { %4804 = vmatpush1.bf16.msra.mxu0 %v9808_v31 }
 0x89d   :  { %4805 = vmatprep.subr.bf16.mxu0 %v9812_v53  ;;  %4847 = vmatpush1.bf16.msra.mxu1 %v9815_v32 }
 0x89e   :  { %4168 = vmatmul.mubr.bf16.gmra.mxu0 %v7026_v23  ;;  %4281 = vmatmul.mubr.bf16.gmra.mxu1 %v7026_v23 }
 0x89f   :  { %4177 = vmatprep.mubr.bf16.mxu0 %v11500_v24  ;;  %4290 = vmatprep.mubr.bf16.mxu1 %v11500_v24 }
 0x8a0   :  { %4806 = vmatpush1.bf16.msra.mxu0 %v9819_v22  ;;  %4848 = vmatprep.subr.bf16.mxu1 %v9821_v33 }
 0x8a1   :  { %4807 = vmatprep.subr.bf16.mxu0 %v9824_v36  ;;  %4849 = vmatpush1.bf16.msra.mxu1 %v9827_v51 }
 0x8a2   :  { %4850 = vmatprep.subr.bf16.mxu1 %v9829_v34 }
 0x8a4   :  { %4808 = vmatpush1.bf16.msra.mxu0 %v9834_v3 }
 0x8a5   :  { %4809 = vmatprep.subr.bf16.mxu0 %v9838_v49  ;;  %4851 = vmatpush1.bf16.msra.mxu1 %v9841_v11 }
 0x8a6   :  { %4178 = vmatmul.mubr.bf16.gmra.mxu0 %v7033_v35  ;;  %4291 = vmatmul.mubr.bf16.gmra.mxu1 %v7033_v35 }
 0x8a7   :  { %4187 = vmatprep.mubr.bf16.mxu0 %v11500_v24  ;;  %4300 = vmatprep.mubr.bf16.mxu1 %v11500_v24 }
 0x8a8   :  { %4810 = vmatpush1.bf16.msra.mxu0 %v9845_v44  ;;  %4852 = vmatprep.subr.bf16.mxu1 %v9847_v7 }
 0x8a9   :  { %4811 = vmatprep.subr.bf16.mxu0 %v9851_v54  ;;  %4853 = vmatpush1.bf16.msra.mxu1 %v9853_v0 }
 0x8aa   :  { %4854 = vmatprep.subr.bf16.mxu1 %v9855_v62 }
 0x8ac   :  { %4812 = vmatpush1.bf16.msra.mxu0 %v9861_v25 }
 0x8ad   :  { %4855 = vmatpush1.bf16.msra.mxu1 %v9865_v30  ;;  %4954 = vmatprep.subr.bf16.mxu0 %v9707_v20 }
 0x8ae   :  { %4188 = vmatmul.mubr.bf16.gmra.mxu0 %v7040_v40  ;;  %4301 = vmatmul.mubr.bf16.gmra.mxu1 %v7040_v40 }
 0x8af   :  { %4197 = vmatprep.mubr.bf16.mxu0 %v11500_v24  ;;  %4310 = vmatprep.mubr.bf16.mxu1 %v11500_v24 }
 0x8b0   :  { %4997 = vmatprep.subr.bf16.mxu1 %v9710_v39 }
 0x8b6   :  { %4198 = vmatmul.mubr.bf16.gmra.mxu0 %v7047_v60  ;;  %4311 = vmatmul.mubr.bf16.gmra.mxu1 %v7047_v60 }
 0x8b7   :  { %4207 = vmatprep.mubr.bf16.mxu0 %v11500_v24  ;;  %4320 = vmatprep.mubr.bf16.mxu1 %v11500_v24 }
 0x8be   :  { %4208 = vmatmul.mubr.bf16.gmra.mxu0 %v7054_v26  ;;  %4321 = vmatmul.mubr.bf16.gmra.mxu1 %v7054_v26 }
 0x8bf   :  { %4217 = vmatprep.mubr.bf16.mxu0 %v11500_v24  ;;  %4330 = vmatprep.mubr.bf16.mxu1 %v11500_v24 }
 0x8c6   :  { %4218 = vmatmul.mubr.bf16.gmra.mxu0 %v7064_v63  ;;  %4331 = vmatmul.mubr.bf16.gmra.mxu1 %v7064_v63 }
 0x8c7   :  { %4829 = vmatprep.mubr.bf16.mxu0 %v11500_v24  ;;  %4872 = vmatprep.mubr.bf16.mxu1 %v11500_v24 }
 0x8ce   :  { %4830 = vmatmul.mubr.bf16.vlgmr.msra.gmra.mxu0 %v11500_v24  ;;  %4873 = vmatmul.mubr.bf16.vlgmr.msra.gmra.mxu1 %v11500_v24 }
 0x8cf   :  { %4955 = vmatpush1.bf16.msra.mxu0 %v9772_v10  ;;  %4998 = vmatpush1.bf16.msra.mxu1 %v9776_v13 }
 0x8d0   :  { %4956 = vmatprep.subr.bf16.mxu0 %v9774_v37  ;;  %4999 = vmatprep.subr.bf16.mxu1 %v9778_v6 }
 0x8d1   :  { %4986 = vmatprep.mubr.bf16.mxu0 %v11500_v24  ;;  %5029 = vmatprep.mubr.bf16.mxu1 %v11500_v24 }
 0x8d3   :  { %4957 = vmatpush1.bf16.msra.mxu0 %v9782_v27  ;;  %5000 = vmatpush1.bf16.msra.mxu1 %v9789_v61 }
 0x8d4   :  { %4958 = vmatprep.subr.bf16.mxu0 %v9786_v42  ;;  %5001 = vmatprep.subr.bf16.mxu1 %v9796_v45 }
 0x8d7   :  { %4959 = vmatpush1.bf16.msra.mxu0 %v9794_v9  ;;  %5002 = vmatpush1.bf16.msra.mxu1 %v9801_v41 }
 0x8d8   :  { %4960 = vmatprep.subr.bf16.mxu0 %v9798_v5  ;;  %5003 = vmatprep.subr.bf16.mxu1 %v9803_v18 }
 0x8db   :  { %4961 = vmatpush1.bf16.msra.mxu0 %v9808_v31  ;;  %5004 = vmatpush1.bf16.msra.mxu1 %v9815_v32 }
 0x8dc   :  { %4962 = vmatprep.subr.bf16.mxu0 %v9812_v53  ;;  %5005 = vmatprep.subr.bf16.mxu1 %v9821_v33 }
 0x8df   :  { %4963 = vmatpush1.bf16.msra.mxu0 %v9819_v22  ;;  %5006 = vmatpush1.bf16.msra.mxu1 %v9827_v51 }
 0x8e0   :  { %4964 = vmatprep.subr.bf16.mxu0 %v9824_v36  ;;  %5007 = vmatprep.subr.bf16.mxu1 %v9829_v34 }
 0x8e3   :  { %4965 = vmatpush1.bf16.msra.mxu0 %v9834_v3  ;;  %5008 = vmatpush1.bf16.msra.mxu1 %v9841_v11 }
 0x8e4   :  { %4966 = vmatprep.subr.bf16.mxu0 %v9838_v49  ;;  %5009 = vmatprep.subr.bf16.mxu1 %v9847_v7 }
 0x8e7   :  { %4967 = vmatpush1.bf16.msra.mxu0 %v9845_v44  ;;  %5010 = vmatpush1.bf16.msra.mxu1 %v9853_v0 }
 0x8e8   :  { %4968 = vmatprep.subr.bf16.mxu0 %v9851_v54  ;;  %5011 = vmatprep.subr.bf16.mxu1 %v9855_v62 }
 0x8eb   :  { %4969 = vmatpush1.bf16.msra.mxu0 %v9861_v25  ;;  %5012 = vmatpush1.bf16.msra.mxu1 %v9865_v30 }
 0x8ec   :  { %5111 = vmatprep.subr.bf16.mxu0 %v9707_v20  ;;  %5154 = vmatprep.subr.bf16.mxu1 %v9710_v39  ;;  %v11641_v39 = vld [vmem:[#allocation10_spill] sm:$0xff] }
 0x8ed   :  { %v11642_v56 = vsub.s32 0, %v11641_v39  ;;  %v11643_v1 = vsub.s32 2, %v11641_v39  ;;  %v11644_v40 = vsub.s32 1, %v11641_v39  ;;  %v11645_v26 = vsub.s32 3, %v11641_v39 }
 0x8ef   :  { %v9937_v12 = vrot.slane %v3885_v38, %v11642_v56  ;;  %v9941_v19 = vrot.slane %v3885_v38, %v11643_v1  ;;  %v9945_v60 = vrot.slane %v3885_v38, %v11644_v40  ;;  %v9949_v63 = vrot.slane %v3885_v38, %v11645_v26 }
 0x94e   :  { %v9916_v28 = vpop.f32.mrf.mxu0  ;;  %v9918_v4 = vpop.f32.mrf.mxu1 }
 0x950   :  { %v9920_v21 = vpop.f32.mrf.mxu0  ;;  %v9922_v29 = vpop.f32.mrf.mxu1 }
 0x952   :  { %v9927_v46 = vpop.f32.mrf.mxu0  ;;  %v9929_v50 = vpop.f32.mrf.mxu1 }
 0x954   :  { %v9931_v48 = vpop.f32.mrf.mxu0  ;;  %v9933_v20 = vpop.f32.mrf.mxu1 }
 0x956   :  { %v4159_v23 = vpop.f32.mrf.mxu0  ;;  %v4272_v35 = vpop.f32.mrf.mxu1 }
 0x957   :  { %v9952_v47 = vadd.f32 %v4159_v23, %v9937_v12  ;;  %v9955_v56 = vadd.f32 %v4272_v35, %v9941_v19 }
 0x958   :  { %v4161_v43 = vpop.f32.mrf.mxu0  ;;  %v4274_v2 = vpop.f32.mrf.mxu1 }
 0x959   :  { %11646 = vst [vmem:[#allocation44_spill] sm:$0xff] %v9955_v56  ;;  %v9958_v1 = vadd.f32 %v4161_v43, %v9945_v60  ;;  %v9961_v8 = vadd.f32 %v4274_v2, %v9949_v63 }
 0x95a   :  { %v4163_v40 = vpop.f32.mrf.mxu0  ;;  %v4276_v55 = vpop.f32.mrf.mxu1 }
 0x95b   :  { %11647 = vst [vmem:[#allocation42_spill] sm:$0xff] %v9958_v1  ;;  %11648 = vst [vmem:[#allocation40_spill] sm:$0xff] %v9961_v8  ;;  %v9964_v39 = vadd.f32 %v4163_v40, %v9937_v12  ;;  %v9967_v38 = vadd.f32 %v4276_v55, %v9941_v19 }
 0x95c   :  { %v4165_v23 = vpop.f32.mrf.mxu0  ;;  %v4278_v26 = vpop.f32.mrf.mxu1 }
 0x95d   :  { %11649 = vst [vmem:[#allocation37_spill] sm:$0xff] %v9967_v38  ;;  %v9970_v35 = vadd.f32 %v4165_v23, %v9945_v60  ;;  %v9973_v14 = vadd.f32 %v4278_v26, %v9949_v63 }
 0x95e   :  { %v4169_v43 = vpop.f32.mrf.mxu0  ;;  %v4282_v16 = vpop.f32.mrf.mxu1 }
 0x95f   :  { %11650 = vst [vmem:[#allocation17_spill] sm:$0xff] %v9970_v35  ;;  %11651 = vst [vmem:[#allocation35_spill] sm:$0xff] %v9973_v14  ;;  %v9976_v2 = vadd.f32 %v4169_v43, %v9937_v12  ;;  %v9979_v17 = vadd.f32 %v4282_v16, %v9941_v19 }
 0x960   :  { %v4171_v40 = vpop.f32.mrf.mxu0  ;;  %v4284_v15 = vpop.f32.mrf.mxu1 }
 0x961   :  { %11652 = vst [vmem:[#allocation15_spill] sm:$0xff] %v9979_v17  ;;  %v9982_v55 = vadd.f32 %v4171_v40, %v9945_v60  ;;  %v9985_v30 = vadd.f32 %v4284_v15, %v9949_v63 }
 0x962   :  { %v4173_v23 = vpop.f32.mrf.mxu0  ;;  %v4286_v25 = vpop.f32.mrf.mxu1 }
 0x963   :  { %11653 = vst [vmem:[#allocation43_spill] sm:$0xff] %v9982_v55  ;;  %11654 = vst [vmem:[#allocation41_spill] sm:$0xff] %v9985_v30  ;;  %v9988_v26 = vadd.f32 %v4173_v23, %v9937_v12  ;;  %v9991_v62 = vadd.f32 %v4286_v25, %v9941_v19 }
 0x964   :  { %v4175_v43 = vpop.f32.mrf.mxu0  ;;  %v4288_v54 = vpop.f32.mrf.mxu1 }
 0x965   :  { %11655 = vst [vmem:[#allocation39_spill] sm:$0xff] %v9991_v62  ;;  %v9994_v16 = vadd.f32 %v4175_v43, %v9945_v60  ;;  %v9997_v0 = vadd.f32 %v4288_v54, %v9949_v63 }
 0x966   :  { %v4179_v40 = vpop.f32.mrf.mxu0  ;;  %v4292_v44 = vpop.f32.mrf.mxu1 }
 0x967   :  { %11656 = vst [vmem:[#allocation18_spill] sm:$0xff] %v9994_v16  ;;  %11657 = vst [vmem:[#allocation48_spill] sm:$0xff] %v9997_v0  ;;  %v4180_v15 = vadd.f32 %v4179_v40, %v9937_v12  ;;  %v10001_v7 = vadd.f32 %v4292_v44, %v9941_v19 }
 0x968   :  { %v4181_v23 = vpop.f32.mrf.mxu0  ;;  %v4294_v49 = vpop.f32.mrf.mxu1 }
 0x969   :  { %11658 = vst [vmem:[#allocation46_spill] sm:$0xff] %v10001_v7  ;;  %v10004_v25 = vadd.f32 %v4181_v23, %v9945_v60  ;;  %v10007_v11 = vadd.f32 %v4294_v49, %v9949_v63 }
 0x96a   :  { %v4183_v43 = vpop.f32.mrf.mxu0  ;;  %v4296_v3 = vpop.f32.mrf.mxu1 }
 0x96b   :  { %11659 = vst [vmem:[#allocation12_spill] sm:$0xff] %v10004_v25  ;;  %11660 = vst [vmem:[#allocation54_spill] sm:$0xff] %v10007_v11  ;;  %v4184_v54 = vadd.f32 %v4183_v43, %v9937_v12  ;;  %v10011_v34 = vadd.f32 %v4296_v3, %v9941_v19 }
 0x96c   :  { %v4185_v36 = vpop.f32.mrf.mxu0  ;;  %v4298_v40 = vpop.f32.mrf.mxu1 }
 0x96d   :  { %11661 = vst [vmem:[#allocation52_spill] sm:$0xff] %v10011_v34  ;;  %v10014_v44 = vadd.f32 %v4185_v36, %v9945_v60  ;;  %v10017_v51 = vadd.f32 %v4298_v40, %v9949_v63 }
 0x96e   :  { %v4189_v23 = vpop.f32.mrf.mxu0  ;;  %v4302_v22 = vpop.f32.mrf.mxu1 }
 0x96f   :  { %11662 = vst [vmem:[#allocation50_spill] sm:$0xff] %v10014_v44  ;;  %11663 = vst [vmem:[#allocation47_spill] sm:$0xff] %v10017_v51  ;;  %v4190_v49 = vadd.f32 %v4189_v23, %v9937_v12  ;;  %v10021_v33 = vadd.f32 %v4302_v22, %v9941_v19 }
 0x970   :  { %v4191_v53 = vpop.f32.mrf.mxu0  ;;  %v4304_v43 = vpop.f32.mrf.mxu1 }
 0x971   :  { %11664 = vst [vmem:[#allocation13_spill] sm:$0xff] %v10021_v33  ;;  %v10024_v3 = vadd.f32 %v4191_v53, %v9945_v60  ;;  %v10027_v32 = vadd.f32 %v4304_v43, %v9949_v63  ;;  %v10031_v36 = vsel %vm66_vm0, %v4180_v15, %v4190_v49  ;;  %v10039_v31 = vsel %vm66_vm0, %v4190_v49, %v4180_v15 }
 0x972   :  { %11667 = vst [vmem:[#allocation53_spill] sm:$0xff] %v10031_v36  ;;  %v4193_v23 = vpop.f32.mrf.mxu0  ;;  %v4306_v22 = vpop.f32.mrf.mxu1  ;;  %11668 = vst [vmem:[#allocation51_spill] sm:$0xff] %v10039_v31 }
 0x973   :  { %11665 = vst [vmem:[#allocation45_spill] sm:$0xff] %v10024_v3  ;;  %11666 = vst [vmem:[#allocation11_spill] sm:$0xff] %v10027_v32  ;;  %v4194_v43 = vadd.f32 %v4193_v23, %v9937_v12  ;;  %v10047_v36 = vadd.f32 %v4306_v22, %v9941_v19 }
 0x974   :  { %v4195_v49 = vpop.f32.mrf.mxu0  ;;  %v4308_v31 = vpop.f32.mrf.mxu1 }
 0x975   :  { %11669 = vst [vmem:[#allocation49_spill] sm:$0xff] %v10047_v36  ;;  %v10066_v53 = vadd.f32 %v4195_v49, %v9945_v60  ;;  %v10069_v40 = vadd.f32 %v4308_v31, %v9949_v63  ;;  %v10073_v15 = vsel %vm66_vm0, %v4184_v54, %v4194_v43  ;;  %v10081_v22 = vsel %vm66_vm0, %v4194_v43, %v4184_v54 }
 0x976   :  { %11672 = vst [vmem:[#allocation57_spill] sm:$0xff] %v10073_v15  ;;  %v4199_v33 = vpop.f32.mrf.mxu0  ;;  %v4312_v7 = vpop.f32.mrf.mxu1  ;;  %11673 = vst [vmem:[#allocation59_spill] sm:$0xff] %v10081_v22 }
 0x977   :  { %11670 = vst [vmem:[#allocation14_spill] sm:$0xff] %v10066_v53  ;;  %11671 = vst [vmem:[#allocation61_spill] sm:$0xff] %v10069_v40  ;;  %v4200_v49 = vadd.f32 %v4199_v33, %v9937_v12  ;;  %v10089_v32 = vadd.f32 %v4312_v7, %v9941_v19 }
 0x978   :  { %v4201_v43 = vpop.f32.mrf.mxu0  ;;  %v4314_v22 = vpop.f32.mrf.mxu1 }
 0x979   :  { %11674 = vst [vmem:[#allocation68_spill] sm:$0xff] %v10089_v32  ;;  %v10108_v31 = vadd.f32 %v4201_v43, %v9945_v60  ;;  %v10111_v23 = vadd.f32 %v4314_v22, %v9949_v63  ;;  %v10116_v54 = vsel %vm66_vm0, %v9976_v2, %v4200_v49  ;;  %v10125_v43 = vsel %vm66_vm0, %v4200_v49, %v9976_v2 }
 0x97a   :  { %v4203_v36 = vpop.f32.mrf.mxu0  ;;  %v4316_v34 = vpop.f32.mrf.mxu1  ;;  %11677 = vst [vmem:[#allocation58_spill] sm:$0xff] %v10125_v43 }
 0x97b   :  { %11675 = vst [vmem:[#allocation65_spill] sm:$0xff] %v10108_v31  ;;  %11676 = vst [vmem:[#allocation64_spill] sm:$0xff] %v10111_v23  ;;  %v4204_v7 = vadd.f32 %v4203_v36, %v9937_v12  ;;  %v10133_v40 = vadd.f32 %v4316_v34, %v9941_v19 }
 0x97c   :  { %v4205_v49 = vpop.f32.mrf.mxu0  ;;  %v4318_v43 = vpop.f32.mrf.mxu1 }
 0x97d   :  { %11678 = vst [vmem:[#allocation60_spill] sm:$0xff] %v10133_v40  ;;  %v10152_v22 = vadd.f32 %v4205_v49, %v9945_v60  ;;  %v10155_v33 = vadd.f32 %v4318_v43, %v9949_v63  ;;  %v10160_v2 = vsel %vm66_vm0, %v9988_v26, %v4204_v7  ;;  %v10169_v49 = vsel %vm66_vm0, %v4204_v7, %v9988_v26 }
 0x97e   :  { %11681 = vst [vmem:[#allocation66_spill] sm:$0xff] %v10160_v2  ;;  %v4209_v51 = vpop.f32.mrf.mxu0  ;;  %v4322_v11 = vpop.f32.mrf.mxu1  ;;  %11682 = vst [vmem:[#allocation67_spill] sm:$0xff] %v10169_v49 }
 0x97f   :  { %11679 = vst [vmem:[#allocation55_spill] sm:$0xff] %v10152_v22  ;;  %11680 = vst [vmem:[#allocation56_spill] sm:$0xff] %v10155_v33  ;;  %v4210_v34 = vadd.f32 %v4209_v51, %v9937_v12  ;;  %v10177_v53 = vadd.f32 %v4322_v11, %v9941_v19  ;;  %v10301_v33 = vadd.f32 %v9922_v29, %v9949_v63 }
 0x980   :  { %v4211_v7 = vpop.f32.mrf.mxu0  ;;  %v4324_v49 = vpop.f32.mrf.mxu1  ;;  %v4154_v29 = vadd.f32 %v9927_v46, %v9937_v12 }
 0x981   :  { %11683 = vst [vmem:[#allocation62_spill] sm:$0xff] %v10177_v53  ;;  %v10196_v43 = vadd.f32 %v4211_v7, %v9945_v60  ;;  %v10199_v36 = vadd.f32 %v4324_v49, %v9949_v63  ;;  %v10204_v26 = vsel %vm66_vm0, %v9952_v47, %v4210_v34  ;;  %v10213_v7 = vsel %vm66_vm0, %v4210_v34, %v9952_v47 }
 0x982   :  { %v4213_v44 = vpop.f32.mrf.mxu0  ;;  %v4326_v15 = vpop.f32.mrf.mxu1  ;;  %11686 = vst [vmem:[#allocation83_spill] sm:$0xff] %v10213_v7  ;;  %11696 = vst [vmem:[#allocation93_spill] sm:$0xff] %v10301_v33 }
 0x983   :  { %11684 = vst [vmem:[#allocation63_spill] sm:$0xff] %v10196_v43  ;;  %11685 = vst [vmem:[#allocation10_spill] sm:$0xff] %v10199_v36  ;;  %v4214_v11 = vadd.f32 %v4213_v44, %v9937_v12  ;;  %v10221_v3 = vadd.f32 %v4326_v15, %v9941_v19  ;;  %v10319_v44 = vadd.f32 %v9929_v50, %v9941_v19 }
 0x984   :  { %v4215_v34 = vpop.f32.mrf.mxu0  ;;  %v4328_v7 = vpop.f32.mrf.mxu1 }
 0x985   :  { %11687 = vst [vmem:[#allocation84_spill] sm:$0xff] %v10221_v3  ;;  %v10240_v49 = vadd.f32 %v4215_v34, %v9945_v60  ;;  %v10243_v51 = vadd.f32 %v4328_v7, %v9949_v63  ;;  %v10248_v47 = vsel %vm66_vm0, %v9964_v39, %v4214_v11  ;;  %v10257_v34 = vsel %vm66_vm0, %v4214_v11, %v9964_v39 }
 0x986   :  { %v4219_v25 = vpop.f32.mrf.mxu0  ;;  %v4332_v40 = vpop.f32.mrf.mxu1  ;;  %11690 = vst [vmem:[#allocation87_spill] sm:$0xff] %v10257_v34  ;;  %v4150_v11 = vadd.f32 %v9916_v28, %v9937_v12  ;;  %v10279_v7 = vadd.f32 %v9918_v4, %v9941_v19  ;;  %v10297_v4 = vadd.f32 %v9920_v21, %v9945_v60  ;;  %11699 = vst [vmem:[#allocation96_spill] sm:$0xff] %v10319_v44 }
 0x987   :  { %11688 = vst [vmem:[#allocation85_spill] sm:$0xff] %v10240_v49  ;;  %11689 = vst [vmem:[#allocation86_spill] sm:$0xff] %v10243_v51  ;;  %v4220_v15 = vadd.f32 %v4219_v25, %v9937_v12  ;;  %v10265_v62 = vadd.f32 %v4332_v40, %v9941_v19 }
 0x988   :  { %11692 = vst [vmem:[#allocation89_spill] sm:$0xff] %v10279_v7  ;;  %v4221_v25 = vpop.f32.mrf.mxu0  ;;  %v4334_v40 = vpop.f32.mrf.mxu1  ;;  %11695 = vst [vmem:[#allocation92_spill] sm:$0xff] %v10297_v4 }
 0x989   :  { %11691 = vst [vmem:[#allocation88_spill] sm:$0xff] %v10265_v62  ;;  %v10290_v39 = vadd.f32 %v4221_v25, %v9945_v60  ;;  %v10293_v28 = vadd.f32 %v4334_v40, %v9949_v63  ;;  %v10305_v32 = vsel %vm66_vm0, %v4220_v15, %v4150_v11 }
 0x98a   :  { %v4223_v34 = vpop.f32.mrf.mxu0  ;;  %v4336_v0 = vpop.f32.mrf.mxu1  ;;  %11697 = vst [vmem:[#allocation94_spill] sm:$0xff] %v10305_v32 }
 0x98b   :  { %11693 = vst [vmem:[#allocation90_spill] sm:$0xff] %v10290_v39  ;;  %11694 = vst [vmem:[#allocation91_spill] sm:$0xff] %v10293_v28  ;;  %v4224_v40 = vadd.f32 %v4223_v34, %v9937_v12  ;;  %v10313_v21 = vadd.f32 %v4336_v0, %v9941_v19  ;;  %v10331_v34 = vadd.f32 %v9931_v48, %v9945_v60 }
 0x98c   :  { %v4225_v17 = vpop.f32.mrf.mxu0  ;;  %v4338_v23 = vpop.f32.mrf.mxu1  ;;  %v10341_v12 = vadd.f32 %v9933_v20, %v9949_v63  ;;  %v4421_v19 = vsel %vm66_vm0, %v4150_v11, %v4220_v15  ;;  %v4422_v20 = vsel %vm8246_vm1, %v10297_v4, %v10290_v39  ;;  %v4424_v57 = vsel %vm8254_vm3, %v10301_v33, %v10293_v28 }
 0x98d   :  { %11698 = vst [vmem:[#allocation95_spill] sm:$0xff] %v10313_v21  ;;  %11700 = vst [vmem:[#allocation97_spill] sm:$0xff] %v10331_v34  ;;  %v10334_v46 = vadd.f32 %v4225_v17, %v9945_v60  ;;  %v10337_v50 = vadd.f32 %v4338_v23, %v9949_v63  ;;  %v10347_v0 = vsel %vm66_vm0, %v4224_v40, %v4154_v29 }
 0x98e   :  { %11703 = vst [vmem:[#allocation100_spill] sm:$0xff] %v10341_v12  ;;  %v4831_v25 = vpop.f32.mrf.mxu0  ;;  %11704 = vst [vmem:[#allocation101_spill] sm:$0xff] %v10347_v0  ;;  %v4874_v60 = vpop.f32.mrf.mxu1 }
 0x98f   :  { %11701 = vst [vmem:[#allocation98_spill] sm:$0xff] %v10334_v46  ;;  %11702 = vst [vmem:[#allocation99_spill] sm:$0xff] %v10337_v50  ;;  %v4883_v48 = vadd.f32 %v4831_v25, %v4421_v19  ;;  %v4425_v25 = vsel %vm66_vm0, %v4154_v29, %v4224_v40  ;;  %v4426_v23 = vsel %vm8246_vm1, %v10331_v34, %v10334_v46 }
 0x990   :  { %v4833_v63 = vpop.f32.mrf.mxu0  ;;  %v4876_v0 = vpop.f32.mrf.mxu1 }
 0x991   :  { %v6601_v11 = vmul.f32 -1.442695, %v4883_v48  ;;  %v4884_v17 = vadd.f32 %v4833_v63, %v4422_v20  ;;  %v4886_v40 = vadd.f32 %v4876_v0, %v4424_v57 }
 0x992   :  { %v4835_v19 = vpop.f32.mrf.mxu0  ;;  %v4878_v48 = vpop.f32.mrf.mxu1 }
 0x993   :  { %7338 = vpow2.f32 %v6601_v11  ;;  %v6603_v32 = vmul.f32 -1.442695, %v4884_v17  ;;  %v4887_v4 = vadd.f32 %v4835_v19, %v4425_v25  ;;  %v4423_v17 = vsel %vm8250_vm2, %v10279_v7, %v10265_v62 }
 0x994   :  { %v4837_v39 = vpop.f32.mrf.mxu0  ;;  %v4880_v29 = vpop.f32.mrf.mxu1  ;;  %v4885_v63 = vadd.f32 %v4874_v60, %v4423_v17  ;;  %v4427_v60 = vsel %vm8250_vm2, %v10319_v44, %v10313_v21 }
 0x995   :  { %7340 = vpow2.f32 %v6603_v32  ;;  %v6602_v30 = vmul.f32 -1.442695, %v4887_v4  ;;  %v4888_v22 = vadd.f32 %v4837_v39, %v4426_v23  ;;  %v4428_v32 = vsel %vm8254_vm3, %v10341_v12, %v10337_v50 }
 0x996   :  { %v4889_v19 = vadd.f32 %v4878_v48, %v4427_v60  ;;  %v11726_v50 = vsel %vm8246_vm1, %v9958_v1, %v10196_v43 }
 0x997   :  { %7342 = vpow2.f32 %v6602_v30  ;;  %v6604_v20 = vmul.f32 -1.442695, %v4888_v22  ;;  %v6605_v30 = vmul.f32 -1.442695, %v4886_v40  ;;  %v4890_v22 = vadd.f32 %v4880_v29, %v4428_v32 }
 0x999   :  { %7344 = vpow2.f32 %v6604_v20  ;;  %v6606_v0 = vmul.f32 -1.442695, %v4890_v22 }
 0x99a   :  { %7346 = vtanh.f32 %v4885_v63 }
 0x99b   :  { %7348 = vpow2.f32 %v6605_v30 }
 0x9a0   :  { %v7339_v39 = vpop.eup %7338 }
 0x9a1   :  { %v4897_v4 = vadd.f32 1.0, %v7339_v39 }
 0x9a2   :  { %v7341_v23 = vpop.eup %7340 }
 0x9a3   :  { %7350 = vrcp.f32 %v4897_v4  ;;  %v4909_v11 = vadd.f32 1.0, %v7341_v23 }
 0x9a4   :  { %v7343_v25 = vpop.eup %7342 }
 0x9a5   :  { %7352 = vrcp.f32 %v4909_v11  ;;  %v4898_v20 = vadd.f32 1.0, %v7343_v25 }
 0x9a6   :  { %v7345_v57 = vpop.eup %7344  ;;  %7354 = vpow2.f32 %v6606_v0 }
 0x9a7   :  { %7356 = vrcp.f32 %v4898_v20  ;;  %v4910_v40 = vadd.f32 1.0, %v7345_v57  ;;  %v7347_v29 = vpop.eup %7346 }
 0x9a8   :  { %7358 = vtanh.f32 %v4889_v19  ;;  %v7349_v17 = vpop.eup %7348 }
 0x9a9   :  { %7360 = vrcp.f32 %v4910_v40  ;;  %v4923_v22 = vadd.f32 1.0, %v7349_v17 }
 0x9ab   :  { %7362 = vrcp.f32 %v4923_v22  ;;  %v11715_v22 = vld [vmem:[#allocation31_spill] sm:$0xff] }
 0x9b0   :  { %v7351_v63 = vpop.eup %7350 }
 0x9b1   :  { %v4931_v32 = vmul.f32 %v7351_v63, %v7347_v29 }
 0x9b2   :  { %v7353_v30 = vpop.eup %7352 }
 0x9b3   :  { %v7355_v39 = vpop.eup %7354  ;;  %v4929_v4 = vmul.f32 0.0, %v7353_v30  ;;  %v11714_v30 = vld [vmem:[#allocation23_spill] sm:$0xff] }
 0x9b4   :  { %v7357_v23 = vpop.eup %7356  ;;  %v4924_v11 = vadd.f32 1.0, %v7355_v39  ;;  %v11716_v39 = vld [vmem:[#allocation27_spill] sm:$0xff] }
 0x9b5   :  { %v7359_v15 = vpop.eup %7358  ;;  %v10387_v44 = vadd.f32 %v4931_v32, %v4929_v4  ;;  %v11717_v4 = vld [vmem:[#allocation29_spill] sm:$0xff] }
 0x9b6   :  { %v7361_v48 = vpop.eup %7360  ;;  %v4932_v60 = vmul.f32 %v7359_v15, %v7357_v23  ;;  %v11713_v15 = vld [vmem:[#allocation19_spill] sm:$0xff]  ;;  %v11718_v23 = vld [vmem:[#allocation22_spill] sm:$0xff] }
 0x9b7   :  { %7364 = vtanh.f32 %v10387_v44  ;;  %v4930_v0 = vmul.f32 0.0, %v7361_v48  ;;  %v11719_v48 = vld [vmem:[#allocation34_spill] sm:$0xff] }
 0x9b8   :  { %7366 = vrcp.f32 %v4924_v11  ;;  %v7363_v19 = vpop.eup %7362  ;;  %v11720_v11 = vld [vmem:[#allocation28_spill] sm:$0xff] }
 0x9b9   :  { %v10390_v25 = vadd.f32 %v4932_v60, %v4930_v0  ;;  %v11721_v0 = vld [vmem:[#allocation38_spill] sm:$0xff]  ;;  %v11722_v60 = vld [vmem:[#allocation36_spill] sm:$0xff] }
 0x9bb   :  { %7368 = vtanh.f32 %v10390_v25 }
 0x9c4   :  { %v7365_v20 = vpop.eup %7364 }
 0x9c5   :  { %v10393_v57 = vmul.f32 %v7365_v20, %v7363_v19  ;;  %v7367_v40 = vpop.eup %7366  ;;  %v11723_v19 = vld [vmem:[#allocation16_spill] sm:$0xff] }
 0x9c6   :  { %v10435_v20 = vld [vmem:[#allocation6 + $0xe4] ss:$16 sps:$4 sm:$0xff]  }
 0x9c7   :  { %11724 = vst [vmem:[#allocation74_spill] sm:$0xff] %v10435_v20 }
 0x9c8   :  { %v7369_v29 = vpop.eup %7368 }
 0x9c9   :  { %v10395_v17 = vmul.f32 %v7369_v29, %v7367_v40  ;;  %v10438_v40 = vld [vmem:[#allocation6 + $0xec] ss:$16 sps:$4 sm:$0xff]  }
 0x9cb   :  { %v6608_v63 = vpack.c.bf16 %v10395_v17, %v10393_v57 }
 0x9cd   :  { %6609 = vmatmul.mubr.msk.bf16.vlgmr.msra.gmra.mxu0 %vm8676_vm6, %v6608_v63  ;;  %6612 = vmatmul.mubr.msk.bf16.vlgmr.msra.gmra.mxu1 %vm8676_vm6, %v6608_v63 }
 0x9ce   :  { %5112 = vmatpush1.bf16.msra.mxu0 %v9772_v10  ;;  %5155 = vmatpush1.bf16.msra.mxu1 %v9776_v13  ;;  %v11706_v10 = vld [vmem:[#allocation20_spill] sm:$0xff] }
 0x9cf   :  { %5113 = vmatprep.subr.bf16.mxu0 %v9774_v37  ;;  %5156 = vmatprep.subr.bf16.mxu1 %v9778_v6  ;;  %v11707_v37 = vld [vmem:[#allocation32_spill] sm:$0xff]  ;;  %v11709_v6 = vld [vmem:[#allocation33_spill] sm:$0xff]  ;;  %11725 = vst [vmem:[#allocation20_spill] sm:$0xff] %v10438_v40 }
 0x9d0   :  { %5143 = vmatprep.mubr.bf16.mxu0 %v11500_v24  ;;  %5186 = vmatprep.mubr.bf16.mxu1 %v11500_v24  ;;  %v11708_v13 = vld [vmem:[#allocation24_spill] sm:$0xff] }
 0x9d2   :  { %5114 = vmatpush1.bf16.msra.mxu0 %v9782_v27  ;;  %5157 = vmatpush1.bf16.msra.mxu1 %v9789_v61  ;;  %v11710_v27 = vld [vmem:[#allocation30_spill] sm:$0xff]  ;;  %v11712_v61 = vld [vmem:[#allocation21_spill] sm:$0xff] }
 0x9d3   :  { %5115 = vmatprep.subr.bf16.mxu0 %v9786_v42  ;;  %5158 = vmatprep.subr.bf16.mxu1 %v9796_v45  ;;  %v11711_v42 = vld [vmem:[#allocation25_spill] sm:$0xff] }
 0x9d6   :  { %5116 = vmatpush1.bf16.msra.mxu0 %v9794_v9  ;;  %5159 = vmatpush1.bf16.msra.mxu1 %v9801_v41 }
 0x9d7   :  { %5117 = vmatprep.subr.bf16.mxu0 %v9798_v5  ;;  %5160 = vmatprep.subr.bf16.mxu1 %v9803_v18 }
 0x9da   :  { %5118 = vmatpush1.bf16.msra.mxu0 %v11706_v10  ;;  %5161 = vmatpush1.bf16.msra.mxu1 %v11707_v37 }
 0x9db   :  { %5119 = vmatprep.subr.bf16.mxu0 %v11708_v13  ;;  %5162 = vmatprep.subr.bf16.mxu1 %v11709_v6 }
 0x9de   :  { %5120 = vmatpush1.bf16.msra.mxu0 %v11710_v27  ;;  %5163 = vmatpush1.bf16.msra.mxu1 %v11711_v42 }
 0x9df   :  { %5121 = vmatprep.subr.bf16.mxu0 %v11712_v61  ;;  %5164 = vmatprep.subr.bf16.mxu1 %v11713_v15 }
 0x9e2   :  { %5122 = vmatpush1.bf16.msra.mxu0 %v11714_v30  ;;  %5165 = vmatpush1.bf16.msra.mxu1 %v11715_v22 }
 0x9e3   :  { %5123 = vmatprep.subr.bf16.mxu0 %v11716_v39  ;;  %5166 = vmatprep.subr.bf16.mxu1 %v11717_v4 }
 0x9e6   :  { %5124 = vmatpush1.bf16.msra.mxu0 %v11718_v23  ;;  %5167 = vmatpush1.bf16.msra.mxu1 %v11719_v48 }
 0x9e7   :  { %5125 = vmatprep.subr.bf16.mxu0 %v11720_v11  ;;  %5168 = vmatprep.subr.bf16.mxu1 %v11721_v0 }
 0x9ea   :  { %5126 = vmatpush1.bf16.msra.mxu0 %v11722_v60  ;;  %5169 = vmatpush1.bf16.msra.mxu1 %v11723_v19 }
 0x9eb   :  { %5268 = vmatprep.subr.bf16.mxu0 %v10435_v20  ;;  %5311 = vmatprep.subr.bf16.mxu1 %v10438_v40 }
 0xa8d   :  { %v4988_v29 = vpop.f32.mrf.mxu0  ;;  %v5031_v32 = vpop.f32.mrf.mxu1 }
 0xa8e   :  { %v5040_v63 = vadd.f32 %v4988_v29, %v10204_v26  ;;  %v11727_v26 = vsel %vm8246_vm1, %v9970_v35, %v10240_v49  ;;  %v11760_v49 = vld [vmem:[#allocation53_spill] sm:$0xff] }
 0xa8f   :  { %v4990_v21 = vpop.f32.mrf.mxu0  ;;  %v5033_v28 = vpop.f32.mrf.mxu1 }
 0xa90   :  { %v6613_v12 = vmul.f32 -1.442695, %v5040_v63  ;;  %v5041_v7 = vadd.f32 %v4990_v21, %v11726_v50 }
 0xa91   :  { %v4992_v62 = vpop.f32.mrf.mxu0  ;;  %v5035_v63 = vpop.f32.mrf.mxu1 }
 0xa92   :  { %7370 = vpow2.f32 %v6613_v12  ;;  %v6615_v33 = vmul.f32 -1.442695, %v5041_v7  ;;  %v5044_v34 = vadd.f32 %v4992_v62, %v10248_v47  ;;  %v11728_v7 = vsel %vm8254_vm3, %v9961_v8, %v10199_v36  ;;  %v10693_v8 = vld [vmem:[#allocation6] ss:$16 sps:$4 sm:$0xff]   ;;  %v10696_v36 = vld [vmem:[#allocation6 + $0x8] ss:$16 sps:$4 sm:$0xff]  }
 0xa93   :  { %v4994_v46 = vpop.f32.mrf.mxu0  ;;  %v5043_v21 = vadd.f32 %v5033_v28, %v11728_v7  ;;  %v5037_v62 = vpop.f32.mrf.mxu1  ;;  %v11731_v28 = vsel %vm8250_vm2, %v9967_v38, %v10221_v3  ;;  %v11735_v3 = vld [vmem:[#allocation69_spill] sm:$0xff]  ;;  %11759 = vst [vmem:[#allocation25_spill] sm:$0xff] %v10696_v36 }
 0xa94   :  { %7372 = vpow2.f32 %v6615_v33  ;;  %v6614_v16 = vmul.f32 -1.442695, %v5044_v34  ;;  %v5045_v29 = vadd.f32 %v4994_v46, %v11727_v26  ;;  %v11729_v33 = vsel %vm8250_vm2, %v9955_v56, %v10177_v53  ;;  %v10687_v56 = vld [vmem:[#allocation6 + $0x4] ss:$16 sps:$4 sm:$0xff]   ;;  %v10690_v53 = vld [vmem:[#allocation6 + $0xc] ss:$16 sps:$4 sm:$0xff]  }
 0xa95   :  { %v5042_v47 = vadd.f32 %v5031_v32, %v11729_v33  ;;  %v6617_v34 = vmul.f32 -1.442695, %v5043_v21  ;;  %v5046_v50 = vadd.f32 %v5035_v63, %v11731_v28 }
 0xa96   :  { %7374 = vpow2.f32 %v6614_v16  ;;  %v6616_v2 = vmul.f32 -1.442695, %v5045_v29  ;;  %v11730_v16 = vsel %vm8254_vm3, %v9973_v14, %v10243_v51 }
 0xa98   :  { %7376 = vpow2.f32 %v6616_v2  ;;  %v5047_v2 = vadd.f32 %v5037_v62, %v11730_v16 }
 0xa99   :  { %7378 = vtanh.f32 %v5042_v47 }
 0xa9a   :  { %7380 = vpow2.f32 %v6617_v34  ;;  %v6618_v29 = vmul.f32 -1.442695, %v5047_v2  ;;  %v4939_v2 = vsel %vm8662_vm4, %v10387_v44, 0.0  ;;  %v11736_v44 = vld [vmem:[#allocation70_spill] sm:$0xff] }
 0xa9b   :  { %v10513_v34 = vld [vmem:[#allocation6 + $0xe0] ss:$16 sps:$4 sm:$0xff]  }
 0xa9f   :  { %v7371_v46 = vpop.eup %7370 }
 0xaa0   :  { %v5054_v12 = vadd.f32 1.0, %v7371_v46 }
 0xaa1   :  { %v7373_v26 = vpop.eup %7372 }
 0xaa2   :  { %7382 = vrcp.f32 %v5054_v12  ;;  %v5066_v32 = vadd.f32 1.0, %v7373_v26 }
 0xaa3   :  { %v7375_v7 = vpop.eup %7374  ;;  %7384 = vtanh.f32 %v5046_v50 }
 0xaa4   :  { %7386 = vrcp.f32 %v5066_v32  ;;  %v5055_v21 = vadd.f32 1.0, %v7375_v7 }
 0xaa5   :  { %v7377_v33 = vpop.eup %7376  ;;  %7388 = vpow2.f32 %v6618_v29 }
 0xaa6   :  { %7390 = vrcp.f32 %v5055_v21  ;;  %v5067_v62 = vadd.f32 1.0, %v7377_v33  ;;  %v7379_v16 = vpop.eup %7378  ;;  %v4940_v33 = vsel %vm8668_vm5, %v10390_v25, 0.0  ;;  %v10522_v21 = vld [vmem:[#allocation6 + $0xcc] ss:$16 sps:$4 sm:$0xff]  }
 0xaa7   :  { %v7381_v14 = vpop.eup %7380 }
 0xaa8   :  { %7392 = vrcp.f32 %v5067_v62  ;;  %v5080_v28 = vadd.f32 1.0, %v7381_v14 }
 0xaaa   :  { %7394 = vrcp.f32 %v5080_v28 }
 0xaaf   :  { %v7383_v38 = vpop.eup %7382 }
 0xab0   :  { %v7385_v63 = vpop.eup %7384  ;;  %v5088_v46 = vmul.f32 %v7383_v38, %v7379_v16 }
 0xab1   :  { %v7387_v47 = vpop.eup %7386 }
 0xab2   :  { %v7389_v12 = vpop.eup %7388  ;;  %v5086_v50 = vmul.f32 %v7387_v47, %v4939_v2 }
 0xab3   :  { %v7391_v26 = vpop.eup %7390  ;;  %v5081_v62 = vadd.f32 1.0, %v7389_v12 }
 0xab4   :  { %v5090_v32 = vadd.f32 %v5088_v46, %v5086_v50  ;;  %v5089_v7 = vmul.f32 %v7391_v26, %v7385_v63  ;;  %v10492_v26 = vsel %vm8662_vm4, %v10393_v57, 0.0 }
 0xab5   :  { %v7393_v29 = vpop.eup %7392  ;;  %11737 = vst [vmem:[#allocation32_spill] sm:$0xff] %v10492_v26 }
 0xab6   :  { %7396 = vtanh.f32 %v5090_v32  ;;  %v5087_v38 = vmul.f32 %v7393_v29, %v4940_v33  ;;  %v10482_v51 = vsel %vm131_vm7, %v5090_v32, %v4939_v2  ;;  %v10497_v2 = vsel %vm8668_vm5, %v10395_v17, 0.0  ;;  %v10516_v17 = vld [vmem:[#allocation6 + $0xe8] ss:$16 sps:$4 sm:$0xff]   ;;  %v10519_v29 = vld [vmem:[#allocation6 + $0xc4] ss:$16 sps:$4 sm:$0xff]  }
 0xab7   :  { %7398 = vrcp.f32 %v5081_v62  ;;  %v7395_v46 = vpop.eup %7394  ;;  %11738 = vst [vmem:[#allocation24_spill] sm:$0xff] %v10497_v2  ;;  %v10530_v62 = vld [vmem:[#allocation6 + $0xc8] ss:$16 sps:$4 sm:$0xff]  }
 0xab8   :  { %v5091_v14 = vadd.f32 %v5089_v7, %v5087_v38  ;;  %v10533_v38 = vld [vmem:[#allocation6 + $0xa4] ss:$16 sps:$4 sm:$0xff]  }
 0xaba   :  { %7400 = vtanh.f32 %v5091_v14  ;;  %v10487_v63 = vsel %vm132_vm8, %v5091_v14, %v4940_v33  ;;  %v10527_v33 = vld [vmem:[#allocation6 + $0xc0] ss:$16 sps:$4 sm:$0xff]  }
 0xac3   :  { %v7397_v47 = vpop.eup %7396 }
 0xac4   :  { %v5094_v25 = vmul.f32 %v7397_v47, %v7395_v46  ;;  %v7399_v28 = vpop.eup %7398  ;;  %v11749_v46 = vld [vmem:[#allocation15_spill] sm:$0xff]  ;;  %v11750_v47 = vld [vmem:[#allocation68_spill] sm:$0xff] }
 0xac6   :  { %v10503_v32 = vsel %vm131_vm7, %v5094_v25, %v10492_v26  ;;  %v11751_v25 = vsel %vm8250_vm2, %v11749_v46, %v11750_v47 }
 0xac7   :  { %v7401_v12 = vpop.eup %7400  ;;  %11739 = vst [vmem:[#allocation33_spill] sm:$0xff] %v10503_v32 }
 0xac8   :  { %v5095_v50 = vmul.f32 %v7401_v12, %v7399_v28 }
 0xaca   :  { %v10509_v7 = vsel %vm132_vm8, %v5095_v50, %v10497_v2  ;;  %v11752_v50 = vld [vmem:[#allocation48_spill] sm:$0xff] }
 0xacb   :  { %11740 = vst [vmem:[#allocation30_spill] sm:$0xff] %v10509_v7  ;;  %v5100_v57 = vpack.c.bf16 %v10509_v7, %v10503_v32 }
 0xacd   :  { %5144 = vmatmul.mubr.bf16.vlgmr.msra.gmra.mxu0 %v5100_v57  ;;  %5187 = vmatmul.mubr.bf16.vlgmr.msra.gmra.mxu1 %v5100_v57  ;;  %v11753_v57 = vld [vmem:[#allocation56_spill] sm:$0xff] }
 0xace   :  { %5269 = vmatpush1.bf16.msra.mxu0 %v10513_v34  ;;  %5312 = vmatpush1.bf16.msra.mxu1 %v10516_v17 }
 0xacf   :  { %5270 = vmatprep.subr.bf16.mxu0 %v10519_v29  ;;  %5313 = vmatprep.subr.bf16.mxu1 %v10522_v21 }
 0xad0   :  { %5300 = vmatprep.mubr.bf16.mxu0 %v11500_v24  ;;  %5343 = vmatprep.mubr.bf16.mxu1 %v11500_v24 }
 0xad2   :  { %5271 = vmatpush1.bf16.msra.mxu0 %v10527_v33  ;;  %5314 = vmatpush1.bf16.msra.mxu1 %v10530_v62 }
 0xad3   :  { %5272 = vmatprep.subr.bf16.mxu0 %v10533_v38  ;;  %5315 = vmatprep.subr.bf16.mxu1 %v9796_v45 }
 0xad6   :  { %5273 = vmatpush1.bf16.msra.mxu0 %v9794_v9  ;;  %5316 = vmatpush1.bf16.msra.mxu1 %v9801_v41 }
 0xad7   :  { %5274 = vmatprep.subr.bf16.mxu0 %v9798_v5  ;;  %5317 = vmatprep.subr.bf16.mxu1 %v9803_v18 }
 0xada   :  { %5275 = vmatpush1.bf16.msra.mxu0 %v11706_v10  ;;  %5318 = vmatpush1.bf16.msra.mxu1 %v11707_v37  ;;  %v11741_v10 = vsel %vm8246_vm1, %v9982_v55, %v10108_v31 }
 0xadb   :  { %5276 = vmatprep.subr.bf16.mxu0 %v11708_v13  ;;  %5319 = vmatprep.subr.bf16.mxu1 %v11709_v6 }
 0xade   :  { %5277 = vmatpush1.bf16.msra.mxu0 %v11710_v27  ;;  %5320 = vmatpush1.bf16.msra.mxu1 %v11711_v42  ;;  %v11742_v42 = vld [vmem:[#allocation66_spill] sm:$0xff] }
 0xadf   :  { %5278 = vmatprep.subr.bf16.mxu0 %v11712_v61  ;;  %5321 = vmatprep.subr.bf16.mxu1 %v11713_v15 }
 0xae2   :  { %5279 = vmatpush1.bf16.msra.mxu0 %v11714_v30  ;;  %5322 = vmatpush1.bf16.msra.mxu1 %v11715_v22  ;;  %v11744_v22 = vld [vmem:[#allocation55_spill] sm:$0xff] }
 0xae3   :  { %5280 = vmatprep.subr.bf16.mxu0 %v11716_v39  ;;  %5323 = vmatprep.subr.bf16.mxu1 %v11717_v4 }
 0xae6   :  { %5281 = vmatpush1.bf16.msra.mxu0 %v11718_v23  ;;  %5324 = vmatpush1.bf16.msra.mxu1 %v11719_v48 }
 0xae7   :  { %5282 = vmatprep.subr.bf16.mxu0 %v11720_v11  ;;  %5325 = vmatprep.subr.bf16.mxu1 %v11721_v0  ;;  %v11746_v11 = vld [vmem:[#allocation41_spill] sm:$0xff]  ;;  %v11747_v0 = vld [vmem:[#allocation64_spill] sm:$0xff] }
 0xaea   :  { %5283 = vmatpush1.bf16.msra.mxu0 %v11722_v60  ;;  %5326 = vmatpush1.bf16.msra.mxu1 %v11723_v19  ;;  %v11748_v60 = vsel %vm8254_vm3, %v11746_v11, %v11747_v0 }
 0xaeb   :  { %5425 = vmatprep.subr.bf16.mxu0 %v10435_v20  ;;  %5468 = vmatprep.subr.bf16.mxu1 %v10438_v40 }
 0xb8d   :  { %v5145_v9 = vpop.f32.mrf.mxu0  ;;  %v5188_v5 = vpop.f32.mrf.mxu1 }
 0xb8e   :  { %v5197_v45 = vadd.f32 %v5145_v9, %v10116_v54  ;;  %v11743_v54 = vld [vmem:[#allocation18_spill] sm:$0xff]  ;;  %v5199_v28 = vadd.f32 %v5188_v5, %v11751_v25  ;;  %v11754_v9 = vsel %vm8254_vm3, %v11752_v50, %v11753_v57  ;;  %v11761_v50 = vld [vmem:[#allocation12_spill] sm:$0xff]  ;;  %v11762_v57 = vld [vmem:[#allocation45_spill] sm:$0xff] }
 0xb8f   :  { %v5147_v41 = vpop.f32.mrf.mxu0  ;;  %v5190_v27 = vpop.f32.mrf.mxu1  ;;  %v11745_v39 = vsel %vm8246_vm1, %v11743_v54, %v11744_v22  ;;  %v11763_v46 = vsel %vm8246_vm1, %v11761_v50, %v11762_v57  ;;  %v11764_v22 = vld [vmem:[#allocation57_spill] sm:$0xff] }
 0xb90   :  { %v6619_v18 = vmul.f32 -1.442695, %v5197_v45  ;;  %v5198_v37 = vadd.f32 %v5147_v41, %v11741_v10  ;;  %v5200_v19 = vadd.f32 %v5190_v27, %v11748_v60  ;;  %v11756_v10 = vld [vmem:[#allocation60_spill] sm:$0xff] }
 0xb91   :  { %v5149_v13 = vpop.f32.mrf.mxu0  ;;  %v5192_v23 = vpop.f32.mrf.mxu1 }
 0xb92   :  { %7402 = vpow2.f32 %v6619_v18  ;;  %v6621_v6 = vmul.f32 -1.442695, %v5198_v37  ;;  %v5201_v61 = vadd.f32 %v5149_v13, %v11742_v42  ;;  %v6623_v12 = vmul.f32 -1.442695, %v5200_v19  ;;  %v11755_v18 = vld [vmem:[#allocation39_spill] sm:$0xff] }
 0xb93   :  { %v5151_v15 = vpop.f32.mrf.mxu0  ;;  %v5194_v14 = vpop.f32.mrf.mxu1  ;;  %v11757_v37 = vsel %vm8250_vm2, %v11755_v18, %v11756_v10 }
 0xb94   :  { %7404 = vpow2.f32 %v6621_v6  ;;  %v6620_v30 = vmul.f32 -1.442695, %v5201_v61  ;;  %v5202_v4 = vadd.f32 %v5151_v15, %v11745_v39  ;;  %v5204_v45 = vadd.f32 %v5194_v14, %v11754_v9 }
 0xb95   :  { %v5203_v13 = vadd.f32 %v5192_v23, %v11757_v37 }
 0xb96   :  { %7406 = vpow2.f32 %v6620_v30  ;;  %v6622_v48 = vmul.f32 -1.442695, %v5202_v4  ;;  %v6624_v42 = vmul.f32 -1.442695, %v5204_v45 }
 0xb98   :  { %7408 = vpow2.f32 %v6622_v48 }
 0xb99   :  { %7410 = vtanh.f32 %v5199_v28 }
 0xb9a   :  { %7412 = vpow2.f32 %v6623_v12 }
 0xb9f   :  { %v7403_v41 = vpop.eup %7402 }
 0xba0   :  { %v5211_v6 = vadd.f32 1.0, %v7403_v41 }
 0xba1   :  { %v7405_v27 = vpop.eup %7404 }
 0xba2   :  { %7414 = vrcp.f32 %v5211_v6  ;;  %v5223_v5 = vadd.f32 1.0, %v7405_v27 }
 0xba3   :  { %v7407_v61 = vpop.eup %7406  ;;  %7416 = vtanh.f32 %v5203_v13 }
 0xba4   :  { %7418 = vrcp.f32 %v5223_v5  ;;  %v5212_v15 = vadd.f32 1.0, %v7407_v61 }
 0xba5   :  { %v7409_v30 = vpop.eup %7408  ;;  %7420 = vpow2.f32 %v6624_v42 }
 0xba6   :  { %7422 = vrcp.f32 %v5212_v15  ;;  %v5224_v39 = vadd.f32 1.0, %v7409_v30  ;;  %v7411_v4 = vpop.eup %7410 }
 0xba7   :  { %v7413_v48 = vpop.eup %7412 }
 0xba8   :  { %7424 = vrcp.f32 %v5224_v39  ;;  %v5237_v25 = vadd.f32 1.0, %v7413_v48 }
 0xbaa   :  { %7426 = vrcp.f32 %v5237_v25  ;;  %v10636_v25 = vld [vmem:[#allocation6 + $0xa8] ss:$16 sps:$4 sm:$0xff]  }
 0xbaf   :  { %v7415_v60 = vpop.eup %7414 }
 0xbb0   :  { %v7417_v23 = vpop.eup %7416  ;;  %v5245_v19 = vmul.f32 %v7415_v60, %v7411_v4 }
 0xbb1   :  { %v7419_v14 = vpop.eup %7418 }
 0xbb2   :  { %v7421_v28 = vpop.eup %7420  ;;  %v5243_v12 = vmul.f32 %v7419_v14, %v10482_v51  ;;  %v10633_v14 = vld [vmem:[#allocation6 + $0xa0] ss:$16 sps:$4 sm:$0xff]  }
 0xbb3   :  { %v7423_v9 = vpop.eup %7422  ;;  %v5238_v13 = vadd.f32 1.0, %v7421_v28  ;;  %v10639_v28 = vld [vmem:[#allocation6 + $0x84] ss:$16 sps:$4 sm:$0xff]  }
 0xbb4   :  { %v5247_v45 = vadd.f32 %v5245_v19, %v5243_v12  ;;  %v5246_v41 = vmul.f32 %v7423_v9, %v7417_v23  ;;  %v10630_v19 = vld [vmem:[#allocation6 + $0xac] ss:$16 sps:$4 sm:$0xff]   ;;  %v10645_v9 = vld [vmem:[#allocation6 + $0x80] ss:$16 sps:$4 sm:$0xff]  }
 0xbb5   :  { %v7425_v37 = vpop.eup %7424  ;;  %v10642_v12 = vld [vmem:[#allocation6 + $0x8c] ss:$16 sps:$4 sm:$0xff]  }
 0xbb6   :  { %7428 = vtanh.f32 %v5247_v45  ;;  %v5244_v6 = vmul.f32 %v7425_v37, %v10487_v63  ;;  %v10599_v42 = vsel %vm137_vm9, %v5247_v45, %v10482_v51  ;;  %v10648_v45 = vld [vmem:[#allocation6 + $0x88] ss:$16 sps:$4 sm:$0xff]   ;;  %v10654_v37 = vld [vmem:[#allocation6 + $0x6c] ss:$16 sps:$4 sm:$0xff]  }
 0xbb7   :  { %7430 = vrcp.f32 %v5238_v13  ;;  %v7427_v15 = vpop.eup %7426  ;;  %v10657_v13 = vld [vmem:[#allocation6 + $0x60] ss:$16 sps:$4 sm:$0xff]  }
 0xbb8   :  { %v5248_v5 = vadd.f32 %v5246_v41, %v5244_v6  ;;  %v10651_v41 = vld [vmem:[#allocation6 + $0x64] ss:$16 sps:$4 sm:$0xff]   ;;  %v10660_v6 = vld [vmem:[#allocation6 + $0x68] ss:$16 sps:$4 sm:$0xff]  }
 0xbba   :  { %7432 = vtanh.f32 %v5248_v5  ;;  %v10605_v61 = vsel %vm138_vm10, %v5248_v5, %v10487_v63  ;;  %v10663_v5 = vld [vmem:[#allocation6 + $0x44] ss:$16 sps:$4 sm:$0xff]  }
 0xbc3   :  { %v7429_v30 = vpop.eup %7428 }
 0xbc4   :  { %v5251_v39 = vmul.f32 %v7429_v30, %v7427_v15  ;;  %v7431_v4 = vpop.eup %7430  ;;  %v10666_v15 = vld [vmem:[#allocation6 + $0x4c] ss:$16 sps:$4 sm:$0xff]   ;;  %v10669_v30 = vld [vmem:[#allocation6 + $0x40] ss:$16 sps:$4 sm:$0xff]  }
 0xbc6   :  { %v10611_v51 = vsel %vm137_vm9, %v5251_v39, %v10503_v32  ;;  %v10672_v39 = vld [vmem:[#allocation6 + $0x48] ss:$16 sps:$4 sm:$0xff]  }
 0xbc7   :  { %v7433_v48 = vpop.eup %7432 }
 0xbc8   :  { %v5252_v60 = vmul.f32 %v7433_v48, %v7431_v4  ;;  %v10675_v4 = vld [vmem:[#allocation6 + $0x24] ss:$16 sps:$4 sm:$0xff]   ;;  %v10678_v48 = vld [vmem:[#allocation6 + $0x2c] ss:$16 sps:$4 sm:$0xff]  }
 0xbca   :  { %v10617_v23 = vsel %vm138_vm10, %v5252_v60, %v10509_v7  ;;  %v10681_v60 = vld [vmem:[#allocation6 + $0x20] ss:$16 sps:$4 sm:$0xff]  }
 0xbcb   :  { %v5257_v63 = vpack.c.bf16 %v10617_v23, %v10611_v51 }
 0xbcd   :  { %5301 = vmatmul.mubr.bf16.vlgmr.msra.gmra.mxu0 %v5257_v63  ;;  %5344 = vmatmul.mubr.bf16.vlgmr.msra.gmra.mxu1 %v5257_v63  ;;  %v10684_v63 = vld [vmem:[#allocation6 + $0x28] ss:$16 sps:$4 sm:$0xff]  }
 0xbce   :  { %5426 = vmatpush1.bf16.msra.mxu0 %v10513_v34  ;;  %5469 = vmatpush1.bf16.msra.mxu1 %v10516_v17 }
 0xbcf   :  { %5427 = vmatprep.subr.bf16.mxu0 %v10519_v29  ;;  %5470 = vmatprep.subr.bf16.mxu1 %v10522_v21 }
 0xbd0   :  { %5457 = vmatprep.mubr.bf16.mxu0 %v11500_v24  ;;  %5500 = vmatprep.mubr.bf16.mxu1 %v11500_v24 }
 0xbd2   :  { %5428 = vmatpush1.bf16.msra.mxu0 %v10527_v33  ;;  %5471 = vmatpush1.bf16.msra.mxu1 %v10530_v62 }
 0xbd3   :  { %5429 = vmatprep.subr.bf16.mxu0 %v10533_v38  ;;  %5472 = vmatprep.subr.bf16.mxu1 %v10630_v19 }
 0xbd6   :  { %5430 = vmatpush1.bf16.msra.mxu0 %v10633_v14  ;;  %5473 = vmatpush1.bf16.msra.mxu1 %v10636_v25 }
 0xbd7   :  { %5431 = vmatprep.subr.bf16.mxu0 %v10639_v28  ;;  %5474 = vmatprep.subr.bf16.mxu1 %v10642_v12 }
 0xbda   :  { %5432 = vmatpush1.bf16.msra.mxu0 %v10645_v9  ;;  %5475 = vmatpush1.bf16.msra.mxu1 %v10648_v45 }
 0xbdb   :  { %5433 = vmatprep.subr.bf16.mxu0 %v10651_v41  ;;  %5476 = vmatprep.subr.bf16.mxu1 %v10654_v37 }
 0xbde   :  { %5434 = vmatpush1.bf16.msra.mxu0 %v10657_v13  ;;  %5477 = vmatpush1.bf16.msra.mxu1 %v10660_v6 }
 0xbdf   :  { %5435 = vmatprep.subr.bf16.mxu0 %v10663_v5  ;;  %5478 = vmatprep.subr.bf16.mxu1 %v10666_v15 }
 0xbe2   :  { %5436 = vmatpush1.bf16.msra.mxu0 %v10669_v30  ;;  %5479 = vmatpush1.bf16.msra.mxu1 %v10672_v39 }
 0xbe3   :  { %5437 = vmatprep.subr.bf16.mxu0 %v10675_v4  ;;  %5480 = vmatprep.subr.bf16.mxu1 %v10678_v48 }
 0xbe6   :  { %5438 = vmatpush1.bf16.msra.mxu0 %v10681_v60  ;;  %5481 = vmatpush1.bf16.msra.mxu1 %v10684_v63 }
 0xbe7   :  { %5439 = vmatprep.subr.bf16.mxu0 %v10687_v56  ;;  %5482 = vmatprep.subr.bf16.mxu1 %v10690_v53 }
 0xbea   :  { %5440 = vmatpush1.bf16.msra.mxu0 %v10693_v8  ;;  %5483 = vmatpush1.bf16.msra.mxu1 %v10696_v36 }
 0xbeb   :  { %5582 = vmatprep.subr.bf16.mxu0 %v10435_v20  ;;  %5625 = vmatprep.subr.bf16.mxu1 %v10438_v40 }
 0xc8d   :  { %v5302_v35 = vpop.f32.mrf.mxu0  ;;  %v5345_v43 = vpop.f32.mrf.mxu1 }
 0xc8e   :  { %v5354_v1 = vadd.f32 %v5302_v35, %v11760_v49  ;;  %v11765_v35 = vld [vmem:[#allocation50_spill] sm:$0xff] }
 0xc8f   :  { %v5304_v18 = vpop.f32.mrf.mxu0  ;;  %v5347_v54 = vpop.f32.mrf.mxu1  ;;  %v11766_v49 = vld [vmem:[#allocation14_spill] sm:$0xff] }
 0xc90   :  { %v6625_v10 = vmul.f32 -1.442695, %v5354_v1  ;;  %v5355_v47 = vadd.f32 %v5304_v18, %v11763_v46  ;;  %v11767_v1 = vsel %vm8246_vm1, %v11765_v35, %v11766_v49  ;;  %v11768_v46 = vld [vmem:[#allocation54_spill] sm:$0xff]  ;;  %v11777_v35 = vld [vmem:[#allocation52_spill] sm:$0xff] }
 0xc91   :  { %v5306_v11 = vpop.f32.mrf.mxu0  ;;  %v5349_v32 = vpop.f32.mrf.mxu1 }
 0xc92   :  { %7434 = vpow2.f32 %v6625_v10  ;;  %v6627_v0 = vmul.f32 -1.442695, %v5355_v47  ;;  %v5358_v55 = vadd.f32 %v5306_v11, %v11764_v22  ;;  %v11769_v47 = vld [vmem:[#allocation11_spill] sm:$0xff]  ;;  %v11772_v11 = vld [vmem:[#allocation13_spill] sm:$0xff] }
 0xc93   :  { %v5308_v31 = vpop.f32.mrf.mxu0  ;;  %v11770_v18 = vsel %vm8254_vm3, %v11768_v46, %v11769_v47  ;;  %v5351_v22 = vpop.f32.mrf.mxu1  ;;  %v11778_v46 = vld [vmem:[#allocation49_spill] sm:$0xff] }
 0xc94   :  { %7436 = vpow2.f32 %v6627_v0  ;;  %v6626_v7 = vmul.f32 -1.442695, %v5358_v55  ;;  %v5359_v2 = vadd.f32 %v5308_v31, %v11767_v1  ;;  %v5357_v10 = vadd.f32 %v5347_v54, %v11770_v18  ;;  %v11771_v55 = vld [vmem:[#allocation46_spill] sm:$0xff]  ;;  %v11774_v31 = vld [vmem:[#allocation47_spill] sm:$0xff] }
 0xc95   :  { %v11773_v0 = vsel %vm8250_vm2, %v11771_v55, %v11772_v11  ;;  %v11779_v54 = vsel %vm8250_vm2, %v11777_v35, %v11778_v46 }
 0xc96   :  { %7438 = vpow2.f32 %v6626_v7  ;;  %v6628_v26 = vmul.f32 -1.442695, %v5359_v2  ;;  %v5356_v27 = vadd.f32 %v5345_v43, %v11773_v0  ;;  %v6629_v16 = vmul.f32 -1.442695, %v5357_v10  ;;  %v11775_v7 = vld [vmem:[#allocation61_spill] sm:$0xff] }
 0xc97   :  { %v11776_v2 = vsel %vm8254_vm3, %v11774_v31, %v11775_v7  ;;  %v5360_v18 = vadd.f32 %v5349_v32, %v11779_v54 }
 0xc98   :  { %7440 = vpow2.f32 %v6628_v26  ;;  %v5361_v26 = vadd.f32 %v5351_v22, %v11776_v2 }
 0xc99   :  { %7442 = vtanh.f32 %v5356_v27 }
 0xc9a   :  { %7444 = vpow2.f32 %v6629_v16  ;;  %v6630_v55 = vmul.f32 -1.442695, %v5361_v26 }
 0xc9f   :  { %v7435_v1 = vpop.eup %7434 }
 0xca0   :  { %v5368_v47 = vadd.f32 1.0, %v7435_v1 }
 0xca1   :  { %v7437_v49 = vpop.eup %7436 }
 0xca2   :  { %7446 = vrcp.f32 %v5368_v47  ;;  %v5380_v43 = vadd.f32 1.0, %v7437_v49 }
 0xca3   :  { %v7439_v10 = vpop.eup %7438  ;;  %7448 = vtanh.f32 %v5360_v18 }
 0xca4   :  { %7450 = vrcp.f32 %v5380_v43  ;;  %v5369_v0 = vadd.f32 1.0, %v7439_v10 }
 0xca5   :  { %v7441_v31 = vpop.eup %7440  ;;  %7452 = vpow2.f32 %v6630_v55 }
 0xca6   :  { %7454 = vrcp.f32 %v5369_v0  ;;  %v5381_v22 = vadd.f32 1.0, %v7441_v31  ;;  %v7443_v2 = vpop.eup %7442  ;;  %v11780_v31 = vld [vmem:[#allocation79_spill] sm:$0xff] }
 0xca7   :  { %v7445_v7 = vpop.eup %7444 }
 0xca8   :  { %7456 = vrcp.f32 %v5381_v22  ;;  %v5394_v54 = vadd.f32 1.0, %v7445_v7 }
 0xcaa   :  { %7458 = vrcp.f32 %v5394_v54 }
 0xcaf   :  { %v7447_v35 = vpop.eup %7446 }
 0xcb0   :  { %v7449_v32 = vpop.eup %7448  ;;  %v5402_v1 = vmul.f32 %v7447_v35, %v7443_v2 }
 0xcb1   :  { %v7451_v27 = vpop.eup %7450 }
 0xcb2   :  { %v7453_v16 = vpop.eup %7452  ;;  %v5400_v47 = vmul.f32 %v7451_v27, %v10599_v42 }
 0xcb3   :  { %v7455_v49 = vpop.eup %7454  ;;  %v5395_v10 = vadd.f32 1.0, %v7453_v16 }
 0xcb4   :  { %v5404_v26 = vadd.f32 %v5402_v1, %v5400_v47  ;;  %v5403_v18 = vmul.f32 %v7455_v49, %v7449_v32  ;;  %v11781_v49 = vld [vmem:[#allocation51_spill] sm:$0xff] }
 0xcb5   :  { %v7457_v43 = vpop.eup %7456 }
 0xcb6   :  { %7460 = vtanh.f32 %v5404_v26  ;;  %v5401_v55 = vmul.f32 %v7457_v43, %v10605_v61  ;;  %v10739_v0 = vsel %vm143_vm11, %v5404_v26, %v10599_v42 }
 0xcb7   :  { %7462 = vrcp.f32 %v5395_v10  ;;  %v7459_v22 = vpop.eup %7458 }
 0xcb8   :  { %v5405_v35 = vadd.f32 %v5403_v18, %v5401_v55  ;;  %v11782_v55 = vsel %vm8246_vm1, %v11762_v57, %v11761_v50  ;;  %v11787_v50 = vld [vmem:[#allocation11_spill] sm:$0xff]  ;;  %v11788_v57 = vld [vmem:[#allocation54_spill] sm:$0xff] }
 0xcba   :  { %7464 = vtanh.f32 %v5405_v35  ;;  %v10745_v7 = vsel %vm144_vm12, %v5405_v35, %v10605_v61 }
 0xcc3   :  { %v7461_v2 = vpop.eup %7460 }
 0xcc4   :  { %v5408_v32 = vmul.f32 %v7461_v2, %v7459_v22  ;;  %v7463_v1 = vpop.eup %7462 }
 0xcc6   :  { %v10751_v42 = vsel %vm143_vm11, %v5408_v32, %v10611_v51 }
 0xcc7   :  { %v7465_v27 = vpop.eup %7464 }
 0xcc8   :  { %v5409_v54 = vmul.f32 %v7465_v27, %v7463_v1  ;;  %v11783_v1 = vld [vmem:[#allocation59_spill] sm:$0xff] }
 0xcca   :  { %v10757_v16 = vsel %vm144_vm12, %v5409_v54, %v10617_v23 }
 0xccb   :  { %v5414_v61 = vpack.c.bf16 %v10757_v16, %v10751_v42 }
 0xccd   :  { %5458 = vmatmul.mubr.bf16.vlgmr.msra.gmra.mxu0 %v5414_v61  ;;  %5501 = vmatmul.mubr.bf16.vlgmr.msra.gmra.mxu1 %v5414_v61 }
 0xcce   :  { %5583 = vmatpush1.bf16.msra.mxu0 %v10513_v34  ;;  %5626 = vmatpush1.bf16.msra.mxu1 %v10516_v17 }
 0xccf   :  { %5584 = vmatprep.subr.bf16.mxu0 %v10519_v29  ;;  %5627 = vmatprep.subr.bf16.mxu1 %v10522_v21 }
 0xcd0   :  { %5614 = vmatprep.mubr.bf16.mxu0 %v11500_v24  ;;  %5657 = vmatprep.mubr.bf16.mxu1 %v11500_v24 }
 0xcd2   :  { %5585 = vmatpush1.bf16.msra.mxu0 %v10527_v33  ;;  %5628 = vmatpush1.bf16.msra.mxu1 %v10530_v62 }
 0xcd3   :  { %5586 = vmatprep.subr.bf16.mxu0 %v10533_v38  ;;  %5629 = vmatprep.subr.bf16.mxu1 %v10630_v19 }
 0xcd6   :  { %5587 = vmatpush1.bf16.msra.mxu0 %v10633_v14  ;;  %5630 = vmatpush1.bf16.msra.mxu1 %v10636_v25 }
 0xcd7   :  { %5588 = vmatprep.subr.bf16.mxu0 %v10639_v28  ;;  %5631 = vmatprep.subr.bf16.mxu1 %v10642_v12 }
 0xcda   :  { %5589 = vmatpush1.bf16.msra.mxu0 %v10645_v9  ;;  %5632 = vmatpush1.bf16.msra.mxu1 %v10648_v45 }
 0xcdb   :  { %5590 = vmatprep.subr.bf16.mxu0 %v10651_v41  ;;  %5633 = vmatprep.subr.bf16.mxu1 %v10654_v37 }
 0xcde   :  { %5591 = vmatpush1.bf16.msra.mxu0 %v10657_v13  ;;  %5634 = vmatpush1.bf16.msra.mxu1 %v10660_v6 }
 0xcdf   :  { %5592 = vmatprep.subr.bf16.mxu0 %v10663_v5  ;;  %5635 = vmatprep.subr.bf16.mxu1 %v10666_v15 }
 0xce2   :  { %5593 = vmatpush1.bf16.msra.mxu0 %v10669_v30  ;;  %5636 = vmatpush1.bf16.msra.mxu1 %v10672_v39 }
 0xce3   :  { %5594 = vmatprep.subr.bf16.mxu0 %v10675_v4  ;;  %5637 = vmatprep.subr.bf16.mxu1 %v10678_v48 }
 0xce6   :  { %5595 = vmatpush1.bf16.msra.mxu0 %v10681_v60  ;;  %5638 = vmatpush1.bf16.msra.mxu1 %v10684_v63 }
 0xce7   :  { %5596 = vmatprep.subr.bf16.mxu0 %v10687_v56  ;;  %5639 = vmatprep.subr.bf16.mxu1 %v10690_v53 }
 0xcea   :  { %5597 = vmatpush1.bf16.msra.mxu0 %v10693_v8  ;;  %5640 = vmatpush1.bf16.msra.mxu1 %v10696_v36 }
 0xceb   :  { %5739 = vmatprep.subr.bf16.mxu0 %v10435_v20  ;;  %5782 = vmatprep.subr.bf16.mxu1 %v10438_v40 }
 0xd8d   :  { %v5459_v47 = vpop.f32.mrf.mxu0  ;;  %v5502_v18 = vpop.f32.mrf.mxu1 }
 0xd8e   :  { %v5511_v26 = vadd.f32 %v5459_v47, %v11781_v49  ;;  %v11784_v47 = vld [vmem:[#allocation14_spill] sm:$0xff] }
 0xd8f   :  { %v5461_v43 = vpop.f32.mrf.mxu0  ;;  %v5504_v32 = vpop.f32.mrf.mxu1  ;;  %v11785_v49 = vld [vmem:[#allocation50_spill] sm:$0xff] }
 0xd90   :  { %v6631_v10 = vmul.f32 -1.442695, %v5511_v26  ;;  %v5512_v35 = vadd.f32 %v5461_v43, %v11782_v55  ;;  %v11786_v26 = vsel %vm8246_vm1, %v11784_v47, %v11785_v49  ;;  %v11789_v43 = vsel %vm8254_vm3, %v11787_v50, %v11788_v57  ;;  %v11795_v47 = vld [vmem:[#allocation52_spill] sm:$0xff] }
 0xd91   :  { %v5463_v22 = vpop.f32.mrf.mxu0  ;;  %v5506_v20 = vpop.f32.mrf.mxu1 }
 0xd92   :  { %7466 = vpow2.f32 %v6631_v10  ;;  %v6633_v2 = vmul.f32 -1.442695, %v5512_v35  ;;  %v5515_v27 = vadd.f32 %v5463_v22, %v11783_v1  ;;  %v5514_v10 = vadd.f32 %v5504_v32, %v11789_v43  ;;  %v11790_v35 = vld [vmem:[#allocation46_spill] sm:$0xff] }
 0xd93   :  { %v5465_v54 = vpop.f32.mrf.mxu0  ;;  %v5508_v55 = vpop.f32.mrf.mxu1  ;;  %v11791_v22 = vsel %vm8250_vm2, %v11772_v11, %v11790_v35  ;;  %v11796_v32 = vsel %vm8250_vm2, %v11778_v46, %v11795_v47 }
 0xd94   :  { %7468 = vpow2.f32 %v6633_v2  ;;  %v6632_v61 = vmul.f32 -1.442695, %v5515_v27  ;;  %v5516_v40 = vadd.f32 %v5465_v54, %v11786_v26  ;;  %v5513_v2 = vadd.f32 %v5502_v18, %v11791_v22  ;;  %v11792_v27 = vld [vmem:[#allocation61_spill] sm:$0xff]  ;;  %v11793_v54 = vld [vmem:[#allocation47_spill] sm:$0xff] }
 0xd95   :  { %v6635_v1 = vmul.f32 -1.442695, %v5514_v10  ;;  %v5517_v49 = vadd.f32 %v5506_v20, %v11796_v32 }
 0xd96   :  { %7470 = vpow2.f32 %v6632_v61  ;;  %v6634_v36 = vmul.f32 -1.442695, %v5516_v40  ;;  %v11794_v40 = vsel %vm8254_vm3, %v11792_v27, %v11793_v54 }
 0xd98   :  { %7472 = vpow2.f32 %v6634_v36  ;;  %v5518_v36 = vadd.f32 %v5508_v55, %v11794_v40 }
 0xd99   :  { %7474 = vtanh.f32 %v5513_v2 }
 0xd9a   :  { %7476 = vpow2.f32 %v6635_v1  ;;  %v6636_v11 = vmul.f32 -1.442695, %v5518_v36 }
 0xd9f   :  { %v7467_v61 = vpop.eup %7466 }
 0xda0   :  { %v5525_v26 = vadd.f32 1.0, %v7467_v61 }
 0xda1   :  { %v7469_v50 = vpop.eup %7468 }
 0xda2   :  { %7478 = vrcp.f32 %v5525_v26  ;;  %v5537_v18 = vadd.f32 1.0, %v7469_v50  ;;  %v11797_v50 = vld [vmem:[#allocation77_spill] sm:$0xff] }
 0xda3   :  { %v7471_v57 = vpop.eup %7470  ;;  %7480 = vtanh.f32 %v5517_v49  ;;  %vm11798_vm0 = vcmp.lt.s32.totalorder %v11797_v50, %v11735_v3  ;;  %vm11799_vm4 = vcmp.lt.s32.totalorder %v11797_v50, %v11736_v44 }
 0xda4   :  { %7482 = vrcp.f32 %v5537_v18  ;;  %v5526_v43 = vadd.f32 1.0, %v7471_v57  ;;  %vm11805_vm15 = vmmov %vm11798_vm0 }
 0xda5   :  { %v7473_v10 = vpop.eup %7472  ;;  %7484 = vpow2.f32 %v6636_v11 }
 0xda6   :  { %7486 = vrcp.f32 %v5526_v43  ;;  %v5538_v55 = vadd.f32 1.0, %v7473_v10  ;;  %v7475_v35 = vpop.eup %7474  ;;  %v11800_v43 = vld [vmem:[#allocation71_spill] sm:$0xff] }
 0xda7   :  { %v7477_v22 = vpop.eup %7476  ;;  %v127_v10 = vadd.s32 1, %v11800_v43  ;;  %v11806_v43 = vld [vmem:[#allocation24_spill] sm:$0xff] }
 0xda8   :  { %7488 = vrcp.f32 %v5538_v55  ;;  %v5551_v54 = vadd.f32 1.0, %v7477_v22  ;;  %v11801_v55 = vld [vmem:[#allocation75_spill] sm:$0xff]  ;;  %v11802_v22 = vld [vmem:[#allocation82_spill] sm:$0xff] }
 0xdaa   :  { %7490 = vrcp.f32 %v5551_v54  ;;  %v11803_v54 = vld [vmem:[#allocation32_spill] sm:$0xff] }
 0xdaf   :  { %v7479_v46 = vpop.eup %7478 }
 0xdb0   :  { %v7481_v20 = vpop.eup %7480  ;;  %v5559_v27 = vmul.f32 %v7479_v46, %v7475_v35  ;;  %v133_v35 = vadd.s32 1, %v11801_v55  ;;  %v139_v46 = vadd.s32 1, %v11802_v22 }
 0xdb1   :  { %v7483_v2 = vpop.eup %7482 }
 0xdb2   :  { %v7485_v1 = vpop.eup %7484  ;;  %v5557_v40 = vmul.f32 %v7483_v2, %v10739_v0 }
 0xdb3   :  { %v7487_v36 = vpop.eup %7486  ;;  %v5552_v49 = vadd.f32 1.0, %v7485_v1 }
 0xdb4   :  { %v5561_v61 = vadd.f32 %v5559_v27, %v5557_v40  ;;  %v5560_v47 = vmul.f32 %v7487_v36, %v7481_v20  ;;  %v145_v20 = vadd.s32 1, %v11780_v31  ;;  %v10849_v27 = vld [vmem:[%s11183_s1] sm:$0xff]  ;;  %v10859_v31 = vld [vmem:[%s11183_s1 + $0x8] sm:$0xff]  ;;  %v11804_v40 = vld [vmem:[#allocation33_spill] sm:$0xff] }
 0xdb5   :  { %v7489_v32 = vpop.eup %7488  ;;  %vm128_vm5 = vcmp.eq.s32.totalorder %v10849_v27, %v127_v10  ;;  %vm134_vm6 = vcmp.eq.s32.totalorder %v10849_v27, %v133_v35  ;;  %vm140_vm7 = vcmp.eq.s32.totalorder %v10849_v27, %v139_v46  ;;  %vm129_vm9 = vcmp.eq.s32.totalorder %v10859_v31, %v127_v10 }
 0xdb6   :  { %7492 = vtanh.f32 %v5561_v61  ;;  %v5558_v26 = vmul.f32 %v7489_v32, %v10745_v7  ;;  %v10833_v11 = vsel %vm11798_vm0, %v5561_v61, %v10739_v0  ;;  %v151_v0 = vadd.s32 1, %v11797_v50 }
 0xdb7   :  { %7494 = vrcp.f32 %v5552_v49  ;;  %v4944_v1 = vsel %vm128_vm5, %v11803_v54, 0.0  ;;  %vm146_vm8 = vcmp.eq.s32.totalorder %v10849_v27, %v145_v20  ;;  %vm135_vm11 = vcmp.eq.s32.totalorder %v10859_v31, %v133_v35 }
 0xdb8   :  { %v5562_v18 = vadd.f32 %v5560_v47, %v5558_v26  ;;  %v5101_v36 = vsel %vm134_vm6, %v11804_v40, %v4944_v1  ;;  %vm152_vm10 = vcmp.eq.s32.totalorder %v10849_v27, %v151_v0  ;;  %vm141_vm12 = vcmp.eq.s32.totalorder %v10859_v31, %v139_v46 }
 0xdb9   :  { %v5258_v47 = vsel %vm140_vm7, %v10611_v51, %v5101_v36  ;;  %v4945_v10 = vsel %vm129_vm9, %v11806_v43, 0.0  ;;  %vm147_vm0 = vcmp.eq.s32.totalorder %v10859_v31, %v145_v20  ;;  %v11807_v51 = vld [vmem:[#allocation30_spill] sm:$0xff]  ;;  %vm11808_vm5 = vcmp.lt.s32.totalorder %v11797_v50, %v11736_v44  ;;  %v11809_v44 = vld [vmem:[#allocation25_spill] sm:$0xff] }
 0xdba   :  { %7496 = vtanh.f32 %v5562_v18  ;;  %v10839_v57 = vsel %vm11799_vm4, %v5562_v18, %v10745_v7  ;;  %v7491_v7 = vpop.eup %7490  ;;  %v5415_v49 = vsel %vm146_vm8, %v10751_v42, %v5258_v47  ;;  %v5102_v35 = vsel %vm135_vm11, %v11807_v51, %v4945_v10  ;;  %v11813_v36 = vld [vmem:[#allocation65_spill] sm:$0xff]  ;;  %v11816_v10 = vld [vmem:[#allocation67_spill] sm:$0xff] }
 0xdbb   :  { %vm153_vm4 = vcmp.eq.s32.totalorder %v10859_v31, %v151_v0  ;;  %v5259_v46 = vsel %vm141_vm12, %v10617_v23, %v5102_v35  ;;  %v11810_v23 = vld [vmem:[#allocation74_spill] sm:$0xff] }
 0xdbc   :  { %v11812_v0 = vld [vmem:[#allocation58_spill] sm:$0xff] }
 0xdc3   :  { %v7493_v2 = vpop.eup %7492 }
 0xdc4   :  { %v5565_v61 = vmul.f32 %v7493_v2, %v7491_v7  ;;  %v7495_v32 = vpop.eup %7494  ;;  %v5416_v7 = vsel %vm147_vm0, %v10757_v16, %v5259_v46  ;;  %v11817_v46 = vld [vmem:[#allocation55_spill] sm:$0xff] }
 0xdc6   :  { %v10872_v26 = vsel %vm11805_vm15, %v5565_v61, %v10751_v42  ;;  %v11814_v61 = vld [vmem:[#allocation43_spill] sm:$0xff] }
 0xdc7   :  { %v7497_v18 = vpop.eup %7496  ;;  %v10877_v55 = vsel %vm152_vm10, %v10872_v26, %v5415_v49  ;;  %v11815_v47 = vsel %vm8246_vm1, %v11813_v36, %v11814_v61  ;;  %v11823_v61 = vld [vmem:[#allocation68_spill] sm:$0xff] }
 0xdc8   :  { %v5566_v22 = vmul.f32 %v7497_v18, %v7495_v32 }
 0xdca   :  { %v10887_v3 = vsel %vm11808_vm5, %v5566_v22, %v10757_v16  ;;  %v11811_v16 = vld [vmem:[#allocation20_spill] sm:$0xff] }
 0xdcb   :  { %v5571_v42 = vpack.c.bf16 %v10887_v3, %v10872_v26  ;;  %v10892_v20 = vsel %vm153_vm4, %v10887_v3, %v5416_v7  ;;  %v11818_v7 = vld [vmem:[#allocation18_spill] sm:$0xff] }
 0xdcd   :  { %5615 = vmatmul.mubr.bf16.vlgmr.msra.gmra.mxu0 %v5571_v42  ;;  %5658 = vmatmul.mubr.bf16.vlgmr.msra.gmra.mxu1 %v5571_v42  ;;  %v11819_v42 = vsel %vm8246_vm1, %v11817_v46, %v11818_v7  ;;  %v11829_v7 = vld [vmem:[#allocation60_spill] sm:$0xff] }
 0xdce   :  { %5740 = vmatpush1.bf16.msra.mxu0 %v10513_v34  ;;  %5783 = vmatpush1.bf16.msra.mxu1 %v10516_v17 }
 0xdcf   :  { %5741 = vmatprep.subr.bf16.mxu0 %v10519_v29  ;;  %5784 = vmatprep.subr.bf16.mxu1 %v10522_v21 }
 0xdd0   :  { %5771 = vmatprep.mubr.bf16.mxu0 %v11500_v24  ;;  %5814 = vmatprep.mubr.bf16.mxu1 %v11500_v24 }
 0xdd2   :  { %5742 = vmatpush1.bf16.msra.mxu0 %v10527_v33  ;;  %5785 = vmatpush1.bf16.msra.mxu1 %v10530_v62 }
 0xdd3   :  { %5743 = vmatprep.subr.bf16.mxu0 %v10533_v38  ;;  %5786 = vmatprep.subr.bf16.mxu1 %v10630_v19 }
 0xdd6   :  { %5744 = vmatpush1.bf16.msra.mxu0 %v10633_v14  ;;  %5787 = vmatpush1.bf16.msra.mxu1 %v10636_v25 }
 0xdd7   :  { %5745 = vmatprep.subr.bf16.mxu0 %v10639_v28  ;;  %5788 = vmatprep.subr.bf16.mxu1 %v10642_v12 }
 0xdda   :  { %5746 = vmatpush1.bf16.msra.mxu0 %v10645_v9  ;;  %5789 = vmatpush1.bf16.msra.mxu1 %v10648_v45 }
 0xddb   :  { %5747 = vmatprep.subr.bf16.mxu0 %v10651_v41  ;;  %5790 = vmatprep.subr.bf16.mxu1 %v10654_v37 }
 0xdde   :  { %5748 = vmatpush1.bf16.msra.mxu0 %v10657_v13  ;;  %5791 = vmatpush1.bf16.msra.mxu1 %v10660_v6 }
 0xddf   :  { %5749 = vmatprep.subr.bf16.mxu0 %v10663_v5  ;;  %5792 = vmatprep.subr.bf16.mxu1 %v10666_v15 }
 0xde2   :  { %5750 = vmatpush1.bf16.msra.mxu0 %v10669_v30  ;;  %5793 = vmatpush1.bf16.msra.mxu1 %v10672_v39 }
 0xde3   :  { %5751 = vmatprep.subr.bf16.mxu0 %v10675_v4  ;;  %5794 = vmatprep.subr.bf16.mxu1 %v10678_v48 }
 0xde6   :  { %5752 = vmatpush1.bf16.msra.mxu0 %v10681_v60  ;;  %5795 = vmatpush1.bf16.msra.mxu1 %v10684_v63 }
 0xde7   :  { %5753 = vmatprep.subr.bf16.mxu0 %v10687_v56  ;;  %5796 = vmatprep.subr.bf16.mxu1 %v10690_v53 }
 0xdea   :  { %5754 = vmatpush1.bf16.msra.mxu0 %v10693_v8  ;;  %5797 = vmatpush1.bf16.msra.mxu1 %v11809_v44 }
 0xdeb   :  { %5896 = vmatprep.subr.bf16.mxu0 %v11810_v23  ;;  %5939 = vmatprep.subr.bf16.mxu1 %v11811_v16 }
 0xe8d   :  { %v5616_v50 = vpop.f32.mrf.mxu0  ;;  %v5659_v54 = vpop.f32.mrf.mxu1 }
 0xe8e   :  { %v5668_v2 = vadd.f32 %v5616_v50, %v11812_v0  ;;  %v11820_v0 = vld [vmem:[#allocation64_spill] sm:$0xff] }
 0xe8f   :  { %v5618_v1 = vpop.f32.mrf.mxu0  ;;  %v5661_v43 = vpop.f32.mrf.mxu1 }
 0xe90   :  { %v6637_v40 = vmul.f32 -1.442695, %v5668_v2  ;;  %v5669_v32 = vadd.f32 %v5618_v1, %v11815_v47  ;;  %v11821_v2 = vld [vmem:[#allocation41_spill] sm:$0xff]  ;;  %v11824_v47 = vld [vmem:[#allocation15_spill] sm:$0xff] }
 0xe91   :  { %v5620_v49 = vpop.f32.mrf.mxu0  ;;  %v5663_v16 = vpop.f32.mrf.mxu1  ;;  %v11822_v1 = vsel %vm8254_vm3, %v11820_v0, %v11821_v2 }
 0xe92   :  { %7498 = vpow2.f32 %v6637_v40  ;;  %v6639_v18 = vmul.f32 -1.442695, %v5669_v32  ;;  %v5672_v51 = vadd.f32 %v5620_v49, %v11816_v10  ;;  %v5671_v40 = vadd.f32 %v5661_v43, %v11822_v1  ;;  %v11826_v10 = vld [vmem:[#allocation56_spill] sm:$0xff] }
 0xe93   :  { %v5622_v35 = vpop.f32.mrf.mxu0  ;;  %v5665_v36 = vpop.f32.mrf.mxu1  ;;  %v11825_v32 = vsel %vm8250_vm2, %v11823_v61, %v11824_v47 }
 0xe94   :  { %7500 = vpow2.f32 %v6639_v18  ;;  %v6638_v22 = vmul.f32 -1.442695, %v5672_v51  ;;  %v5673_v23 = vadd.f32 %v5622_v35, %v11819_v42  ;;  %v5670_v49 = vadd.f32 %v5659_v54, %v11825_v32  ;;  %v11827_v51 = vld [vmem:[#allocation48_spill] sm:$0xff]  ;;  %v11830_v42 = vld [vmem:[#allocation39_spill] sm:$0xff] }
 0xe95   :  { %v6641_v18 = vmul.f32 -1.442695, %v5671_v40  ;;  %v11828_v35 = vsel %vm8254_vm3, %v11826_v10, %v11827_v51  ;;  %v11831_v43 = vsel %vm8250_vm2, %v11829_v7, %v11830_v42 }
 0xe96   :  { %7502 = vpow2.f32 %v6638_v22  ;;  %v6640_v50 = vmul.f32 -1.442695, %v5673_v23  ;;  %v5675_v22 = vadd.f32 %v5665_v36, %v11828_v35  ;;  %v5674_v23 = vadd.f32 %v5663_v16, %v11831_v43 }
 0xe98   :  { %7504 = vpow2.f32 %v6640_v50  ;;  %v6642_v2 = vmul.f32 -1.442695, %v5675_v22 }
 0xe99   :  { %7506 = vtanh.f32 %v5670_v49 }
 0xe9a   :  { %7508 = vpow2.f32 %v6641_v18 }
 0xe9f   :  { %v7499_v46 = vpop.eup %7498 }
 0xea0   :  { %v5682_v50 = vadd.f32 1.0, %v7499_v46 }
 0xea1   :  { %v7501_v0 = vpop.eup %7500 }
 0xea2   :  { %7510 = vrcp.f32 %v5682_v50  ;;  %v5694_v54 = vadd.f32 1.0, %v7501_v0  ;;  %v11832_v0 = vld [vmem:[#allocation80_spill] sm:$0xff] }
 0xea3   :  { %v7503_v1 = vpop.eup %7502  ;;  %7512 = vtanh.f32 %v5674_v23 }
 0xea4   :  { %7514 = vrcp.f32 %v5694_v54  ;;  %v5683_v40 = vadd.f32 1.0, %v7503_v1 }
 0xea5   :  { %v7505_v61 = vpop.eup %7504  ;;  %7516 = vpow2.f32 %v6642_v2  ;;  %v11833_v2 = vld [vmem:[#allocation78_spill] sm:$0xff] }
 0xea6   :  { %7518 = vrcp.f32 %v5683_v40  ;;  %v5695_v36 = vadd.f32 1.0, %v7505_v61  ;;  %v7507_v47 = vpop.eup %7506  ;;  %vm11834_vm6 = vcmp.lt.s32.totalorder %v11832_v0, %v11833_v2  ;;  %v11835_v40 = vld [vmem:[#allocation81_spill] sm:$0xff] }
 0xea7   :  { %v7509_v32 = vpop.eup %7508  ;;  %vm11836_vm7 = vcmp.lt.s32.totalorder %v11832_v0, %v11835_v40  ;;  %vm11837_vm9 = vmmov %vm11834_vm6 }
 0xea8   :  { %7520 = vrcp.f32 %v5695_v36  ;;  %v5708_v35 = vadd.f32 1.0, %v7509_v32  ;;  %v157_v36 = vadd.s32 1, %v11832_v0  ;;  %vm11838_vm11 = vmmov %vm11836_vm7 }
 0xeaa   :  { %7522 = vrcp.f32 %v5708_v35  ;;  %vm158_vm8 = vcmp.eq.s32.totalorder %v10849_v27, %v157_v36  ;;  %vm159_vm10 = vcmp.eq.s32.totalorder %v10859_v31, %v157_v36 }
 0xeaf   :  { %v7511_v10 = vpop.eup %7510 }
 0xeb0   :  { %v7513_v16 = vpop.eup %7512  ;;  %v5716_v51 = vmul.f32 %v7511_v10, %v7507_v47 }
 0xeb1   :  { %v7515_v49 = vpop.eup %7514 }
 0xeb2   :  { %v7517_v18 = vpop.eup %7516  ;;  %v5714_v22 = vmul.f32 %v7515_v49, %v10833_v11 }
 0xeb3   :  { %v7519_v46 = vpop.eup %7518  ;;  %v5709_v23 = vadd.f32 1.0, %v7517_v18 }
 0xeb4   :  { %v5718_v7 = vadd.f32 %v5716_v51, %v5714_v22  ;;  %v5717_v42 = vmul.f32 %v7519_v46, %v7513_v16  ;;  %v11854_v22 = vld [vmem:[#allocation35_spill] sm:$0xff] }
 0xeb5   :  { %v7521_v43 = vpop.eup %7520 }
 0xeb6   :  { %7524 = vtanh.f32 %v5718_v7  ;;  %v5715_v50 = vmul.f32 %v7521_v43, %v10839_v57  ;;  %v10966_v54 = vsel %vm11834_vm6, %v5718_v7, %v10833_v11  ;;  %v11856_v43 = vld [vmem:[#allocation84_spill] sm:$0xff] }
 0xeb7   :  { %7526 = vrcp.f32 %v5709_v23  ;;  %v7523_v47 = vpop.eup %7522  ;;  %v11857_v23 = vld [vmem:[#allocation37_spill] sm:$0xff] }
 0xeb8   :  { %v5719_v1 = vadd.f32 %v5717_v42, %v5715_v50  ;;  %v11858_v50 = vsel %vm8250_vm2, %v11856_v43, %v11857_v23  ;;  %v11865_v23 = vld [vmem:[#allocation90_spill] sm:$0xff] }
 0xeba   :  { %7528 = vtanh.f32 %v5719_v1  ;;  %v10972_v61 = vsel %vm11836_vm7, %v5719_v1, %v10839_v57  ;;  %vm7708_vm7 = vmmov 0  }
 0xec3   :  { %v7525_v32 = vpop.eup %7524 }
 0xec4   :  { %v5722_v10 = vmul.f32 %v7525_v32, %v7523_v47  ;;  %v7527_v16 = vpop.eup %7526 }
 0xec6   :  { %v10980_v11 = vsel %vm11837_vm9, %v5722_v10, %v10872_v26 }
 0xec7   :  { %v7529_v51 = vpop.eup %7528  ;;  %v10984_v49 = vsel %vm158_vm8, %v10980_v11, %v10877_v55 }
 0xec8   :  { %v5723_v57 = vmul.f32 %v7529_v51, %v7527_v16 }
 0xeca   :  { %v10991_v35 = vsel %vm11838_vm11, %v5723_v57, %v10887_v3 }
 0xecb   :  { %v5728_v18 = vpack.c.bf16 %v10991_v35, %v10980_v11  ;;  %v10997_v26 = vsel %vm159_vm10, %v10991_v35, %v10892_v20 }
 0xecd   :  { %5772 = vmatmul.mubr.bf16.vlgmr.msra.gmra.mxu0 %v5728_v18  ;;  %5815 = vmatmul.mubr.bf16.vlgmr.msra.gmra.mxu1 %v5728_v18 }
 0xece   :  { %5897 = vmatpush1.bf16.msra.mxu0 %v10513_v34  ;;  %5940 = vmatpush1.bf16.msra.mxu1 %v10516_v17  ;;  %v11839_v34 = vld [vmem:[#allocation83_spill] sm:$0xff] }
 0xecf   :  { %5898 = vmatprep.subr.bf16.mxu0 %v10519_v29  ;;  %5941 = vmatprep.subr.bf16.mxu1 %v10522_v21 }
 0xed0   :  { %5928 = vmatprep.mubr.bf16.mxu0 %v11500_v24  ;;  %5971 = vmatprep.mubr.bf16.mxu1 %v11500_v24 }
 0xed2   :  { %5899 = vmatpush1.bf16.msra.mxu0 %v10527_v33  ;;  %5942 = vmatpush1.bf16.msra.mxu1 %v10530_v62  ;;  %v11840_v62 = vld [vmem:[#allocation63_spill] sm:$0xff] }
 0xed3   :  { %5900 = vmatprep.subr.bf16.mxu0 %v10533_v38  ;;  %5943 = vmatprep.subr.bf16.mxu1 %v10630_v19  ;;  %v11841_v38 = vld [vmem:[#allocation42_spill] sm:$0xff] }
 0xed4   :  { %v11842_v19 = vsel %vm8246_vm1, %v11840_v62, %v11841_v38 }
 0xed6   :  { %5901 = vmatpush1.bf16.msra.mxu0 %v10633_v14  ;;  %5944 = vmatpush1.bf16.msra.mxu1 %v10636_v25 }
 0xed7   :  { %5902 = vmatprep.subr.bf16.mxu0 %v10639_v28  ;;  %5945 = vmatprep.subr.bf16.mxu1 %v10642_v12  ;;  %v11843_v28 = vld [vmem:[#allocation87_spill] sm:$0xff] }
 0xeda   :  { %5903 = vmatpush1.bf16.msra.mxu0 %v10645_v9  ;;  %5946 = vmatpush1.bf16.msra.mxu1 %v10648_v45  ;;  %v11844_v45 = vld [vmem:[#allocation85_spill] sm:$0xff] }
 0xedb   :  { %5904 = vmatprep.subr.bf16.mxu0 %v10651_v41  ;;  %5947 = vmatprep.subr.bf16.mxu1 %v10654_v37  ;;  %v11845_v41 = vld [vmem:[#allocation17_spill] sm:$0xff] }
 0xedc   :  { %v11846_v37 = vsel %vm8246_vm1, %v11844_v45, %v11845_v41 }
 0xede   :  { %5905 = vmatpush1.bf16.msra.mxu0 %v10657_v13  ;;  %5948 = vmatpush1.bf16.msra.mxu1 %v10660_v6 }
 0xedf   :  { %5906 = vmatprep.subr.bf16.mxu0 %v10663_v5  ;;  %5949 = vmatprep.subr.bf16.mxu1 %v10666_v15  ;;  %v11847_v15 = vld [vmem:[#allocation10_spill] sm:$0xff] }
 0xee2   :  { %5907 = vmatpush1.bf16.msra.mxu0 %v10669_v30  ;;  %5950 = vmatpush1.bf16.msra.mxu1 %v10672_v39  ;;  %v11848_v30 = vld [vmem:[#allocation40_spill] sm:$0xff] }
 0xee3   :  { %5908 = vmatprep.subr.bf16.mxu0 %v10675_v4  ;;  %5951 = vmatprep.subr.bf16.mxu1 %v10678_v48  ;;  %v11849_v39 = vsel %vm8254_vm3, %v11847_v15, %v11848_v30 }
 0xee6   :  { %5909 = vmatpush1.bf16.msra.mxu0 %v10681_v60  ;;  %5952 = vmatpush1.bf16.msra.mxu1 %v10684_v63  ;;  %v11850_v60 = vld [vmem:[#allocation62_spill] sm:$0xff]  ;;  %v11851_v63 = vld [vmem:[#allocation44_spill] sm:$0xff] }
 0xee7   :  { %5910 = vmatprep.subr.bf16.mxu0 %v10687_v56  ;;  %5953 = vmatprep.subr.bf16.mxu1 %v10690_v53  ;;  %v11852_v55 = vsel %vm8250_vm2, %v11850_v60, %v11851_v63  ;;  %v7077_v60 = vld [vmem:[%s11190_s8 + $0x20] sm:$0xff]   ;;  %v7078_v63 = vld [vmem:[%s11190_s8 + $0x18] sm:$0xff]  }
 0xeea   :  { %5911 = vmatpush1.bf16.msra.mxu0 %v10693_v8  ;;  %5954 = vmatpush1.bf16.msra.mxu1 %v11809_v44  ;;  %v11853_v44 = vld [vmem:[#allocation86_spill] sm:$0xff] }
 0xeeb   :  { %v11855_v46 = vsel %vm8254_vm3, %v11853_v44, %v11854_v22  ;;  %v11864_v22 = vld [vmem:[#allocation94_spill] sm:$0xff] }
 0xf8d   :  { %v5773_v24 = vpop.f32.mrf.mxu0  ;;  %v5816_v29 = vpop.f32.mrf.mxu1 }
 0xf8e   :  { %v5825_v17 = vadd.f32 %v5773_v24, %v11839_v34  ;;  %v5827_v3 = vadd.f32 %v5816_v29, %v11852_v55  ;;  %v7079_v55 = vld [vmem:[%s11190_s8 + $0x10] sm:$0xff]  }
 0xf8f   :  { %v5775_v21 = vpop.f32.mrf.mxu0  ;;  %v5818_v53 = vpop.f32.mrf.mxu1 }
 0xf90   :  { %v6643_v33 = vmul.f32 -1.442695, %v5825_v17  ;;  %v5826_v14 = vadd.f32 %v5775_v21, %v11842_v19  ;;  %v5828_v4 = vadd.f32 %v5818_v53, %v11849_v39 }
 0xf91   :  { %v5777_v25 = vpop.f32.mrf.mxu0  ;;  %v5820_v6 = vpop.f32.mrf.mxu1 }
 0xf92   :  { %7530 = vpow2.f32 %v6643_v33  ;;  %v6645_v56 = vmul.f32 -1.442695, %v5826_v14  ;;  %v5829_v8 = vadd.f32 %v5777_v25, %v11843_v28  ;;  %v6647_v20 = vmul.f32 -1.442695, %v5828_v4 }
 0xf93   :  { %v5779_v12 = vpop.f32.mrf.mxu0  ;;  %v5822_v48 = vpop.f32.mrf.mxu1  ;;  %v5831_v0 = vadd.f32 %v5820_v6, %v11858_v50  ;;  %v11866_v50 = vld [vmem:[#allocation92_spill] sm:$0xff] }
 0xf94   :  { %7532 = vpow2.f32 %v6645_v56  ;;  %v6644_v9 = vmul.f32 -1.442695, %v5829_v8  ;;  %v5830_v13 = vadd.f32 %v5779_v12, %v11846_v37  ;;  %v5832_v7 = vadd.f32 %v5822_v48, %v11855_v46  ;;  %v11859_v8 = vld [vmem:[#allocation76_spill] sm:$0xff] }
 0xf95   :  { %vm11860_vm12 = vcmp.lt.s32.totalorder %v11859_v8, %v11833_v2  ;;  %vm11861_vm15 = vcmp.lt.s32.totalorder %v11859_v8, %v11835_v40  ;;  %v163_v41 = vadd.s32 1, %v11859_v8  ;;  %v7707_v48 = vmov 0.0   ;;  %v11878_v8 = vld [vmem:[#allocation99_spill] sm:$0xff]  ;;  %v6655_v2 = vld [vmem:[%s11191_s9] ss:$0 sm:$0xff] }
 0xf96   :  { %7534 = vpow2.f32 %v6644_v9  ;;  %v6646_v5 = vmul.f32 -1.442695, %v5830_v13  ;;  %v6648_v47 = vmul.f32 -1.442695, %v5832_v7  ;;  %vm11862_vm4 = vmmov %vm11860_vm12  ;;  %6736 = vmatprep.subr.bf16.mxu0 %v7707_v48 }
 0xf97   :  { %vm164_vm0 = vcmp.eq.s32.totalorder %v10849_v27, %v163_v41  ;;  %vm165_vm5 = vcmp.eq.s32.totalorder %v10859_v31, %v163_v41  ;;  %vm11863_vm6 = vmmov %vm11861_vm15 }
 0xf98   :  { %7536 = vpow2.f32 %v6646_v5 }
 0xf99   :  { %7538 = vtanh.f32 %v5827_v3  ;;  %v7080_v3 = vld [vmem:[%s11190_s8 + $0x8] sm:$0xff]  }
 0xf9a   :  { %7540 = vpow2.f32 %v6647_v20  ;;  %v7081_v20 = vld [vmem:[%s11190_s8] sm:$0xff]  }
 0xf9f   :  { %v7531_v42 = vpop.eup %7530 }
 0xfa0   :  { %v5839_v1 = vadd.f32 1.0, %v7531_v42 }
 0xfa1   :  { %v7533_v36 = vpop.eup %7532 }
 0xfa2   :  { %7542 = vrcp.f32 %v5839_v1  ;;  %v5851_v32 = vadd.f32 1.0, %v7533_v36 }
 0xfa3   :  { %v7535_v10 = vpop.eup %7534  ;;  %7544 = vtanh.f32 %v5831_v0  ;;  %v11867_v0 = vsel %vm8246_vm1, %v11865_v23, %v11866_v50 }
 0xfa4   :  { %7546 = vrcp.f32 %v5851_v32  ;;  %v5840_v16 = vadd.f32 1.0, %v7535_v10  ;;  %v11868_v10 = vld [vmem:[#allocation101_spill] sm:$0xff] }
 0xfa5   :  { %v7537_v51 = vpop.eup %7536  ;;  %7548 = vpow2.f32 %v6648_v47 }
 0xfa6   :  { %7550 = vrcp.f32 %v5840_v16  ;;  %v5852_v57 = vadd.f32 1.0, %v7537_v51  ;;  %v7539_v18 = vpop.eup %7538 }
 0xfa7   :  { %v7541_v24 = vpop.eup %7540 }
 0xfa8   :  { %7552 = vrcp.f32 %v5852_v57  ;;  %v5865_v33 = vadd.f32 1.0, %v7541_v24  ;;  %v11870_v24 = vld [vmem:[#allocation97_spill] sm:$0xff] }
 0xfaa   :  { %7554 = vrcp.f32 %v5865_v33  ;;  %v11872_v33 = vld [vmem:[#allocation91_spill] sm:$0xff] }
 0xfaf   :  { %v7543_v34 = vpop.eup %7542 }
 0xfb0   :  { %v7545_v17 = vpop.eup %7544  ;;  %v5873_v29 = vmul.f32 %v7543_v34, %v7539_v18  ;;  %v11869_v18 = vld [vmem:[#allocation98_spill] sm:$0xff] }
 0xfb1   :  { %v7547_v21 = vpop.eup %7546  ;;  %v11871_v34 = vsel %vm8246_vm1, %v11869_v18, %v11870_v24 }
 0xfb2   :  { %v7549_v62 = vpop.eup %7548  ;;  %v5871_v38 = vmul.f32 %v7547_v21, %v10966_v54 }
 0xfb3   :  { %v7551_v19 = vpop.eup %7550  ;;  %v5866_v53 = vadd.f32 1.0, %v7549_v62  ;;  %v11873_v62 = vld [vmem:[#allocation93_spill] sm:$0xff] }
 0xfb4   :  { %v5875_v14 = vadd.f32 %v5873_v29, %v5871_v38  ;;  %v5874_v25 = vmul.f32 %v7551_v19, %v7545_v17  ;;  %v11874_v38 = vsel %vm8254_vm3, %v11872_v33, %v11873_v62 }
 0xfb5   :  { %v7553_v56 = vpop.eup %7552 }
 0xfb6   :  { %7556 = vtanh.f32 %v5875_v14  ;;  %v5872_v28 = vmul.f32 %v7553_v56, %v10972_v61  ;;  %v11069_v12 = vsel %vm11860_vm12, %v5875_v14, %v10966_v54  ;;  %v11876_v56 = vld [vmem:[#allocation89_spill] sm:$0xff] }
 0xfb7   :  { %7558 = vrcp.f32 %v5866_v53  ;;  %v7555_v37 = vpop.eup %7554 }
 0xfb8   :  { %v5876_v9 = vadd.f32 %v5874_v25, %v5872_v28  ;;  %v11875_v25 = vld [vmem:[#allocation88_spill] sm:$0xff] }
 0xfb9   :  { %v11877_v52 = vsel %vm8250_vm2, %v11875_v25, %v11876_v56 }
 0xfba   :  { %7560 = vtanh.f32 %v5876_v9  ;;  %v11075_v45 = vsel %vm11861_vm15, %v5876_v9, %v10972_v61  ;;  %v11879_v9 = vld [vmem:[#allocation100_spill] sm:$0xff] }
 0xfbb   :  { %v11880_v41 = vsel %vm8254_vm3, %v11878_v8, %v11879_v9 }
 0xfc3   :  { %v7557_v13 = vpop.eup %7556 }
 0xfc4   :  { %v5879_v6 = vmul.f32 %v7557_v13, %v7555_v37  ;;  %v7559_v5 = vpop.eup %7558 }
 0xfc6   :  { %v11083_v54 = vsel %vm11862_vm4, %v5879_v6, %v10980_v11  ;;  %v11881_v6 = vld [vmem:[#allocation95_spill] sm:$0xff] }
 0xfc7   :  { %v7561_v15 = vpop.eup %7560  ;;  %v11087_v30 = vsel %vm164_vm0, %v11083_v54, %v10984_v49  ;;  %v7074_v49 = vld [vmem:[%s11190_s8 + $0x38] sm:$0xff]  }
 0xfc8   :  { %v5880_v61 = vmul.f32 %v7561_v15, %v7559_v5  ;;  %v11882_v5 = vld [vmem:[#allocation96_spill] sm:$0xff] }
 0xfc9   :  { %v11883_v15 = vsel %vm8250_vm2, %v11881_v6, %v11882_v5 }
 0xfca   :  { %v11094_v39 = vsel %vm11863_vm6, %v5880_v61, %v10991_v35  ;;  %v7075_v35 = vld [vmem:[%s11190_s8 + $0x30] sm:$0xff]  }
 0xfcb   :  { %v5885_v4 = vpack.c.bf16 %v11094_v39, %v11083_v54  ;;  %v11100_v11 = vsel %vm165_vm5, %v11094_v39, %v10997_v26  ;;  %v7076_v26 = vld [vmem:[%s11190_s8 + $0x28] sm:$0xff]  }
 0xfcd   :  { %5929 = vmatmul.mubr.bf16.vlgmr.msra.gmra.mxu0 %v5885_v4  ;;  %5972 = vmatmul.mubr.bf16.vlgmr.msra.gmra.mxu1 %v5885_v4 }
 0xfce   :  { %6737 = vmatpush3.bf16.msra.mxu0 %v7074_v49  ;;  %6752 = vmatprep.mubr.msk.bf16.mxu0 %vm7708_vm7, %v7707_v48 }
 0xfcf   :  { %6738 = vmatprep.subr.bf16.mxu0 %v7707_v48 }
 0xfd2   :  { %6739 = vmatpush3.bf16.msra.mxu0 %v7075_v35 }
 0xfd3   :  { %6740 = vmatprep.subr.bf16.mxu0 %v7707_v48 }
 0xfd6   :  { %6741 = vmatpush3.bf16.msra.mxu0 %v7076_v26 }
 0xfd7   :  { %6742 = vmatprep.subr.bf16.mxu0 %v7707_v48 }
 0xfda   :  { %6743 = vmatpush3.bf16.msra.mxu0 %v7077_v60 }
 0xfdb   :  { %6744 = vmatprep.subr.bf16.mxu0 %v7707_v48 }
 0xfde   :  { %6745 = vmatpush3.bf16.msra.mxu0 %v7078_v63 }
 0xfdf   :  { %6746 = vmatprep.subr.bf16.mxu0 %v7707_v48 }
 0xfe2   :  { %6747 = vmatpush3.bf16.msra.mxu0 %v7079_v55 }
 0xfe3   :  { %6748 = vmatprep.subr.bf16.mxu0 %v7707_v48 }
 0xfe6   :  { %6749 = vmatpush3.bf16.msra.mxu0 %v7080_v3 }
 0xfe7   :  { %6750 = vmatprep.subr.bf16.mxu0 %v7707_v48 }
 0xfea   :  { %6751 = vmatpush3.bf16.msra.mxu0 %v7081_v20 }
0x108d   :  { %v5930_v44 = vpop.f32.mrf.mxu0  ;;  %v5973_v7 = vpop.f32.mrf.mxu1 }
0x108e   :  { %v5982_v46 = vadd.f32 %v5930_v44, %v11864_v22  ;;  %v5984_v53 = vadd.f32 %v5973_v7, %v11877_v52 }
0x108f   :  { %v5932_v42 = vpop.f32.mrf.mxu0  ;;  %v5975_v32 = vpop.f32.mrf.mxu1 }
0x1090   :  { %v6649_v43 = vmul.f32 -1.442695, %v5982_v46  ;;  %v5983_v1 = vadd.f32 %v5932_v42, %v11867_v0  ;;  %v5985_v19 = vadd.f32 %v5975_v32, %v11874_v38  ;;  %v11884_v32 = vld [vmem:[#allocation26_spill] sm:$0xff] }
0x1091   :  { %v5934_v36 = vpop.f32.mrf.mxu0  ;;  %v5977_v29 = vpop.f32.mrf.mxu1 }
0x1092   :  { %7562 = vpow2.f32 %v6649_v43  ;;  %v6651_v47 = vmul.f32 -1.442695, %v5983_v1  ;;  %v5986_v16 = vadd.f32 %v5934_v36, %v11868_v10  ;;  %v6653_v28 = vmul.f32 -1.442695, %v5985_v19 }
0x1093   :  { %v5936_v51 = vpop.f32.mrf.mxu0  ;;  %v5979_v14 = vpop.f32.mrf.mxu1  ;;  %v5988_v61 = vadd.f32 %v5977_v29, %v11883_v15  ;;  %v169_v10 = vadd.s32 1, %v11884_v32 }
0x1094   :  { %7564 = vpow2.f32 %v6651_v47  ;;  %v6650_v57 = vmul.f32 -1.442695, %v5986_v16  ;;  %v5987_v17 = vadd.f32 %v5936_v51, %v11871_v34  ;;  %v5989_v37 = vadd.f32 %v5979_v14, %v11880_v41 }
0x1095   :  { %vm170_vm1 = vcmp.eq.s32.totalorder %v10849_v27, %v169_v10  ;;  %vm171_vm2 = vcmp.eq.s32.totalorder %v10859_v31, %v169_v10 }
0x1096   :  { %7566 = vpow2.f32 %v6650_v57  ;;  %v6652_v21 = vmul.f32 -1.442695, %v5987_v17  ;;  %v6654_v48 = vmul.f32 -1.442695, %v5989_v37 }
0x1098   :  { %7568 = vpow2.f32 %v6652_v21 }
0x1099   :  { %7570 = vtanh.f32 %v5984_v53 }
0x109a   :  { %7572 = vpow2.f32 %v6653_v28 }
0x109f   :  { %v7563_v13 = vpop.eup %7562 }
0x10a0   :  { %v5996_v4 = vadd.f32 1.0, %v7563_v13 }
0x10a1   :  { %v7565_v49 = vpop.eup %7564 }
0x10a2   :  { %7574 = vrcp.f32 %v5996_v4  ;;  %v6008_v35 = vadd.f32 1.0, %v7565_v49 }
0x10a3   :  { %v7567_v26 = vpop.eup %7566  ;;  %7576 = vtanh.f32 %v5988_v61 }
0x10a4   :  { %7578 = vrcp.f32 %v6008_v35  ;;  %v5997_v59 = vadd.f32 1.0, %v7567_v26 }
0x10a5   :  { %v7569_v60 = vpop.eup %7568  ;;  %7580 = vpow2.f32 %v6654_v48 }
0x10a6   :  { %7582 = vrcp.f32 %v5997_v59  ;;  %v6009_v63 = vadd.f32 1.0, %v7569_v60  ;;  %v7571_v58 = vpop.eup %7570 }
0x10a7   :  { %v7573_v55 = vpop.eup %7572 }
0x10a8   :  { %7584 = vrcp.f32 %v6009_v63  ;;  %v6022_v46 = vadd.f32 1.0, %v7573_v55 }
0x10aa   :  { %7586 = vrcp.f32 %v6022_v46 }
0x10af   :  { %v7575_v3 = vpop.eup %7574 }
0x10b0   :  { %v7577_v20 = vpop.eup %7576  ;;  %v6030_v44 = vmul.f32 %v7575_v3, %v7571_v58 }
0x10b1   :  { %v7579_v22 = vpop.eup %7578 }
0x10b2   :  { %v7581_v7 = vpop.eup %7580  ;;  %v6028_v42 = vmul.f32 %v7579_v22, %v11069_v12 }
0x10b3   :  { %v7583_v43 = vpop.eup %7582  ;;  %v6023_v1 = vadd.f32 1.0, %v7581_v7 }
0x10b4   :  { %v6032_v23 = vadd.f32 %v6030_v44, %v6028_v42  ;;  %v6031_v50 = vmul.f32 %v7583_v43, %v7577_v20 }
0x10b5   :  { %v7585_v0 = vpop.eup %7584 }
0x10b6   :  { %7588 = vtanh.f32 %v6032_v23  ;;  %v6029_v36 = vmul.f32 %v7585_v0, %v11075_v45 }
0x10b7   :  { %7590 = vrcp.f32 %v6023_v1  ;;  %v7587_v16 = vpop.eup %7586 }
0x10b8   :  { %v6033_v47 = vadd.f32 %v6031_v50, %v6029_v36 }
0x10ba   :  { %7592 = vtanh.f32 %v6033_v47 }
0x10c3   :  { %v7589_v51 = vpop.eup %7588 }
0x10c4   :  { %v6036_v57 = vmul.f32 %v7589_v51, %v7587_v16  ;;  %v7591_v12 = vpop.eup %7590 }
0x10c6   :  { %v6038_v18 = vsel %vm167_vm14, %v6036_v57, %v11083_v54 }
0x10c7   :  { %v7593_v24 = vpop.eup %7592  ;;  %v6040_v34 = vsel %vm170_vm1, %v6038_v18, %v11087_v30 }
0x10c8   :  { %v6037_v45 = vmul.f32 %v7593_v24, %v7591_v12 }
0x10ca   :  { %v6039_v17 = vsel %vm168_vm13, %v6037_v45, %v11094_v39 }
0x10cb   :  { %v6041_v29 = vsel %vm171_vm2, %v6039_v17, %v11100_v11 }
0x10cc   :  { %v6042_v27 = vpack.c.bf16 %v6041_v29, %v6040_v34 }
0x10ce   :  { %6753 = vmatmul.mubr.bf16.vlgmr.msra.gmra.mxu0 %v6042_v27 }
0x118e   :  { %v6148_v54 = vpop.f32.mrf.mxu0 }
0x118f   :  { %v6149_v21 = vadd.f32 %v6655_v2, %v6148_v54 }
0x1190   :  { %v6754_v33 = vpop.f32.mrf.mxu0 }
0x1191   :  { %6155 = vst [vmem:[%s11192_s10] sm:$0xff] %v6149_v21 }
0x1192   :  { %v6151_v31 = vpop.f32.mrf.mxu0 }
0x1193   :  { %v6152_v30 = vadd.f32 %v6655_v2, %v6151_v31 }
0x1194   :  { %v6755_v62 = vpop.f32.mrf.mxu0 }
0x1195   :  { %6156 = vst [vmem:[%s11192_s10 + $0x8] sm:$0xff] %v6152_v30 }
0x1196   :  { %6161 = vsyncpa [#allocation5], 1 }
0x1197   :  { %6162 = vsyncpa [#allocation7], 1 }

</bundles_post_ra>
